<compile_context>
chip_gen: v7x
topology: tpu7x:2x2x1
jax: 0.10.0
libtpu: 0.0.40
codegen_flags: <defaults>
</compile_context>

<pallas_src>
import numpy as np
import jax
import jax.numpy as jnp
from jax.experimental import pallas as pl
from jax.experimental.pallas import tpu as pltpu

# -------------------- configuration (Transformer constructor args) --------------------
BEHAVIOR_DIM = 4
BEHAVIOR_T = 2
WINDOW_SIZE = (8, 7, 7)
SHIFT_SIZE = tuple(w // 2 for w in WINDOW_SIZE)
EMB_DIM = 160
NUM_BLOCKS = 4
NUM_HEADS = 4
MLP_DIM = 488
MLP_DIM_PAD = 512          # lane-dense internal hidden width (488 -> 512)
HEAD_DIM = EMB_DIM // NUM_HEADS

MATMUL_DTYPE = jnp.bfloat16          # MXU input dtype (f32 accumulation)
VMEM_LIMIT = 32 * 1024 * 1024        # explicit scoped-VMEM budget (fits v7x 64MiB/TC)


# -------------------- small helpers --------------------
def _round_up(x, m):
    return (x + m - 1) // m * m


def _largest_divisor_leq(n, cap):
    cap = max(1, min(n, cap))
    for d in range(cap, 0, -1):
        if n % d == 0:
            return d
    return 1


def _row_tile(n, target=512):
    """Pick a row tile (multiple of 8) and the padded row count."""
    nblocks = -(-n // target)
    tn = _round_up(-(-n // nblocks), 8)
    return tn, _round_up(n, tn)


def _erf_approx(x):
    # Abramowitz & Stegun 7.1.26, |err| < 1.5e-7.  Mosaic has no native erf, so we
    # evaluate the polynomial in-kernel (exp goes to the EUP slot).
    a1, a2, a3, a4, a5 = (0.254829592, -0.284496736, 1.421413741,
                          -1.453152027, 1.061405429)
    p = 0.3275911
    ax = jnp.abs(x)
    t = 1.0 / (1.0 + p * ax)
    poly = ((((a5 * t + a4) * t + a3) * t + a2) * t + a1) * t
    y = 1.0 - poly * jnp.exp(-ax * ax)
    return jnp.where(x >= 0, y, -y)


def _gelu_exact(x):
    return 0.5 * x * (1.0 + _erf_approx(x * 0.7071067811865476))


# ============================ Pallas kernels ============================

def linear_pallas(x, w, b, activation=None, residual=None, row_block=512):
    """out = act(x @ w + b) [+ residual]; row-tiled, bf16 matmul, f32 accum/output."""
    N, Din = x.shape
    Dout = w.shape[1]
    tn, Np = _row_tile(N, row_block)
    if Np != N:
        x = jnp.pad(x, ((0, Np - N), (0, 0)))
        if residual is not None:
            residual = jnp.pad(residual, ((0, Np - N), (0, 0)))
    use_res = residual is not None

    def kernel(*refs):
        if use_res:
            x_ref, w_ref, b_ref, r_ref, o_ref = refs
        else:
            x_ref, w_ref, b_ref, o_ref = refs
        y = jnp.dot(x_ref[...].astype(MATMUL_DTYPE), w_ref[...],
                    preferred_element_type=jnp.float32) + b_ref[0]
        if activation == "tanh":
            y = jnp.tanh(y)
        if use_res:
            y = y + r_ref[...]
        o_ref[...] = y.astype(o_ref.dtype)

    in_specs = [pl.BlockSpec((tn, Din), lambda i: (i, 0)),
                pl.BlockSpec((Din, Dout), lambda i: (0, 0)),
                pl.BlockSpec((1, Dout), lambda i: (0, 0))]
    args = [x, w, b.reshape(1, Dout)]
    if use_res:
        in_specs.append(pl.BlockSpec((tn, Dout), lambda i: (i, 0)))
        args.append(residual)

    out = pl.pallas_call(
        kernel,
        out_shape=jax.ShapeDtypeStruct((Np, Dout), jnp.float32),
        grid=(Np // tn,),
        in_specs=in_specs,
        out_specs=pl.BlockSpec((tn, Dout), lambda i: (i, 0)),
        compiler_params=pltpu.CompilerParams(
            dimension_semantics=("parallel",), vmem_limit_bytes=VMEM_LIMIT),
    )(*args)
    return out[:N]


def linear_swiglu_pallas(x, w1, b1, row_block=512):
    """One fused (N, Din)@(Din, 2*Hp) matmul + SwiGLU.  w1 = [value | gate] columns.

    Output is bf16 with lane-dense hidden width Hp (=512)."""
    N, Din = x.shape
    H2 = w1.shape[1]
    Hp = H2 // 2
    tn, Np = _row_tile(N, row_block)
    if Np != N:
        x = jnp.pad(x, ((0, Np - N), (0, 0)))

    def kernel(x_ref, w_ref, b_ref, o_ref):
        y = jnp.dot(x_ref[...].astype(MATMUL_DTYPE), w_ref[...],
                    preferred_element_type=jnp.float32) + b_ref[0]
        val = y[:, :Hp]
        gate = y[:, Hp:]
        sig = pl.reciprocal(1.0 + jnp.exp(-gate), approx=True)   # EUP sigmoid
        o_ref[...] = (gate * sig * val).astype(o_ref.dtype)

    out = pl.pallas_call(
        kernel,
        out_shape=jax.ShapeDtypeStruct((Np, Hp), MATMUL_DTYPE),
        grid=(Np // tn,),
        in_specs=[pl.BlockSpec((tn, Din), lambda i: (i, 0)),
                  pl.BlockSpec((Din, H2), lambda i: (0, 0)),
                  pl.BlockSpec((1, H2), lambda i: (0, 0))],
        out_specs=pl.BlockSpec((tn, Hp), lambda i: (i, 0)),
        compiler_params=pltpu.CompilerParams(
            dimension_semantics=("parallel",), vmem_limit_bytes=VMEM_LIMIT),
    )(x, w1, b1.reshape(1, H2))
    return out[:N]


def dwconv3d_gelu_pallas(x, w27, b, c_block=128):
    """Depthwise 3x3x3 conv (stride 1, pad 1) + exact GELU, channel-tiled.

    x: [B, T, H, W, Cp] (bf16, Cp multiple of 128), w27: [27, Cp] f32, b: [Cp] f32.
    Compute in f32 (v5e has no bf16 VPU); output stored bf16 (feeds a matmul only).
    """
    B, T, H, W, Cp = x.shape
    xp = jnp.pad(x, ((0, 0), (1, 1), (1, 1), (1, 1), (0, 0)))
    nC = Cp // c_block

    def kernel(xp_ref, w_ref, b_ref, o_ref):
        xv = xp_ref[0].astype(jnp.float32)           # (T+2, H+2, W+2, c_block)
        acc = jnp.zeros((T, H, W, c_block), jnp.float32)
        for dt in range(3):
            for dh in range(3):
                for dw in range(3):
                    k = (dt * 3 + dh) * 3 + dw
                    win = xv[dt:dt + T, dh:dh + H, dw:dw + W, :]
                    acc = acc + win * w_ref[k].reshape(1, 1, 1, c_block)
        y = acc + b_ref[0].reshape(1, 1, 1, c_block)
        o_ref[0] = _gelu_exact(y).astype(o_ref.dtype)

    # TODO(synk): for very long clips on v7x also tile T/H with a 1-plane halo;
    # here channel tiling (4x) + explicit vmem_limit keeps the footprint bounded.
    return pl.pallas_call(
        kernel,
        out_shape=jax.ShapeDtypeStruct((B, T, H, W, Cp), MATMUL_DTYPE),
        grid=(B, nC),
        in_specs=[pl.BlockSpec((1, T + 2, H + 2, W + 2, c_block),
                               lambda i, c: (i, 0, 0, 0, c)),
                  pl.BlockSpec((27, c_block), lambda i, c: (0, c)),
                  pl.BlockSpec((1, c_block), lambda i, c: (0, c))],
        out_specs=pl.BlockSpec((1, T, H, W, c_block), lambda i, c: (i, 0, 0, 0, c)),
        compiler_params=pltpu.CompilerParams(
            dimension_semantics=("parallel", "parallel"),
            vmem_limit_bytes=VMEM_LIMIT),
    )(xp, w27, b.reshape(1, Cp))


def window_attention_pallas(xw, wqkv, bqkv, wo, bo, rpb, mask, num_heads, win_block):
    """Fused W-MSA.  One grid step = WB windows, all heads.

    xw:   [NW, L, C]  (bf16) windows
    wqkv: [C, 3C] bf16 ([q|k|v] columns), bqkv: [1, 3C] f32
    wo:   [C, C] bf16, bo: [1, C] f32
    rpb:  [nh, L, L] f32 relative-position bias
    mask: [nwin, L, L] f32 additive mask or None (mask-free variant).
    """
    NW, L, C = xw.shape
    hd = C // num_heads
    scale = float(hd) ** (-0.5)
    WB = win_block
    use_mask = mask is not None

    def kernel(*refs):
        if use_mask:
            x_ref, wqkv_ref, bqkv_ref, wo_ref, bo_ref, rpb_ref, m_ref, o_ref = refs
        else:
            x_ref, wqkv_ref, bqkv_ref, wo_ref, bo_ref, rpb_ref, o_ref = refs

        x2 = x_ref[...].reshape(WB * L, C)                       # bf16
        qkv = (jnp.dot(x2, wqkv_ref[...], preferred_element_type=jnp.float32)
               + bqkv_ref[0])                                    # (WB*L, 3C) f32
        qkv = qkv.reshape(WB, L, 3 * C)

        heads = []
        for h in range(num_heads):
            qh = (qkv[:, :, h * hd:(h + 1) * hd] * scale).astype(MATMUL_DTYPE)
            kh = qkv[:, :, C + h * hd:C + (h + 1) * hd].astype(MATMUL_DTYPE)
            vh = qkv[:, :, 2 * C + h * hd:2 * C + (h + 1) * hd].astype(MATMUL_DTYPE)
            # scores: (WB, L, L), batched over windows
            a = jax.lax.dot_general(qh, kh, (((2,), (2,)), ((0,), (0,))),
                                    preferred_element_type=jnp.float32)
            a = a + rpb_ref[h]
            if use_mask:
                a = a + m_ref[...]
            a = a - jnp.max(a, axis=-1, keepdims=True)
            p = jnp.exp(a)
            p = p * pl.reciprocal(jnp.sum(p, axis=-1, keepdims=True), approx=True)
            oh = jax.lax.dot_general(p.astype(MATMUL_DTYPE), vh,
                                     (((2,), (1,)), ((0,), (0,))),
                                     preferred_element_type=jnp.float32)  # (WB,L,hd)
            heads.append(oh)

        o = jnp.concatenate(heads, axis=-1)                      # (WB, L, C) f32
        o2 = o.reshape(WB * L, C).astype(MATMUL_DTYPE)
        out = (jnp.dot(o2, wo_ref[...], preferred_element_type=jnp.float32)
               + bo_ref[0])
        o_ref[...] = out.reshape(WB, L, C)

    in_specs = [
        pl.BlockSpec((WB, L, C), lambda i: (i, 0, 0)),
        pl.BlockSpec((C, 3 * C), lambda i: (0, 0)),
        pl.BlockSpec((1, 3 * C), lambda i: (0, 0)),
        pl.BlockSpec((C, C), lambda i: (0, 0)),
        pl.BlockSpec((1, C), lambda i: (0, 0)),
        pl.BlockSpec((num_heads, L, L), lambda i: (0, 0, 0)),
    ]
    args = [xw, wqkv, bqkv, wo, bo, rpb]
    if use_mask:
        nmb = mask.shape[0] // WB        # mask block count along the window axis
        in_specs.append(pl.BlockSpec((WB, L, L), lambda i: (i % nmb, 0, 0)))
        args.append(mask)

    return pl.pallas_call(
        kernel,
        out_shape=jax.ShapeDtypeStruct((NW, L, C), jnp.float32),
        grid=(NW // WB,),
        in_specs=in_specs,
        out_specs=pl.BlockSpec((WB, L, C), lambda i: (i, 0, 0)),
        compiler_params=pltpu.CompilerParams(
            dimension_semantics=("parallel",), vmem_limit_bytes=VMEM_LIMIT),
    )(*args)


# ======================= host-side helpers (glue) =======================

def _compute_pad_size_3d(size_dhw, patch_size):
    return tuple((patch_size[i] - size_dhw[i] % patch_size[i]) % patch_size[i]
                 for i in range(3))


def _make_relative_position_index(ws):
    coords = np.stack(np.meshgrid(np.arange(ws[0]), np.arange(ws[1]),
                                  np.arange(ws[2]), indexing="ij"))
    coords_flatten = coords.reshape(3, -1)
    rel = coords_flatten[:, :, None] - coords_flatten[:, None, :]
    rel = rel.transpose(1, 2, 0).astype(np.int64)
    rel[:, :, 0] += ws[0] - 1
    rel[:, :, 1] += ws[1] - 1
    rel[:, :, 2] += ws[2] - 1
    rel[:, :, 0] *= (2 * ws[1] - 1) * (2 * ws[2] - 1)
    rel[:, :, 1] *= (2 * ws[2] - 1)
    return rel.sum(-1).astype(np.int32)          # (V, V)


RPI = _make_relative_position_index(WINDOW_SIZE)


def _compute_attention_mask_3d_np(size_dhw, window_size, shift_size):
    attn_mask = np.zeros(size_dhw, dtype=np.float32)
    num_windows = ((size_dhw[0] // window_size[0])
                   * (size_dhw[1] // window_size[1])
                   * (size_dhw[2] // window_size[2]))
    slices = [((0, -window_size[i]),
               (-window_size[i], -shift_size[i]),
               (-shift_size[i], None)) for i in range(3)]
    count = 0
    for d in slices[0]:
        for h in slices[1]:
            for w in slices[2]:
                attn_mask[d[0]:d[1], h[0]:h[1], w[0]:w[1]] = count
                count += 1
    attn_mask = attn_mask.reshape(size_dhw[0] // window_size[0], window_size[0],
                                  size_dhw[1] // window_size[1], window_size[1],
                                  size_dhw[2] // window_size[2], window_size[2])
    attn_mask = attn_mask.transpose(0, 2, 4, 1, 3, 5).reshape(num_windows, -1)
    diff = attn_mask[:, None, :] - attn_mask[:, :, None]
    return np.where(diff != 0, -100.0, 0.0).astype(np.float32)


# ============================ forward blocks ============================

def behavior_mlp_forward(p, beh):
    # beh: [B, T, BEHAVIOR_DIM] -> [B, T // BEHAVIOR_T, EMB_DIM]
    B, T, D = beh.shape
    h = linear_pallas(beh.reshape(B * T, D), p['w1'], p['b1'], activation="tanh")
    h = linear_pallas(h, p['w2'], p['b2'], activation="tanh")
    return h.reshape(B, T // BEHAVIOR_T, -1)


def window_attention_forward(p, x):
    # x: [B, t, h, w, C]  -> shifted-window MSA output (same shape, no residual)
    B, t, h, w, C = x.shape
    size_dhw = [t, h, w]
    ws = list(WINDOW_SIZE)
    ss = list(SHIFT_SIZE)
    for i in range(3):
        if size_dhw[i] <= ws[i]:
            ws[i] = size_dhw[i]
            ss[i] = 0
    wv = ws[0] * ws[1] * ws[2]

    # relative position bias (index table is a precomputed numpy constant so only
    # one small gather remains in the graph)
    idx = RPI[:wv, :wv].reshape(-1)
    rpb = p['rpb_table'][idx].reshape(wv, wv, NUM_HEADS)
    rpb = jnp.transpose(rpb, (2, 0, 1))                 # (nh, wv, wv)

    pad = _compute_pad_size_3d((t, h, w), tuple(ws))
    xp = jnp.pad(x, ((0, 0), (0, pad[0]), (0, pad[1]), (0, pad[2]), (0, 0)))
    Tp, Hp, Wp = t + pad[0], h + pad[1], w + pad[2]
    shifted = sum(ss) > 0
    if shifted:
        xp = jnp.roll(xp, shift=(-ss[0], -ss[1], -ss[2]), axis=(1, 2, 3))

    nT, nH, nW = Tp // ws[0], Hp // ws[1], Wp // ws[2]
    nwin = nT * nH * nW
    xw = xp.reshape(B, nT, ws[0], nH, ws[1], nW, ws[2], C)
    xw = jnp.transpose(xw, (0, 1, 3, 5, 2, 4, 6, 7)).reshape(B * nwin, wv, C)
    xw = xw.astype(MATMUL_DTYPE)    # cast fuses into the window-partition copy

    NW = B * nwin
    target_wb = max(1, 1024 // wv)  # ~1024 rows per grid step
    if shifted:
        WB = _largest_divisor_leq(nwin, target_wb)      # keep mask blocks aligned
        mask = jnp.asarray(
            _compute_attention_mask_3d_np((Tp, Hp, Wp), tuple(ws), tuple(ss)))
    else:
        WB = _largest_divisor_leq(NW, target_wb)
        mask = None                                     # mask-free kernel variant

    yw = window_attention_pallas(xw, p['wqkv'], p['bqkv'], p['wo'], p['bo'],
                                 rpb, mask, NUM_HEADS, WB)

    y = yw.reshape(B, nT, nH, nW, ws[0], ws[1], ws[2], C)
    y = jnp.transpose(y, (0, 1, 4, 2, 5, 3, 6, 7)).reshape(B, Tp, Hp, Wp, C)
    if shifted:
        y = jnp.roll(y, shift=(ss[0], ss[1], ss[2]), axis=(1, 2, 3))
    return y[:, :t, :h, :w, :]


def mlp_forward(p, x):
    # x: [B, T, H, W, C]; returns MLP(x) + x  (residual add fused into last matmul)
    B, T, H, W, C = x.shape
    N = B * T * H * W
    xf = x.reshape(N, C)
    h1 = linear_swiglu_pallas(xf, p['w1'], p['b1'])               # [N, 512] bf16
    h1 = h1.reshape(B, T, H, W, MLP_DIM_PAD)
    hc = dwconv3d_gelu_pallas(h1, p['dw'], p['dwb'])              # GELU fused, bf16
    out = linear_pallas(hc.reshape(N, MLP_DIM_PAD), p['w2'], p['b2'], residual=xf)
    return out.reshape(B, T, H, W, C)


def transformer_forward(params, inputs, behaviors):
    """inputs: [B, T', H', W', C] (channels last), behaviors: [B, T'*BEHAVIOR_T, 4]."""
    out = inputs
    for blk in params['blocks']:
        b_lat = behavior_mlp_forward(blk['bmlp'], behaviors)       # [B, T', C]
        out = out + b_lat[:, :, None, None, :]
        out = window_attention_forward(blk['attn'], out) + out     # MHA residual
        out = mlp_forward(blk['mlp'], out)                         # MLP residual fused
    return out


# ============================== parameters ==============================

def init_params(key):
    keys = iter(jax.random.split(key, 256))

    def nrm(shape, scale=0.02):
        return scale * jax.random.normal(next(keys), shape, dtype=jnp.float32)

    rpb_rows = ((2 * WINDOW_SIZE[0] - 1) * (2 * WINDOW_SIZE[1] - 1)
                * (2 * WINDOW_SIZE[2] - 1))
    pad_h = MLP_DIM_PAD - MLP_DIM

    blocks = []
    for _ in range(NUM_BLOCKS):
        qkv_w = nrm((3 * EMB_DIM, EMB_DIM))
        qkv_b = nrm((3 * EMB_DIM,))
        proj_w = nrm((EMB_DIM, EMB_DIM))
        proj_b = nrm((EMB_DIM,))
        attn = dict(
            wqkv=qkv_w.T.astype(MATMUL_DTYPE),              # (C, 3C)  [q|k|v]
            bqkv=qkv_b.reshape(1, 3 * EMB_DIM),             # f32
            wo=proj_w.T.astype(MATMUL_DTYPE),               # (C, C)
            bo=proj_b.reshape(1, EMB_DIM),                  # f32
            rpb_table=nrm((rpb_rows, NUM_HEADS)),
        )

        w1 = nrm((2 * MLP_DIM, EMB_DIM)); b1 = nrm((2 * MLP_DIM,))
        dw_w = nrm((MLP_DIM, 1, 3, 3, 3), 0.05); dw_b = nrm((MLP_DIM,))
        w2 = nrm((EMB_DIM, MLP_DIM)); b2 = nrm((EMB_DIM,))

        # zero-pad hidden dim 488 -> 512 (exact: padded channels stay identically 0)
        w1a = jnp.pad(w1[:MLP_DIM].T, ((0, 0), (0, pad_h)))     # value half
        w1g = jnp.pad(w1[MLP_DIM:].T, ((0, 0), (0, pad_h)))     # gate half
        b1a = jnp.pad(b1[:MLP_DIM], (0, pad_h))
        b1g = jnp.pad(b1[MLP_DIM:], (0, pad_h))
        mlp = dict(
            w1=jnp.concatenate([w1a, w1g], axis=1).astype(MATMUL_DTYPE),  # (C, 2*512)
            b1=jnp.concatenate([b1a, b1g]),                               # (1024,) f32
            dw=jnp.pad(dw_w.reshape(MLP_DIM, 27).T, ((0, 0), (0, pad_h))),  # (27,512) f32
            dwb=jnp.pad(dw_b, (0, pad_h)),                                  # (512,) f32
            w2=jnp.pad(w2.T, ((0, pad_h), (0, 0))).astype(MATMUL_DTYPE),    # (512, C)
            b2=b2,
        )

        bw1 = nrm((EMB_DIM // 2, BEHAVIOR_DIM)); bb1 = nrm((EMB_DIM // 2,))
        bw2 = nrm((EMB_DIM // BEHAVIOR_T, EMB_DIM // 2))
        bb2 = nrm((EMB_DIM // BEHAVIOR_T,))
        bmlp = dict(w1=bw1.T.astype(MATMUL_DTYPE), b1=bb1,
                    w2=bw2.T.astype(MATMUL_DTYPE), b2=bb2)

        blocks.append(dict(attn=attn, mlp=mlp, bmlp=bmlp))
    return dict(blocks=blocks)


# ================================= main =================================

def _run_case(params, data_key, B, Tp, Hp, Wp):
    k1, k2 = jax.random.split(data_key)
    inputs = jax.random.normal(k1, (B, Tp, Hp, Wp, EMB_DIM), jnp.float32)
    behaviors = jax.random.normal(k2, (B, Tp * BEHAVIOR_T, BEHAVIOR_DIM), jnp.float32)
    out = jax.jit(transformer_forward)(params, inputs, behaviors)
    out = jax.block_until_ready(out)
    assert out.shape == inputs.shape, (out.shape, inputs.shape)
    assert bool(jnp.all(jnp.isfinite(out)))
    return out


if __name__ == "__main__":
    key = jax.random.PRNGKey(0)
    kp, kd = jax.random.split(key)
    params = init_params(kp)

    # Case 1: feature map smaller than the window -> clamped window, no shift/mask.
    _run_case(params, kd, B=2, Tp=2, Hp=4, Wp=4)
    # Case 2: H'/W' > window size -> shifted windows + additive attention mask path.
    _run_case(params, kd, B=1, Tp=2, Hp=8, Wp=8)

    print("KERNEL_OK")
</pallas_src>

<mosaic_0001>
module attributes {stable_mosaic.version = 11 : i64} {
  func.func @kernel(%arg0: i32, %arg1: memref<8x80xf32, #tpu.memory_space<vmem>>, %arg2: memref<80x80xbf16, #tpu.memory_space<vmem>>, %arg3: memref<1x80xf32, #tpu.memory_space<vmem>>, %arg4: memref<8x80xf32, #tpu.memory_space<vmem>>) attributes {dimension_semantics = [#tpu.dimension_semantics<parallel>], iteration_bounds = array<i64: 1>, scalar_prefetch = 0 : i64, scratch_operands = 0 : i64, tpu.core_type = #tpu.core_type<tc>, window_params = [{transform_indices = @transform_0, window_bounds = array<i64: 8, 80>}, {pipeline_mode = #tpu.pipeline_mode<synchronous>, transform_indices = @transform_1, window_bounds = array<i64: 80, 80>}, {pipeline_mode = #tpu.pipeline_mode<synchronous>, transform_indices = @transform_2, window_bounds = array<i64: 1, 80>}, {transform_indices = @transform_3, window_bounds = array<i64: 8, 80>}]} {
    %c0 = arith.constant 0 : index
    %c0_0 = arith.constant 0 : index
    %0 = vector.load %arg1[%c0, %c0_0] : memref<8x80xf32, #tpu.memory_space<vmem>>, vector<8x80xf32>
    %1 = arith.truncf %0 : vector<8x80xf32> to vector<8x80xbf16>
    %c0_1 = arith.constant 0 : index
    %c0_2 = arith.constant 0 : index
    %2 = vector.load %arg2[%c0_1, %c0_2] : memref<80x80xbf16, #tpu.memory_space<vmem>>, vector<80x80xbf16>
    %cst = arith.constant dense<0.000000e+00> : vector<8x80xf32>
    %3 = tpu.matmul %1, %2, %cst {dimension_numbers = #tpu.dot_dimension_numbers<[1], [0], [0], [1], [0, 0, 1, 1], [], []>} : vector<8x80xbf16>, vector<80x80xbf16>, vector<8x80xf32> -> vector<8x80xf32>
    %c0_3 = arith.constant 0 : index
    %c0_4 = arith.constant 0 : index
    %4 = vector.load %arg3[%c0_3, %c0_4] : memref<1x80xf32, #tpu.memory_space<vmem>>, vector<1x80xf32>
    %5 = vector.shape_cast %4 : vector<1x80xf32> to vector<80xf32>
    %6 = vector.shape_cast %5 : vector<80xf32> to vector<1x80xf32>
    %7 = vector.broadcast %6 : vector<1x80xf32> to vector<8x80xf32>
    %8 = arith.addf %3, %7 : vector<8x80xf32>
    %9 = math.tanh %8 : vector<8x80xf32>
    %c0_5 = arith.constant 0 : index
    %c0_6 = arith.constant 0 : index
    %10 = vector.load %arg4[%c0_5, %c0_6] : memref<8x80xf32, #tpu.memory_space<vmem>>, vector<8x80xf32>
    tpu.vector_store %arg4[%c0_5, %c0_6], %9 {strides = array<i32>} : memref<8x80xf32, #tpu.memory_space<vmem>>, vector<8x80xf32>,
    return
  }
  func.func @transform_0(%arg0: i32) -> (i32, i32) {
    %c0_i32 = arith.constant 0 : i32
    %c0_i32_0 = arith.constant 0 : i32
    return %arg0, %c0_i32 : i32, i32
  }
  func.func @transform_1(%arg0: i32) -> (i32, i32) {
    %c0_i32 = arith.constant 0 : i32
    %c0_i32_0 = arith.constant 0 : i32
    %c0_i32_1 = arith.constant 0 : i32
    return %c0_i32, %c0_i32_0 : i32, i32
  }
  func.func @transform_2(%arg0: i32) -> (i32, i32) {
    %c0_i32 = arith.constant 0 : i32
    %c0_i32_0 = arith.constant 0 : i32
    %c0_i32_1 = arith.constant 0 : i32
    return %c0_i32, %c0_i32_0 : i32, i32
  }
  func.func @transform_3(%arg0: i32) -> (i32, i32) {
    %c0_i32 = arith.constant 0 : i32
    %c0_i32_0 = arith.constant 0 : i32
    return %arg0, %c0_i32 : i32, i32
  }
}

module attributes {stable_mosaic.version = 11 : i64} {
  func.func @kernel(%arg0: i32, %arg1: memref<8x4xf32, #tpu.memory_space<vmem>>, %arg2: memref<4x80xbf16, #tpu.memory_space<vmem>>, %arg3: memref<1x80xf32, #tpu.memory_space<vmem>>, %arg4: memref<8x80xf32, #tpu.memory_space<vmem>>) attributes {dimension_semantics = [#tpu.dimension_semantics<parallel>], iteration_bounds = array<i64: 1>, scalar_prefetch = 0 : i64, scratch_operands = 0 : i64, tpu.core_type = #tpu.core_type<tc>, window_params = [{transform_indices = @transform_0, window_bounds = array<i64: 8, 4>}, {pipeline_mode = #tpu.pipeline_mode<synchronous>, transform_indices = @transform_1, window_bounds = array<i64: 4, 80>}, {pipeline_mode = #tpu.pipeline_mode<synchronous>, transform_indices = @transform_2, window_bounds = array<i64: 1, 80>}, {transform_indices = @transform_3, window_bounds = array<i64: 8, 80>}]} {
    %c0 = arith.constant 0 : index
    %c0_0 = arith.constant 0 : index
    %0 = vector.load %arg1[%c0, %c0_0] : memref<8x4xf32, #tpu.memory_space<vmem>>, vector<8x4xf32>
    %1 = arith.truncf %0 : vector<8x4xf32> to vector<8x4xbf16>
    %c0_1 = arith.constant 0 : index
    %c0_2 = arith.constant 0 : index
    %2 = vector.load %arg2[%c0_1, %c0_2] : memref<4x80xbf16, #tpu.memory_space<vmem>>, vector<4x80xbf16>
    %cst = arith.constant dense<0.000000e+00> : vector<8x80xf32>
    %3 = tpu.matmul %1, %2, %cst {dimension_numbers = #tpu.dot_dimension_numbers<[1], [0], [0], [1], [0, 0, 1, 1], [], []>} : vector<8x4xbf16>, vector<4x80xbf16>, vector<8x80xf32> -> vector<8x80xf32>
    %c0_3 = arith.constant 0 : index
    %c0_4 = arith.constant 0 : index
    %4 = vector.load %arg3[%c0_3, %c0_4] : memref<1x80xf32, #tpu.memory_space<vmem>>, vector<1x80xf32>
    %5 = vector.shape_cast %4 : vector<1x80xf32> to vector<80xf32>
    %6 = vector.shape_cast %5 : vector<80xf32> to vector<1x80xf32>
    %7 = vector.broadcast %6 : vector<1x80xf32> to vector<8x80xf32>
    %8 = arith.addf %3, %7 : vector<8x80xf32>
    %9 = math.tanh %8 : vector<8x80xf32>
    %c0_5 = arith.constant 0 : index
    %c0_6 = arith.constant 0 : index
    %10 = vector.load %arg4[%c0_5, %c0_6] : memref<8x80xf32, #tpu.memory_space<vmem>>, vector<8x80xf32>
    tpu.vector_store %arg4[%c0_5, %c0_6], %9 {strides = array<i32>} : memref<8x80xf32, #tpu.memory_space<vmem>>, vector<8x80xf32>,
    return
  }
  func.func @transform_0(%arg0: i32) -> (i32, i32) {
    %c0_i32 = arith.constant 0 : i32
    %c0_i32_0 = arith.constant 0 : i32
    return %arg0, %c0_i32 : i32, i32
  }
  func.func @transform_1(%arg0: i32) -> (i32, i32) {
    %c0_i32 = arith.constant 0 : i32
    %c0_i32_0 = arith.constant 0 : i32
    %c0_i32_1 = arith.constant 0 : i32
    return %c0_i32, %c0_i32_0 : i32, i32
  }
  func.func @transform_2(%arg0: i32) -> (i32, i32) {
    %c0_i32 = arith.constant 0 : i32
    %c0_i32_0 = arith.constant 0 : i32
    %c0_i32_1 = arith.constant 0 : i32
    return %c0_i32, %c0_i32_0 : i32, i32
  }
  func.func @transform_3(%arg0: i32) -> (i32, i32) {
    %c0_i32 = arith.constant 0 : i32
    %c0_i32_0 = arith.constant 0 : i32
    return %arg0, %c0_i32 : i32, i32
  }
}

module attributes {stable_mosaic.version = 11 : i64} {
  func.func @kernel(%arg0: i32, %arg1: memref<2x32x160xbf16, #tpu.memory_space<vmem>>, %arg2: memref<160x480xbf16, #tpu.memory_space<vmem>>, %arg3: memref<1x480xf32, #tpu.memory_space<vmem>>, %arg4: memref<160x160xbf16, #tpu.memory_space<vmem>>, %arg5: memref<1x160xf32, #tpu.memory_space<vmem>>, %arg6: memref<4x32x32xf32, #tpu.memory_space<vmem>>, %arg7: memref<2x32x160xf32, #tpu.memory_space<vmem>>) attributes {dimension_semantics = [#tpu.dimension_semantics<parallel>], iteration_bounds = array<i64: 1>, scalar_prefetch = 0 : i64, scratch_operands = 0 : i64, tpu.core_type = #tpu.core_type<tc>, window_params = [{transform_indices = @transform_0, window_bounds = array<i64: 2, 32, 160>}, {pipeline_mode = #tpu.pipeline_mode<synchronous>, transform_indices = @transform_1, window_bounds = array<i64: 160, 480>}, {pipeline_mode = #tpu.pipeline_mode<synchronous>, transform_indices = @transform_2, window_bounds = array<i64: 1, 480>}, {pipeline_mode = #tpu.pipeline_mode<synchronous>, transform_indices = @transform_3, window_bounds = array<i64: 160, 160>}, {pipeline_mode = #tpu.pipeline_mode<synchronous>, transform_indices = @transform_4, window_bounds = array<i64: 1, 160>}, {pipeline_mode = #tpu.pipeline_mode<synchronous>, transform_indices = @transform_5, window_bounds = array<i64: 4, 32, 32>}, {transform_indices = @transform_6, window_bounds = array<i64: 2, 32, 160>}]} {
    %c0 = arith.constant 0 : index
    %c0_0 = arith.constant 0 : index
    %c0_1 = arith.constant 0 : index
    %0 = vector.load %arg1[%c0, %c0_0, %c0_1] : memref<2x32x160xbf16, #tpu.memory_space<vmem>>, vector<2x32x160xbf16>
    %1 = vector.shape_cast %0 : vector<2x32x160xbf16> to vector<64x160xbf16>
    %c0_2 = arith.constant 0 : index
    %c0_3 = arith.constant 0 : index
    %2 = vector.load %arg2[%c0_2, %c0_3] : memref<160x480xbf16, #tpu.memory_space<vmem>>, vector<160x480xbf16>
    %cst = arith.constant dense<0.000000e+00> : vector<64x480xf32>
    %3 = tpu.matmul %1, %2, %cst {dimension_numbers = #tpu.dot_dimension_numbers<[1], [0], [0], [1], [0, 0, 1, 1], [], []>} : vector<64x160xbf16>, vector<160x480xbf16>, vector<64x480xf32> -> vector<64x480xf32>
    %c0_4 = arith.constant 0 : index
    %c0_5 = arith.constant 0 : index
    %4 = vector.load %arg3[%c0_4, %c0_5] : memref<1x480xf32, #tpu.memory_space<vmem>>, vector<1x480xf32>
    %5 = vector.shape_cast %4 : vector<1x480xf32> to vector<480xf32>
    %6 = vector.shape_cast %5 : vector<480xf32> to vector<1x480xf32>
    %7 = vector.broadcast %6 : vector<1x480xf32> to vector<64x480xf32>
    %8 = arith.addf %3, %7 : vector<64x480xf32>
    %9 = vector.shape_cast %8 : vector<64x480xf32> to vector<2x32x480xf32>
    %10 = vector.extract_strided_slice %9 {offsets = [0, 0, 0], sizes = [2, 32, 40], strides = [1, 1, 1]} : vector<2x32x480xf32> to vector<2x32x40xf32>
    %cst_6 = arith.constant 0.158113882 : f32
    %11 = vector.broadcast %cst_6 : f32 to vector<2x32x40xf32>
    %12 = arith.mulf %10, %11 : vector<2x32x40xf32>
    %13 = arith.truncf %12 : vector<2x32x40xf32> to vector<2x32x40xbf16>
    %14 = vector.extract_strided_slice %9 {offsets = [0, 0, 160], sizes = [2, 32, 40], strides = [1, 1, 1]} : vector<2x32x480xf32> to vector<2x32x40xf32>
    %15 = arith.truncf %14 : vector<2x32x40xf32> to vector<2x32x40xbf16>
    %16 = vector.extract_strided_slice %9 {offsets = [0, 0, 320], sizes = [2, 32, 40], strides = [1, 1, 1]} : vector<2x32x480xf32> to vector<2x32x40xf32>
    %17 = arith.truncf %16 : vector<2x32x40xf32> to vector<2x32x40xbf16>
    %cst_7 = arith.constant dense<0.000000e+00> : vector<2x32x32xf32>
    %18 = tpu.matmul %13, %15, %cst_7 {dimension_numbers = #tpu.dot_dimension_numbers<[2], [2], [1], [1], [0, 0, 0, 1, 1, 1], [0], [0]>} : vector<2x32x40xbf16>, vector<2x32x40xbf16>, vector<2x32x32xf32> -> vector<2x32x32xf32>
    %c0_8 = arith.constant 0 : index
    %c0_9 = arith.constant 0 : index
    %c0_10 = arith.constant 0 : index
    %19 = vector.load %arg6[%c0_8, %c0_9, %c0_10] : memref<4x32x32xf32, #tpu.memory_space<vmem>>, vector<1x32x32xf32>
    %20 = vector.shape_cast %19 : vector<1x32x32xf32> to vector<32x32xf32>
    %21 = vector.shape_cast %20 : vector<32x32xf32> to vector<1x32x32xf32>
    %22 = vector.broadcast %21 : vector<1x32x32xf32> to vector<2x32x32xf32>
    %23 = arith.addf %18, %22 : vector<2x32x32xf32>
    %cst_11 = arith.constant dense<0xFF800000> : vector<2x32xf32>
    %24 = vector.multi_reduction <maximumf>, %23, %cst_11 [2] : vector<2x32x32xf32> to vector<2x32xf32>
    %25 = vector.shape_cast %24 : vector<2x32xf32> to vector<2x32x1xf32>
    %26 = vector.broadcast %25 : vector<2x32x1xf32> to vector<2x32x32xf32>
    %27 = arith.subf %23, %26 : vector<2x32x32xf32>
    %28 = math.exp %27 : vector<2x32x32xf32>
    %cst_12 = arith.constant dense<0.000000e+00> : vector<2x32xf32>
    %29 = vector.multi_reduction <add>, %28, %cst_12 [2] : vector<2x32x32xf32> to vector<2x32xf32>
    %30 = vector.shape_cast %29 : vector<2x32xf32> to vector<2x32x1xf32>
    %31 = tpu.reciprocal %30 {approx = true} : vector<2x32x1xf32> -> vector<2x32x1xf32>
    %32 = vector.broadcast %31 : vector<2x32x1xf32> to vector<2x32x32xf32>
    %33 = arith.mulf %28, %32 : vector<2x32x32xf32>
    %34 = arith.truncf %33 : vector<2x32x32xf32> to vector<2x32x32xbf16>
    %cst_13 = arith.constant dense<0.000000e+00> : vector<2x32x40xf32>
    %35 = tpu.matmul %34, %17, %cst_13 {dimension_numbers = #tpu.dot_dimension_numbers<[2], [1], [1], [2], [0, 0, 0, 1, 1, 2], [0], [0]>} : vector<2x32x32xbf16>, vector<2x32x40xbf16>, vector<2x32x40xf32> -> vector<2x32x40xf32>
    %36 = vector.extract_strided_slice %9 {offsets = [0, 0, 40], sizes = [2, 32, 40], strides = [1, 1, 1]} : vector<2x32x480xf32> to vector<2x32x40xf32>
    %cst_14 = arith.constant 0.158113882 : f32
    %37 = vector.broadcast %cst_14 : f32 to vector<2x32x40xf32>
    %38 = arith.mulf %36, %37 : vector<2x32x40xf32>
    %39 = arith.truncf %38 : vector<2x32x40xf32> to vector<2x32x40xbf16>
    %40 = vector.extract_strided_slice %9 {offsets = [0, 0, 200], sizes = [2, 32, 40], strides = [1, 1, 1]} : vector<2x32x480xf32> to vector<2x32x40xf32>
    %41 = arith.truncf %40 : vector<2x32x40xf32> to vector<2x32x40xbf16>
    %42 = vector.extract_strided_slice %9 {offsets = [0, 0, 360], sizes = [2, 32, 40], strides = [1, 1, 1]} : vector<2x32x480xf32> to vector<2x32x40xf32>
    %43 = arith.truncf %42 : vector<2x32x40xf32> to vector<2x32x40xbf16>
    %cst_15 = arith.constant dense<0.000000e+00> : vector<2x32x32xf32>
    %44 = tpu.matmul %39, %41, %cst_15 {dimension_numbers = #tpu.dot_dimension_numbers<[2], [2], [1], [1], [0, 0, 0, 1, 1, 1], [0], [0]>} : vector<2x32x40xbf16>, vector<2x32x40xbf16>, vector<2x32x32xf32> -> vector<2x32x32xf32>
    %c1 = arith.constant 1 : index
    %c0_16 = arith.constant 0 : index
    %c0_17 = arith.constant 0 : index
    %45 = vector.load %arg6[%c1, %c0_16, %c0_17] : memref<4x32x32xf32, #tpu.memory_space<vmem>>, vector<1x32x32xf32>
    %46 = vector.shape_cast %45 : vector<1x32x32xf32> to vector<32x32xf32>
    %47 = vector.shape_cast %46 : vector<32x32xf32> to vector<1x32x32xf32>
    %48 = vector.broadcast %47 : vector<1x32x32xf32> to vector<2x32x32xf32>
    %49 = arith.addf %44, %48 : vector<2x32x32xf32>
    %cst_18 = arith.constant dense<0xFF800000> : vector<2x32xf32>
    %50 = vector.multi_reduction <maximumf>, %49, %cst_18 [2] : vector<2x32x32xf32> to vector<2x32xf32>
    %51 = vector.shape_cast %50 : vector<2x32xf32> to vector<2x32x1xf32>
    %52 = vector.broadcast %51 : vector<2x32x1xf32> to vector<2x32x32xf32>
    %53 = arith.subf %49, %52 : vector<2x32x32xf32>
    %54 = math.exp %53 : vector<2x32x32xf32>
    %cst_19 = arith.constant dense<0.000000e+00> : vector<2x32xf32>
    %55 = vector.multi_reduction <add>, %54, %cst_19 [2] : vector<2x32x32xf32> to vector<2x32xf32>
    %56 = vector.shape_cast %55 : vector<2x32xf32> to vector<2x32x1xf32>
    %57 = tpu.reciprocal %56 {approx = true} : vector<2x32x1xf32> -> vector<2x32x1xf32>
    %58 = vector.broadcast %57 : vector<2x32x1xf32> to vector<2x32x32xf32>
    %59 = arith.mulf %54, %58 : vector<2x32x32xf32>
    %60 = arith.truncf %59 : vector<2x32x32xf32> to vector<2x32x32xbf16>
    %cst_20 = arith.constant dense<0.000000e+00> : vector<2x32x40xf32>
    %61 = tpu.matmul %60, %43, %cst_20 {dimension_numbers = #tpu.dot_dimension_numbers<[2], [1], [1], [2], [0, 0, 0, 1, 1, 2], [0], [0]>} : vector<2x32x32xbf16>, vector<2x32x40xbf16>, vector<2x32x40xf32> -> vector<2x32x40xf32>
    %62 = vector.extract_strided_slice %9 {offsets = [0, 0, 80], sizes = [2, 32, 40], strides = [1, 1, 1]} : vector<2x32x480xf32> to vector<2x32x40xf32>
    %cst_21 = arith.constant 0.158113882 : f32
    %63 = vector.broadcast %cst_21 : f32 to vector<2x32x40xf32>
    %64 = arith.mulf %62, %63 : vector<2x32x40xf32>
    %65 = arith.truncf %64 : vector<2x32x40xf32> to vector<2x32x40xbf16>
    %66 = vector.extract_strided_slice %9 {offsets = [0, 0, 240], sizes = [2, 32, 40], strides = [1, 1, 1]} : vector<2x32x480xf32> to vector<2x32x40xf32>
    %67 = arith.truncf %66 : vector<2x32x40xf32> to vector<2x32x40xbf16>
    %68 = vector.extract_strided_slice %9 {offsets = [0, 0, 400], sizes = [2, 32, 40], strides = [1, 1, 1]} : vector<2x32x480xf32> to vector<2x32x40xf32>
    %69 = arith.truncf %68 : vector<2x32x40xf32> to vector<2x32x40xbf16>
    %cst_22 = arith.constant dense<0.000000e+00> : vector<2x32x32xf32>
    %70 = tpu.matmul %65, %67, %cst_22 {dimension_numbers = #tpu.dot_dimension_numbers<[2], [2], [1], [1], [0, 0, 0, 1, 1, 1], [0], [0]>} : vector<2x32x40xbf16>, vector<2x32x40xbf16>, vector<2x32x32xf32> -> vector<2x32x32xf32>
    %c2 = arith.constant 2 : index
    %c0_23 = arith.constant 0 : index
    %c0_24 = arith.constant 0 : index
    %71 = vector.load %arg6[%c2, %c0_23, %c0_24] : memref<4x32x32xf32, #tpu.memory_space<vmem>>, vector<1x32x32xf32>
    %72 = vector.shape_cast %71 : vector<1x32x32xf32> to vector<32x32xf32>
    %73 = vector.shape_cast %72 : vector<32x32xf32> to vector<1x32x32xf32>
    %74 = vector.broadcast %73 : vector<1x32x32xf32> to vector<2x32x32xf32>
    %75 = arith.addf %70, %74 : vector<2x32x32xf32>
    %cst_25 = arith.constant dense<0xFF800000> : vector<2x32xf32>
    %76 = vector.multi_reduction <maximumf>, %75, %cst_25 [2] : vector<2x32x32xf32> to vector<2x32xf32>
    %77 = vector.shape_cast %76 : vector<2x32xf32> to vector<2x32x1xf32>
    %78 = vector.broadcast %77 : vector<2x32x1xf32> to vector<2x32x32xf32>
    %79 = arith.subf %75, %78 : vector<2x32x32xf32>
    %80 = math.exp %79 : vector<2x32x32xf32>
    %cst_26 = arith.constant dense<0.000000e+00> : vector<2x32xf32>
    %81 = vector.multi_reduction <add>, %80, %cst_26 [2] : vector<2x32x32xf32> to vector<2x32xf32>
    %82 = vector.shape_cast %81 : vector<2x32xf32> to vector<2x32x1xf32>
    %83 = tpu.reciprocal %82 {approx = true} : vector<2x32x1xf32> -> vector<2x32x1xf32>
    %84 = vector.broadcast %83 : vector<2x32x1xf32> to vector<2x32x32xf32>
    %85 = arith.mulf %80, %84 : vector<2x32x32xf32>
    %86 = arith.truncf %85 : vector<2x32x32xf32> to vector<2x32x32xbf16>
    %cst_27 = arith.constant dense<0.000000e+00> : vector<2x32x40xf32>
    %87 = tpu.matmul %86, %69, %cst_27 {dimension_numbers = #tpu.dot_dimension_numbers<[2], [1], [1], [2], [0, 0, 0, 1, 1, 2], [0], [0]>} : vector<2x32x32xbf16>, vector<2x32x40xbf16>, vector<2x32x40xf32> -> vector<2x32x40xf32>
    %88 = vector.extract_strided_slice %9 {offsets = [0, 0, 120], sizes = [2, 32, 40], strides = [1, 1, 1]} : vector<2x32x480xf32> to vector<2x32x40xf32>
    %cst_28 = arith.constant 0.158113882 : f32
    %89 = vector.broadcast %cst_28 : f32 to vector<2x32x40xf32>
    %90 = arith.mulf %88, %89 : vector<2x32x40xf32>
    %91 = arith.truncf %90 : vector<2x32x40xf32> to vector<2x32x40xbf16>
    %92 = vector.extract_strided_slice %9 {offsets = [0, 0, 280], sizes = [2, 32, 40], strides = [1, 1, 1]} : vector<2x32x480xf32> to vector<2x32x40xf32>
    %93 = arith.truncf %92 : vector<2x32x40xf32> to vector<2x32x40xbf16>
    %94 = vector.extract_strided_slice %9 {offsets = [0, 0, 440], sizes = [2, 32, 40], strides = [1, 1, 1]} : vector<2x32x480xf32> to vector<2x32x40xf32>
    %95 = arith.truncf %94 : vector<2x32x40xf32> to vector<2x32x40xbf16>
    %cst_29 = arith.constant dense<0.000000e+00> : vector<2x32x32xf32>
    %96 = tpu.matmul %91, %93, %cst_29 {dimension_numbers = #tpu.dot_dimension_numbers<[2], [2], [1], [1], [0, 0, 0, 1, 1, 1], [0], [0]>} : vector<2x32x40xbf16>, vector<2x32x40xbf16>, vector<2x32x32xf32> -> vector<2x32x32xf32>
    %c3 = arith.constant 3 : index
    %c0_30 = arith.constant 0 : index
    %c0_31 = arith.constant 0 : index
    %97 = vector.load %arg6[%c3, %c0_30, %c0_31] : memref<4x32x32xf32, #tpu.memory_space<vmem>>, vector<1x32x32xf32>
    %98 = vector.shape_cast %97 : vector<1x32x32xf32> to vector<32x32xf32>
    %99 = vector.shape_cast %98 : vector<32x32xf32> to vector<1x32x32xf32>
    %100 = vector.broadcast %99 : vector<1x32x32xf32> to vector<2x32x32xf32>
    %101 = arith.addf %96, %100 : vector<2x32x32xf32>
    %cst_32 = arith.constant dense<0xFF800000> : vector<2x32xf32>
    %102 = vector.multi_reduction <maximumf>, %101, %cst_32 [2] : vector<2x32x32xf32> to vector<2x32xf32>
    %103 = vector.shape_cast %102 : vector<2x32xf32> to vector<2x32x1xf32>
    %104 = vector.broadcast %103 : vector<2x32x1xf32> to vector<2x32x32xf32>
    %105 = arith.subf %101, %104 : vector<2x32x32xf32>
    %106 = math.exp %105 : vector<2x32x32xf32>
    %cst_33 = arith.constant dense<0.000000e+00> : vector<2x32xf32>
    %107 = vector.multi_reduction <add>, %106, %cst_33 [2] : vector<2x32x32xf32> to vector<2x32xf32>
    %108 = vector.shape_cast %107 : vector<2x32xf32> to vector<2x32x1xf32>
    %109 = tpu.reciprocal %108 {approx = true} : vector<2x32x1xf32> -> vector<2x32x1xf32>
    %110 = vector.broadcast %109 : vector<2x32x1xf32> to vector<2x32x32xf32>
    %111 = arith.mulf %106, %110 : vector<2x32x32xf32>
    %112 = arith.truncf %111 : vector<2x32x32xf32> to vector<2x32x32xbf16>
    %cst_34 = arith.constant dense<0.000000e+00> : vector<2x32x40xf32>
    %113 = tpu.matmul %112, %95, %cst_34 {dimension_numbers = #tpu.dot_dimension_numbers<[2], [1], [1], [2], [0, 0, 0, 1, 1, 2], [0], [0]>} : vector<2x32x32xbf16>, vector<2x32x40xbf16>, vector<2x32x40xf32> -> vector<2x32x40xf32>
    %114 = tpu.concatenate %35, %61, %87, %113 in 2 : vector<2x32x40xf32>, vector<2x32x40xf32>, vector<2x32x40xf32>, vector<2x32x40xf32> -> vector<2x32x160xf32>
    %115 = vector.shape_cast %114 : vector<2x32x160xf32> to vector<64x160xf32>
    %116 = arith.truncf %115 : vector<64x160xf32> to vector<64x160xbf16>
    %c0_35 = arith.constant 0 : index
    %c0_36 = arith.constant 0 : index
    %117 = vector.load %arg4[%c0_35, %c0_36] : memref<160x160xbf16, #tpu.memory_space<vmem>>, vector<160x160xbf16>
    %cst_37 = arith.constant dense<0.000000e+00> : vector<64x160xf32>
    %118 = tpu.matmul %116, %117, %cst_37 {dimension_numbers = #tpu.dot_dimension_numbers<[1], [0], [0], [1], [0, 0, 1, 1], [], []>} : vector<64x160xbf16>, vector<160x160xbf16>, vector<64x160xf32> -> vector<64x160xf32>
    %c0_38 = arith.constant 0 : index
    %c0_39 = arith.constant 0 : index
    %119 = vector.load %arg5[%c0_38, %c0_39] : memref<1x160xf32, #tpu.memory_space<vmem>>, vector<1x160xf32>
    %120 = vector.shape_cast %119 : vector<1x160xf32> to vector<160xf32>
    %121 = vector.shape_cast %120 : vector<160xf32> to vector<1x160xf32>
    %122 = vector.broadcast %121 : vector<1x160xf32> to vector<64x160xf32>
    %123 = arith.addf %118, %122 : vector<64x160xf32>
    %124 = vector.shape_cast %123 : vector<64x160xf32> to vector<2x32x160xf32>
    %c0_40 = arith.constant 0 : index
    %c0_41 = arith.constant 0 : index
    %c0_42 = arith.constant 0 : index
    %125 = vector.load %arg7[%c0_40, %c0_41, %c0_42] : memref<2x32x160xf32, #tpu.memory_space<vmem>>, vector<2x32x160xf32>
    tpu.vector_store %arg7[%c0_40, %c0_41, %c0_42], %124 {strides = array<i32>} : memref<2x32x160xf32, #tpu.memory_space<vmem>>, vector<2x32x160xf32>,
    return
  }
  func.func @transform_0(%arg0: i32) -> (i32, i32, i32) {
    %c0_i32 = arith.constant 0 : i32
    %c0_i32_0 = arith.constant 0 : i32
    %c0_i32_1 = arith.constant 0 : i32
    return %arg0, %c0_i32, %c0_i32_0 : i32, i32, i32
  }
  func.func @transform_1(%arg0: i32) -> (i32, i32) {
    %c0_i32 = arith.constant 0 : i32
    %c0_i32_0 = arith.constant 0 : i32
    %c0_i32_1 = arith.constant 0 : i32
    return %c0_i32, %c0_i32_0 : i32, i32
  }
  func.func @transform_2(%arg0: i32) -> (i32, i32) {
    %c0_i32 = arith.constant 0 : i32
    %c0_i32_0 = arith.constant 0 : i32
    %c0_i32_1 = arith.constant 0 : i32
    return %c0_i32, %c0_i32_0 : i32, i32
  }
  func.func @transform_3(%arg0: i32) -> (i32, i32) {
    %c0_i32 = arith.constant 0 : i32
    %c0_i32_0 = arith.constant 0 : i32
    %c0_i32_1 = arith.constant 0 : i32
    return %c0_i32, %c0_i32_0 : i32, i32
  }
  func.func @transform_4(%arg0: i32) -> (i32, i32) {
    %c0_i32 = arith.constant 0 : i32
    %c0_i32_0 = arith.constant 0 : i32
    %c0_i32_1 = arith.constant 0 : i32
    return %c0_i32, %c0_i32_0 : i32, i32
  }
  func.func @transform_5(%arg0: i32) -> (i32, i32, i32) {
    %c0_i32 = arith.constant 0 : i32
    %c0_i32_0 = arith.constant 0 : i32
    %c0_i32_1 = arith.constant 0 : i32
    %c0_i32_2 = arith.constant 0 : i32
    return %c0_i32, %c0_i32_0, %c0_i32_1 : i32, i32, i32
  }
  func.func @transform_6(%arg0: i32) -> (i32, i32, i32) {
    %c0_i32 = arith.constant 0 : i32
    %c0_i32_0 = arith.constant 0 : i32
    %c0_i32_1 = arith.constant 0 : i32
    return %arg0, %c0_i32, %c0_i32_0 : i32, i32, i32
  }
}

module attributes {stable_mosaic.version = 11 : i64} {
  func.func @kernel(%arg0: i32, %arg1: memref<64x160xf32, #tpu.memory_space<vmem>>, %arg2: memref<160x1024xbf16, #tpu.memory_space<vmem>>, %arg3: memref<1x1024xf32, #tpu.memory_space<vmem>>, %arg4: memref<64x512xbf16, #tpu.memory_space<vmem>>) attributes {dimension_semantics = [#tpu.dimension_semantics<parallel>], iteration_bounds = array<i64: 1>, scalar_prefetch = 0 : i64, scratch_operands = 0 : i64, tpu.core_type = #tpu.core_type<tc>, window_params = [{transform_indices = @transform_0, window_bounds = array<i64: 64, 160>}, {pipeline_mode = #tpu.pipeline_mode<synchronous>, transform_indices = @transform_1, window_bounds = array<i64: 160, 1024>}, {pipeline_mode = #tpu.pipeline_mode<synchronous>, transform_indices = @transform_2, window_bounds = array<i64: 1, 1024>}, {transform_indices = @transform_3, window_bounds = array<i64: 64, 512>}]} {
    %c0 = arith.constant 0 : index
    %c0_0 = arith.constant 0 : index
    %0 = vector.load %arg1[%c0, %c0_0] : memref<64x160xf32, #tpu.memory_space<vmem>>, vector<64x160xf32>
    %1 = arith.truncf %0 : vector<64x160xf32> to vector<64x160xbf16>
    %c0_1 = arith.constant 0 : index
    %c0_2 = arith.constant 0 : index
    %2 = vector.load %arg2[%c0_1, %c0_2] : memref<160x1024xbf16, #tpu.memory_space<vmem>>, vector<160x1024xbf16>
    %cst = arith.constant dense<0.000000e+00> : vector<64x1024xf32>
    %3 = tpu.matmul %1, %2, %cst {dimension_numbers = #tpu.dot_dimension_numbers<[1], [0], [0], [1], [0, 0, 1, 1], [], []>} : vector<64x160xbf16>, vector<160x1024xbf16>, vector<64x1024xf32> -> vector<64x1024xf32>
    %c0_3 = arith.constant 0 : index
    %c0_4 = arith.constant 0 : index
    %4 = vector.load %arg3[%c0_3, %c0_4] : memref<1x1024xf32, #tpu.memory_space<vmem>>, vector<1x1024xf32>
    %5 = vector.shape_cast %4 : vector<1x1024xf32> to vector<1024xf32>
    %6 = vector.shape_cast %5 : vector<1024xf32> to vector<1x1024xf32>
    %7 = vector.broadcast %6 : vector<1x1024xf32> to vector<64x1024xf32>
    %8 = arith.addf %3, %7 : vector<64x1024xf32>
    %9 = vector.extract_strided_slice %8 {offsets = [0, 0], sizes = [64, 512], strides = [1, 1]} : vector<64x1024xf32> to vector<64x512xf32>
    %10 = vector.extract_strided_slice %8 {offsets = [0, 512], sizes = [64, 512], strides = [1, 1]} : vector<64x1024xf32> to vector<64x512xf32>
    %cst_5 = arith.constant 0.000000e+00 : f32
    %11 = vector.broadcast %cst_5 : f32 to vector<64x512xf32>
    %12 = arith.subf %11, %10 : vector<64x512xf32>
    %13 = math.exp %12 : vector<64x512xf32>
    %cst_6 = arith.constant 1.000000e+00 : f32
    %14 = vector.broadcast %cst_6 : f32 to vector<64x512xf32>
    %15 = arith.addf %14, %13 : vector<64x512xf32>
    %16 = tpu.reciprocal %15 {approx = true} : vector<64x512xf32> -> vector<64x512xf32>
    %17 = arith.mulf %10, %16 : vector<64x512xf32>
    %18 = arith.mulf %17, %9 : vector<64x512xf32>
    %19 = arith.truncf %18 : vector<64x512xf32> to vector<64x512xbf16>
    %c0_7 = arith.constant 0 : index
    %c0_8 = arith.constant 0 : index
    %20 = vector.load %arg4[%c0_7, %c0_8] : memref<64x512xbf16, #tpu.memory_space<vmem>>, vector<64x512xbf16>
    tpu.vector_store %arg4[%c0_7, %c0_8], %19 {strides = array<i32>} : memref<64x512xbf16, #tpu.memory_space<vmem>>, vector<64x512xbf16>,
    return
  }
  func.func @transform_0(%arg0: i32) -> (i32, i32) {
    %c0_i32 = arith.constant 0 : i32
    %c0_i32_0 = arith.constant 0 : i32
    return %arg0, %c0_i32 : i32, i32
  }
  func.func @transform_1(%arg0: i32) -> (i32, i32) {
    %c0_i32 = arith.constant 0 : i32
    %c0_i32_0 = arith.constant 0 : i32
    %c0_i32_1 = arith.constant 0 : i32
    return %c0_i32, %c0_i32_0 : i32, i32
  }
  func.func @transform_2(%arg0: i32) -> (i32, i32) {
    %c0_i32 = arith.constant 0 : i32
    %c0_i32_0 = arith.constant 0 : i32
    %c0_i32_1 = arith.constant 0 : i32
    return %c0_i32, %c0_i32_0 : i32, i32
  }
  func.func @transform_3(%arg0: i32) -> (i32, i32) {
    %c0_i32 = arith.constant 0 : i32
    %c0_i32_0 = arith.constant 0 : i32
    return %arg0, %c0_i32 : i32, i32
  }
}

module attributes {stable_mosaic.version = 11 : i64} {
  func.func @kernel(%arg0: i32, %arg1: i32, %arg2: memref<1x4x6x6x128xbf16, #tpu.memory_space<vmem>>, %arg3: memref<27x128xf32, #tpu.memory_space<vmem>>, %arg4: memref<1x128xf32, #tpu.memory_space<vmem>>, %arg5: memref<1x2x4x4x128xbf16, #tpu.memory_space<vmem>>) attributes {dimension_semantics = [#tpu.dimension_semantics<parallel>, #tpu.dimension_semantics<parallel>], iteration_bounds = array<i64: 2, 4>, scalar_prefetch = 0 : i64, scratch_operands = 0 : i64, tpu.core_type = #tpu.core_type<tc>, window_params = [{transform_indices = @transform_0, window_bounds = array<i64: 1, 4, 6, 6, 128>}, {transform_indices = @transform_1, window_bounds = array<i64: 27, 128>}, {transform_indices = @transform_2, window_bounds = array<i64: 1, 128>}, {transform_indices = @transform_3, window_bounds = array<i64: 1, 2, 4, 4, 128>}]} {
    %c0 = arith.constant 0 : index
    %c0_0 = arith.constant 0 : index
    %c0_1 = arith.constant 0 : index
    %c0_2 = arith.constant 0 : index
    %c0_3 = arith.constant 0 : index
    %0 = vector.load %arg2[%c0, %c0_0, %c0_1, %c0_2, %c0_3] : memref<1x4x6x6x128xbf16, #tpu.memory_space<vmem>>, vector<1x4x6x6x128xbf16>
    %1 = vector.shape_cast %0 : vector<1x4x6x6x128xbf16> to vector<4x6x6x128xbf16>
    %2 = arith.extf %1 : vector<4x6x6x128xbf16> to vector<4x6x6x128xf32>
    %cst = arith.constant 0.000000e+00 : f32
    %3 = vector.broadcast %cst : f32 to vector<2x4x4x128xf32>
    %4 = vector.extract_strided_slice %2 {offsets = [0, 0, 0, 0], sizes = [2, 4, 4, 128], strides = [1, 1, 1, 1]} : vector<4x6x6x128xf32> to vector<2x4x4x128xf32>
    %c0_4 = arith.constant 0 : index
    %c0_5 = arith.constant 0 : index
    %5 = vector.load %arg3[%c0_4, %c0_5] : memref<27x128xf32, #tpu.memory_space<vmem>>, vector<1x128xf32>
    %6 = vector.shape_cast %5 : vector<1x128xf32> to vector<128xf32>
    %7 = vector.shape_cast %6 : vector<128xf32> to vector<1x1x1x128xf32>
    %8 = vector.broadcast %7 : vector<1x1x1x128xf32> to vector<2x4x4x128xf32>
    %9 = arith.mulf %4, %8 : vector<2x4x4x128xf32>
    %10 = arith.addf %3, %9 : vector<2x4x4x128xf32>
    %11 = vector.extract_strided_slice %2 {offsets = [0, 0, 1, 0], sizes = [2, 4, 4, 128], strides = [1, 1, 1, 1]} : vector<4x6x6x128xf32> to vector<2x4x4x128xf32>
    %c1 = arith.constant 1 : index
    %c0_6 = arith.constant 0 : index
    %12 = vector.load %arg3[%c1, %c0_6] : memref<27x128xf32, #tpu.memory_space<vmem>>, vector<1x128xf32>
    %13 = vector.shape_cast %12 : vector<1x128xf32> to vector<128xf32>
    %14 = vector.shape_cast %13 : vector<128xf32> to vector<1x1x1x128xf32>
    %15 = vector.broadcast %14 : vector<1x1x1x128xf32> to vector<2x4x4x128xf32>
    %16 = arith.mulf %11, %15 : vector<2x4x4x128xf32>
    %17 = arith.addf %10, %16 : vector<2x4x4x128xf32>
    %18 = vector.extract_strided_slice %2 {offsets = [0, 0, 2, 0], sizes = [2, 4, 4, 128], strides = [1, 1, 1, 1]} : vector<4x6x6x128xf32> to vector<2x4x4x128xf32>
    %c2 = arith.constant 2 : index
    %c0_7 = arith.constant 0 : index
    %19 = vector.load %arg3[%c2, %c0_7] : memref<27x128xf32, #tpu.memory_space<vmem>>, vector<1x128xf32>
    %20 = vector.shape_cast %19 : vector<1x128xf32> to vector<128xf32>
    %21 = vector.shape_cast %20 : vector<128xf32> to vector<1x1x1x128xf32>
    %22 = vector.broadcast %21 : vector<1x1x1x128xf32> to vector<2x4x4x128xf32>
    %23 = arith.mulf %18, %22 : vector<2x4x4x128xf32>
    %24 = arith.addf %17, %23 : vector<2x4x4x128xf32>
    %25 = vector.extract_strided_slice %2 {offsets = [0, 1, 0, 0], sizes = [2, 4, 4, 128], strides = [1, 1, 1, 1]} : vector<4x6x6x128xf32> to vector<2x4x4x128xf32>
    %c3 = arith.constant 3 : index
    %c0_8 = arith.constant 0 : index
    %26 = vector.load %arg3[%c3, %c0_8] : memref<27x128xf32, #tpu.memory_space<vmem>>, vector<1x128xf32>
    %27 = vector.shape_cast %26 : vector<1x128xf32> to vector<128xf32>
    %28 = vector.shape_cast %27 : vector<128xf32> to vector<1x1x1x128xf32>
    %29 = vector.broadcast %28 : vector<1x1x1x128xf32> to vector<2x4x4x128xf32>
    %30 = arith.mulf %25, %29 : vector<2x4x4x128xf32>
    %31 = arith.addf %24, %30 : vector<2x4x4x128xf32>
    %32 = vector.extract_strided_slice %2 {offsets = [0, 1, 1, 0], sizes = [2, 4, 4, 128], strides = [1, 1, 1, 1]} : vector<4x6x6x128xf32> to vector<2x4x4x128xf32>
    %c4 = arith.constant 4 : index
    %c0_9 = arith.constant 0 : index
    %33 = vector.load %arg3[%c4, %c0_9] : memref<27x128xf32, #tpu.memory_space<vmem>>, vector<1x128xf32>
    %34 = vector.shape_cast %33 : vector<1x128xf32> to vector<128xf32>
    %35 = vector.shape_cast %34 : vector<128xf32> to vector<1x1x1x128xf32>
    %36 = vector.broadcast %35 : vector<1x1x1x128xf32> to vector<2x4x4x128xf32>
    %37 = arith.mulf %32, %36 : vector<2x4x4x128xf32>
    %38 = arith.addf %31, %37 : vector<2x4x4x128xf32>
    %39 = vector.extract_strided_slice %2 {offsets = [0, 1, 2, 0], sizes = [2, 4, 4, 128], strides = [1, 1, 1, 1]} : vector<4x6x6x128xf32> to vector<2x4x4x128xf32>
    %c5 = arith.constant 5 : index
    %c0_10 = arith.constant 0 : index
    %40 = vector.load %arg3[%c5, %c0_10] : memref<27x128xf32, #tpu.memory_space<vmem>>, vector<1x128xf32>
    %41 = vector.shape_cast %40 : vector<1x128xf32> to vector<128xf32>
    %42 = vector.shape_cast %41 : vector<128xf32> to vector<1x1x1x128xf32>
    %43 = vector.broadcast %42 : vector<1x1x1x128xf32> to vector<2x4x4x128xf32>
    %44 = arith.mulf %39, %43 : vector<2x4x4x128xf32>
    %45 = arith.addf %38, %44 : vector<2x4x4x128xf32>
    %46 = vector.extract_strided_slice %2 {offsets = [0, 2, 0, 0], sizes = [2, 4, 4, 128], strides = [1, 1, 1, 1]} : vector<4x6x6x128xf32> to vector<2x4x4x128xf32>
    %c6 = arith.constant 6 : index
    %c0_11 = arith.constant 0 : index
    %47 = vector.load %arg3[%c6, %c0_11] : memref<27x128xf32, #tpu.memory_space<vmem>>, vector<1x128xf32>
    %48 = vector.shape_cast %47 : vector<1x128xf32> to vector<128xf32>
    %49 = vector.shape_cast %48 : vector<128xf32> to vector<1x1x1x128xf32>
    %50 = vector.broadcast %49 : vector<1x1x1x128xf32> to vector<2x4x4x128xf32>
    %51 = arith.mulf %46, %50 : vector<2x4x4x128xf32>
    %52 = arith.addf %45, %51 : vector<2x4x4x128xf32>
    %53 = vector.extract_strided_slice %2 {offsets = [0, 2, 1, 0], sizes = [2, 4, 4, 128], strides = [1, 1, 1, 1]} : vector<4x6x6x128xf32> to vector<2x4x4x128xf32>
    %c7 = arith.constant 7 : index
    %c0_12 = arith.constant 0 : index
    %54 = vector.load %arg3[%c7, %c0_12] : memref<27x128xf32, #tpu.memory_space<vmem>>, vector<1x128xf32>
    %55 = vector.shape_cast %54 : vector<1x128xf32> to vector<128xf32>
    %56 = vector.shape_cast %55 : vector<128xf32> to vector<1x1x1x128xf32>
    %57 = vector.broadcast %56 : vector<1x1x1x128xf32> to vector<2x4x4x128xf32>
    %58 = arith.mulf %53, %57 : vector<2x4x4x128xf32>
    %59 = arith.addf %52, %58 : vector<2x4x4x128xf32>
    %60 = vector.extract_strided_slice %2 {offsets = [0, 2, 2, 0], sizes = [2, 4, 4, 128], strides = [1, 1, 1, 1]} : vector<4x6x6x128xf32> to vector<2x4x4x128xf32>
    %c8 = arith.constant 8 : index
    %c0_13 = arith.constant 0 : index
    %61 = vector.load %arg3[%c8, %c0_13] : memref<27x128xf32, #tpu.memory_space<vmem>>, vector<1x128xf32>
    %62 = vector.shape_cast %61 : vector<1x128xf32> to vector<128xf32>
    %63 = vector.shape_cast %62 : vector<128xf32> to vector<1x1x1x128xf32>
    %64 = vector.broadcast %63 : vector<1x1x1x128xf32> to vector<2x4x4x128xf32>
    %65 = arith.mulf %60, %64 : vector<2x4x4x128xf32>
    %66 = arith.addf %59, %65 : vector<2x4x4x128xf32>
    %67 = vector.extract_strided_slice %2 {offsets = [1, 0, 0, 0], sizes = [2, 4, 4, 128], strides = [1, 1, 1, 1]} : vector<4x6x6x128xf32> to vector<2x4x4x128xf32>
    %c9 = arith.constant 9 : index
    %c0_14 = arith.constant 0 : index
    %68 = vector.load %arg3[%c9, %c0_14] : memref<27x128xf32, #tpu.memory_space<vmem>>, vector<1x128xf32>
    %69 = vector.shape_cast %68 : vector<1x128xf32> to vector<128xf32>
    %70 = vector.shape_cast %69 : vector<128xf32> to vector<1x1x1x128xf32>
    %71 = vector.broadcast %70 : vector<1x1x1x128xf32> to vector<2x4x4x128xf32>
    %72 = arith.mulf %67, %71 : vector<2x4x4x128xf32>
    %73 = arith.addf %66, %72 : vector<2x4x4x128xf32>
    %74 = vector.extract_strided_slice %2 {offsets = [1, 0, 1, 0], sizes = [2, 4, 4, 128], strides = [1, 1, 1, 1]} : vector<4x6x6x128xf32> to vector<2x4x4x128xf32>
    %c10 = arith.constant 10 : index
    %c0_15 = arith.constant 0 : index
    %75 = vector.load %arg3[%c10, %c0_15] : memref<27x128xf32, #tpu.memory_space<vmem>>, vector<1x128xf32>
    %76 = vector.shape_cast %75 : vector<1x128xf32> to vector<128xf32>
    %77 = vector.shape_cast %76 : vector<128xf32> to vector<1x1x1x128xf32>
    %78 = vector.broadcast %77 : vector<1x1x1x128xf32> to vector<2x4x4x128xf32>
    %79 = arith.mulf %74, %78 : vector<2x4x4x128xf32>
    %80 = arith.addf %73, %79 : vector<2x4x4x128xf32>
    %81 = vector.extract_strided_slice %2 {offsets = [1, 0, 2, 0], sizes = [2, 4, 4, 128], strides = [1, 1, 1, 1]} : vector<4x6x6x128xf32> to vector<2x4x4x128xf32>
    %c11 = arith.constant 11 : index
    %c0_16 = arith.constant 0 : index
    %82 = vector.load %arg3[%c11, %c0_16] : memref<27x128xf32, #tpu.memory_space<vmem>>, vector<1x128xf32>
    %83 = vector.shape_cast %82 : vector<1x128xf32> to vector<128xf32>
    %84 = vector.shape_cast %83 : vector<128xf32> to vector<1x1x1x128xf32>
    %85 = vector.broadcast %84 : vector<1x1x1x128xf32> to vector<2x4x4x128xf32>
    %86 = arith.mulf %81, %85 : vector<2x4x4x128xf32>
    %87 = arith.addf %80, %86 : vector<2x4x4x128xf32>
    %88 = vector.extract_strided_slice %2 {offsets = [1, 1, 0, 0], sizes = [2, 4, 4, 128], strides = [1, 1, 1, 1]} : vector<4x6x6x128xf32> to vector<2x4x4x128xf32>
    %c12 = arith.constant 12 : index
    %c0_17 = arith.constant 0 : index
    %89 = vector.load %arg3[%c12, %c0_17] : memref<27x128xf32, #tpu.memory_space<vmem>>, vector<1x128xf32>
    %90 = vector.shape_cast %89 : vector<1x128xf32> to vector<128xf32>
    %91 = vector.shape_cast %90 : vector<128xf32> to vector<1x1x1x128xf32>
    %92 = vector.broadcast %91 : vector<1x1x1x128xf32> to vector<2x4x4x128xf32>
    %93 = arith.mulf %88, %92 : vector<2x4x4x128xf32>
    %94 = arith.addf %87, %93 : vector<2x4x4x128xf32>
    %95 = vector.extract_strided_slice %2 {offsets = [1, 1, 1, 0], sizes = [2, 4, 4, 128], strides = [1, 1, 1, 1]} : vector<4x6x6x128xf32> to vector<2x4x4x128xf32>
    %c13 = arith.constant 13 : index
    %c0_18 = arith.constant 0 : index
    %96 = vector.load %arg3[%c13, %c0_18] : memref<27x128xf32, #tpu.memory_space<vmem>>, vector<1x128xf32>
    %97 = vector.shape_cast %96 : vector<1x128xf32> to vector<128xf32>
    %98 = vector.shape_cast %97 : vector<128xf32> to vector<1x1x1x128xf32>
    %99 = vector.broadcast %98 : vector<1x1x1x128xf32> to vector<2x4x4x128xf32>
    %100 = arith.mulf %95, %99 : vector<2x4x4x128xf32>
    %101 = arith.addf %94, %100 : vector<2x4x4x128xf32>
    %102 = vector.extract_strided_slice %2 {offsets = [1, 1, 2, 0], sizes = [2, 4, 4, 128], strides = [1, 1, 1, 1]} : vector<4x6x6x128xf32> to vector<2x4x4x128xf32>
    %c14 = arith.constant 14 : index
    %c0_19 = arith.constant 0 : index
    %103 = vector.load %arg3[%c14, %c0_19] : memref<27x128xf32, #tpu.memory_space<vmem>>, vector<1x128xf32>
    %104 = vector.shape_cast %103 : vector<1x128xf32> to vector<128xf32>
    %105 = vector.shape_cast %104 : vector<128xf32> to vector<1x1x1x128xf32>
    %106 = vector.broadcast %105 : vector<1x1x1x128xf32> to vector<2x4x4x128xf32>
    %107 = arith.mulf %102, %106 : vector<2x4x4x128xf32>
    %108 = arith.addf %101, %107 : vector<2x4x4x128xf32>
    %109 = vector.extract_strided_slice %2 {offsets = [1, 2, 0, 0], sizes = [2, 4, 4, 128], strides = [1, 1, 1, 1]} : vector<4x6x6x128xf32> to vector<2x4x4x128xf32>
    %c15 = arith.constant 15 : index
    %c0_20 = arith.constant 0 : index
    %110 = vector.load %arg3[%c15, %c0_20] : memref<27x128xf32, #tpu.memory_space<vmem>>, vector<1x128xf32>
    %111 = vector.shape_cast %110 : vector<1x128xf32> to vector<128xf32>
    %112 = vector.shape_cast %111 : vector<128xf32> to vector<1x1x1x128xf32>
    %113 = vector.broadcast %112 : vector<1x1x1x128xf32> to vector<2x4x4x128xf32>
    %114 = arith.mulf %109, %113 : vector<2x4x4x128xf32>
    %115 = arith.addf %108, %114 : vector<2x4x4x128xf32>
    %116 = vector.extract_strided_slice %2 {offsets = [1, 2, 1, 0], sizes = [2, 4, 4, 128], strides = [1, 1, 1, 1]} : vector<4x6x6x128xf32> to vector<2x4x4x128xf32>
    %c16 = arith.constant 16 : index
    %c0_21 = arith.constant 0 : index
    %117 = vector.load %arg3[%c16, %c0_21] : memref<27x128xf32, #tpu.memory_space<vmem>>, vector<1x128xf32>
    %118 = vector.shape_cast %117 : vector<1x128xf32> to vector<128xf32>
    %119 = vector.shape_cast %118 : vector<128xf32> to vector<1x1x1x128xf32>
    %120 = vector.broadcast %119 : vector<1x1x1x128xf32> to vector<2x4x4x128xf32>
    %121 = arith.mulf %116, %120 : vector<2x4x4x128xf32>
    %122 = arith.addf %115, %121 : vector<2x4x4x128xf32>
    %123 = vector.extract_strided_slice %2 {offsets = [1, 2, 2, 0], sizes = [2, 4, 4, 128], strides = [1, 1, 1, 1]} : vector<4x6x6x128xf32> to vector<2x4x4x128xf32>
    %c17 = arith.constant 17 : index
    %c0_22 = arith.constant 0 : index
    %124 = vector.load %arg3[%c17, %c0_22] : memref<27x128xf32, #tpu.memory_space<vmem>>, vector<1x128xf32>
    %125 = vector.shape_cast %124 : vector<1x128xf32> to vector<128xf32>
    %126 = vector.shape_cast %125 : vector<128xf32> to vector<1x1x1x128xf32>
    %127 = vector.broadcast %126 : vector<1x1x1x128xf32> to vector<2x4x4x128xf32>
    %128 = arith.mulf %123, %127 : vector<2x4x4x128xf32>
    %129 = arith.addf %122, %128 : vector<2x4x4x128xf32>
    %130 = vector.extract_strided_slice %2 {offsets = [2, 0, 0, 0], sizes = [2, 4, 4, 128], strides = [1, 1, 1, 1]} : vector<4x6x6x128xf32> to vector<2x4x4x128xf32>
    %c18 = arith.constant 18 : index
    %c0_23 = arith.constant 0 : index
    %131 = vector.load %arg3[%c18, %c0_23] : memref<27x128xf32, #tpu.memory_space<vmem>>, vector<1x128xf32>
    %132 = vector.shape_cast %131 : vector<1x128xf32> to vector<128xf32>
    %133 = vector.shape_cast %132 : vector<128xf32> to vector<1x1x1x128xf32>
    %134 = vector.broadcast %133 : vector<1x1x1x128xf32> to vector<2x4x4x128xf32>
    %135 = arith.mulf %130, %134 : vector<2x4x4x128xf32>
    %136 = arith.addf %129, %135 : vector<2x4x4x128xf32>
    %137 = vector.extract_strided_slice %2 {offsets = [2, 0, 1, 0], sizes = [2, 4, 4, 128], strides = [1, 1, 1, 1]} : vector<4x6x6x128xf32> to vector<2x4x4x128xf32>
    %c19 = arith.constant 19 : index
    %c0_24 = arith.constant 0 : index
    %138 = vector.load %arg3[%c19, %c0_24] : memref<27x128xf32, #tpu.memory_space<vmem>>, vector<1x128xf32>
    %139 = vector.shape_cast %138 : vector<1x128xf32> to vector<128xf32>
    %140 = vector.shape_cast %139 : vector<128xf32> to vector<1x1x1x128xf32>
    %141 = vector.broadcast %140 : vector<1x1x1x128xf32> to vector<2x4x4x128xf32>
    %142 = arith.mulf %137, %141 : vector<2x4x4x128xf32>
    %143 = arith.addf %136, %142 : vector<2x4x4x128xf32>
    %144 = vector.extract_strided_slice %2 {offsets = [2, 0, 2, 0], sizes = [2, 4, 4, 128], strides = [1, 1, 1, 1]} : vector<4x6x6x128xf32> to vector<2x4x4x128xf32>
    %c20 = arith.constant 20 : index
    %c0_25 = arith.constant 0 : index
    %145 = vector.load %arg3[%c20, %c0_25] : memref<27x128xf32, #tpu.memory_space<vmem>>, vector<1x128xf32>
    %146 = vector.shape_cast %145 : vector<1x128xf32> to vector<128xf32>
    %147 = vector.shape_cast %146 : vector<128xf32> to vector<1x1x1x128xf32>
    %148 = vector.broadcast %147 : vector<1x1x1x128xf32> to vector<2x4x4x128xf32>
    %149 = arith.mulf %144, %148 : vector<2x4x4x128xf32>
    %150 = arith.addf %143, %149 : vector<2x4x4x128xf32>
    %151 = vector.extract_strided_slice %2 {offsets = [2, 1, 0, 0], sizes = [2, 4, 4, 128], strides = [1, 1, 1, 1]} : vector<4x6x6x128xf32> to vector<2x4x4x128xf32>
    %c21 = arith.constant 21 : index
    %c0_26 = arith.constant 0 : index
    %152 = vector.load %arg3[%c21, %c0_26] : memref<27x128xf32, #tpu.memory_space<vmem>>, vector<1x128xf32>
    %153 = vector.shape_cast %152 : vector<1x128xf32> to vector<128xf32>
    %154 = vector.shape_cast %153 : vector<128xf32> to vector<1x1x1x128xf32>
    %155 = vector.broadcast %154 : vector<1x1x1x128xf32> to vector<2x4x4x128xf32>
    %156 = arith.mulf %151, %155 : vector<2x4x4x128xf32>
    %157 = arith.addf %150, %156 : vector<2x4x4x128xf32>
    %158 = vector.extract_strided_slice %2 {offsets = [2, 1, 1, 0], sizes = [2, 4, 4, 128], strides = [1, 1, 1, 1]} : vector<4x6x6x128xf32> to vector<2x4x4x128xf32>
    %c22 = arith.constant 22 : index
    %c0_27 = arith.constant 0 : index
    %159 = vector.load %arg3[%c22, %c0_27] : memref<27x128xf32, #tpu.memory_space<vmem>>, vector<1x128xf32>
    %160 = vector.shape_cast %159 : vector<1x128xf32> to vector<128xf32>
    %161 = vector.shape_cast %160 : vector<128xf32> to vector<1x1x1x128xf32>
    %162 = vector.broadcast %161 : vector<1x1x1x128xf32> to vector<2x4x4x128xf32>
    %163 = arith.mulf %158, %162 : vector<2x4x4x128xf32>
    %164 = arith.addf %157, %163 : vector<2x4x4x128xf32>
    %165 = vector.extract_strided_slice %2 {offsets = [2, 1, 2, 0], sizes = [2, 4, 4, 128], strides = [1, 1, 1, 1]} : vector<4x6x6x128xf32> to vector<2x4x4x128xf32>
    %c23 = arith.constant 23 : index
    %c0_28 = arith.constant 0 : index
    %166 = vector.load %arg3[%c23, %c0_28] : memref<27x128xf32, #tpu.memory_space<vmem>>, vector<1x128xf32>
    %167 = vector.shape_cast %166 : vector<1x128xf32> to vector<128xf32>
    %168 = vector.shape_cast %167 : vector<128xf32> to vector<1x1x1x128xf32>
    %169 = vector.broadcast %168 : vector<1x1x1x128xf32> to vector<2x4x4x128xf32>
    %170 = arith.mulf %165, %169 : vector<2x4x4x128xf32>
    %171 = arith.addf %164, %170 : vector<2x4x4x128xf32>
    %172 = vector.extract_strided_slice %2 {offsets = [2, 2, 0, 0], sizes = [2, 4, 4, 128], strides = [1, 1, 1, 1]} : vector<4x6x6x128xf32> to vector<2x4x4x128xf32>
    %c24 = arith.constant 24 : index
    %c0_29 = arith.constant 0 : index
    %173 = vector.load %arg3[%c24, %c0_29] : memref<27x128xf32, #tpu.memory_space<vmem>>, vector<1x128xf32>
    %174 = vector.shape_cast %173 : vector<1x128xf32> to vector<128xf32>
    %175 = vector.shape_cast %174 : vector<128xf32> to vector<1x1x1x128xf32>
    %176 = vector.broadcast %175 : vector<1x1x1x128xf32> to vector<2x4x4x128xf32>
    %177 = arith.mulf %172, %176 : vector<2x4x4x128xf32>
    %178 = arith.addf %171, %177 : vector<2x4x4x128xf32>
    %179 = vector.extract_strided_slice %2 {offsets = [2, 2, 1, 0], sizes = [2, 4, 4, 128], strides = [1, 1, 1, 1]} : vector<4x6x6x128xf32> to vector<2x4x4x128xf32>
    %c25 = arith.constant 25 : index
    %c0_30 = arith.constant 0 : index
    %180 = vector.load %arg3[%c25, %c0_30] : memref<27x128xf32, #tpu.memory_space<vmem>>, vector<1x128xf32>
    %181 = vector.shape_cast %180 : vector<1x128xf32> to vector<128xf32>
    %182 = vector.shape_cast %181 : vector<128xf32> to vector<1x1x1x128xf32>
    %183 = vector.broadcast %182 : vector<1x1x1x128xf32> to vector<2x4x4x128xf32>
    %184 = arith.mulf %179, %183 : vector<2x4x4x128xf32>
    %185 = arith.addf %178, %184 : vector<2x4x4x128xf32>
    %186 = vector.extract_strided_slice %2 {offsets = [2, 2, 2, 0], sizes = [2, 4, 4, 128], strides = [1, 1, 1, 1]} : vector<4x6x6x128xf32> to vector<2x4x4x128xf32>
    %c26 = arith.constant 26 : index
    %c0_31 = arith.constant 0 : index
    %187 = vector.load %arg3[%c26, %c0_31] : memref<27x128xf32, #tpu.memory_space<vmem>>, vector<1x128xf32>
    %188 = vector.shape_cast %187 : vector<1x128xf32> to vector<128xf32>
    %189 = vector.shape_cast %188 : vector<128xf32> to vector<1x1x1x128xf32>
    %190 = vector.broadcast %189 : vector<1x1x1x128xf32> to vector<2x4x4x128xf32>
    %191 = arith.mulf %186, %190 : vector<2x4x4x128xf32>
    %192 = arith.addf %185, %191 : vector<2x4x4x128xf32>
    %c0_32 = arith.constant 0 : index
    %c0_33 = arith.constant 0 : index
    %193 = vector.load %arg4[%c0_32, %c0_33] : memref<1x128xf32, #tpu.memory_space<vmem>>, vector<1x128xf32>
    %194 = vector.shape_cast %193 : vector<1x128xf32> to vector<128xf32>
    %195 = vector.shape_cast %194 : vector<128xf32> to vector<1x1x1x128xf32>
    %196 = vector.broadcast %195 : vector<1x1x1x128xf32> to vector<2x4x4x128xf32>
    %197 = arith.addf %192, %196 : vector<2x4x4x128xf32>
    %cst_34 = arith.constant 5.000000e-01 : f32
    %198 = vector.broadcast %cst_34 : f32 to vector<2x4x4x128xf32>
    %199 = arith.mulf %198, %197 : vector<2x4x4x128xf32>
    %cst_35 = arith.constant 0.707106769 : f32
    %200 = vector.broadcast %cst_35 : f32 to vector<2x4x4x128xf32>
    %201 = arith.mulf %197, %200 : vector<2x4x4x128xf32>
    %202 = math.absf %201 : vector<2x4x4x128xf32>
    %cst_36 = arith.constant 0.327591091 : f32
    %203 = vector.broadcast %cst_36 : f32 to vector<2x4x4x128xf32>
    %204 = arith.mulf %203, %202 : vector<2x4x4x128xf32>
    %cst_37 = arith.constant 1.000000e+00 : f32
    %205 = vector.broadcast %cst_37 : f32 to vector<2x4x4x128xf32>
    %206 = arith.addf %205, %204 : vector<2x4x4x128xf32>
    %cst_38 = arith.constant 1.000000e+00 : f32
    %207 = vector.broadcast %cst_38 : f32 to vector<2x4x4x128xf32>
    %208 = arith.divf %207, %206 : vector<2x4x4x128xf32>
    %cst_39 = arith.constant 1.06140542 : f32
    %209 = vector.broadcast %cst_39 : f32 to vector<2x4x4x128xf32>
    %210 = arith.mulf %209, %208 : vector<2x4x4x128xf32>
    %cst_40 = arith.constant -1.45315206 : f32
    %211 = vector.broadcast %cst_40 : f32 to vector<2x4x4x128xf32>
    %212 = arith.addf %210, %211 : vector<2x4x4x128xf32>
    %213 = arith.mulf %212, %208 : vector<2x4x4x128xf32>
    %cst_41 = arith.constant 1.42141378 : f32
    %214 = vector.broadcast %cst_41 : f32 to vector<2x4x4x128xf32>
    %215 = arith.addf %213, %214 : vector<2x4x4x128xf32>
    %216 = arith.mulf %215, %208 : vector<2x4x4x128xf32>
    %cst_42 = arith.constant -0.284496725 : f32
    %217 = vector.broadcast %cst_42 : f32 to vector<2x4x4x128xf32>
    %218 = arith.addf %216, %217 : vector<2x4x4x128xf32>
    %219 = arith.mulf %218, %208 : vector<2x4x4x128xf32>
    %cst_43 = arith.constant 0.254829586 : f32
    %220 = vector.broadcast %cst_43 : f32 to vector<2x4x4x128xf32>
    %221 = arith.addf %219, %220 : vector<2x4x4x128xf32>
    %222 = arith.mulf %221, %208 : vector<2x4x4x128xf32>
    %cst_44 = arith.constant 0.000000e+00 : f32
    %223 = vector.broadcast %cst_44 : f32 to vector<2x4x4x128xf32>
    %224 = arith.subf %223, %202 : vector<2x4x4x128xf32>
    %225 = arith.mulf %224, %202 : vector<2x4x4x128xf32>
    %226 = math.exp %225 : vector<2x4x4x128xf32>
    %227 = arith.mulf %222, %226 : vector<2x4x4x128xf32>
    %cst_45 = arith.constant 1.000000e+00 : f32
    %228 = vector.broadcast %cst_45 : f32 to vector<2x4x4x128xf32>
    %229 = arith.subf %228, %227 : vector<2x4x4x128xf32>
    %cst_46 = arith.constant 0.000000e+00 : f32
    %230 = vector.broadcast %cst_46 : f32 to vector<2x4x4x128xf32>
    %231 = arith.cmpf oge, %201, %230 : vector<2x4x4x128xf32>
    %cst_47 = arith.constant 0.000000e+00 : f32
    %232 = vector.broadcast %cst_47 : f32 to vector<2x4x4x128xf32>
    %233 = arith.subf %232, %229 : vector<2x4x4x128xf32>
    %234 = arith.select %231, %229, %233 : vector<2x4x4x128xi1>, vector<2x4x4x128xf32>
    %cst_48 = arith.constant 1.000000e+00 : f32
    %235 = vector.broadcast %cst_48 : f32 to vector<2x4x4x128xf32>
    %236 = arith.addf %235, %234 : vector<2x4x4x128xf32>
    %237 = arith.mulf %199, %236 : vector<2x4x4x128xf32>
    %238 = arith.truncf %237 : vector<2x4x4x128xf32> to vector<2x4x4x128xbf16>
    %c0_49 = arith.constant 0 : index
    %c0_50 = arith.constant 0 : index
    %c0_51 = arith.constant 0 : index
    %c0_52 = arith.constant 0 : index
    %c0_53 = arith.constant 0 : index
    %239 = vector.load %arg5[%c0_49, %c0_50, %c0_51, %c0_52, %c0_53] : memref<1x2x4x4x128xbf16, #tpu.memory_space<vmem>>, vector<1x2x4x4x128xbf16>
    %240 = vector.shape_cast %239 : vector<1x2x4x4x128xbf16> to vector<2x4x4x128xbf16>
    %241 = vector.shape_cast %238 : vector<2x4x4x128xbf16> to vector<1x2x4x4x128xbf16>
    tpu.vector_store %arg5[%c0_49, %c0_50, %c0_51, %c0_52, %c0_53], %241 {strides = array<i32>} : memref<1x2x4x4x128xbf16, #tpu.memory_space<vmem>>, vector<1x2x4x4x128xbf16>,
    return
  }
  func.func @transform_0(%arg0: i32, %arg1: i32) -> (i32, i32, i32, i32, i32) {
    %c0_i32 = arith.constant 0 : i32
    %c0_i32_0 = arith.constant 0 : i32
    %c0_i32_1 = arith.constant 0 : i32
    %c0_i32_2 = arith.constant 0 : i32
    return %arg0, %c0_i32, %c0_i32_0, %c0_i32_1, %arg1 : i32, i32, i32, i32, i32
  }
  func.func @transform_1(%arg0: i32, %arg1: i32) -> (i32, i32) {
    %c0_i32 = arith.constant 0 : i32
    %c0_i32_0 = arith.constant 0 : i32
    return %c0_i32, %arg1 : i32, i32
  }
  func.func @transform_2(%arg0: i32, %arg1: i32) -> (i32, i32) {
    %c0_i32 = arith.constant 0 : i32
    %c0_i32_0 = arith.constant 0 : i32
    return %c0_i32, %arg1 : i32, i32
  }
  func.func @transform_3(%arg0: i32, %arg1: i32) -> (i32, i32, i32, i32, i32) {
    %c0_i32 = arith.constant 0 : i32
    %c0_i32_0 = arith.constant 0 : i32
    %c0_i32_1 = arith.constant 0 : i32
    %c0_i32_2 = arith.constant 0 : i32
    return %arg0, %c0_i32, %c0_i32_0, %c0_i32_1, %arg1 : i32, i32, i32, i32, i32
  }
}

module attributes {stable_mosaic.version = 11 : i64} {
  func.func @kernel(%arg0: i32, %arg1: memref<64x512xbf16, #tpu.memory_space<vmem>>, %arg2: memref<512x160xbf16, #tpu.memory_space<vmem>>, %arg3: memref<1x160xf32, #tpu.memory_space<vmem>>, %arg4: memref<64x160xf32, #tpu.memory_space<vmem>>, %arg5: memref<64x160xf32, #tpu.memory_space<vmem>>) attributes {dimension_semantics = [#tpu.dimension_semantics<parallel>], iteration_bounds = array<i64: 1>, scalar_prefetch = 0 : i64, scratch_operands = 0 : i64, tpu.core_type = #tpu.core_type<tc>, window_params = [{transform_indices = @transform_0, window_bounds = array<i64: 64, 512>}, {pipeline_mode = #tpu.pipeline_mode<synchronous>, transform_indices = @transform_1, window_bounds = array<i64: 512, 160>}, {pipeline_mode = #tpu.pipeline_mode<synchronous>, transform_indices = @transform_2, window_bounds = array<i64: 1, 160>}, {transform_indices = @transform_3, window_bounds = array<i64: 64, 160>}, {transform_indices = @transform_4, window_bounds = array<i64: 64, 160>}]} {
    %c0 = arith.constant 0 : index
    %c0_0 = arith.constant 0 : index
    %0 = vector.load %arg1[%c0, %c0_0] : memref<64x512xbf16, #tpu.memory_space<vmem>>, vector<64x512xbf16>
    %c0_1 = arith.constant 0 : index
    %c0_2 = arith.constant 0 : index
    %1 = vector.load %arg2[%c0_1, %c0_2] : memref<512x160xbf16, #tpu.memory_space<vmem>>, vector<512x160xbf16>
    %cst = arith.constant dense<0.000000e+00> : vector<64x160xf32>
    %2 = tpu.matmul %0, %1, %cst {dimension_numbers = #tpu.dot_dimension_numbers<[1], [0], [0], [1], [0, 0, 1, 1], [], []>} : vector<64x512xbf16>, vector<512x160xbf16>, vector<64x160xf32> -> vector<64x160xf32>
    %c0_3 = arith.constant 0 : index
    %c0_4 = arith.constant 0 : index
    %3 = vector.load %arg3[%c0_3, %c0_4] : memref<1x160xf32, #tpu.memory_space<vmem>>, vector<1x160xf32>
    %4 = vector.shape_cast %3 : vector<1x160xf32> to vector<160xf32>
    %5 = vector.shape_cast %4 : vector<160xf32> to vector<1x160xf32>
    %6 = vector.broadcast %5 : vector<1x160xf32> to vector<64x160xf32>
    %7 = arith.addf %2, %6 : vector<64x160xf32>
    %c0_5 = arith.constant 0 : index
    %c0_6 = arith.constant 0 : index
    %8 = vector.load %arg4[%c0_5, %c0_6] : memref<64x160xf32, #tpu.memory_space<vmem>>, vector<64x160xf32>
    %9 = arith.addf %7, %8 : vector<64x160xf32>
    %c0_7 = arith.constant 0 : index
    %c0_8 = arith.constant 0 : index
    %10 = vector.load %arg5[%c0_7, %c0_8] : memref<64x160xf32, #tpu.memory_space<vmem>>, vector<64x160xf32>
    tpu.vector_store %arg5[%c0_7, %c0_8], %9 {strides = array<i32>} : memref<64x160xf32, #tpu.memory_space<vmem>>, vector<64x160xf32>,
    return
  }
  func.func @transform_0(%arg0: i32) -> (i32, i32) {
    %c0_i32 = arith.constant 0 : i32
    %c0_i32_0 = arith.constant 0 : i32
    return %arg0, %c0_i32 : i32, i32
  }
  func.func @transform_1(%arg0: i32) -> (i32, i32) {
    %c0_i32 = arith.constant 0 : i32
    %c0_i32_0 = arith.constant 0 : i32
    %c0_i32_1 = arith.constant 0 : i32
    return %c0_i32, %c0_i32_0 : i32, i32
  }
  func.func @transform_2(%arg0: i32) -> (i32, i32) {
    %c0_i32 = arith.constant 0 : i32
    %c0_i32_0 = arith.constant 0 : i32
    %c0_i32_1 = arith.constant 0 : i32
    return %c0_i32, %c0_i32_0 : i32, i32
  }
  func.func @transform_3(%arg0: i32) -> (i32, i32) {
    %c0_i32 = arith.constant 0 : i32
    %c0_i32_0 = arith.constant 0 : i32
    return %arg0, %c0_i32 : i32, i32
  }
  func.func @transform_4(%arg0: i32) -> (i32, i32) {
    %c0_i32 = arith.constant 0 : i32
    %c0_i32_0 = arith.constant 0 : i32
    return %arg0, %c0_i32 : i32, i32
  }
}

module attributes {stable_mosaic.version = 11 : i64} {
  func.func @kernel(%arg0: i32, %arg1: memref<8x4xf32, #tpu.memory_space<vmem>>, %arg2: memref<4x80xbf16, #tpu.memory_space<vmem>>, %arg3: memref<1x80xf32, #tpu.memory_space<vmem>>, %arg4: memref<8x80xf32, #tpu.memory_space<vmem>>) attributes {dimension_semantics = [#tpu.dimension_semantics<parallel>], iteration_bounds = array<i64: 1>, scalar_prefetch = 0 : i64, scratch_operands = 0 : i64, tpu.core_type = #tpu.core_type<tc>, window_params = [{transform_indices = @transform_0, window_bounds = array<i64: 8, 4>}, {pipeline_mode = #tpu.pipeline_mode<synchronous>, transform_indices = @transform_1, window_bounds = array<i64: 4, 80>}, {pipeline_mode = #tpu.pipeline_mode<synchronous>, transform_indices = @transform_2, window_bounds = array<i64: 1, 80>}, {transform_indices = @transform_3, window_bounds = array<i64: 8, 80>}]} {
    %c0 = arith.constant 0 : index
    %c0_0 = arith.constant 0 : index
    %0 = vector.load %arg1[%c0, %c0_0] : memref<8x4xf32, #tpu.memory_space<vmem>>, vector<8x4xf32>
    %1 = arith.truncf %0 : vector<8x4xf32> to vector<8x4xbf16>
    %c0_1 = arith.constant 0 : index
    %c0_2 = arith.constant 0 : index
    %2 = vector.load %arg2[%c0_1, %c0_2] : memref<4x80xbf16, #tpu.memory_space<vmem>>, vector<4x80xbf16>
    %cst = arith.constant dense<0.000000e+00> : vector<8x80xf32>
    %3 = tpu.matmul %1, %2, %cst {dimension_numbers = #tpu.dot_dimension_numbers<[1], [0], [0], [1], [0, 0, 1, 1], [], []>} : vector<8x4xbf16>, vector<4x80xbf16>, vector<8x80xf32> -> vector<8x80xf32>
    %c0_3 = arith.constant 0 : index
    %c0_4 = arith.constant 0 : index
    %4 = vector.load %arg3[%c0_3, %c0_4] : memref<1x80xf32, #tpu.memory_space<vmem>>, vector<1x80xf32>
    %5 = vector.shape_cast %4 : vector<1x80xf32> to vector<80xf32>
    %6 = vector.shape_cast %5 : vector<80xf32> to vector<1x80xf32>
    %7 = vector.broadcast %6 : vector<1x80xf32> to vector<8x80xf32>
    %8 = arith.addf %3, %7 : vector<8x80xf32>
    %9 = math.tanh %8 : vector<8x80xf32>
    %c0_5 = arith.constant 0 : index
    %c0_6 = arith.constant 0 : index
    %10 = vector.load %arg4[%c0_5, %c0_6] : memref<8x80xf32, #tpu.memory_space<vmem>>, vector<8x80xf32>
    tpu.vector_store %arg4[%c0_5, %c0_6], %9 {strides = array<i32>} : memref<8x80xf32, #tpu.memory_space<vmem>>, vector<8x80xf32>,
    return
  }
  func.func @transform_0(%arg0: i32) -> (i32, i32) {
    %c0_i32 = arith.constant 0 : i32
    %c0_i32_0 = arith.constant 0 : i32
    return %arg0, %c0_i32 : i32, i32
  }
  func.func @transform_1(%arg0: i32) -> (i32, i32) {
    %c0_i32 = arith.constant 0 : i32
    %c0_i32_0 = arith.constant 0 : i32
    %c0_i32_1 = arith.constant 0 : i32
    return %c0_i32, %c0_i32_0 : i32, i32
  }
  func.func @transform_2(%arg0: i32) -> (i32, i32) {
    %c0_i32 = arith.constant 0 : i32
    %c0_i32_0 = arith.constant 0 : i32
    %c0_i32_1 = arith.constant 0 : i32
    return %c0_i32, %c0_i32_0 : i32, i32
  }
  func.func @transform_3(%arg0: i32) -> (i32, i32) {
    %c0_i32 = arith.constant 0 : i32
    %c0_i32_0 = arith.constant 0 : i32
    return %arg0, %c0_i32 : i32, i32
  }
}

module attributes {stable_mosaic.version = 11 : i64} {
  func.func @kernel(%arg0: i32, %arg1: memref<8x80xf32, #tpu.memory_space<vmem>>, %arg2: memref<80x80xbf16, #tpu.memory_space<vmem>>, %arg3: memref<1x80xf32, #tpu.memory_space<vmem>>, %arg4: memref<8x80xf32, #tpu.memory_space<vmem>>) attributes {dimension_semantics = [#tpu.dimension_semantics<parallel>], iteration_bounds = array<i64: 1>, scalar_prefetch = 0 : i64, scratch_operands = 0 : i64, tpu.core_type = #tpu.core_type<tc>, window_params = [{transform_indices = @transform_0, window_bounds = array<i64: 8, 80>}, {pipeline_mode = #tpu.pipeline_mode<synchronous>, transform_indices = @transform_1, window_bounds = array<i64: 80, 80>}, {pipeline_mode = #tpu.pipeline_mode<synchronous>, transform_indices = @transform_2, window_bounds = array<i64: 1, 80>}, {transform_indices = @transform_3, window_bounds = array<i64: 8, 80>}]} {
    %c0 = arith.constant 0 : index
    %c0_0 = arith.constant 0 : index
    %0 = vector.load %arg1[%c0, %c0_0] : memref<8x80xf32, #tpu.memory_space<vmem>>, vector<8x80xf32>
    %1 = arith.truncf %0 : vector<8x80xf32> to vector<8x80xbf16>
    %c0_1 = arith.constant 0 : index
    %c0_2 = arith.constant 0 : index
    %2 = vector.load %arg2[%c0_1, %c0_2] : memref<80x80xbf16, #tpu.memory_space<vmem>>, vector<80x80xbf16>
    %cst = arith.constant dense<0.000000e+00> : vector<8x80xf32>
    %3 = tpu.matmul %1, %2, %cst {dimension_numbers = #tpu.dot_dimension_numbers<[1], [0], [0], [1], [0, 0, 1, 1], [], []>} : vector<8x80xbf16>, vector<80x80xbf16>, vector<8x80xf32> -> vector<8x80xf32>
    %c0_3 = arith.constant 0 : index
    %c0_4 = arith.constant 0 : index
    %4 = vector.load %arg3[%c0_3, %c0_4] : memref<1x80xf32, #tpu.memory_space<vmem>>, vector<1x80xf32>
    %5 = vector.shape_cast %4 : vector<1x80xf32> to vector<80xf32>
    %6 = vector.shape_cast %5 : vector<80xf32> to vector<1x80xf32>
    %7 = vector.broadcast %6 : vector<1x80xf32> to vector<8x80xf32>
    %8 = arith.addf %3, %7 : vector<8x80xf32>
    %9 = math.tanh %8 : vector<8x80xf32>
    %c0_5 = arith.constant 0 : index
    %c0_6 = arith.constant 0 : index
    %10 = vector.load %arg4[%c0_5, %c0_6] : memref<8x80xf32, #tpu.memory_space<vmem>>, vector<8x80xf32>
    tpu.vector_store %arg4[%c0_5, %c0_6], %9 {strides = array<i32>} : memref<8x80xf32, #tpu.memory_space<vmem>>, vector<8x80xf32>,
    return
  }
  func.func @transform_0(%arg0: i32) -> (i32, i32) {
    %c0_i32 = arith.constant 0 : i32
    %c0_i32_0 = arith.constant 0 : i32
    return %arg0, %c0_i32 : i32, i32
  }
  func.func @transform_1(%arg0: i32) -> (i32, i32) {
    %c0_i32 = arith.constant 0 : i32
    %c0_i32_0 = arith.constant 0 : i32
    %c0_i32_1 = arith.constant 0 : i32
    return %c0_i32, %c0_i32_0 : i32, i32
  }
  func.func @transform_2(%arg0: i32) -> (i32, i32) {
    %c0_i32 = arith.constant 0 : i32
    %c0_i32_0 = arith.constant 0 : i32
    %c0_i32_1 = arith.constant 0 : i32
    return %c0_i32, %c0_i32_0 : i32, i32
  }
  func.func @transform_3(%arg0: i32) -> (i32, i32) {
    %c0_i32 = arith.constant 0 : i32
    %c0_i32_0 = arith.constant 0 : i32
    return %arg0, %c0_i32 : i32, i32
  }
}

</mosaic_0001>

<bundles_post_ra>
// kernel: transformer_forward.25
= control target key start
LH: loop header
LB: loop body
LE: loop exit
PB: predicated region body
PF: predicated region fallthrough
CT: control target
= control target key end

     0   :  { %8 = vsyncpa [#allocation3], 0  ;;  %s286_s0 = inlined_call_operand.vmem [shape: f32[8,80], index: 0, kind: input, shape index: {}]   ;;  %s287_s1 = inlined_call_operand.hbm [shape: bf16[80,80], index: 1, kind: input, shape index: {}]   ;;  %s288_s2 = inlined_call_operand.hbm [shape: f32[1,80], index: 2, kind: input, shape index: {}]   ;;  %s289_s3 = inlined_call_operand.vmem [shape: f32[8,80], index: 3, kind: output, shape index: {}]  }
   0x1   :  { %9 = vsyncpa [#allocation5], 0  ;;  %s230_s12 = smov [#allocation2]   ;;  %s182_s16 = scalar_lea.hbm %s287_s1, 640 }
   0x2   :  { %s17_s13 = sshll.u32 %s230_s12, 4  ;;  %p183_p0 = scmp.ne.s32.totalorder %s287_s1, %s182_s16  ;;  %s18_s13 = int_to_ptr.vmem [resolvable:$true] %s17_s13 }
   0x3   :  { %p186_p1 = scmp.lt.u32.totalorder %s182_s16, %s287_s1 }
   0x5   :  { %p188_p2 = pnand %p186_p1, %p183_p0 }
   0x7   :  { %191 = shalt.err (!%p188_p2)
}
   0x8   :  { %s192_s21 = scalar_lea.vmem %s18_s13, 640  ;;  %p197_p4 = scmp.lt.s32.totalorder %s18_s13, %s18_s13 }
   0x9   :  { %p193_p3 = scmp.ne.s32.totalorder %s18_s13, %s192_s21  ;;  %p198_p5 = scmp.lt.s32.totalorder %s192_s21, %s192_s21 }
   0xb   :  { %p199_p6 = por %p198_p5, %p197_p4 }
   0xd   :  { %p200_p7 = pnand %p199_p6, %p193_p3 }
   0xf   :  { %203 = shalt.err (!%p200_p7)
}
  0x10   :  { %s231_s22 = smov 64   ;;  %s232_s23 = smov 4  }
  0x11   :  { %23 = dma.hbm_to_vmem [thread:$0]  %s287_s1, 640, %s18_s13, [#allocation3], %s231_s22, %s231_s22, %s232_s23  }
  0x12   :  { %s233_s26 = smov [#allocation4]   ;;  %s204_s30 = scalar_lea.hbm %s288_s2, 16 }
  0x13   :  { %s30_s27 = sshll.u32 %s233_s26, 4  ;;  %p205_p8 = scmp.ne.s32.totalorder %s288_s2, %s204_s30  ;;  %s31_s27 = int_to_ptr.vmem [resolvable:$true] %s30_s27 }
  0x14   :  { %p208_p9 = scmp.lt.u32.totalorder %s204_s30, %s288_s2 }
  0x16   :  { %p210_p10 = pnand %p208_p9, %p205_p8 }
  0x18   :  { %213 = shalt.err (!%p210_p10)
}
  0x19   :  { %s214_s8 = scalar_lea.vmem %s31_s27, 16  ;;  %s218_s1 = scalar_lea.vmem %s31_s27, 32 }
  0x1a   :  { %p215_p11 = scmp.ne.s32.totalorder %s31_s27, %s214_s8  ;;  %p219_p12 = scmp.lt.s32.totalorder %s31_s27, %s31_s27 }
  0x1b   :  { %p220_p13 = scmp.lt.s32.totalorder %s218_s1, %s214_s8 }
  0x1d   :  { %p221_p0 = por %p220_p13, %p219_p12 }
  0x1f   :  { %p222_p1 = pnand %p221_p0, %p215_p11 }
  0x21   :  { %225 = shalt.err (!%p222_p1)
}
  0x22   :  { %33 = dma.hbm_to_vmem [thread:$0]  %s288_s2, 16, %s31_s27, [#allocation5]  }
  0x23   :  { %226 = dma.done.wait [#allocation3], 640  }
  0x24   :  { %227 = vsyncadd [#allocation3], 4294966656 }
  0x25   :  { %228 = dma.done.wait [#allocation5], 16  }
  0x26   :  { %229 = vsyncadd [#allocation5], 4294967280  ;;  %v234_v0 = vmov 0.0   ;;  %vm235_vm0 = vmmov 0   ;;  %v175_v1 = vld [vmem:[#allocation2] sm:$0xff]   ;;  %v176_v2 = vld [vmem:[#allocation2 + $0x8] sm:$0xff]  }
  0x27   :  { %155 = vmatprep.subr.bf16.mxu0 %v234_v0  ;;  %165 = vmatprep.mubr.msk.bf16.mxu0 %vm235_vm0, %v234_v0  ;;  %v177_v3 = vld [vmem:[#allocation2 + $0x10] sm:$0xff]   ;;  %v178_v4 = vld [vmem:[#allocation2 + $0x18] sm:$0xff]   ;;  %v179_v5 = vld [vmem:[#allocation2 + $0x20] sm:$0xff]   ;;  %vm90_vm1 = vcmask 654336  }
  0x28   :  { %156 = vmatpush3.bf16.msra.mxu0 %v175_v1  ;;  %v41_v6 = vld [vmem:[%s286_s0] sm:$0xff]  ;;  %v142_v8 = vld [vmem:[#allocation4] ss:$0 sm:$0xff] }
  0x29   :  { %157 = vmatprep.subr.bf16.mxu0 %v234_v0  ;;  %v42_v7 = vpack.c.bf16 %v41_v6, %v41_v6 }
  0x2c   :  { %158 = vmatpush3.bf16.msra.mxu0 %v176_v2 }
  0x2d   :  { %159 = vmatprep.subr.bf16.mxu0 %v234_v0 }
  0x30   :  { %160 = vmatpush3.bf16.msra.mxu0 %v177_v3 }
  0x31   :  { %161 = vmatprep.subr.bf16.mxu0 %v234_v0 }
  0x34   :  { %162 = vmatpush3.bf16.msra.mxu0 %v178_v4 }
  0x35   :  { %163 = vmatprep.subr.bf16.mxu0 %v234_v0 }
  0x38   :  { %164 = vmatpush3.bf16.msra.mxu0 %v179_v5 }
  0x3b   :  { %166 = vmatmul.mubr.msk.bf16.vlgmr.msra.gmra.mrb[0].mxu0 %vm90_vm1, %v42_v7 }
 0x10e   :  { %v128_v9 = vpop.f32.mrb[0].mxu0 }
 0x10f   :  { %v129_v10 = vadd.f32 %v142_v8, %v128_v9  ;;  %v167_v11 = vpop.f32.mrb[1].mxu0 }
 0x110   :  { %v131_v12 = vpop.f32.mrb[2].mxu0 }
 0x111   :  { %180 = vtanh.f32 %v129_v10  ;;  %v168_v13 = vpop.f32.mrb[3].mxu0 }
 0x11b   :  { %v181_v14 = vpop.eup %180 }
 0x11c   :  { %135 = vst.msk [vmem:[%s289_s3] sm:$0xff] %vm90_vm1, %v181_v14 }
 0x11d   :  { %140 = vsyncpa [#allocation3], 1 }
 0x11e   :  { %141 = vsyncpa [#allocation5], 1 }

// kernel: transformer_forward.24
= control target key start
LH: loop header
LB: loop body
LE: loop exit
PB: predicated region body
PF: predicated region fallthrough
CT: control target
= control target key end

     0   :  { %8 = vsyncpa [#allocation3], 0  ;;  %s268_s0 = inlined_call_operand.hbm [shape: f32[8,4], index: 0, kind: input, shape index: {}]   ;;  %s269_s1 = inlined_call_operand.hbm [shape: bf16[4,80], index: 1, kind: input, shape index: {}]   ;;  %s270_s2 = inlined_call_operand.hbm [shape: f32[1,80], index: 2, kind: input, shape index: {}]   ;;  %s271_s3 = inlined_call_operand.vmem [shape: f32[8,80], index: 3, kind: output, shape index: {}]  }
   0x1   :  { %9 = vsyncpa [#allocation5], 0  ;;  %s204_s12 = smov [#allocation4]   ;;  %s205_s14 = smov [#allocation2]  }
   0x2   :  { %s26_s13 = sshll.u32 %s204_s12, 4  ;;  %s16_s15 = sshll.u32 %s205_s14, 4  ;;  %s27_s13 = int_to_ptr.vmem [resolvable:$true] %s26_s13  ;;  %s17_s15 = int_to_ptr.vmem [resolvable:$true] %s16_s15 }
   0x3   :  { %s134_s18 = scalar_lea.hbm %s269_s1, 32 }
   0x4   :  { %p135_p0 = scmp.ne.s32.totalorder %s269_s1, %s134_s18  ;;  %p138_p1 = scmp.lt.u32.totalorder %s134_s18, %s269_s1 }
   0x6   :  { %p140_p2 = pnand %p138_p1, %p135_p0 }
   0x8   :  { %143 = shalt.err (!%p140_p2)
}
   0x9   :  { %s144_s23 = scalar_lea.vmem %s27_s13, 32  ;;  %p149_p4 = scmp.lt.s32.totalorder %s27_s13, %s27_s13 }
   0xa   :  { %p145_p3 = scmp.ne.s32.totalorder %s27_s13, %s144_s23  ;;  %p150_p5 = scmp.lt.s32.totalorder %s144_s23, %s144_s23 }
   0xc   :  { %p151_p6 = por %p150_p5, %p149_p4 }
   0xe   :  { %p152_p7 = pnand %p151_p6, %p145_p3 }
  0x10   :  { %155 = shalt.err (!%p152_p7)
}
  0x11   :  { %29 = dma.hbm_to_vmem [thread:$0]  %s269_s1, 32, %s27_s13, [#allocation5]  }
  0x12   :  { %s156_s28 = scalar_lea.hbm %s268_s0, 128 }
  0x13   :  { %p157_p8 = scmp.ne.s32.totalorder %s268_s0, %s156_s28  ;;  %p160_p9 = scmp.lt.u32.totalorder %s156_s28, %s268_s0 }
  0x15   :  { %p162_p10 = pnand %p160_p9, %p157_p8 }
  0x17   :  { %165 = shalt.err (!%p162_p10)
}
  0x18   :  { %s166_s6 = scalar_lea.vmem %s17_s15, 128  ;;  %p171_p12 = scmp.lt.s32.totalorder %s17_s15, %s17_s15 }
  0x19   :  { %p167_p11 = scmp.ne.s32.totalorder %s17_s15, %s166_s6  ;;  %p172_p13 = scmp.lt.s32.totalorder %s166_s6, %s166_s6 }
  0x1b   :  { %p173_p0 = por %p172_p13, %p171_p12 }
  0x1d   :  { %p174_p1 = pnand %p173_p0, %p167_p11 }
  0x1f   :  { %177 = shalt.err (!%p174_p1)
}
  0x20   :  { %19 = dma.hbm_to_vmem [thread:$0]  %s268_s0, 128, %s17_s15, [#allocation3]  }
  0x21   :  { %s206_s8 = smov [#allocation6]   ;;  %s178_s12 = scalar_lea.hbm %s270_s2, 16 }
  0x22   :  { %s36_s9 = sshll.u32 %s206_s8, 4  ;;  %p179_p2 = scmp.ne.s32.totalorder %s270_s2, %s178_s12  ;;  %s37_s9 = int_to_ptr.vmem [resolvable:$true] %s36_s9 }
  0x23   :  { %p182_p3 = scmp.lt.u32.totalorder %s178_s12, %s270_s2 }
  0x25   :  { %p184_p4 = pnand %p182_p3, %p179_p2 }
  0x27   :  { %187 = shalt.err (!%p184_p4)
}
  0x28   :  { %s188_s18 = scalar_lea.vmem %s37_s9, 16  ;;  %s192_s0 = scalar_lea.vmem %s37_s9, 32 }
  0x29   :  { %p189_p5 = scmp.ne.s32.totalorder %s37_s9, %s188_s18  ;;  %p193_p6 = scmp.lt.s32.totalorder %s37_s9, %s37_s9 }
  0x2a   :  { %p194_p7 = scmp.lt.s32.totalorder %s192_s0, %s188_s18 }
  0x2c   :  { %p195_p8 = por %p194_p7, %p193_p6 }
  0x2e   :  { %p196_p9 = pnand %p195_p8, %p189_p5 }
  0x30   :  { %199 = shalt.err (!%p196_p9)
}
  0x31   :  { %39 = dma.hbm_to_vmem [thread:$0]  %s270_s2, 16, %s37_s9, [#allocation5]  }
  0x32   :  { %200 = dma.done.wait [#allocation3], 128  }
  0x33   :  { %201 = vsyncadd [#allocation3], 4294967168 }
  0x34   :  { %202 = dma.done.wait [#allocation5], 48  }
  0x35   :  { %203 = vsyncadd [#allocation5], 4294967248  ;;  %v207_v0 = vmov 0.0   ;;  %vm208_vm0 = vmmov 0   ;;  %vm64_vm1 = vcmask 1041408   ;;  %v50_v2 = vld [vmem:[#allocation2] sm:$0xff] }
  0x36   :  { %121 = vmatprep.subr.bf16.mxu0 %v207_v0  ;;  %123 = vmatprep.mubr.msk.bf16.mxu0 %vm208_vm0, %v207_v0  ;;  %v52_v1 = vld [vmem:[#allocation4] sm:$0x3]  ;;  %v51_v4 = vpack.c.bf16 %v50_v2, %v50_v2  ;;  %vm60_vm2 = vcmask 31744   ;;  %v117_v5 = vld [vmem:[#allocation6] ss:$0 sm:$0xff]  ;;  %vm109_vm3 = vcmask 654336  }
  0x37   :  { %v66_v3 = vsel %vm64_vm1, %v52_v1, 0 }
  0x38   :  { %122 = vmatpush3.bf16.msra.mxu0 %v66_v3 }
  0x3b   :  { %124 = vmatmul.mubr.msk.bf16.vlgmr.msra.gmra.mrb[0].mxu0 %vm60_vm2, %v51_v4 }
 0x10e   :  { %v102_v6 = vpop.f32.mrb[0].mxu0 }
 0x10f   :  { %v103_v7 = vadd.f32 %v117_v5, %v102_v6  ;;  %v125_v8 = vpop.f32.mrb[1].mxu0 }
 0x110   :  { %v105_v9 = vpop.f32.mrb[2].mxu0 }
 0x111   :  { %132 = vtanh.f32 %v103_v7  ;;  %v126_v10 = vpop.f32.mrb[3].mxu0 }
 0x11b   :  { %v133_v11 = vpop.eup %132 }
 0x11c   :  { %110 = vst.msk [vmem:[%s271_s3] sm:$0xff] %vm109_vm3, %v133_v11 }
 0x11d   :  { %115 = vsyncpa [#allocation3], 1 }
 0x11e   :  { %116 = vsyncpa [#allocation5], 1 }

// kernel: transformer_forward.27
= control target key start
LH: loop header
LB: loop body
LE: loop exit
PB: predicated region body
PF: predicated region fallthrough
CT: control target
= control target key end

     0   :  { %vm561_vm0 = vcmask 261120   ;;  %s2243_s1 = inlined_call_operand.vmem [shape: bf16[160,1024], index: 1, kind: input, shape index: {}]   ;;  %s2244_s0 = inlined_call_operand.vmem [shape: f32[64,160], index: 0, kind: input, shape index: {}]   ;;  %s2245_s2 = inlined_call_operand.vmem [shape: f32[1,1024], index: 2, kind: input, shape index: {}]   ;;  %s2246_s3 = inlined_call_operand.vmem [shape: bf16[64,512], index: 3, kind: output, shape index: {}]  }
   0x1   :  { %v39_v0 = vld [vmem:[%s2243_s1] sm:$0xff]  ;;  %v40_v2 = vld [vmem:[%s2243_s1 + $0x8] sm:$0xff]  ;;  %v18_v38 = vld [vmem:[%s2244_s0 + $0x18] sm:$0xff] }
   0x2   :  { %v43_v1 = vld [vmem:[%s2243_s1 + $0x20] sm:$0xff]  ;;  %v44_v4 = vld [vmem:[%s2243_s1 + $0x28] sm:$0xff] }
   0x3   :  { %v1207_v3 = vcombine.high %v39_v0, %v43_v1  ;;  %v1206_v5 = vcombine.low %v39_v0, %v43_v1  ;;  %v47_v6 = vld [vmem:[%s2243_s1 + $0x40] sm:$0xff]  ;;  %v1209_v8 = vcombine.high %v40_v2, %v44_v4  ;;  %v1208_v9 = vcombine.low %v40_v2, %v44_v4  ;;  %v48_v11 = vld [vmem:[%s2243_s1 + $0x48] sm:$0xff] }
   0x4   :  { %v51_v7 = vld [vmem:[%s2243_s1 + $0x60] sm:$0xff]  ;;  %v52_v12 = vld [vmem:[%s2243_s1 + $0x68] sm:$0xff] }
   0x5   :  { %v1215_v10 = vcombine.high %v47_v6, %v51_v7  ;;  %v55_v13 = vld [vmem:[%s2243_s1 + $0x80] sm:$0xff]  ;;  %574 = vmatprep.subr.bf16.mxu0 %v1207_v3  ;;  %v1217_v14 = vcombine.high %v48_v11, %v52_v12  ;;  %v56_v16 = vld [vmem:[%s2243_s1 + $0x88] sm:$0xff]  ;;  %647 = vmatprep.subr.bf16.mxu1 %v1209_v8  ;;  %v1214_v18 = vcombine.low %v47_v6, %v51_v7 }
   0x6   :  { %v59_v15 = vld [vmem:[%s2243_s1 + $0xa0] sm:$0xff]  ;;  %v60_v17 = vld [vmem:[%s2243_s1 + $0xa8] sm:$0xff]  ;;  %575 = vmatpush1.bf16.msra.mxu0 %v1206_v5  ;;  %648 = vmatpush1.bf16.msra.mxu1 %v1208_v9  ;;  %v1216_v19 = vcombine.low %v48_v11, %v52_v12 }
   0x7   :  { %576 = vmatprep.subr.bf16.mxu0 %v1215_v10  ;;  %v1223_v20 = vcombine.high %v55_v13, %v59_v15  ;;  %649 = vmatprep.subr.bf16.mxu1 %v1217_v14  ;;  %v1225_v21 = vcombine.high %v56_v16, %v60_v17  ;;  %v63_v22 = vld [vmem:[%s2243_s1 + $0xc0] sm:$0xff]  ;;  %v64_v24 = vld [vmem:[%s2243_s1 + $0xc8] sm:$0xff]  ;;  %v1222_v26 = vcombine.low %v55_v13, %v59_v15 }
   0x8   :  { %v67_v23 = vld [vmem:[%s2243_s1 + $0xe0] sm:$0xff]  ;;  %v68_v25 = vld [vmem:[%s2243_s1 + $0xe8] sm:$0xff]  ;;  %v1224_v27 = vcombine.low %v56_v16, %v60_v17  ;;  %v41_v17 = vld [vmem:[%s2243_s1 + $0x10] sm:$0xff] }
   0x9   :  { %v1231_v28 = vcombine.high %v63_v22, %v67_v23  ;;  %v1233_v29 = vcombine.high %v64_v24, %v68_v25  ;;  %v71_v30 = vld [vmem:[%s2243_s1 + $0x100] sm:$0xff]  ;;  %v72_v32 = vld [vmem:[%s2243_s1 + $0x108] sm:$0xff]  ;;  %v1230_v34 = vcombine.low %v63_v22, %v67_v23  ;;  %v1232_v35 = vcombine.low %v64_v24, %v68_v25  ;;  %v17_v23 = vld [vmem:[%s2244_s0 + $0x10] sm:$0xff] }
   0xa   :  { %577 = vmatpush1.bf16.msra.mxu0 %v1214_v18  ;;  %650 = vmatpush1.bf16.msra.mxu1 %v1216_v19  ;;  %v75_v31 = vld [vmem:[%s2243_s1 + $0x120] sm:$0xff]  ;;  %v76_v33 = vld [vmem:[%s2243_s1 + $0x128] sm:$0xff]  ;;  %v45_v18 = vld [vmem:[%s2243_s1 + $0x30] sm:$0xff] }
   0xb   :  { %578 = vmatprep.subr.bf16.mxu0 %v1223_v20  ;;  %651 = vmatprep.subr.bf16.mxu1 %v1225_v21  ;;  %v1239_v36 = vcombine.high %v71_v30, %v75_v31  ;;  %v16_v37 = vld [vmem:[%s2244_s0 + $0x8] sm:$0xff]  ;;  %v1241_v39 = vcombine.high %v72_v32, %v76_v33  ;;  %v79_v40 = vld [vmem:[%s2243_s1 + $0x140] sm:$0xff]  ;;  %v1238_v45 = vcombine.low %v71_v30, %v75_v31  ;;  %v42_v19 = vld [vmem:[%s2243_s1 + $0x18] sm:$0xff] }
   0xc   :  { %v83_v41 = vld [vmem:[%s2243_s1 + $0x160] sm:$0xff]  ;;  %v1554_v42 = vpack.c.bf16 %v18_v38, %v16_v37  ;;  %v80_v43 = vld [vmem:[%s2243_s1 + $0x148] sm:$0xff]  ;;  %v1240_v46 = vcombine.low %v72_v32, %v76_v33  ;;  %v46_v20 = vld [vmem:[%s2243_s1 + $0x38] sm:$0xff]  ;;  %v1211_v25 = vcombine.high %v41_v17, %v45_v18 }
   0xd   :  { %v84_v44 = vld [vmem:[%s2243_s1 + $0x168] sm:$0xff]  ;;  %v1247_v47 = vcombine.high %v79_v40, %v83_v41  ;;  %v87_v49 = vld [vmem:[%s2243_s1 + $0x180] sm:$0xff]  ;;  %v1246_v53 = vcombine.low %v79_v40, %v83_v41  ;;  %v54_v31 = vld [vmem:[%s2243_s1 + $0x78] sm:$0xff] }
   0xe   :  { %579 = vmatpush1.bf16.msra.mxu0 %v1222_v26  ;;  %652 = vmatpush1.bf16.msra.mxu1 %v1224_v27  ;;  %v1249_v48 = vcombine.high %v80_v43, %v84_v44  ;;  %v91_v50 = vld [vmem:[%s2243_s1 + $0x1a0] sm:$0xff]  ;;  %v88_v51 = vld [vmem:[%s2243_s1 + $0x188] sm:$0xff]  ;;  %v1248_v54 = vcombine.low %v80_v43, %v84_v44  ;;  %v1213_v26 = vcombine.high %v42_v19, %v46_v20  ;;  %v49_v27 = vld [vmem:[%s2243_s1 + $0x50] sm:$0xff] }
   0xf   :  { %580 = vmatprep.subr.bf16.mxu0 %v1231_v28  ;;  %653 = vmatprep.subr.bf16.mxu1 %v1233_v29  ;;  %v92_v52 = vld [vmem:[%s2243_s1 + $0x1a8] sm:$0xff]  ;;  %v1255_v55 = vcombine.high %v87_v49, %v91_v50  ;;  %v95_v57 = vld [vmem:[%s2243_s1 + $0x1c0] sm:$0xff]  ;;  %v1254_v61 = vcombine.low %v87_v49, %v91_v50  ;;  %v53_v28 = vld [vmem:[%s2243_s1 + $0x70] sm:$0xff] }
  0x10   :  { %1286 = vmatprep.mubr.msk.bf16.mxu0 %vm561_vm0, %v1554_v42  ;;  %1290 = vmatprep.mubr.msk.bf16.mxu1 %vm561_vm0, %v1554_v42  ;;  %v1257_v56 = vcombine.high %v88_v51, %v92_v52  ;;  %v99_v58 = vld [vmem:[%s2243_s1 + $0x1e0] sm:$0xff]  ;;  %v96_v59 = vld [vmem:[%s2243_s1 + $0x1c8] sm:$0xff]  ;;  %v1256_v62 = vcombine.low %v88_v51, %v92_v52  ;;  %v50_v29 = vld [vmem:[%s2243_s1 + $0x58] sm:$0xff]  ;;  %v1218_v44 = vcombine.low %v49_v27, %v53_v28 }
  0x11   :  { %v100_v60 = vld [vmem:[%s2243_s1 + $0x1e8] sm:$0xff]  ;;  %v1263_v63 = vcombine.high %v95_v57, %v99_v58  ;;  %v103_v1 = vld [vmem:[%s2243_s1 + $0x200] sm:$0xff]  ;;  %v1262_v5 = vcombine.low %v95_v57, %v99_v58  ;;  %v22_v33 = vld [vmem:[%s2244_s0 + $0x38] sm:$0xff]  ;;  %v1221_v37 = vcombine.high %v50_v29, %v54_v31 }
  0x12   :  { %581 = vmatpush1.bf16.msra.mxu0 %v1230_v34  ;;  %654 = vmatpush1.bf16.msra.mxu1 %v1232_v35  ;;  %v1265_v0 = vcombine.high %v96_v59, %v100_v60  ;;  %v107_v2 = vld [vmem:[%s2243_s1 + $0x220] sm:$0xff]  ;;  %v104_v3 = vld [vmem:[%s2243_s1 + $0x208] sm:$0xff]  ;;  %v1264_v6 = vcombine.low %v96_v59, %v100_v60  ;;  %v1210_v34 = vcombine.low %v41_v17, %v45_v18  ;;  %v57_v38 = vld [vmem:[%s2243_s1 + $0x90] sm:$0xff] }
  0x13   :  { %582 = vmatprep.subr.bf16.mxu0 %v1239_v36  ;;  %655 = vmatprep.subr.bf16.mxu1 %v1241_v39  ;;  %v108_v4 = vld [vmem:[%s2243_s1 + $0x228] sm:$0xff]  ;;  %v1271_v7 = vcombine.high %v103_v1, %v107_v2  ;;  %v111_v9 = vld [vmem:[%s2243_s1 + $0x240] sm:$0xff]  ;;  %v1270_v13 = vcombine.low %v103_v1, %v107_v2  ;;  %v1212_v35 = vcombine.low %v42_v19, %v46_v20  ;;  %v61_v39 = vld [vmem:[%s2243_s1 + $0xb0] sm:$0xff] }
  0x14   :  { %v1273_v8 = vcombine.high %v104_v3, %v108_v4  ;;  %v115_v10 = vld [vmem:[%s2243_s1 + $0x260] sm:$0xff]  ;;  %v112_v11 = vld [vmem:[%s2243_s1 + $0x248] sm:$0xff]  ;;  %v1272_v14 = vcombine.low %v104_v3, %v108_v4  ;;  %v1219_v36 = vcombine.high %v49_v27, %v53_v28  ;;  %v58_v41 = vld [vmem:[%s2243_s1 + $0x98] sm:$0xff]  ;;  %v1226_v57 = vcombine.low %v57_v38, %v61_v39 }
  0x15   :  { %v116_v12 = vld [vmem:[%s2243_s1 + $0x268] sm:$0xff]  ;;  %v1279_v15 = vcombine.high %v111_v9, %v115_v10  ;;  %v1278_v21 = vcombine.low %v111_v9, %v115_v10  ;;  %v15_v22 = vld [vmem:[%s2244_s0] sm:$0xff]  ;;  %v62_v43 = vld [vmem:[%s2243_s1 + $0xb8] sm:$0xff] }
  0x16   :  { %583 = vmatpush1.bf16.msra.mxu0 %v1238_v45  ;;  %656 = vmatpush1.bf16.msra.mxu1 %v1240_v46  ;;  %v1281_v16 = vcombine.high %v112_v11, %v116_v12  ;;  %v1280_v24 = vcombine.low %v112_v11, %v116_v12  ;;  %v1641_v30 = vpack.c.bf16 %v17_v23, %v15_v22  ;;  %v20_v32 = vld [vmem:[%s2244_s0 + $0x28] sm:$0xff]  ;;  %v19_v45 = vld [vmem:[%s2244_s0 + $0x20] sm:$0xff]  ;;  %v21_v46 = vld [vmem:[%s2244_s0 + $0x30] sm:$0xff] }
  0x17   :  { %584 = vmatprep.subr.bf16.mxu0 %v1247_v47  ;;  %657 = vmatprep.subr.bf16.mxu1 %v1249_v48  ;;  %v1658_v40 = vpack.c.bf16 %v22_v33, %v20_v32  ;;  %v1220_v47 = vcombine.low %v50_v29, %v54_v31  ;;  %v1227_v48 = vcombine.high %v57_v38, %v61_v39  ;;  %v65_v50 = vld [vmem:[%s2243_s1 + $0xd0] sm:$0xff]  ;;  %v66_v52 = vld [vmem:[%s2243_s1 + $0xd8] sm:$0xff]  ;;  %v23_v3 = vld [vmem:[%s2244_s0 + $0x40] sm:$0xff] }
  0x18   :  { %v1229_v49 = vcombine.high %v58_v41, %v62_v43  ;;  %v69_v51 = vld [vmem:[%s2243_s1 + $0xf0] sm:$0xff]  ;;  %v1228_v58 = vcombine.low %v58_v41, %v62_v43  ;;  %v78_v1 = vld [vmem:[%s2243_s1 + $0x138] sm:$0xff] }
  0x19   :  { %v1235_v59 = vcombine.high %v65_v50, %v69_v51  ;;  %v1234_v2 = vcombine.low %v65_v50, %v69_v51  ;;  %v25_v4 = vld [vmem:[%s2244_s0 + $0x50] sm:$0xff]  ;;  %v82_v10 = vld [vmem:[%s2243_s1 + $0x158] sm:$0xff] }
  0x1a   :  { %585 = vmatpush1.bf16.msra.mxu0 %v1246_v53  ;;  %658 = vmatpush1.bf16.msra.mxu1 %v1248_v54  ;;  %v70_v53 = vld [vmem:[%s2243_s1 + $0xf8] sm:$0xff]  ;;  %v1690_v54 = vpack.c.bf16 %v21_v46, %v19_v45  ;;  %v85_v9 = vld [vmem:[%s2243_s1 + $0x170] sm:$0xff]  ;;  %v1736_v12 = vpack.c.bf16 %v25_v4, %v23_v3 }
  0x1b   :  { %586 = vmatprep.subr.bf16.mxu0 %v1255_v55  ;;  %659 = vmatprep.subr.bf16.mxu1 %v1257_v56  ;;  %v24_v55 = vld [vmem:[%s2244_s0 + $0x48] sm:$0xff]  ;;  %v26_v56 = vld [vmem:[%s2244_s0 + $0x58] sm:$0xff]  ;;  %v1237_v60 = vcombine.high %v66_v52, %v70_v53  ;;  %v89_v19 = vld [vmem:[%s2243_s1 + $0x190] sm:$0xff] }
  0x1c   :  { %v86_v11 = vld [vmem:[%s2243_s1 + $0x178] sm:$0xff]  ;;  %v93_v20 = vld [vmem:[%s2243_s1 + $0x1b0] sm:$0xff] }
  0x1d   :  { %v1253_v18 = vcombine.high %v82_v10, %v86_v11  ;;  %v90_v22 = vld [vmem:[%s2243_s1 + $0x198] sm:$0xff]  ;;  %v1252_v27 = vcombine.low %v82_v10, %v86_v11  ;;  %v1259_v28 = vcombine.high %v89_v19, %v93_v20  ;;  %v97_v31 = vld [vmem:[%s2243_s1 + $0x1d0] sm:$0xff] }
  0x1e   :  { %587 = vmatpush1.bf16.msra.mxu0 %v1254_v61  ;;  %660 = vmatpush1.bf16.msra.mxu1 %v1256_v62  ;;  %v73_v61 = vld [vmem:[%s2243_s1 + $0x110] sm:$0xff]  ;;  %v94_v23 = vld [vmem:[%s2243_s1 + $0x1b8] sm:$0xff] }
  0x1f   :  { %588 = vmatprep.subr.bf16.mxu0 %v1263_v63  ;;  %661 = vmatprep.subr.bf16.mxu1 %v1265_v0  ;;  %v77_v62 = vld [vmem:[%s2243_s1 + $0x130] sm:$0xff]  ;;  %v1704_v63 = vpack.c.bf16 %v26_v56, %v24_v55  ;;  %v74_v0 = vld [vmem:[%s2243_s1 + $0x118] sm:$0xff]  ;;  %v1261_v29 = vcombine.high %v90_v22, %v94_v23 }
  0x20   :  { %v101_v32 = vld [vmem:[%s2243_s1 + $0x1f0] sm:$0xff]  ;;  %v98_v33 = vld [vmem:[%s2243_s1 + $0x1d8] sm:$0xff] }
  0x21   :  { %v1267_v38 = vcombine.high %v97_v31, %v101_v32  ;;  %v105_v41 = vld [vmem:[%s2243_s1 + $0x210] sm:$0xff]  ;;  %v110_v45 = vld [vmem:[%s2243_s1 + $0x238] sm:$0xff]  ;;  %v1266_v46 = vcombine.low %v97_v31, %v101_v32 }
  0x22   :  { %589 = vmatpush1.bf16.msra.mxu0 %v1262_v5  ;;  %662 = vmatpush1.bf16.msra.mxu1 %v1264_v6  ;;  %v1236_v5 = vcombine.low %v66_v52, %v70_v53  ;;  %v1243_v6 = vcombine.high %v73_v61, %v77_v62  ;;  %v109_v43 = vld [vmem:[%s2243_s1 + $0x230] sm:$0xff]  ;;  %v114_v52 = vld [vmem:[%s2243_s1 + $0x258] sm:$0xff] }
  0x23   :  { %590 = vmatprep.subr.bf16.mxu0 %v1271_v7  ;;  %663 = vmatprep.subr.bf16.mxu1 %v1273_v8  ;;  %v1245_v7 = vcombine.high %v74_v0, %v78_v1  ;;  %v81_v8 = vld [vmem:[%s2243_s1 + $0x150] sm:$0xff]  ;;  %v118_v53 = vld [vmem:[%s2243_s1 + $0x278] sm:$0xff]  ;;  %v1274_v55 = vcombine.low %v105_v41, %v109_v43 }
  0x24   :  { %v1251_v17 = vcombine.high %v81_v8, %v85_v9  ;;  %v113_v50 = vld [vmem:[%s2243_s1 + $0x250] sm:$0xff] }
  0x25   :  { %v117_v51 = vld [vmem:[%s2243_s1 + $0x270] sm:$0xff] }
  0x26   :  { %591 = vmatpush1.bf16.msra.mxu0 %v1270_v13  ;;  %664 = vmatpush1.bf16.msra.mxu1 %v1272_v14  ;;  %v28_v13 = vld [vmem:[%s2244_s0 + $0x68] sm:$0xff]  ;;  %v30_v14 = vld [vmem:[%s2244_s0 + $0x78] sm:$0xff] }
  0x27   :  { %592 = vmatprep.subr.bf16.mxu0 %v1279_v15  ;;  %665 = vmatprep.subr.bf16.mxu1 %v1281_v16  ;;  %v1242_v15 = vcombine.low %v73_v61, %v77_v62  ;;  %v1244_v16 = vcombine.low %v74_v0, %v78_v1 }
  0x2a   :  { %593 = vmatpush1.bf16.msra.mxu0 %v1278_v21  ;;  %666 = vmatpush1.bf16.msra.mxu1 %v1280_v24  ;;  %v1750_v21 = vpack.c.bf16 %v30_v14, %v28_v13  ;;  %v1250_v24 = vcombine.low %v81_v8, %v85_v9 }
  0x2b   :  { %720 = vmatprep.subr.bf16.mxu0 %v1211_v25  ;;  %793 = vmatprep.subr.bf16.mxu1 %v1213_v26  ;;  %v27_v25 = vld [vmem:[%s2244_s0 + $0x60] sm:$0xff]  ;;  %v29_v26 = vld [vmem:[%s2244_s0 + $0x70] sm:$0xff] }
  0x2d   :  { %607 = vmatmul.mubr.bf16.vlgmr.msra.gmra.mrb[0].mxu0 %v1641_v30  ;;  %680 = vmatmul.mubr.bf16.vlgmr.msra.gmra.mrb[0].mxu1 %v1641_v30 }
  0x2e   :  { %721 = vmatpush1.bf16.msra.mxu0 %v1210_v34  ;;  %794 = vmatpush1.bf16.msra.mxu1 %v1212_v35  ;;  %v102_v34 = vld [vmem:[%s2243_s1 + $0x1f8] sm:$0xff]  ;;  %v37_v35 = vpack.c.bf16 %v29_v26, %v27_v25 }
  0x2f   :  { %722 = vmatprep.subr.bf16.mxu0 %v1219_v36  ;;  %795 = vmatprep.subr.bf16.mxu1 %v1221_v37  ;;  %v1258_v36 = vcombine.low %v89_v19, %v93_v20  ;;  %v1260_v37 = vcombine.low %v90_v22, %v94_v23  ;;  %v1269_v39 = vcombine.high %v98_v33, %v102_v34  ;;  %v121_v20 = vlaneseq }
  0x30   :  { %1287 = vmatprep.mubr.msk.bf16.mxu0 %vm561_vm0, %v1658_v40  ;;  %1291 = vmatprep.mubr.msk.bf16.mxu1 %vm561_vm0, %v1658_v40 }
  0x31   :  { %v122_v26 = vshrl.u32 %v121_v20, 7 }
  0x32   :  { %723 = vmatpush1.bf16.msra.mxu0 %v1218_v44  ;;  %796 = vmatpush1.bf16.msra.mxu1 %v1220_v47  ;;  %v106_v44 = vld [vmem:[%s2243_s1 + $0x218] sm:$0xff]  ;;  %v1268_v47 = vcombine.low %v98_v33, %v102_v34  ;;  %v119_v33 = vld [vmem:[%s2245_s2] sm:$0xff] }
  0x33   :  { %724 = vmatprep.subr.bf16.mxu0 %v1227_v48  ;;  %797 = vmatprep.subr.bf16.mxu1 %v1229_v49  ;;  %v1275_v48 = vcombine.high %v105_v41, %v109_v43  ;;  %v1277_v49 = vcombine.high %v106_v44, %v110_v45  ;;  %v1276_v56 = vcombine.low %v106_v44, %v110_v45  ;;  %v147_v31 = vsub.s32 6, %v122_v26 }
  0x34   :  { %v143_v32 = vsub.s32 5, %v122_v26  ;;  %v127_v34 = vsub.s32 1, %v122_v26 }
  0x35   :  { %617 = vmatmul.mubr.bf16.gmra.mrb[4].mxu0 %v1690_v54  ;;  %690 = vmatmul.mubr.bf16.gmra.mrb[4].mxu1 %v1690_v54  ;;  %v1895_v41 = vrot.slane %v119_v33, %v147_v31 }
  0x36   :  { %725 = vmatpush1.bf16.msra.mxu0 %v1226_v57  ;;  %798 = vmatpush1.bf16.msra.mxu1 %v1228_v58  ;;  %v1283_v57 = vcombine.high %v113_v50, %v117_v51  ;;  %v1285_v58 = vcombine.high %v114_v52, %v118_v53  ;;  %v1897_v43 = vrot.slane %v119_v33, %v143_v32 }
  0x37   :  { %726 = vmatprep.subr.bf16.mxu0 %v1235_v59  ;;  %799 = vmatprep.subr.bf16.mxu1 %v1237_v60  ;;  %v1282_v59 = vcombine.low %v113_v50, %v117_v51  ;;  %v1284_v60 = vcombine.low %v114_v52, %v118_v53  ;;  %v1899_v44 = vrot.slane %v119_v33, %v127_v34 }
  0x38   :  { %1288 = vmatprep.mubr.msk.bf16.mxu0 %vm561_vm0, %v1704_v63  ;;  %1292 = vmatprep.mubr.msk.bf16.mxu1 %vm561_vm0, %v1704_v63 }
  0x39   :  { %2278 = vst [vmem:[#allocation20_spill] sm:$0xff] %v1899_v44 }
  0x3a   :  { %727 = vmatpush1.bf16.msra.mxu0 %v1234_v2  ;;  %800 = vmatpush1.bf16.msra.mxu1 %v1236_v5 }
  0x3b   :  { %728 = vmatprep.subr.bf16.mxu0 %v1243_v6  ;;  %801 = vmatprep.subr.bf16.mxu1 %v1245_v7 }
  0x3d   :  { %627 = vmatmul.mubr.bf16.gmra.mrb[8].mxu0 %v1736_v12  ;;  %700 = vmatmul.mubr.bf16.gmra.mrb[8].mxu1 %v1736_v12 }
  0x3e   :  { %729 = vmatpush1.bf16.msra.mxu0 %v1242_v15  ;;  %802 = vmatpush1.bf16.msra.mxu1 %v1244_v16 }
  0x3f   :  { %730 = vmatprep.subr.bf16.mxu0 %v1251_v17  ;;  %803 = vmatprep.subr.bf16.mxu1 %v1253_v18 }
  0x40   :  { %1289 = vmatprep.mubr.msk.bf16.mxu0 %vm561_vm0, %v1750_v21  ;;  %1293 = vmatprep.mubr.msk.bf16.mxu1 %vm561_vm0, %v1750_v21 }
  0x42   :  { %731 = vmatpush1.bf16.msra.mxu0 %v1250_v24  ;;  %804 = vmatpush1.bf16.msra.mxu1 %v1252_v27  ;;  %v139_v27 = vsub.s32 4, %v122_v26 }
  0x43   :  { %732 = vmatprep.subr.bf16.mxu0 %v1259_v28  ;;  %805 = vmatprep.subr.bf16.mxu1 %v1261_v29  ;;  %v123_v28 = vsub.s32 0, %v122_v26  ;;  %v131_v29 = vsub.s32 2, %v122_v26 }
  0x45   :  { %637 = vmatmul.mubr.bf16.gmra.mrb[12].mxu0 %v37_v35  ;;  %710 = vmatmul.mubr.bf16.gmra.mrb[12].mxu1 %v37_v35 }
  0x46   :  { %733 = vmatpush1.bf16.msra.mxu0 %v1258_v36  ;;  %806 = vmatpush1.bf16.msra.mxu1 %v1260_v37  ;;  %v135_v36 = vsub.s32 3, %v122_v26  ;;  %v1889_v37 = vrot.slane %v119_v33, %v139_v27 }
  0x47   :  { %734 = vmatprep.subr.bf16.mxu0 %v1267_v38  ;;  %807 = vmatprep.subr.bf16.mxu1 %v1269_v39  ;;  %v1891_v38 = vrot.slane %v119_v33, %v123_v28  ;;  %v1893_v39 = vrot.slane %v119_v33, %v131_v29 }
  0x48   :  { %1294 = vmatprep.mubr.msk.bf16.mxu0 %vm561_vm0, %v1554_v42  ;;  %1298 = vmatprep.mubr.msk.bf16.mxu1 %vm561_vm0, %v1554_v42 }
  0x4a   :  { %735 = vmatpush1.bf16.msra.mxu0 %v1266_v46  ;;  %808 = vmatpush1.bf16.msra.mxu1 %v1268_v47  ;;  %v1903_v47 = vrot.slane %v119_v33, %v135_v36 }
  0x4b   :  { %736 = vmatprep.subr.bf16.mxu0 %v1275_v48  ;;  %809 = vmatprep.subr.bf16.mxu1 %v1277_v49 }
  0x4c   :  { %2279 = vst [vmem:[#allocation21_spill] sm:$0xff] %v1903_v47 }
  0x4e   :  { %737 = vmatpush1.bf16.msra.mxu0 %v1274_v55  ;;  %810 = vmatpush1.bf16.msra.mxu1 %v1276_v56 }
  0x4f   :  { %738 = vmatprep.subr.bf16.mxu0 %v1283_v57  ;;  %811 = vmatprep.subr.bf16.mxu1 %v1285_v58 }
  0x52   :  { %739 = vmatpush1.bf16.msra.mxu0 %v1282_v59  ;;  %812 = vmatpush1.bf16.msra.mxu1 %v1284_v60 }
  0x55   :  { %753 = vmatmul.mubr.bf16.vlgmr.msra.gmra.mrb[16].mxu0 %v1641_v30  ;;  %826 = vmatmul.mubr.bf16.vlgmr.msra.gmra.mrb[16].mxu1 %v1641_v30 }
  0x56   :  { %1295 = vmatprep.mubr.msk.bf16.mxu0 %vm561_vm0, %v1658_v40  ;;  %1299 = vmatprep.mubr.msk.bf16.mxu1 %vm561_vm0, %v1658_v40 }
  0x5d   :  { %763 = vmatmul.mubr.bf16.gmra.mrb[20].mxu0 %v1690_v54  ;;  %836 = vmatmul.mubr.bf16.gmra.mrb[20].mxu1 %v1690_v54 }
  0x5e   :  { %1296 = vmatprep.mubr.msk.bf16.mxu0 %vm561_vm0, %v1704_v63  ;;  %1300 = vmatprep.mubr.msk.bf16.mxu1 %vm561_vm0, %v1704_v63 }
  0x65   :  { %773 = vmatmul.mubr.bf16.gmra.mrb[24].mxu0 %v1736_v12  ;;  %846 = vmatmul.mubr.bf16.gmra.mrb[24].mxu1 %v1736_v12 }
  0x66   :  { %1297 = vmatprep.mubr.msk.bf16.mxu0 %vm561_vm0, %v1750_v21  ;;  %1301 = vmatprep.mubr.msk.bf16.mxu1 %vm561_vm0, %v1750_v21 }
  0x6d   :  { %783 = vmatmul.mubr.bf16.gmra.mrb[28].mxu0 %v37_v35  ;;  %856 = vmatmul.mubr.bf16.gmra.mrb[28].mxu1 %v37_v35  ;;  %v151_v35 = vsub.s32 7, %v122_v26 }
  0x6f   :  { %v1901_v45 = vrot.slane %v119_v33, %v151_v35 }
 0x100   :  { %v608_v42 = vpop.f32.mrb[0].mxu0  ;;  %v681_v30 = vpop.f32.mrb[0].mxu1 }
 0x101   :  { %v610_v40 = vpop.f32.mrb[1].mxu0  ;;  %v1828_v54 = vpop.f32.mrb[1].mxu1  ;;  %v1909_v51 = vadd.f32 %v608_v42, %v1891_v38  ;;  %v1912_v52 = vadd.f32 %v681_v30, %v1893_v39 }
 0x102   :  { %v1830_v61 = vpop.f32.mrb[2].mxu0  ;;  %v1832_v62 = vpop.f32.mrb[2].mxu1  ;;  %v1921_v58 = vadd.f32 %v610_v40, %v1899_v44 }
 0x103   :  { %v1834_v63 = vpop.f32.mrb[3].mxu0  ;;  %v1836_v0 = vpop.f32.mrb[3].mxu1 }
 0x108   :  { %v1838_v1 = vpop.f32.mrb[4].mxu0  ;;  %v1840_v2 = vpop.f32.mrb[4].mxu1 }
 0x109   :  { %v1842_v3 = vpop.f32.mrb[5].mxu0  ;;  %v1844_v4 = vpop.f32.mrb[5].mxu1 }
 0x10a   :  { %v1846_v5 = vpop.f32.mrb[6].mxu0  ;;  %v1848_v6 = vpop.f32.mrb[6].mxu1 }
 0x10b   :  { %v1850_v7 = vpop.f32.mrb[7].mxu0  ;;  %v1852_v8 = vpop.f32.mrb[7].mxu1 }
 0x10c   :  { %2260 = vst [vmem:[#allocation2_spill] sm:$0xff] %v1850_v7  ;;  %2261 = vst [vmem:[#allocation3_spill] sm:$0xff] %v1852_v8 }
 0x110   :  { %v1854_v9 = vpop.f32.mrb[8].mxu0  ;;  %v1856_v10 = vpop.f32.mrb[8].mxu1 }
 0x111   :  { %2262 = vst [vmem:[#allocation4_spill] sm:$0xff] %v1854_v9  ;;  %2263 = vst [vmem:[#allocation5_spill] sm:$0xff] %v1856_v10  ;;  %v1858_v11 = vpop.f32.mrb[9].mxu0  ;;  %v1860_v12 = vpop.f32.mrb[9].mxu1 }
 0x112   :  { %2264 = vst [vmem:[#allocation6_spill] sm:$0xff] %v1858_v11  ;;  %2265 = vst [vmem:[#allocation7_spill] sm:$0xff] %v1860_v12  ;;  %v1862_v13 = vpop.f32.mrb[10].mxu0  ;;  %v1864_v14 = vpop.f32.mrb[10].mxu1 }
 0x113   :  { %2266 = vst [vmem:[#allocation8_spill] sm:$0xff] %v1862_v13  ;;  %2267 = vst [vmem:[#allocation9_spill] sm:$0xff] %v1864_v14  ;;  %v1866_v15 = vpop.f32.mrb[11].mxu0  ;;  %v1868_v16 = vpop.f32.mrb[11].mxu1 }
 0x114   :  { %2268 = vst [vmem:[#allocation10_spill] sm:$0xff] %v1866_v15  ;;  %2269 = vst [vmem:[#allocation11_spill] sm:$0xff] %v1868_v16 }
 0x118   :  { %v1870_v17 = vpop.f32.mrb[12].mxu0  ;;  %v1872_v18 = vpop.f32.mrb[12].mxu1 }
 0x119   :  { %2270 = vst [vmem:[#allocation12_spill] sm:$0xff] %v1870_v17  ;;  %2271 = vst [vmem:[#allocation13_spill] sm:$0xff] %v1872_v18  ;;  %v1874_v19 = vpop.f32.mrb[13].mxu0  ;;  %v1876_v21 = vpop.f32.mrb[13].mxu1 }
 0x11a   :  { %2272 = vst [vmem:[#allocation14_spill] sm:$0xff] %v1874_v19  ;;  %2273 = vst [vmem:[#allocation15_spill] sm:$0xff] %v1876_v21  ;;  %v1878_v22 = vpop.f32.mrb[14].mxu0  ;;  %v1880_v23 = vpop.f32.mrb[14].mxu1 }
 0x11b   :  { %2274 = vst [vmem:[#allocation16_spill] sm:$0xff] %v1878_v22  ;;  %2275 = vst [vmem:[#allocation17_spill] sm:$0xff] %v1880_v23  ;;  %v1882_v24 = vpop.f32.mrb[15].mxu0  ;;  %v1884_v25 = vpop.f32.mrb[15].mxu1 }
 0x11c   :  { %2276 = vst [vmem:[#allocation18_spill] sm:$0xff] %v1882_v24  ;;  %2277 = vst [vmem:[#allocation19_spill] sm:$0xff] %v1884_v25 }
 0x128   :  { %v754_v46 = vpop.f32.mrb[16].mxu0  ;;  %v827_v49 = vpop.f32.mrb[16].mxu1 }
 0x129   :  { %v1906_v48 = vadd.f32 %v754_v46, %v1889_v37  ;;  %v756_v50 = vpop.f32.mrb[17].mxu0  ;;  %v1915_v53 = vadd.f32 %v827_v49, %v1895_v41  ;;  %v829_v56 = vpop.f32.mrb[17].mxu1 }
 0x12a   :  { %v1918_v55 = vadd.f32 %v756_v50, %v1897_v43  ;;  %v758_v57 = vpop.f32.mrb[18].mxu0  ;;  %v1925_v60 = vadd.f32 %v829_v56, %v1901_v45  ;;  %v831_v30 = vpop.f32.mrb[18].mxu1 }
 0x12b   :  { %v866_v59 = vsub.f32 0.0, %v1906_v48  ;;  %v1928_v42 = vadd.f32 %v758_v57, %v1889_v37  ;;  %v760_v20 = vpop.f32.mrb[19].mxu0  ;;  %v868_v26 = vsub.f32 0.0, %v1915_v53  ;;  %v1933_v28 = vadd.f32 %v831_v30, %v1895_v41  ;;  %v833_v29 = vpop.f32.mrb[19].mxu1 }
 0x12c   :  { %v867_v27 = vsub.f32 0.0, %v1918_v55  ;;  %v1936_v40 = vadd.f32 %v760_v20, %v1897_v43  ;;  %v869_v32 = vsub.f32 0.0, %v1925_v60  ;;  %v1941_v34 = vadd.f32 %v833_v29, %v1901_v45 }
 0x12d   :  { %v898_v31 = vmul.f32 1.442695, %v866_v59  ;;  %v870_v33 = vsub.f32 0.0, %v1928_v42  ;;  %v902_v35 = vmul.f32 1.442695, %v868_v26  ;;  %v872_v46 = vsub.f32 0.0, %v1933_v28 }
 0x12e   :  { %v900_v36 = vmul.f32 1.442695, %v867_v27  ;;  %v871_v49 = vsub.f32 0.0, %v1936_v40  ;;  %v904_v50 = vmul.f32 1.442695, %v869_v32  ;;  %v873_v57 = vsub.f32 0.0, %v1941_v34 }
 0x12f   :  { %1334 = vpow2.f32 %v898_v31  ;;  %v906_v56 = vmul.f32 1.442695, %v870_v33  ;;  %v1948_v59 = vadd.f32 %v1828_v54, %v1903_v47  ;;  %v1952_v30 = vadd.f32 %v1830_v61, %v1891_v38 }
 0x130   :  { %1336 = vpow2.f32 %v902_v35  ;;  %v910_v20 = vmul.f32 1.442695, %v872_v46  ;;  %v764_v26 = vpop.f32.mrb[20].mxu0  ;;  %v1956_v27 = vadd.f32 %v1832_v62, %v1893_v39  ;;  %v908_v29 = vmul.f32 1.442695, %v871_v49  ;;  %v837_v32 = vpop.f32.mrb[20].mxu1 }
 0x131   :  { %1338 = vpow2.f32 %v900_v36  ;;  %v1959_v31 = vadd.f32 %v764_v26, %v1889_v37  ;;  %v766_v33 = vpop.f32.mrb[21].mxu0  ;;  %v912_v54 = vmul.f32 1.442695, %v873_v57  ;;  %v1962_v25 = vadd.f32 %v837_v32, %v1895_v41  ;;  %v839_v35 = vpop.f32.mrb[21].mxu1 }
 0x132   :  { %1340 = vpow2.f32 %v904_v50  ;;  %v1965_v61 = vadd.f32 %v766_v33, %v1897_v43  ;;  %v768_v46 = vpop.f32.mrb[22].mxu0  ;;  %v1969_v36 = vadd.f32 %v839_v35, %v1901_v45  ;;  %v841_v26 = vpop.f32.mrb[22].mxu1 }
 0x133   :  { %1342 = vpow2.f32 %v906_v56  ;;  %v874_v62 = vsub.f32 0.0, %v1959_v31  ;;  %v1972_v49 = vadd.f32 %v768_v46, %v1889_v37  ;;  %v770_v50 = vpop.f32.mrb[23].mxu0  ;;  %v876_v57 = vsub.f32 0.0, %v1962_v25  ;;  %v843_v24 = vpop.f32.mrb[23].mxu1 }
 0x134   :  { %1344 = vpow2.f32 %v910_v20  ;;  %v875_v32 = vsub.f32 0.0, %v1965_v61  ;;  %v1977_v33 = vadd.f32 %v841_v26, %v1895_v41  ;;  %v877_v23 = vsub.f32 0.0, %v1969_v36 }
 0x135   :  { %1346 = vpow2.f32 %v908_v29  ;;  %v914_v56 = vmul.f32 1.442695, %v874_v62  ;;  %v878_v35 = vsub.f32 0.0, %v1972_v49  ;;  %v1983_v46 = vadd.f32 %v1834_v63, %v1899_v44 }
 0x136   :  { %2280 = vst [vmem:[#allocation22_spill] sm:$0xff] %v1977_v33  ;;  %1348 = vpow2.f32 %v912_v54  ;;  %v918_v20 = vmul.f32 1.442695, %v876_v57  ;;  %v916_v22 = vmul.f32 1.442695, %v875_v32  ;;  %v1986_v26 = vadd.f32 %v770_v50, %v1897_v43 }
 0x137   :  { %1350 = vpow2.f32 %v914_v56  ;;  %v920_v21 = vmul.f32 1.442695, %v877_v23  ;;  %v922_v19 = vmul.f32 1.442695, %v878_v35  ;;  %v1990_v29 = vadd.f32 %v1836_v0, %v1903_v47 }
 0x138   :  { %2281 = vst [vmem:[#allocation23_spill] sm:$0xff] %v1986_v26  ;;  %1352 = vpow2.f32 %v918_v20  ;;  %v880_v62 = vsub.f32 0.0, %v1977_v33  ;;  %v1994_v18 = vadd.f32 %v843_v24, %v1901_v45  ;;  %v774_v63 = vpop.f32.mrb[24].mxu0  ;;  %v1998_v57 = vadd.f32 %v1838_v1, %v1891_v38  ;;  %v847_v50 = vpop.f32.mrb[24].mxu1 }
 0x139   :  { %v1335_v54 = vpop.eup %1334  ;;  %v2002_v23 = vadd.f32 %v1840_v2, %v1893_v39  ;;  %1354 = vpow2.f32 %v916_v22  ;;  %v2005_v0 = vadd.f32 %v774_v63, %v1889_v37  ;;  %v776_v32 = vpop.f32.mrb[25].mxu0  ;;  %v2009_v24 = vadd.f32 %v1842_v3, %v1899_v44 }
 0x13a   :  { %2282 = vst [vmem:[#allocation24_spill] sm:$0xff] %v1994_v18  ;;  %v1337_v56 = vpop.eup %1336  ;;  %v962_v35 = vadd.f32 1.0, %v1335_v54  ;;  %1356 = vpow2.f32 %v920_v21  ;;  %v2012_v1 = vadd.f32 %v847_v50, %v1895_v41  ;;  %v849_v20 = vpop.f32.mrb[25].mxu1  ;;  %v2016_v22 = vadd.f32 %v1844_v4, %v1903_v47 }
 0x13b   :  { %2283 = vst [vmem:[#allocation25_spill] sm:$0xff] %v2005_v0  ;;  %v778_v17 = vpop.f32.mrb[26].mxu0  ;;  %v1339_v2 = vpop.eup %1338  ;;  %v964_v63 = vadd.f32 1.0, %v1337_v56  ;;  %1358 = vpow2.f32 %v922_v19  ;;  %v879_v16 = vsub.f32 0.0, %v1986_v26  ;;  %v2019_v21 = vmul.f32 1.442695, %v880_v62 }
 0x13c   :  { %2284 = vst [vmem:[#allocation26_spill] sm:$0xff] %v2012_v1  ;;  %v851_v15 = vpop.f32.mrb[26].mxu1  ;;  %v780_v14 = vpop.f32.mrb[27].mxu0  ;;  %1360 = vrcp.f32 %v962_v35  ;;  %v963_v54 = vadd.f32 1.0, %v1339_v2  ;;  %v881_v50 = vsub.f32 0.0, %v1994_v18  ;;  %v882_v4 = vsub.f32 0.0, %v2005_v0 }
 0x13d   :  { %v1341_v3 = vpop.eup %1340  ;;  %v853_v13 = vpop.f32.mrb[27].mxu1  ;;  %1362 = vrcp.f32 %v964_v63  ;;  %v2024_v56 = vadd.f32 %v776_v32, %v1897_v43  ;;  %v884_v33 = vsub.f32 0.0, %v2012_v1  ;;  %v2028_v35 = vadd.f32 %v849_v20, %v1901_v45 }
 0x13e   :  { %v1343_v12 = vpop.eup %1342  ;;  %v965_v11 = vadd.f32 1.0, %v1341_v3  ;;  %1364 = vrcp.f32 %v963_v54  ;;  %v2030_v18 = vmul.f32 1.442695, %v879_v16  ;;  %v2033_v63 = vadd.f32 %v778_v17, %v1889_v37 }
 0x13f   :  { %2285 = vst [vmem:[#allocation27_spill] sm:$0xff] %v2024_v56  ;;  %v1345_v19 = vpop.eup %1344  ;;  %v966_v26 = vadd.f32 1.0, %v1343_v12  ;;  %2286 = vst [vmem:[#allocation28_spill] sm:$0xff] %v2028_v35  ;;  %v2035_v0 = vmul.f32 1.442695, %v881_v50  ;;  %v2038_v12 = vadd.f32 %v851_v15, %v1895_v41  ;;  %v885_v50 = vsub.f32 0.0, %v2028_v35 }
 0x140   :  { %v1347_v62 = vpop.eup %1346  ;;  %1366 = vrcp.f32 %v965_v11  ;;  %v968_v2 = vadd.f32 1.0, %v1345_v19  ;;  %2287 = vst [vmem:[#allocation29_spill] sm:$0xff] %v2033_v63  ;;  %v784_v54 = vpop.f32.mrb[28].mxu0  ;;  %v2040_v10 = vmul.f32 1.442695, %v882_v4  ;;  %v883_v11 = vsub.f32 0.0, %v2024_v56 }
 0x141   :  { %v1349_v3 = vpop.eup %1348  ;;  %1368 = vrcp.f32 %v966_v26  ;;  %v967_v32 = vadd.f32 1.0, %v1347_v62  ;;  %2288 = vst [vmem:[#allocation30_spill] sm:$0xff] %v2038_v12  ;;  %v857_v16 = vpop.f32.mrb[28].mxu1  ;;  %v934_v62 = vmul.f32 1.442695, %v884_v33  ;;  %v886_v4 = vsub.f32 0.0, %v2033_v63 }
 0x142   :  { %v1351_v1 = vpop.eup %1350  ;;  %1370 = vrcp.f32 %v968_v2  ;;  %v969_v20 = vadd.f32 1.0, %v1349_v3  ;;  %v2043_v19 = vpop.f32.mrb[29].mxu0  ;;  %v2052_v3 = vadd.f32 %v780_v14, %v1897_v43  ;;  %v2060_v35 = vadd.f32 %v853_v13, %v1901_v45 }
 0x143   :  { %v1353_v17 = vpop.eup %1352  ;;  %1372 = vrcp.f32 %v967_v32  ;;  %v970_v26 = vadd.f32 1.0, %v1351_v1  ;;  %v2046_v9 = vpop.f32.mrb[29].mxu1  ;;  %v888_v32 = vsub.f32 0.0, %v2038_v12  ;;  %v932_v63 = vmul.f32 1.442695, %v883_v11 }
 0x144   :  { %v2048_v15 = vpop.f32.mrb[30].mxu0  ;;  %v1355_v8 = vpop.eup %1354  ;;  %1374 = vrcp.f32 %v969_v20  ;;  %v972_v2 = vadd.f32 1.0, %v1353_v17  ;;  %v887_v14 = vsub.f32 0.0, %v2052_v3  ;;  %v938_v13 = vmul.f32 1.442695, %v886_v4 }
 0x145   :  { %2289 = vst [vmem:[#allocation31_spill] sm:$0xff] %v2048_v15  ;;  %v2054_v56 = vpop.f32.mrb[30].mxu1  ;;  %v2056_v47 = vpop.f32.mrb[31].mxu0  ;;  %1376 = vrcp.f32 %v970_v26  ;;  %v971_v33 = vadd.f32 1.0, %v1355_v8  ;;  %v2066_v26 = vadd.f32 %v784_v54, %v1889_v37  ;;  %v942_v11 = vmul.f32 1.442695, %v888_v32 }
 0x146   :  { %2290 = vst [vmem:[#allocation32_spill] sm:$0xff] %v2054_v56  ;;  %2291 = vst [vmem:[#allocation33_spill] sm:$0xff] %v2056_v47  ;;  %v1357_v1 = vpop.eup %1356  ;;  %v2062_v7 = vpop.f32.mrb[31].mxu1  ;;  %1378 = vrcp.f32 %v972_v2  ;;  %v936_v47 = vmul.f32 1.442695, %v885_v50 }
 0x147   :  { %2292 = vst [vmem:[#allocation34_spill] sm:$0xff] %v2062_v7  ;;  %v1359_v20 = vpop.eup %1358  ;;  %v973_v17 = vadd.f32 1.0, %v1357_v1  ;;  %1380 = vrcp.f32 %v971_v33  ;;  %v889_v7 = vsub.f32 0.0, %v2060_v35  ;;  %v2072_v1 = vadd.f32 %v857_v16, %v1895_v41 }
 0x148   :  { %v1361_v44 = vpop.eup %1360  ;;  %v974_v56 = vadd.f32 1.0, %v1359_v20 }
 0x149   :  { %v1363_v8 = vpop.eup %1362  ;;  %v1026_v12 = vmul.f32 %v1361_v44, %v1906_v48  ;;  %1382 = vrcp.f32 %v973_v17  ;;  %v940_v44 = vmul.f32 1.442695, %v887_v14 }
 0x14a   :  { %v1365_v15 = vpop.eup %1364  ;;  %v1028_v2 = vmul.f32 %v1363_v8, %v1915_v53  ;;  %1384 = vrcp.f32 %v974_v56  ;;  %v890_v53 = vsub.f32 0.0, %v2066_v26 }
 0x14b   :  { %v1367_v33 = vpop.eup %1366  ;;  %v1058_v50 = vmul.f32 %v1026_v12, %v1909_v51  ;;  %v1027_v54 = vmul.f32 %v1365_v15, %v1918_v55  ;;  %1386 = vpow2.f32 %v2019_v21  ;;  %v944_v51 = vmul.f32 1.442695, %v889_v7 }
 0x14c   :  { %v1369_v48 = vpop.eup %1368  ;;  %v1060_v4 = vmul.f32 %v1028_v2, %v1912_v52  ;;  %v1029_v20 = vmul.f32 %v1367_v33, %v1925_v60  ;;  %1388 = vpow2.f32 %v2030_v18  ;;  %v892_v52 = vsub.f32 0.0, %v2072_v1 }
 0x14d   :  { %v1371_v56 = vpop.eup %1370  ;;  %v1059_v16 = vmul.f32 %v1027_v54, %v1921_v58  ;;  %v1030_v32 = vmul.f32 %v1369_v48, %v1928_v42  ;;  %1390 = vpow2.f32 %v2035_v0 }
 0x14e   :  { %v1373_v55 = vpop.eup %1372  ;;  %v1061_v21 = vmul.f32 %v1029_v20, %v1948_v59  ;;  %v1032_v12 = vmul.f32 %v1371_v56, %v1933_v28  ;;  %1392 = vpow2.f32 %v2040_v10  ;;  %v2131_v56 = vadd.f32 %v2046_v9, %v1901_v45 }
 0x14f   :  { %v1375_v18 = vpop.eup %1374  ;;  %v1318_v60 = vpack.c.bf16 %v1059_v16, %v1058_v50  ;;  %v1062_v15 = vmul.f32 %v1030_v32, %v1952_v30  ;;  %v1031_v58 = vmul.f32 %v1373_v55, %v1936_v40  ;;  %1394 = vpow2.f32 %v934_v62 }
 0x150   :  { %v1377_v42 = vpop.eup %1376  ;;  %v1319_v17 = vpack.c.bf16 %v1061_v21, %v1060_v4  ;;  %v1064_v7 = vmul.f32 %v1032_v12, %v1956_v27  ;;  %v1033_v0 = vmul.f32 %v1375_v18, %v1941_v34  ;;  %1396 = vpow2.f32 %v932_v63  ;;  %v2294_v12 = vld [vmem:[#allocation20_spill] sm:$0xff] }
 0x151   :  { %v1379_v59 = vpop.eup %1378  ;;  %1186 = vst [vmem:[%s2246_s3] sm:$0xff] %v1318_v60  ;;  %v1063_v10 = vmul.f32 %v1031_v58, %v1983_v46  ;;  %v1034_v28 = vmul.f32 %v1377_v42, %v1959_v31  ;;  %1398 = vpow2.f32 %v936_v47  ;;  %v946_v30 = vmul.f32 1.442695, %v890_v53 }
 0x152   :  { %v1381_v40 = vpop.eup %1380  ;;  %1187 = vst [vmem:[%s2246_s3 + $0x8] sm:$0xff] %v1319_v17  ;;  %v1065_v27 = vmul.f32 %v1033_v0, %v1990_v29  ;;  %v1036_v34 = vmul.f32 %v1379_v59, %v1962_v25  ;;  %1400 = vpow2.f32 %v938_v13  ;;  %v950_v63 = vmul.f32 1.442695, %v892_v52  ;;  %v2295_v52 = vld [vmem:[#allocation2_spill] sm:$0xff]  ;;  %v2297_v17 = vld [vmem:[#allocation33_spill] sm:$0xff] }
 0x153   :  { %v1383_v62 = vpop.eup %1382  ;;  %v1320_v14 = vpack.c.bf16 %v1063_v10, %v1062_v15  ;;  %v1066_v8 = vmul.f32 %v1034_v28, %v1998_v57  ;;  %v1035_v46 = vmul.f32 %v1381_v40, %v1965_v61  ;;  %1402 = vpow2.f32 %v942_v11  ;;  %v2296_v15 = vld [vmem:[#allocation32_spill] sm:$0xff]  ;;  %v2298_v10 = vld [vmem:[#allocation34_spill] sm:$0xff]  ;;  %v2300_v40 = vld [vmem:[#allocation3_spill] sm:$0xff] }
 0x154   :  { %v1385_v47 = vpop.eup %1384  ;;  %v1321_v31 = vpack.c.bf16 %v1065_v27, %v1064_v7  ;;  %v1068_v2 = vmul.f32 %v1036_v34, %v2002_v23  ;;  %v1037_v33 = vmul.f32 %v1383_v62, %v1969_v36  ;;  %1404 = vpow2.f32 %v940_v44 }
 0x155   :  { %v1387_v50 = vpop.eup %1386  ;;  %v623_v25 = vadd.f32 %v1846_v5, %v1891_v38  ;;  %1188 = vst [vmem:[%s2246_s3 + $0x10] sm:$0xff] %v1320_v14  ;;  %v1067_v29 = vmul.f32 %v1035_v46, %v2009_v24  ;;  %v1038_v61 = vmul.f32 %v1385_v47, %v1972_v49  ;;  %1406 = vpow2.f32 %v944_v51 }
 0x156   :  { %v1389_v57 = vpop.eup %1388  ;;  %1189 = vst [vmem:[%s2246_s3 + $0x18] sm:$0xff] %v1321_v31  ;;  %v1069_v36 = vmul.f32 %v1037_v33, %v2016_v22  ;;  %v976_v23 = vadd.f32 1.0, %v1387_v50  ;;  %1408 = vpow2.f32 %v946_v30  ;;  %v2124_v22 = vadd.f32 %v2043_v19, %v1897_v43  ;;  %v2293_v19 = vld [vmem:[#allocation31_spill] sm:$0xff]  ;;  %v2299_v30 = vld [vmem:[#allocation21_spill] sm:$0xff] }
 0x157   :  { %v1391_v13 = vpop.eup %1390  ;;  %v1322_v5 = vpack.c.bf16 %v1067_v29, %v1066_v8  ;;  %v2117_v11 = vmul.f32 %v1038_v61, %v623_v25  ;;  %v975_v54 = vadd.f32 1.0, %v1389_v57  ;;  %1410 = vpow2.f32 %v950_v63  ;;  %v2302_v57 = vld [vmem:[#allocation5_spill] sm:$0xff] }
 0x158   :  { %v1393_v44 = vpop.eup %1392  ;;  %v1323_v24 = vpack.c.bf16 %v1069_v36, %v1068_v2  ;;  %1412 = vrcp.f32 %v976_v23  ;;  %v977_v49 = vadd.f32 1.0, %v1391_v13  ;;  %v696_v32 = vadd.f32 %v1848_v6, %v1893_v39  ;;  %v2303_v23 = vld [vmem:[#allocation22_spill] sm:$0xff] }
 0x159   :  { %v1395_v48 = vpop.eup %1394  ;;  %1190 = vst [vmem:[%s2246_s3 + $0x20] sm:$0xff] %v1322_v5  ;;  %1414 = vrcp.f32 %v975_v54  ;;  %v978_v4 = vadd.f32 1.0, %v1393_v44  ;;  %v2137_v55 = vadd.f32 %v2293_v19, %v1889_v37  ;;  %v625_v18 = vadd.f32 %v2295_v52, %v2294_v12  ;;  %v2304_v44 = vld [vmem:[#allocation6_spill] sm:$0xff] }
 0x15a   :  { %v1397_v20 = vpop.eup %1396  ;;  %1191 = vst [vmem:[%s2246_s3 + $0x28] sm:$0xff] %v1323_v24  ;;  %1416 = vrcp.f32 %v977_v49  ;;  %v980_v53 = vadd.f32 1.0, %v1395_v48  ;;  %v2143_v9 = vadd.f32 %v2296_v15, %v1895_v41  ;;  %v891_v6 = vsub.f32 0.0, %v2124_v22  ;;  %v2305_v49 = vld [vmem:[#allocation23_spill] sm:$0xff] }
 0x15b   :  { %v1399_v16 = vpop.eup %1398  ;;  %1418 = vrcp.f32 %v978_v4  ;;  %v979_v51 = vadd.f32 1.0, %v1397_v20  ;;  %v2148_v7 = vadd.f32 %v2297_v17, %v1897_v43  ;;  %v893_v59 = vsub.f32 0.0, %v2131_v56  ;;  %v2301_v43 = vld [vmem:[#allocation4_spill] sm:$0xff] }
 0x15c   :  { %v1401_v21 = vpop.eup %1400  ;;  %1420 = vrcp.f32 %v980_v53  ;;  %v981_v60 = vadd.f32 1.0, %v1399_v16  ;;  %v2153_v28 = vadd.f32 %v2298_v10, %v1901_v45  ;;  %v698_v27 = vadd.f32 %v2300_v40, %v2299_v30  ;;  %v2306_v16 = vld [vmem:[#allocation24_spill] sm:$0xff]  ;;  %v2310_v40 = vld [vmem:[#allocation27_spill] sm:$0xff] }
 0x15d   :  { %v1403_v58 = vpop.eup %1402  ;;  %1422 = vrcp.f32 %v979_v51  ;;  %v982_v42 = vadd.f32 1.0, %v1401_v21  ;;  %v894_v63 = vsub.f32 0.0, %v2137_v55  ;;  %v629_v14 = vadd.f32 %v2301_v43, %v1891_v38  ;;  %v2311_v43 = vld [vmem:[#allocation28_spill] sm:$0xff] }
 0x15e   :  { %v1405_v37 = vpop.eup %1404  ;;  %1424 = vrcp.f32 %v981_v60  ;;  %v984_v0 = vadd.f32 1.0, %v1403_v58  ;;  %v896_v46 = vsub.f32 0.0, %v2143_v9  ;;  %v948_v31 = vmul.f32 1.442695, %v891_v6  ;;  %v2307_v60 = vld [vmem:[#allocation25_spill] sm:$0xff]  ;;  %v2308_v6 = vld [vmem:[#allocation7_spill] sm:$0xff] }
 0x15f   :  { %v1407_v41 = vpop.eup %1406  ;;  %1426 = vrcp.f32 %v982_v42  ;;  %v983_v34 = vadd.f32 1.0, %v1405_v37  ;;  %v895_v2 = vsub.f32 0.0, %v2148_v7  ;;  %v952_v25 = vmul.f32 1.442695, %v893_v59 }
 0x160   :  { %v1409_v62 = vpop.eup %1408  ;;  %1428 = vrcp.f32 %v984_v0  ;;  %v985_v8 = vadd.f32 1.0, %v1407_v41  ;;  %v897_v29 = vsub.f32 0.0, %v2153_v28  ;;  %v702_v36 = vadd.f32 %v2302_v57, %v1893_v39  ;;  %v2309_v0 = vld [vmem:[#allocation26_spill] sm:$0xff] }
 0x161   :  { %v1411_v47 = vpop.eup %1410  ;;  %1430 = vrcp.f32 %v983_v34  ;;  %v986_v45 = vadd.f32 1.0, %v1409_v62  ;;  %v954_v5 = vmul.f32 1.442695, %v894_v63  ;;  %v631_v24 = vadd.f32 %v2304_v44, %v2294_v12  ;;  %v2316_v57 = vld [vmem:[#allocation10_spill] sm:$0xff]  ;;  %v2317_v44 = vld [vmem:[#allocation11_spill] sm:$0xff] }
 0x162   :  { %v1413_v33 = vpop.eup %1412  ;;  %1432 = vrcp.f32 %v985_v8  ;;  %v988_v50 = vadd.f32 1.0, %v1411_v47  ;;  %v958_v4 = vmul.f32 1.442695, %v896_v46  ;;  %v956_v19 = vmul.f32 1.442695, %v895_v2  ;;  %v2312_v47 = vld [vmem:[#allocation8_spill] sm:$0xff] }
 0x163   :  { %v1415_v61 = vpop.eup %1414  ;;  %v1040_v13 = vmul.f32 %v1413_v33, %v2303_v23  ;;  %1434 = vrcp.f32 %v986_v45  ;;  %v960_v58 = vmul.f32 1.442695, %v897_v29  ;;  %v704_v17 = vadd.f32 %v2308_v6, %v2299_v30  ;;  %v2314_v2 = vld [vmem:[#allocation9_spill] sm:$0xff] }
 0x164   :  { %v1417_v54 = vpop.eup %1416  ;;  %v1039_v48 = vmul.f32 %v1415_v61, %v2305_v49  ;;  %1436 = vrcp.f32 %v988_v50  ;;  %v706_v33 = vadd.f32 %v2314_v2, %v1893_v39 }
 0x165   :  { %v1419_v20 = vpop.eup %1418  ;;  %v1072_v53 = vmul.f32 %v1040_v13, %v696_v32  ;;  %v1041_v51 = vmul.f32 %v1417_v54, %v2306_v16  ;;  %1438 = vpow2.f32 %v948_v31 }
 0x166   :  { %v1421_v21 = vpop.eup %1420  ;;  %v1071_v52 = vmul.f32 %v1039_v48, %v625_v18  ;;  %v1042_v15 = vmul.f32 %v1419_v20, %v2307_v60  ;;  %1440 = vpow2.f32 %v952_v25  ;;  %v2315_v25 = vld [vmem:[#allocation30_spill] sm:$0xff] }
 0x167   :  { %v1423_v42 = vpop.eup %1422  ;;  %v1073_v37 = vmul.f32 %v1041_v51, %v698_v27  ;;  %v1044_v59 = vmul.f32 %v1421_v21, %v2309_v0  ;;  %1442 = vpow2.f32 %v954_v5  ;;  %v633_v27 = vadd.f32 %v2312_v47, %v1891_v38  ;;  %v2319_v21 = vld [vmem:[#allocation13_spill] sm:$0xff]  ;;  %v2321_v47 = vld [vmem:[#allocation15_spill] sm:$0xff] }
 0x168   :  { %v1425_v10 = vpop.eup %1424  ;;  %v1324_v32 = vpack.c.bf16 %v1071_v52, %v2117_v11  ;;  %v1074_v41 = vmul.f32 %v1042_v15, %v629_v14  ;;  %v1043_v34 = vmul.f32 %v1423_v42, %v2310_v40  ;;  %1444 = vpow2.f32 %v958_v4  ;;  %v2313_v11 = vld [vmem:[#allocation29_spill] sm:$0xff] }
 0x169   :  { %v1427_v18 = vpop.eup %1426  ;;  %v1325_v63 = vpack.c.bf16 %v1073_v37, %v1072_v53  ;;  %v1076_v62 = vmul.f32 %v1044_v59, %v702_v36  ;;  %v1045_v8 = vmul.f32 %v1425_v10, %v2311_v43  ;;  %1446 = vpow2.f32 %v956_v19  ;;  %v2318_v53 = vld [vmem:[#allocation12_spill] sm:$0xff] }
 0x16a   :  { %v1429_v46 = vpop.eup %1428  ;;  %1192 = vst [vmem:[%s2246_s3 + $0x30] sm:$0xff] %v1324_v32  ;;  %v1075_v45 = vmul.f32 %v1043_v34, %v631_v24  ;;  %v1046_v14 = vmul.f32 %v1427_v18, %v2313_v11  ;;  %1448 = vpow2.f32 %v960_v58  ;;  %v635_v36 = vadd.f32 %v2316_v57, %v2294_v12 }
 0x16b   :  { %v1431_v31 = vpop.eup %1430  ;;  %1193 = vst [vmem:[%s2246_s3 + $0x38] sm:$0xff] %v1325_v63  ;;  %v1077_v50 = vmul.f32 %v1045_v8, %v704_v17  ;;  %v1048_v29 = vmul.f32 %v1429_v46, %v2315_v25  ;;  %v708_v24 = vadd.f32 %v2317_v44, %v2299_v30  ;;  %v639_v16 = vadd.f32 %v2318_v53, %v1891_v38  ;;  %v2323_v25 = vld [vmem:[#allocation17_spill] sm:$0xff] }
 0x16c   :  { %v1433_v61 = vpop.eup %1432  ;;  %v1326_v23 = vpack.c.bf16 %v1075_v45, %v1074_v41  ;;  %v1078_v13 = vmul.f32 %v1046_v14, %v633_v27  ;;  %v1047_v5 = vmul.f32 %v1431_v31, %v2052_v3  ;;  %v712_v52 = vadd.f32 %v2319_v21, %v1893_v39  ;;  %v2322_v14 = vld [vmem:[#allocation16_spill] sm:$0xff] }
 0x16d   :  { %v1435_v54 = vpop.eup %1434  ;;  %v1327_v49 = vpack.c.bf16 %v1077_v50, %v1076_v62  ;;  %v1080_v48 = vmul.f32 %v1048_v29, %v706_v33  ;;  %v1049_v4 = vmul.f32 %v1433_v61, %v2060_v35  ;;  %v2320_v62 = vld [vmem:[#allocation14_spill] sm:$0xff]  ;;  %v714_v27 = vadd.f32 %v2321_v47, %v2299_v30 }
 0x16e   :  { %v1437_v20 = vpop.eup %1436  ;;  %1194 = vst [vmem:[%s2246_s3 + $0x40] sm:$0xff] %v1326_v23  ;;  %v1079_v51 = vmul.f32 %v1047_v5, %v635_v36  ;;  %v1050_v19 = vmul.f32 %v1435_v54, %v2066_v26  ;;  %v641_v43 = vadd.f32 %v2320_v62, %v2294_v12  ;;  %v643_v31 = vadd.f32 %v2322_v14, %v1891_v38  ;;  %v2324_v36 = vld [vmem:[#allocation18_spill] sm:$0xff]  ;;  %v2325_v38 = vld [vmem:[#allocation19_spill] sm:$0xff] }
 0x16f   :  { %v1439_v3 = vpop.eup %1438  ;;  %1195 = vst [vmem:[%s2246_s3 + $0x48] sm:$0xff] %v1327_v49  ;;  %v1081_v35 = vmul.f32 %v1049_v4, %v708_v24  ;;  %v1052_v60 = vmul.f32 %v1437_v20, %v2072_v1  ;;  %v716_v29 = vadd.f32 %v2323_v25, %v1893_v39  ;;  %v645_v23 = vadd.f32 %v2324_v36, %v2294_v12 }
 0x170   :  { %v1441_v15 = vpop.eup %1440  ;;  %v1328_v58 = vpack.c.bf16 %v1079_v51, %v1078_v13  ;;  %v1082_v42 = vmul.f32 %v1050_v19, %v639_v16  ;;  %v987_v6 = vadd.f32 1.0, %v1439_v3  ;;  %v718_v54 = vadd.f32 %v2325_v38, %v2299_v30 }
 0x171   :  { %v1443_v17 = vpop.eup %1442  ;;  %v1329_v37 = vpack.c.bf16 %v1081_v35, %v1080_v48  ;;  %v1084_v0 = vmul.f32 %v1052_v60, %v712_v52  ;;  %v989_v59 = vadd.f32 1.0, %v1441_v15 }
 0x172   :  { %v1445_v26 = vpop.eup %1444  ;;  %1196 = vst [vmem:[%s2246_s3 + $0x50] sm:$0xff] %v1328_v58  ;;  %1450 = vrcp.f32 %v987_v6  ;;  %v990_v10 = vadd.f32 1.0, %v1443_v17 }
 0x173   :  { %v1447_v32 = vpop.eup %1446  ;;  %1197 = vst [vmem:[%s2246_s3 + $0x58] sm:$0xff] %v1329_v37  ;;  %1452 = vrcp.f32 %v989_v59  ;;  %v992_v1 = vadd.f32 1.0, %v1445_v26 }
 0x174   :  { %v1449_v41 = vpop.eup %1448  ;;  %1454 = vrcp.f32 %v990_v10  ;;  %v991_v40 = vadd.f32 1.0, %v1447_v32 }
 0x175   :  { %1456 = vrcp.f32 %v992_v1  ;;  %v993_v34 = vadd.f32 1.0, %v1449_v41 }
 0x176   :  { %1458 = vrcp.f32 %v991_v40 }
 0x177   :  { %1460 = vrcp.f32 %v993_v34 }
 0x17c   :  { %v1451_v18 = vpop.eup %1450 }
 0x17d   :  { %v1453_v63 = vpop.eup %1452  ;;  %v1051_v8 = vmul.f32 %v1451_v18, %v2124_v22 }
 0x17e   :  { %v1455_v46 = vpop.eup %1454  ;;  %v1053_v45 = vmul.f32 %v1453_v63, %v2131_v56 }
 0x17f   :  { %v1457_v11 = vpop.eup %1456  ;;  %v1083_v2 = vmul.f32 %v1051_v8, %v641_v43  ;;  %v1054_v33 = vmul.f32 %v1455_v46, %v2137_v55 }
 0x180   :  { %v1459_v50 = vpop.eup %1458  ;;  %v1085_v61 = vmul.f32 %v1053_v45, %v714_v27  ;;  %v1056_v22 = vmul.f32 %v1457_v11, %v2143_v9 }
 0x181   :  { %v1461_v57 = vpop.eup %1460  ;;  %v1330_v13 = vpack.c.bf16 %v1083_v2, %v1082_v42  ;;  %v1086_v56 = vmul.f32 %v1054_v33, %v643_v31  ;;  %v1055_v5 = vmul.f32 %v1459_v50, %v2148_v7 }
 0x182   :  { %v1331_v44 = vpack.c.bf16 %v1085_v61, %v1084_v0  ;;  %v1088_v55 = vmul.f32 %v1056_v22, %v716_v29  ;;  %v1057_v24 = vmul.f32 %v1461_v57, %v2153_v28 }
 0x183   :  { %1198 = vst [vmem:[%s2246_s3 + $0x60] sm:$0xff] %v1330_v13  ;;  %v1087_v39 = vmul.f32 %v1055_v5, %v645_v23 }
 0x184   :  { %1199 = vst [vmem:[%s2246_s3 + $0x68] sm:$0xff] %v1331_v44  ;;  %v1089_v12 = vmul.f32 %v1057_v24, %v718_v54 }
 0x185   :  { %v1332_v9 = vpack.c.bf16 %v1087_v39, %v1086_v56 }
 0x186   :  { %v1333_v49 = vpack.c.bf16 %v1089_v12, %v1088_v55 }
 0x187   :  { %1200 = vst [vmem:[%s2246_s3 + $0x70] sm:$0xff] %v1332_v9 }
 0x188   :  { %1201 = vst [vmem:[%s2246_s3 + $0x78] sm:$0xff] %v1333_v49 }

// kernel: transformer_forward.26
= control target key start
LH: loop header
LB: loop body
LE: loop exit
PB: predicated region body
PF: predicated region fallthrough
CT: control target
= control target key end

     0   :  { %vm330_vm0 = vcmask 261120   ;;  %v74_v32 = vlaneseq  ;;  %vm519_vm1 = vcmask 326656   ;;  %s3007_s8 = smov 96   ;;  %s3008_s28 = smov 64   ;;  %vm1119_vm2 = vcmask 195584   ;;  %s4053_s1 = inlined_call_operand.vmem [shape: bf16[160,480], index: 1, kind: input, shape index: {}]   ;;  %s4054_s0 = inlined_call_operand.vmem [shape: bf16[2,32,160], index: 0, kind: input, shape index: {}]   ;;  %s4055_s2 = inlined_call_operand.vmem [shape: f32[1,480], index: 2, kind: input, shape index: {}]   ;;  %s4056_s5 = inlined_call_operand.vmem [shape: f32[4,32,32], index: 5, kind: input, shape index: {}]   ;;  %s4057_s3 = inlined_call_operand.vmem [shape: bf16[160,160], index: 3, kind: input, shape index: {}]   ;;  %s4058_s4 = inlined_call_operand.vmem [shape: f32[1,160], index: 4, kind: input, shape index: {}]   ;;  %s4059_s6 = inlined_call_operand.vmem [shape: f32[2,32,160], index: 6, kind: output, shape index: {}]  }
   0x1   :  { %v2777_v0 = vld [vmem:[%s4053_s1 + $0x4] ss:$16 sps:$4 sm:$0xff]   ;;  %v2779_v1 = vld [vmem:[%s4053_s1] ss:$16 sps:$4 sm:$0xff]   ;;  %v2813_v24 = vld [vmem:[%s4053_s1 + $0x8] ss:$16 sps:$4 sm:$0xff]  }
   0x2   :  { %343 = vmatprep.subr.bf16.mxu1 %v2777_v0  ;;  %v2780_v2 = vld [vmem:[%s4053_s1 + $0x24] ss:$16 sps:$4 sm:$0xff]   ;;  %v2782_v3 = vld [vmem:[%s4053_s1 + $0x20] ss:$16 sps:$4 sm:$0xff]   ;;  %v2815_v25 = vld [vmem:[%s4053_s1 + $0xc] ss:$16 sps:$4 sm:$0xff]  }
   0x3   :  { %344 = vmatpush1.bf16.msra.mxu1 %v2779_v1  ;;  %v2783_v4 = vld [vmem:[%s4053_s1 + $0x44] ss:$16 sps:$4 sm:$0xff]   ;;  %v2785_v5 = vld [vmem:[%s4053_s1 + $0x40] ss:$16 sps:$4 sm:$0xff]   ;;  %v2818_v26 = vld [vmem:[%s4053_s1 + $0x2c] ss:$16 sps:$4 sm:$0xff]  }
   0x4   :  { %345 = vmatprep.subr.bf16.mxu1 %v2780_v2  ;;  %v2786_v6 = vld [vmem:[%s4053_s1 + $0x64] ss:$16 sps:$4 sm:$0xff]   ;;  %v2788_v7 = vld [vmem:[%s4053_s1 + $0x60] ss:$16 sps:$4 sm:$0xff]   ;;  %v2816_v27 = vld [vmem:[%s4053_s1 + $0x28] ss:$16 sps:$4 sm:$0xff]  }
   0x5   :  { %v2789_v8 = vld [vmem:[%s4053_s1 + $0x84] ss:$16 sps:$4 sm:$0xff]   ;;  %v2791_v10 = vld [vmem:[%s4053_s1 + $0x80] ss:$16 sps:$4 sm:$0xff]   ;;  %v2821_v28 = vld [vmem:[%s4053_s1 + $0x4c] ss:$16 sps:$4 sm:$0xff]  }
   0x6   :  { %v3086_v9 = vld [vmem:[%s4054_s0 + $0x4] ss:$8 sps:$4 sm:$0xff]   ;;  %v2794_v12 = vld [vmem:[%s4053_s1 + $0xa0] ss:$16 sps:$4 sm:$0xff]   ;;  %v3131_v22 = vld [vmem:[%s4054_s0 + $0x14] ss:$8 sps:$4 sm:$0xff]  }
   0x7   :  { %346 = vmatpush1.bf16.msra.mxu1 %v2782_v3  ;;  %v2792_v11 = vld [vmem:[%s4053_s1 + $0xa4] ss:$16 sps:$4 sm:$0xff]   ;;  %2419 = vmatprep.mubr.msk.bf16.mxu1 %vm330_vm0, %v3086_v9  ;;  %v2797_v14 = vld [vmem:[%s4053_s1 + $0xc0] ss:$16 sps:$4 sm:$0xff]   ;;  %v2819_v29 = vld [vmem:[%s4053_s1 + $0x48] ss:$16 sps:$4 sm:$0xff]  }
   0x8   :  { %347 = vmatprep.subr.bf16.mxu1 %v2783_v4  ;;  %v2795_v13 = vld [vmem:[%s4053_s1 + $0xc4] ss:$16 sps:$4 sm:$0xff]   ;;  %v2800_v16 = vld [vmem:[%s4053_s1 + $0xe0] ss:$16 sps:$4 sm:$0xff]   ;;  %v2824_v30 = vld [vmem:[%s4053_s1 + $0x6c] ss:$16 sps:$4 sm:$0xff]  }
   0x9   :  { %v2798_v15 = vld [vmem:[%s4053_s1 + $0xe4] ss:$16 sps:$4 sm:$0xff]   ;;  %v2803_v18 = vld [vmem:[%s4053_s1 + $0x100] ss:$16 sps:$4 sm:$0xff]   ;;  %v2822_v31 = vld [vmem:[%s4053_s1 + $0x68] ss:$16 sps:$4 sm:$0xff]  }
   0xa   :  { %v2801_v17 = vld [vmem:[%s4053_s1 + $0x104] ss:$16 sps:$4 sm:$0xff]   ;;  %v2806_v20 = vld [vmem:[%s4053_s1 + $0x120] ss:$16 sps:$4 sm:$0xff]   ;;  %v3166_v33 = vshrl.u32 %v74_v32, 7  ;;  %s3009_s29 = smov 88  }
   0xb   :  { %348 = vmatpush1.bf16.msra.mxu1 %v2785_v5  ;;  %v2804_v19 = vld [vmem:[%s4053_s1 + $0x124] ss:$16 sps:$4 sm:$0xff]   ;;  %v3126_v21 = vld [vmem:[%s4054_s0] ss:$8 sps:$4 sm:$0xff]   ;;  %v3139_v23 = vld [vmem:[%s4054_s0 + $0x10] ss:$8 sps:$4 sm:$0xff]  }
   0xc   :  { %349 = vmatprep.subr.bf16.mxu1 %v2786_v6  ;;  %v4061_v34 = vsub.s32 0, %v3166_v33  ;;  %v3172_v35 = vld [vmem:[%s4055_s2] sm:$0xf]  ;;  %v4060_v36 = vsub.s32 1, %v3166_v33  ;;  %v2825_v37 = vld [vmem:[%s4053_s1 + $0x88] ss:$16 sps:$4 sm:$0xff]  }
   0xd   :  { %v2827_v38 = vld [vmem:[%s4053_s1 + $0x8c] ss:$16 sps:$4 sm:$0xff]   ;;  %v2828_v42 = vld [vmem:[%s4053_s1 + $0xa8] ss:$16 sps:$4 sm:$0xff]   ;;  %s3010_s30 = smov 56   ;;  %s3011_s7 = smov 24  }
   0xe   :  { %v3184_v39 = vrot.slane %v3172_v35, %v4061_v34  ;;  %v2830_v40 = vld [vmem:[%s4053_s1 + $0xac] ss:$16 sps:$4 sm:$0xff]   ;;  %v3192_v41 = vrot.slane %v3172_v35, %v4060_v36  ;;  %v2833_v52 = vld [vmem:[%s4054_s0 + $0x20] ss:$8 sps:$4 sm:$0xff]   ;;  %vm1265_vm3 = vcmask 130048   ;;  %s3013_s17 = smov 48  }
   0xf   :  { %350 = vmatpush1.bf16.msra.mxu1 %v2788_v7  ;;  %v2831_v50 = vld [vmem:[%s4054_s0 + $0x24] ss:$8 sps:$4 sm:$0xff]   ;;  %v2834_v53 = vld [vmem:[%s4053_s1 + $0xc8] ss:$16 sps:$4 sm:$0xff]   ;;  %v2840_v7 = vld [vmem:[%s4054_s0 + $0x34] ss:$8 sps:$4 sm:$0xff]  }
  0x10   :  { %351 = vmatprep.subr.bf16.mxu1 %v2789_v8  ;;  %v2836_v56 = vld [vmem:[%s4053_s1 + $0xcc] ss:$16 sps:$4 sm:$0xff]   ;;  %v2837_v63 = vld [vmem:[%s4053_s1 + $0xe8] ss:$16 sps:$4 sm:$0xff]   ;;  %s3014_s18 = smov 112   ;;  %s3016_s25 = smov 8  }
  0x11   :  { %v2839_v60 = vld [vmem:[%s4053_s1 + $0xec] ss:$16 sps:$4 sm:$0xff]   ;;  %vm1645_vm4 = vcmask 64512   ;;  %s3018_s10 = smov 80   ;;  %s3019_s11 = smov 40   ;;  %vm2108_vm5 = vcmask 654336  }
  0x12   :  { %s3020_s23 = smov 120   ;;  %vm2117_vm6 = vcmask 982016  }
  0x13   :  { %352 = vmatpush1.bf16.msra.mxu1 %v2791_v10  ;;  %v2842_v10 = vld [vmem:[%s4054_s0 + $0x30] ss:$8 sps:$4 sm:$0xff]   ;;  %s3015_s0 = smov 104  }
  0x14   :  { %353 = vmatprep.subr.bf16.mxu1 %v2792_v11  ;;  %v2843_v11 = vld [vmem:[%s4053_s1 + $0x108] ss:$16 sps:$4 sm:$0xff]  }
  0x17   :  { %354 = vmatpush1.bf16.msra.mxu1 %v2794_v12 }
  0x18   :  { %355 = vmatprep.subr.bf16.mxu1 %v2795_v13 }
  0x1b   :  { %356 = vmatpush1.bf16.msra.mxu1 %v2797_v14  ;;  %v2845_v14 = vld [vmem:[%s4053_s1 + $0x10c] ss:$16 sps:$4 sm:$0xff]  }
  0x1c   :  { %357 = vmatprep.subr.bf16.mxu1 %v2798_v15 }
  0x1f   :  { %358 = vmatpush1.bf16.msra.mxu1 %v2800_v16 }
  0x20   :  { %359 = vmatprep.subr.bf16.mxu1 %v2801_v17 }
  0x23   :  { %360 = vmatpush1.bf16.msra.mxu1 %v2803_v18  ;;  %v2848_v18 = vld [vmem:[%s4053_s1 + $0x12c] ss:$16 sps:$4 sm:$0xff]  }
  0x24   :  { %361 = vmatprep.subr.bf16.mxu1 %v2804_v19 }
  0x27   :  { %362 = vmatpush1.bf16.msra.mxu1 %v2806_v20 }
  0x28   :  { %416 = vmatprep.subr.bf16.mxu1 %v2815_v25 }
  0x2a   :  { %376 = vmatmul.mubr.bf16.vlgmr.msra.gmra.mrb[0].mxu1 %v3126_v21 }
  0x2b   :  { %2420 = vmatprep.mubr.msk.bf16.mxu1 %vm330_vm0, %v3131_v22  ;;  %417 = vmatpush1.bf16.msra.mxu1 %v2813_v24  ;;  %v2846_v24 = vld [vmem:[%s4053_s1 + $0x128] ss:$16 sps:$4 sm:$0xff]  }
  0x2c   :  { %418 = vmatprep.subr.bf16.mxu1 %v2818_v26 }
  0x2f   :  { %419 = vmatpush1.bf16.msra.mxu1 %v2816_v27 }
  0x30   :  { %420 = vmatprep.subr.bf16.mxu1 %v2821_v28 }
  0x32   :  { %386 = vmatmul.mubr.bf16.gmra.mrb[4].mxu1 %v3139_v23 }
  0x33   :  { %421 = vmatpush1.bf16.msra.mxu1 %v2819_v29  ;;  %2421 = vmatprep.mubr.msk.bf16.mxu1 %vm330_vm0, %v2831_v50 }
  0x34   :  { %422 = vmatprep.subr.bf16.mxu1 %v2824_v30 }
  0x37   :  { %423 = vmatpush1.bf16.msra.mxu1 %v2822_v31 }
  0x38   :  { %424 = vmatprep.subr.bf16.mxu1 %v2827_v38 }
  0x3a   :  { %396 = vmatmul.mubr.bf16.gmra.mrb[8].mxu1 %v2833_v52 }
  0x3b   :  { %425 = vmatpush1.bf16.msra.mxu1 %v2825_v37  ;;  %2422 = vmatprep.mubr.msk.bf16.mxu1 %vm330_vm0, %v2840_v7 }
  0x3c   :  { %426 = vmatprep.subr.bf16.mxu1 %v2830_v40 }
  0x3f   :  { %427 = vmatpush1.bf16.msra.mxu1 %v2828_v42 }
  0x40   :  { %428 = vmatprep.subr.bf16.mxu1 %v2836_v56 }
  0x42   :  { %406 = vmatmul.mubr.bf16.gmra.mrb[12].mxu1 %v2842_v10 }
  0x43   :  { %429 = vmatpush1.bf16.msra.mxu1 %v2834_v53  ;;  %2423 = vmatprep.mubr.msk.bf16.mxu1 %vm330_vm0, %v3086_v9  ;;  %v84_v53 = vsub.s32 2, %v3166_v33 }
  0x44   :  { %430 = vmatprep.subr.bf16.mxu1 %v2839_v60 }
  0x47   :  { %431 = vmatpush1.bf16.msra.mxu1 %v2837_v63 }
  0x48   :  { %432 = vmatprep.subr.bf16.mxu1 %v2845_v14 }
  0x4b   :  { %433 = vmatpush1.bf16.msra.mxu1 %v2843_v11 }
  0x4c   :  { %434 = vmatprep.subr.bf16.mxu1 %v2848_v18 }
  0x4f   :  { %435 = vmatpush1.bf16.msra.mxu1 %v2846_v24 }
  0x52   :  { %449 = vmatmul.mubr.bf16.vlgmr.msra.gmra.mrb[16].mxu1 %v3126_v21 }
  0x53   :  { %2424 = vmatprep.mubr.msk.bf16.mxu1 %vm330_vm0, %v3131_v22 }
  0x5a   :  { %459 = vmatmul.mubr.bf16.gmra.mrb[20].mxu1 %v3139_v23 }
  0x5b   :  { %2425 = vmatprep.mubr.msk.bf16.mxu1 %vm330_vm0, %v2831_v50 }
  0x62   :  { %469 = vmatmul.mubr.bf16.gmra.mrb[24].mxu1 %v2833_v52 }
  0x63   :  { %2426 = vmatprep.mubr.msk.bf16.mxu1 %vm330_vm0, %v2840_v7 }
  0x6a   :  { %479 = vmatmul.mubr.bf16.gmra.mrb[28].mxu1 %v2842_v10 }
  0xfd   :  { %v377_v43 = vpop.f32.mrb[0].mxu1 }
  0xfe   :  { %v378_v44 = vadd.f32 %v377_v43, %v3184_v39  ;;  %v379_v45 = vpop.f32.mrb[1].mxu1 }
  0xff   :  { %v380_v46 = vadd.f32 %v379_v45, %v3192_v41  ;;  %v381_v47 = vpop.f32.mrb[2].mxu1 }
 0x100   :  { %v382_v48 = vadd.f32 %v381_v47, %v3184_v39  ;;  %v383_v49 = vpop.f32.mrb[3].mxu1  ;;  %v489_v54 = vmul.f32 0.15811388, %v378_v44 }
 0x101   :  { %v384_v51 = vadd.f32 %v383_v49, %v3192_v41  ;;  %v3214_v57 = vmul.f32 0.15811388, %v380_v46 }
 0x102   :  { %v490_v55 = vmul.f32 0.15811388, %v382_v48 }
 0x103   :  { %v3216_v58 = vpack.c.bf16 %v384_v51, %v380_v46  ;;  %v3218_v59 = vmul.f32 0.15811388, %v384_v51 }
 0x104   :  { %v3223_v61 = vpack.c.bf16 %v490_v55, %v489_v54  ;;  %v88_v54 = vsub.s32 3, %v3166_v33 }
 0x105   :  { %v387_v62 = vpop.f32.mrb[4].mxu1  ;;  %515 = vrot.lane.b32.xlu0 %v3216_v58, %s3007_s8  ;;  %v1626_v0 = vpack.c.bf16 %v3218_v59, %v3214_v57 }
 0x106   :  { %v388_v1 = vadd.f32 %v387_v62, %v3184_v39  ;;  %v389_v2 = vpop.f32.mrb[5].mxu1  ;;  %2563 = vmatprep.mubr.msk.bf16.mxu0 %vm519_vm1, %v3223_v61 }
 0x107   :  { %v390_v3 = vadd.f32 %v389_v2, %v3192_v41  ;;  %v391_v4 = vpop.f32.mrb[6].mxu1 }
 0x108   :  { %v392_v5 = vadd.f32 %v391_v4, %v3184_v39  ;;  %v393_v6 = vpop.f32.mrb[7].mxu1  ;;  %v491_v12 = vmul.f32 0.15811388, %v388_v1  ;;  %v3308_v1 = vrot.slane %v3172_v35, %v84_v53 }
 0x109   :  { %v394_v8 = vadd.f32 %v393_v6, %v3192_v41  ;;  %v3251_v15 = vmul.f32 0.15811388, %v390_v3 }
 0x10a   :  { %v492_v13 = vmul.f32 0.15811388, %v392_v5 }
 0x10b   :  { %v3253_v16 = vpack.c.bf16 %v394_v8, %v390_v3  ;;  %v3255_v17 = vmul.f32 0.15811388, %v394_v8 }
 0x10c   :  { %v3260_v19 = vpack.c.bf16 %v492_v13, %v491_v12 }
 0x10d   :  { %v1627_v20 = vpack.c.bf16 %v3255_v17, %v3251_v15  ;;  %517 = vrot.lane.b32.xlu0 %v3253_v16, %s3007_s8  ;;  %v397_v22 = vpop.f32.mrb[8].mxu1 }
 0x10e   :  { %v398_v23 = vadd.f32 %v397_v22, %v3184_v39  ;;  %v399_v27 = vpop.f32.mrb[9].mxu1  ;;  %v3343_v22 = vld [vmem:[%s4056_s5] sm:$0xff] }
 0x10f   :  { %v401_v28 = vpop.f32.mrb[10].mxu1  ;;  %v400_v30 = vadd.f32 %v399_v27, %v3192_v41 }
 0x110   :  { %v493_v29 = vmul.f32 0.15811388, %v398_v23  ;;  %v402_v31 = vadd.f32 %v401_v28, %v3184_v39  ;;  %v403_v32 = vpop.f32.mrb[11].mxu1 }
 0x111   :  { %v3286_v37 = vmul.f32 0.15811388, %v400_v30  ;;  %v404_v40 = vadd.f32 %v403_v32, %v3192_v41 }
 0x112   :  { %v494_v38 = vmul.f32 0.15811388, %v402_v31 }
 0x113   :  { %v3292_v46 = vpack.c.bf16 %v404_v40, %v400_v30  ;;  %v3294_v47 = vmul.f32 0.15811388, %v404_v40 }
 0x114   :  { %v3290_v45 = vpack.c.bf16 %v494_v38, %v493_v29  ;;  %v3349_v29 = vld [vmem:[%s4056_s5 + $0x8] sm:$0xff] }
 0x115   :  { %v407_v42 = vpop.f32.mrb[12].mxu1  ;;  %v1628_v55 = vpack.c.bf16 %v3294_v47, %v3286_v37 }
 0x116   :  { %v408_v43 = vadd.f32 %v407_v42, %v3184_v39  ;;  %v409_v44 = vpop.f32.mrb[13].mxu1  ;;  %2571 = vmatprep.mubr.msk.bf16.mxu1 %vm519_vm1, %v3290_v45 }
 0x117   :  { %v410_v48 = vadd.f32 %v409_v44, %v3192_v41  ;;  %v411_v49 = vpop.f32.mrb[14].mxu1 }
 0x118   :  { %v495_v50 = vmul.f32 0.15811388, %v408_v43  ;;  %v412_v51 = vadd.f32 %v411_v49, %v3184_v39  ;;  %v413_v52 = vpop.f32.mrb[15].mxu1  ;;  %v3311_v39 = vrot.slane %v3172_v35, %v88_v54  ;;  %v3358_v43 = vld [vmem:[%s4056_s5 + $0x18] sm:$0xff] }
 0x119   :  { %v3302_v56 = vmul.f32 0.15811388, %v410_v48  ;;  %v414_v60 = vadd.f32 %v413_v52, %v3192_v41 }
 0x11a   :  { %v496_v63 = vmul.f32 0.15811388, %v412_v51 }
 0x11b   :  { %v3313_v3 = vpack.c.bf16 %v414_v60, %v410_v48  ;;  %v3315_v4 = vmul.f32 0.15811388, %v414_v60 }
 0x11c   :  { %v3317_v6 = vpack.c.bf16 %v496_v63, %v495_v50 }
 0x11d   :  { %v1629_v11 = vpack.c.bf16 %v3315_v4, %v3302_v56 }
 0x125   :  { %v450_v62 = vpop.f32.mrb[16].mxu1 }
 0x126   :  { %v452_v2 = vpop.f32.mrb[17].mxu1  ;;  %v451_v41 = vadd.f32 %v450_v62, %v3308_v1 }
 0x127   :  { %v454_v5 = vpop.f32.mrb[18].mxu1  ;;  %v453_v7 = vadd.f32 %v452_v2, %v3311_v39 }
 0x128   :  { %v455_v8 = vadd.f32 %v454_v5, %v3308_v1  ;;  %v456_v10 = vpop.f32.mrb[19].mxu1 }
 0x129   :  { %v457_v35 = vadd.f32 %v456_v10, %v3311_v39 }
 0x12a   :  { %v3325_v12 = vpack.c.bf16 %v455_v8, %v451_v41 }
 0x12b   :  { %v3327_v13 = vpack.c.bf16 %v457_v35, %v453_v7 }
 0x12d   :  { %v460_v14 = vpop.f32.mrb[20].mxu1 }
 0x12e   :  { %v461_v18 = vadd.f32 %v460_v14, %v3308_v1  ;;  %v3330_v24 = vpop.f32.mrb[21].mxu1 }
 0x177   :  { %v516_v9 = vpop.permute.xlu0 %515 }
 0x178   :  { %2687 = vmatprep.subr.msk.bf16.mxu0 %vm519_vm1, %v516_v9  ;;  %v527_v25 = vsel %vm519_vm1, %v516_v9, 0  ;;  %v464_v9 = vpop.f32.mrb[22].mxu1 }
 0x179   :  { %2560 = vmatpush3.bf16.xpose.msra.mxu0 %v527_v25  ;;  %v465_v25 = vadd.f32 %v464_v9, %v3308_v1 }
 0x17f   :  { %v518_v26 = vpop.permute.xlu0 %517 }
 0x180   :  { %2688 = vmatprep.subr.msk.bf16.mxu0 %vm519_vm1, %v518_v26  ;;  %v530_v21 = vsel %vm519_vm1, %v518_v26, 0  ;;  %v3333_v26 = vpack.c.bf16 %v465_v25, %v461_v18 }
 0x181   :  { %2562 = vmatpush3.bf16.xpose.msra.mxu0 %v530_v21  ;;  %v3338_v21 = vld [vmem:[%s4056_s5 + $0x10] sm:$0xff] }
 0x188   :  { %2564 = vmatmul.mubr.msk.bf16.vlgmr.msra.gmra.mrb[0].mxu0 %vm519_vm1, %v3260_v19 }
 0x25b   :  { %v2565_v23 = vpop.f32.mrb[0].mxu0 }
 0x25c   :  { %v575_v27 = vadd.f32 %v2565_v23, %v3338_v21  ;;  %v566_v28 = vpop.f32.mrb[1].mxu0 }
 0x25d   :  { %v567_v30 = vadd.f32 %v566_v28, %v3343_v22  ;;  %v2566_v31 = vpop.f32.mrb[2].mxu0 }
 0x25e   :  { %v569_v32 = vpop.f32.mrb[3].mxu0  ;;  %v654_v38 = vsel %vm330_vm0, %v575_v27, -inf  ;;  %v578_v44 = vadd.f32 %v2566_v31, %v3358_v43 }
 0x25f   :  { %v570_v40 = vadd.f32 %v569_v32, %v3349_v29  ;;  %655 = vmax.xlane.f32.xlu0 %v654_v38  ;;  %v648_v42 = vsel %vm330_vm0, %v567_v30, -inf  ;;  %v463_v38 = vadd.f32 %v3330_v24, %v3311_v39 }
 0x260   :  { %649 = vmax.xlane.f32.xlu1 %v648_v42  ;;  %v657_v49 = vsel %vm330_vm0, %v578_v44, -inf }
 0x261   :  { %v651_v48 = vsel %vm330_vm0, %v570_v40, -inf }
 0x264   :  { %652 = vmax.xlane.f32.xlu1 %v651_v48 }
 0x268   :  { %658 = vmax.xlane.f32.xlu1 %v657_v49 }
 0x275   :  { %744 = vrot.lane.b32.xlu0 %v3333_v26, %s3008_s28 }
 0x279   :  { %877 = vrot.lane.b32.xlu0 %v3223_v61, %s3009_s29  ;;  %742 = vrot.lane.b32.xlu1 %v3325_v12, %s3008_s28 }
 0x27d   :  { %881 = vrot.lane.b32.xlu1 %v3216_v58, %s3010_s30  ;;  %952 = vrot.lane.b32.xlu0 %v3292_v46, %s3010_s30 }
 0x281   :  { %583 = vrot.lane.b32.xlu1 %v3292_v46, %s3007_s8  ;;  %948 = vrot.lane.b32.xlu0 %v3290_v45, %s3009_s29 }
 0x2ec   :  { %v656_v50 = vpop.xlane.xlu0 %655 }
 0x2ed   :  { %v674_v51 = vsub.f32 %v575_v27, %v656_v50  ;;  %v650_v52 = vpop.xlane.xlu1 %649 }
 0x2ee   :  { %v672_v53 = vsub.f32 %v567_v30, %v650_v52 }
 0x2ef   :  { %v684_v54 = vmul.f32 1.442695, %v674_v51 }
 0x2f0   :  { %v680_v60 = vmul.f32 1.442695, %v672_v53  ;;  %v745_v35 = vpop.permute.xlu0 %744 }
 0x2f1   :  { %2879 = vpow2.f32 %v684_v54  ;;  %v653_v62 = vpop.xlane.xlu1 %652 }
 0x2f2   :  { %2881 = vpow2.f32 %v680_v60  ;;  %v673_v63 = vsub.f32 %v570_v40, %v653_v62  ;;  %v466_v40 = vpop.f32.mrb[23].mxu1 }
 0x2f3   :  { %v467_v42 = vadd.f32 %v466_v40, %v3311_v39  ;;  %v470_v48 = vpop.f32.mrb[24].mxu1 }
 0x2f4   :  { %v682_v41 = vmul.f32 1.442695, %v673_v63  ;;  %v471_v49 = vadd.f32 %v470_v48, %v3308_v1  ;;  %v472_v50 = vpop.f32.mrb[25].mxu1 }
 0x2f5   :  { %v659_v2 = vpop.xlane.xlu1 %658  ;;  %v473_v51 = vadd.f32 %v472_v50, %v3311_v39  ;;  %v474_v52 = vpop.f32.mrb[26].mxu1 }
 0x2f6   :  { %v675_v5 = vsub.f32 %v578_v44, %v659_v2  ;;  %v3406_v44 = vpack.c.bf16 %v467_v42, %v463_v38  ;;  %v475_v53 = vadd.f32 %v474_v52, %v3308_v1  ;;  %v476_v54 = vpop.f32.mrb[27].mxu1 }
 0x2f7   :  { %v477_v60 = vadd.f32 %v476_v54, %v3311_v39  ;;  %v480_v62 = vpop.f32.mrb[28].mxu1 }
 0x2f8   :  { %v686_v7 = vmul.f32 1.442695, %v675_v5  ;;  %v3412_v63 = vpack.c.bf16 %v475_v53, %v471_v49  ;;  %v481_v24 = vadd.f32 %v480_v62, %v3308_v1  ;;  %v482_v2 = vpop.f32.mrb[29].mxu1 }
 0x2f9   :  { %v743_v8 = vpop.permute.xlu1 %742  ;;  %v3415_v5 = vpack.c.bf16 %v477_v60, %v473_v51 }
 0x2fa   :  { %2883 = vpow2.f32 %v686_v7  ;;  %2575 = vmatprep.subr.bf16.mxu0 %v743_v8  ;;  %v484_v7 = vpop.f32.mrb[30].mxu1 }
 0x2fb   :  { %v3377_v10 = vpop.eup %2879  ;;  %2576 = vmatpush3.bf16.msra.mxu0 %v743_v8  ;;  %2885 = vpow2.f32 %v682_v41  ;;  %v483_v41 = vadd.f32 %v482_v2, %v3311_v39  ;;  %v485_v8 = vadd.f32 %v484_v7, %v3308_v1 }
 0x2fc   :  { %v702_v14 = vsel %vm330_vm0, %v3377_v10, 0.0  ;;  %2577 = vmatprep.subr.bf16.mxu0 %v745_v35  ;;  %v3381_v18 = vpop.eup %2881 }
 0x2fd   :  { %703 = vadd.xlane.f32.xlu1 %v702_v14  ;;  %v3383_v9 = vpop.permute.xlu1 %881  ;;  %v696_v25 = vsel %vm330_vm0, %v3381_v18, 0.0 }
 0x2fe   :  { %v892_v2 = vsel %vm519_vm1, %v3383_v9, 0 }
 0x2ff   :  { %2578 = vmatpush3.bf16.msra.mxu0 %v745_v35  ;;  %v486_v35 = vpop.f32.mrb[31].mxu1 }
 0x300   :  { %2691 = vmatprep.subr.msk.bf16.mxu0 %vm519_vm1, %v3383_v9  ;;  %v487_v14 = vadd.f32 %v486_v35, %v3311_v39 }
 0x301   :  { %697 = vadd.xlane.f32.xlu1 %v696_v25  ;;  %v584_v23 = vpop.permute.xlu1 %583  ;;  %v3420_v25 = vpack.c.bf16 %v485_v8, %v481_v24  ;;  %v878_v24 = vpop.permute.xlu0 %877 }
 0x302   :  { %2689 = vmatprep.subr.msk.bf16.mxu1 %vm519_vm1, %v584_v23  ;;  %v594_v27 = vsel %vm519_vm1, %v584_v23, 0  ;;  %v3422_v23 = vpack.c.bf16 %v487_v14, %v483_v41 }
 0x303   :  { %2568 = vmatpush3.bf16.xpose.msra.mxu1 %v594_v27 }
 0x304   :  { %v2884_v28 = vpop.eup %2883 }
 0x305   :  { %v705_v30 = vsel %vm330_vm0, %v2884_v28, 0.0  ;;  %v2886_v31 = vpop.eup %2885 }
 0x306   :  { %706 = vadd.xlane.f32.xlu1 %v705_v30  ;;  %v699_v32 = vsel %vm330_vm0, %v2886_v31, 0.0 }
 0x30a   :  { %700 = vadd.xlane.f32.xlu1 %v699_v32 }
 0x31b   :  { %883 = vrot.lane.b32.xlu1 %v3253_v16, %s3010_s30 }
 0x31f   :  { %585 = vrot.lane.b32.xlu1 %v3313_v3, %s3007_s8  ;;  %s3012_s8 = smov 16  }
 0x323   :  { %879 = vrot.lane.b32.xlu1 %v3260_v19, %s3009_s29 }
 0x327   :  { %954 = vrot.lane.b32.xlu1 %v3313_v3, %s3010_s30 }
 0x32b   :  { %950 = vrot.lane.b32.xlu1 %v3317_v6, %s3009_s29 }
 0x38a   :  { %v704_v27 = vpop.xlane.xlu1 %703 }
 0x38e   :  { %v698_v30 = vpop.xlane.xlu1 %697 }
 0x393   :  { %v707_v32 = vpop.xlane.xlu1 %706 }
 0x394   :  { %2887 = vrcp.f32 %v707_v32 }
 0x395   :  { %2889 = vrcp.f32 %v698_v30 }
 0x396   :  { %2891 = vrcp.f32 %v704_v27 }
 0x397   :  { %v701_v38 = vpop.xlane.xlu1 %700 }
 0x398   :  { %2893 = vrcp.f32 %v701_v38 }
 0x39b   :  { %v884_v40 = vpop.permute.xlu1 %883 }
 0x39e   :  { %v2888_v42 = vpop.eup %2887 }
 0x39f   :  { %v586_v48 = vpop.permute.xlu1 %585  ;;  %v2890_v49 = vpop.eup %2889  ;;  %v731_v51 = vmul.f32 %v2888_v42, %v2884_v28 }
 0x3a0   :  { %2690 = vmatprep.subr.msk.bf16.mxu1 %vm519_vm1, %v586_v48  ;;  %v597_v1 = vsel %vm519_vm1, %v586_v48, 0  ;;  %v2892_v39 = vpop.eup %2891  ;;  %v728_v52 = vmul.f32 %v2890_v49, %v3381_v18  ;;  %v953_v18 = vpop.permute.xlu0 %952 }
 0x3a1   :  { %2570 = vmatpush3.bf16.xpose.msra.mxu1 %v597_v1  ;;  %v730_v54 = vmul.f32 %v2892_v39, %v3377_v10  ;;  %v895_v10 = vsel %vm519_vm1, %v884_v40, 0  ;;  %v963_v41 = vsel %vm519_vm1, %v953_v18, 0 }
 0x3a2   :  { %v2894_v50 = vpop.eup %2893 }
 0x3a3   :  { %v729_v53 = vmul.f32 %v2894_v50, %v2886_v31  ;;  %v737_v62 = vpack.c.bf16 %v731_v51, %v730_v54  ;;  %v880_v28 = vpop.permute.xlu1 %879 }
 0x3a4   :  { %v949_v31 = vpop.permute.xlu0 %948 }
 0x3a5   :  { %v736_v60 = vpack.c.bf16 %v729_v53, %v728_v52 }
 0x3a7   :  { %2579 = vmatprep.mubr.msk.bf16.mxu0 %vm330_vm0, %v736_v60  ;;  %v955_v7 = vpop.permute.xlu1 %954 }
 0x3a8   :  { %2572 = vmatmul.mubr.msk.bf16.vlgmr.msra.gmra.mrb[32].mxu1 %vm519_vm1, %v3317_v6  ;;  %2580 = vmatmul.mubr.msk.bf16.vlgmr.msra.gmra.mrb[4].mxu0 %vm330_vm0, %v737_v62  ;;  %v966_v9 = vsel %vm519_vm1, %v955_v7, 0 }
 0x3a9   :  { %2592 = vmatpush3.bf16.xpose.msra.mxu0 %v892_v2  ;;  %2595 = vmatprep.mubr.msk.bf16.mxu0 %vm519_vm1, %v878_v24 }
 0x3aa   :  { %2692 = vmatprep.subr.msk.bf16.mxu0 %vm519_vm1, %v884_v40 }
 0x3ab   :  { %v951_v8 = vpop.permute.xlu1 %950 }
 0x3b1   :  { %2594 = vmatpush3.bf16.xpose.msra.mxu0 %v895_v10 }
 0x3b2   :  { %2693 = vmatprep.subr.msk.bf16.mxu0 %vm519_vm1, %v953_v18 }
 0x3b8   :  { %2596 = vmatmul.mubr.msk.bf16.vlgmr.msra.gmra.mrb[8].mxu0 %vm519_vm1, %v880_v28 }
 0x3b9   :  { %2600 = vmatpush3.bf16.xpose.msra.mxu0 %v963_v41  ;;  %2603 = vmatprep.mubr.msk.bf16.mxu0 %vm519_vm1, %v949_v31 }
 0x3ba   :  { %2694 = vmatprep.subr.msk.bf16.mxu0 %vm519_vm1, %v955_v7 }
 0x3c1   :  { %2602 = vmatpush3.bf16.xpose.msra.mxu0 %v966_v9 }
 0x3c8   :  { %2604 = vmatmul.mubr.msk.bf16.vlgmr.msra.gmra.mrb[12].mxu0 %vm519_vm1, %v951_v8 }
 0x47b   :  { %v2573_v35 = vpop.f32.mrb[32].mxu1  ;;  %v3444_v14 = vpop.f32.mrb[4].mxu0 }
 0x47c   :  { %v633_v27 = vpop.f32.mrb[33].mxu1  ;;  %v3446_v30 = vpop.f32.mrb[5].mxu0  ;;  %v642_v49 = vadd.f32 %v2573_v35, %v3338_v21 }
 0x47d   :  { %v634_v32 = vadd.f32 %v633_v27, %v3343_v22  ;;  %v2574_v38 = vpop.f32.mrb[34].mxu1  ;;  %v3449_v40 = vpop.f32.mrb[6].mxu0 }
 0x47e   :  { %v636_v42 = vpop.f32.mrb[35].mxu1  ;;  %v3451_v48 = vpop.f32.mrb[7].mxu0  ;;  %v645_v50 = vadd.f32 %v2574_v38, %v3358_v43  ;;  %v666_v22 = vsel %vm330_vm0, %v642_v49, -inf }
 0x47f   :  { %v637_v1 = vadd.f32 %v636_v42, %v3349_v29  ;;  %v660_v39 = vsel %vm330_vm0, %v634_v32, -inf }
 0x480   :  { %661 = vmax.xlane.f32.xlu1 %v660_v39  ;;  %v669_v52 = vsel %vm330_vm0, %v645_v50, -inf }
 0x481   :  { %v663_v51 = vsel %vm330_vm0, %v637_v1, -inf }
 0x482   :  { %664 = vmax.xlane.f32.xlu0 %v663_v51 }
 0x484   :  { %667 = vmax.xlane.f32.xlu1 %v666_v22 }
 0x486   :  { %670 = vmax.xlane.f32.xlu0 %v669_v52 }
 0x48b   :  { %v3460_v53 = vpop.f32.mrb[8].mxu0 }
 0x48c   :  { %v3462_v54 = vpop.f32.mrb[9].mxu0 }
 0x48d   :  { %v3464_v21 = vpop.f32.mrb[10].mxu0 }
 0x48e   :  { %v3466_v29 = vpop.f32.mrb[11].mxu0 }
 0x495   :  { %1111 = vrot.lane.b32.xlu1 %v3325_v12, %s3011_s7 }
 0x499   :  { %1115 = vrot.lane.b32.xlu1 %v3333_v26, %s3011_s7 }
 0x49b   :  { %v3470_v43 = vpop.f32.mrb[12].mxu0 }
 0x49c   :  { %v3472_v60 = vpop.f32.mrb[13].mxu0  ;;  %1113 = vrot.lane.b32.xlu0 %v3327_v13, %s3011_s7 }
 0x49d   :  { %v3475_v62 = vpop.f32.mrb[14].mxu0  ;;  %805 = vrot.lane.b32.xlu1 %v3412_v63, %s3008_s28 }
 0x49e   :  { %v3479_v24 = vpop.f32.mrb[15].mxu0 }
 0x4a0   :  { %1117 = vrot.lane.b32.xlu0 %v3406_v44, %s3011_s7 }
 0x4a1   :  { %807 = vrot.lane.b32.xlu1 %v3420_v25, %s3008_s28 }
 0x4a4   :  { %1257 = vrot.lane.b32.xlu0 %v3216_v58, %s3012_s8 }
 0x4a5   :  { %1259 = vrot.lane.b32.xlu1 %v3325_v12, %s3012_s8 }
 0x4a8   :  { %1181 = vrot.lane.b32.xlu0 %v3412_v63, %s3011_s7 }
 0x4a9   :  { %1183 = vrot.lane.b32.xlu1 %v3415_v5, %s3011_s7 }
 0x4ac   :  { %1185 = vrot.lane.b32.xlu0 %v3420_v25, %s3011_s7 }
 0x4ad   :  { %1187 = vrot.lane.b32.xlu1 %v3422_v23, %s3011_s7 }
 0x50d   :  { %v662_v2 = vpop.xlane.xlu1 %661 }
 0x50e   :  { %v676_v10 = vsub.f32 %v634_v32, %v662_v2 }
 0x50f   :  { %v665_v18 = vpop.xlane.xlu0 %664 }
 0x510   :  { %v677_v31 = vsub.f32 %v637_v1, %v665_v18  ;;  %v688_v7 = vmul.f32 1.442695, %v676_v10  ;;  %v2436_v18 = vld [vmem:[%s4056_s5 + $0x28] sm:$0xff] }
 0x511   :  { %v668_v28 = vpop.xlane.xlu1 %667 }
 0x512   :  { %v678_v41 = vsub.f32 %v642_v49, %v668_v28  ;;  %v690_v27 = vmul.f32 1.442695, %v677_v31 }
 0x513   :  { %v671_v9 = vpop.xlane.xlu0 %670 }
 0x514   :  { %v692_v58 = vmul.f32 1.442695, %v678_v41  ;;  %v679_v8 = vsub.f32 %v645_v50, %v671_v9  ;;  %v3513_v9 = vadd.f32 %v2436_v18, %v3466_v29  ;;  %v2435_v29 = vld [vmem:[%s4056_s5 + $0x20] sm:$0xff] }
 0x515   :  { %v1112_v35 = vpop.permute.xlu1 %1111 }
 0x516   :  { %2895 = vpow2.f32 %v692_v58  ;;  %v694_v38 = vmul.f32 1.442695, %v679_v8 }
 0x517   :  { %2897 = vpow2.f32 %v688_v7  ;;  %v1114_v42 = vpop.permute.xlu0 %1113  ;;  %v2437_v7 = vld [vmem:[%s4056_s5 + $0x30] sm:$0xff] }
 0x518   :  { %2899 = vpow2.f32 %v694_v38  ;;  %v1120_v39 = vsel %vm1119_vm2, %v1112_v35, %v1114_v42  ;;  %v3529_v42 = vadd.f32 %v3470_v43, %v2437_v7  ;;  %v3540_v43 = vadd.f32 %v2435_v29, %v3472_v60 }
 0x519   :  { %2607 = vmatprep.subr.bf16.mxu0 %v1120_v39  ;;  %v1116_v32 = vpop.permute.xlu1 %1115  ;;  %2901 = vpow2.f32 %v690_v27  ;;  %v940_v27 = vadd.f32 %v3460_v53, %v2437_v7  ;;  %v3553_v60 = vadd.f32 %v2436_v18, %v3479_v24 }
 0x51a   :  { %2608 = vmatpush3.bf16.msra.mxu0 %v1120_v39 }
 0x51b   :  { %v1118_v1 = vpop.permute.xlu0 %1117 }
 0x51c   :  { %v1121_v49 = vsel %vm1119_vm2, %v1116_v32, %v1118_v1  ;;  %v1020_v1 = vsel %vm330_vm0, %v3513_v9, -inf }
 0x51d   :  { %2609 = vmatprep.subr.bf16.mxu0 %v1121_v49  ;;  %v806_v51 = vpop.permute.xlu1 %805 }
 0x51e   :  { %2583 = vmatprep.subr.bf16.mxu1 %v806_v51  ;;  %2610 = vmatpush3.bf16.msra.mxu0 %v1121_v49  ;;  %v932_v49 = vadd.f32 %v2435_v29, %v3462_v54  ;;  %v1029_v54 = vsel %vm330_vm0, %v3540_v43, -inf }
 0x51f   :  { %2584 = vmatpush3.bf16.msra.mxu1 %v806_v51  ;;  %v1258_v28 = vpop.permute.xlu0 %1257  ;;  %v1023_v51 = vsel %vm330_vm0, %v940_v27, -inf }
 0x520   :  { %v3494_v50 = vpop.eup %2895 }
 0x521   :  { %v3496_v22 = vpop.eup %2897  ;;  %v808_v52 = vpop.permute.xlu1 %807  ;;  %v714_v2 = vsel %vm330_vm0, %v3494_v50, 0.0 }
 0x522   :  { %v3500_v10 = vpop.eup %2899  ;;  %715 = vadd.xlane.f32.xlu1 %v714_v2  ;;  %2585 = vmatprep.subr.bf16.mxu1 %v808_v52  ;;  %v708_v8 = vsel %vm330_vm0, %v3496_v22, 0.0  ;;  %v1035_v2 = vsel %vm330_vm0, %v3529_v42, -inf }
 0x523   :  { %2586 = vmatpush3.bf16.msra.mxu1 %v808_v52  ;;  %v717_v31 = vsel %vm330_vm0, %v3500_v10, 0.0  ;;  %v3507_v41 = vpop.eup %2901  ;;  %v1182_v39 = vpop.permute.xlu0 %1181  ;;  %v2438_v52 = vld [vmem:[%s4056_s5 + $0x38] sm:$0xff] }
 0x524   :  { %718 = vadd.xlane.f32.xlu0 %v717_v31  ;;  %v711_v38 = vsel %vm330_vm0, %v3507_v41, 0.0  ;;  %v1017_v31 = vsel %vm330_vm0, %v932_v49, -inf  ;;  %v3549_v7 = vadd.f32 %v3475_v62, %v2438_v52 }
 0x525   :  { %v1260_v58 = vpop.permute.xlu1 %1259 }
 0x526   :  { %v3518_v35 = vsel %vm1265_vm3, %v1258_v28, %v1260_v58  ;;  %709 = vadd.xlane.f32.xlu1 %v708_v8  ;;  %v943_v28 = vadd.f32 %v3464_v21, %v2438_v52  ;;  %v1038_v8 = vsel %vm330_vm0, %v3549_v7, -inf  ;;  %v1032_v21 = vsel %vm330_vm0, %v3553_v60, -inf }
 0x527   :  { %2695 = vmatprep.subr.msk.bf16.mxu0 %vm519_vm1, %v3518_v35 }
 0x528   :  { %712 = vadd.xlane.f32.xlu0 %v711_v38  ;;  %v1026_v58 = vsel %vm330_vm0, %v943_v28, -inf  ;;  %v1186_v38 = vpop.permute.xlu0 %1185 }
 0x529   :  { %v1184_v32 = vpop.permute.xlu1 %1183 }
 0x52a   :  { %1021 = vmax.xlane.f32.xlu1 %v1020_v1  ;;  %v1189_v53 = vsel %vm1119_vm2, %v1182_v39, %v1184_v32 }
 0x52b   :  { %2615 = vmatprep.subr.bf16.mxu1 %v1189_v53 }
 0x52c   :  { %1024 = vmax.xlane.f32.xlu0 %v1023_v51 }
 0x52d   :  { %v1188_v62 = vpop.permute.xlu1 %1187 }
 0x52e   :  { %1036 = vmax.xlane.f32.xlu1 %v1035_v2 }
 0x530   :  { %1018 = vmax.xlane.f32.xlu0 %v1017_v31 }
 0x532   :  { %1030 = vmax.xlane.f32.xlu1 %v1029_v54 }
 0x534   :  { %1027 = vmax.xlane.f32.xlu0 %v1026_v58 }
 0x538   :  { %1039 = vmax.xlane.f32.xlu0 %v1038_v8 }
 0x53c   :  { %1033 = vmax.xlane.f32.xlu0 %v1032_v21 }
 0x543   :  { %1263 = vrot.lane.b32.xlu1 %v3333_v26, %s3012_s8 }
 0x552   :  { %1261 = vrot.lane.b32.xlu0 %v3253_v16, %s3012_s8 }
 0x5af   :  { %v716_v29 = vpop.xlane.xlu1 %715 }
 0x5b1   :  { %v719_v39 = vpop.xlane.xlu0 %718 }
 0x5b2   :  { %2903 = vrcp.f32 %v719_v39 }
 0x5b3   :  { %v710_v24 = vpop.xlane.xlu1 %709 }
 0x5b4   :  { %2905 = vrcp.f32 %v710_v24 }
 0x5b5   :  { %2907 = vrcp.f32 %v716_v29  ;;  %v713_v18 = vpop.xlane.xlu0 %712 }
 0x5b6   :  { %2909 = vrcp.f32 %v713_v18 }
 0x5b7   :  { %v1022_v2 = vpop.xlane.xlu1 %1021 }
 0x5b8   :  { %v1042_v39 = vsub.f32 %v3513_v9, %v1022_v2 }
 0x5b9   :  { %v1025_v32 = vpop.xlane.xlu0 %1024 }
 0x5ba   :  { %v1043_v1 = vsub.f32 %v940_v27, %v1025_v32  ;;  %v1051_v34 = vmul.f32 1.442695, %v1042_v39 }
 0x5bc   :  { %v1053_v51 = vmul.f32 1.442695, %v1043_v1  ;;  %v2904_v52 = vpop.eup %2903 }
 0x5bd   :  { %v1019_v31 = vpop.xlane.xlu0 %1018  ;;  %v735_v21 = vmul.f32 %v2904_v52, %v3500_v10  ;;  %v1190_v10 = vsel %vm1119_vm2, %v1186_v38, %v1188_v62  ;;  %v1037_v62 = vpop.xlane.xlu1 %1036 }
 0x5be   :  { %v2906_v54 = vpop.eup %2905  ;;  %2911 = vpow2.f32 %v1053_v51  ;;  %v1041_v58 = vsub.f32 %v932_v49, %v1019_v31  ;;  %v1047_v38 = vsub.f32 %v3529_v42, %v1037_v62 }
 0x5bf   :  { %v2908_v16 = vpop.eup %2907  ;;  %v732_v29 = vmul.f32 %v2906_v54, %v3496_v22 }
 0x5c0   :  { %v2910_v8 = vpop.eup %2909  ;;  %v1049_v36 = vmul.f32 1.442695, %v1041_v58  ;;  %v734_v27 = vmul.f32 %v2908_v16, %v3494_v50  ;;  %v1061_v31 = vmul.f32 1.442695, %v1047_v38 }
 0x5c1   :  { %v1028_v24 = vpop.xlane.xlu0 %1027  ;;  %v733_v18 = vmul.f32 %v2910_v8, %v3507_v41  ;;  %v1031_v52 = vpop.xlane.xlu1 %1030 }
 0x5c2   :  { %2913 = vpow2.f32 %v1049_v36  ;;  %v1044_v32 = vsub.f32 %v943_v28, %v1028_v24  ;;  %v739_v49 = vpack.c.bf16 %v735_v21, %v734_v27  ;;  %v1045_v54 = vsub.f32 %v3540_v43, %v1031_v52 }
 0x5c3   :  { %v738_v1 = vpack.c.bf16 %v733_v18, %v732_v29 }
 0x5c4   :  { %v1055_v51 = vmul.f32 1.442695, %v1044_v32  ;;  %v1057_v58 = vmul.f32 1.442695, %v1045_v54 }
 0x5c5   :  { %2587 = vmatprep.mubr.msk.bf16.mxu1 %vm330_vm0, %v738_v1  ;;  %v1040_v2 = vpop.xlane.xlu0 %1039  ;;  %v1264_v32 = vpop.permute.xlu1 %1263 }
 0x5c6   :  { %2915 = vpow2.f32 %v1055_v51  ;;  %2588 = vmatmul.mubr.msk.bf16.vlgmr.msra.gmra.mrb[36].mxu1 %vm330_vm0, %v739_v49  ;;  %v1048_v16 = vsub.f32 %v3549_v7, %v1040_v2 }
 0x5c7   :  { %2616 = vmatpush3.bf16.msra.mxu1 %v1189_v53  ;;  %2917 = vpow2.f32 %v1051_v34 }
 0x5c8   :  { %v3571_v9 = vpop.eup %2911  ;;  %2617 = vmatprep.subr.bf16.mxu1 %v1190_v10  ;;  %2919 = vpow2.f32 %v1061_v31  ;;  %v1063_v21 = vmul.f32 1.442695, %v1048_v16  ;;  %v1275_v31 = vsel %vm519_vm1, %v3518_v35, 0 }
 0x5c9   :  { %v1071_v36 = vsel %vm330_vm0, %v3571_v9, 0.0  ;;  %v1034_v8 = vpop.xlane.xlu0 %1033  ;;  %2921 = vpow2.f32 %v1057_v58 }
 0x5ca   :  { %1072 = vadd.xlane.f32.xlu1 %v1071_v36  ;;  %2923 = vpow2.f32 %v1063_v21 }
 0x5cb   :  { %2618 = vmatpush3.bf16.msra.mxu1 %v1190_v10 }
 0x5cc   :  { %v3575_v50 = vpop.eup %2913 }
 0x5cd   :  { %v1065_v22 = vsel %vm330_vm0, %v3575_v50, 0.0  ;;  %v1262_v51 = vpop.permute.xlu0 %1261 }
 0x5ce   :  { %1066 = vadd.xlane.f32.xlu1 %v1065_v22  ;;  %v1267_v58 = vsel %vm1265_vm3, %v1262_v51, %v1264_v32 }
 0x5d0   :  { %v3579_v41 = vpop.eup %2915 }
 0x5d1   :  { %v1074_v53 = vsel %vm330_vm0, %v3579_v41, 0.0  ;;  %v3583_v28 = vpop.eup %2917 }
 0x5d2   :  { %1075 = vadd.xlane.f32.xlu0 %v1074_v53  ;;  %v1068_v34 = vsel %vm330_vm0, %v3583_v28, 0.0  ;;  %v3595_v24 = vpop.eup %2919 }
 0x5d3   :  { %v1083_v42 = vsel %vm330_vm0, %v3595_v24, 0.0  ;;  %v3599_v29 = vpop.eup %2921 }
 0x5d4   :  { %v1077_v43 = vsel %vm330_vm0, %v3599_v29, 0.0  ;;  %v3603_v7 = vpop.eup %2923 }
 0x5d6   :  { %1069 = vadd.xlane.f32.xlu0 %v1068_v34 }
 0x5df   :  { %1333 = vrot.lane.b32.xlu1 %v3292_v46, %s3012_s8  ;;  %v1046_v46 = vsub.f32 %v3553_v60, %v1034_v8  ;;  %v1086_v60 = vsel %vm330_vm0, %v3603_v7, 0.0 }
 0x5e1   :  { %v1059_v39 = vmul.f32 1.442695, %v1046_v46 }
 0x5e3   :  { %2925 = vpow2.f32 %v1059_v39 }
 0x5ec   :  { %1253 = vrot.lane.b32.xlu0 %v3223_v61, %s3013_s17 }
 0x5ed   :  { %v3607_v18 = vpop.eup %2925 }
 0x5ee   :  { %v1080_v27 = vsel %vm330_vm0, %v3607_v18, 0.0 }
 0x603   :  { %1084 = vadd.xlane.f32.xlu1 %v1083_v42 }
 0x607   :  { %1078 = vadd.xlane.f32.xlu1 %v1077_v43 }
 0x60b   :  { %1087 = vadd.xlane.f32.xlu0 %v1086_v60 }
 0x60f   :  { %1081 = vadd.xlane.f32.xlu0 %v1080_v27 }
 0x618   :  { %1255 = vrot.lane.b32.xlu1 %v3260_v19, %s3013_s17 }
 0x61c   :  { %1339 = vrot.lane.b32.xlu1 %v3420_v25, %s3012_s8 }
 0x620   :  { %1331 = vrot.lane.b32.xlu1 %v3317_v6, %s3013_s17 }
 0x624   :  { %1496 = vrot.lane.b32.xlu1 %v3327_v13, %s3014_s18 }
 0x625   :  { %1335 = vrot.lane.b32.xlu0 %v3412_v63, %s3012_s8 }
 0x628   :  { %1648 = vrot.lane.b32.xlu1 %v3325_v12, %s3015_s0 }
 0x629   :  { %1337 = vrot.lane.b32.xlu0 %v3313_v3, %s3012_s8 }
 0x62c   :  { %1557 = vrot.lane.b32.xlu1 %v3415_v5, %s3014_s18 }
 0x62d   :  { %1329 = vrot.lane.b32.xlu0 %v3290_v45, %s3013_s17 }
 0x630   :  { %1559 = vrot.lane.b32.xlu1 %v3422_v23, %s3014_s18 }
 0x631   :  { %1498 = vrot.lane.b32.xlu0 %v3406_v44, %s3014_s18 }
 0x634   :  { %1650 = vrot.lane.b32.xlu1 %v3333_v26, %s3015_s0 }
 0x657   :  { %v1073_v1 = vpop.xlane.xlu1 %1072 }
 0x65b   :  { %v1067_v49 = vpop.xlane.xlu1 %1066 }
 0x65f   :  { %v1076_v12 = vpop.xlane.xlu0 %1075 }
 0x660   :  { %2927 = vrcp.f32 %v1076_v12 }
 0x661   :  { %2929 = vrcp.f32 %v1067_v49 }
 0x662   :  { %2931 = vrcp.f32 %v1073_v1 }
 0x663   :  { %v1070_v3 = vpop.xlane.xlu0 %1069 }
 0x664   :  { %2933 = vrcp.f32 %v1070_v3 }
 0x667   :  { %v1254_v54 = vpop.permute.xlu0 %1253 }
 0x66a   :  { %v2928_v10 = vpop.eup %2927 }
 0x66b   :  { %v2930_v36 = vpop.eup %2929  ;;  %v1100_v34 = vmul.f32 %v2928_v10, %v3579_v41 }
 0x66c   :  { %v2932_v22 = vpop.eup %2931  ;;  %v1097_v62 = vmul.f32 %v2930_v36, %v3575_v50  ;;  %v1278_v50 = vsel %vm519_vm1, %v1267_v58, 0 }
 0x66d   :  { %v1099_v38 = vmul.f32 %v2932_v22, %v3571_v9  ;;  %v1334_v9 = vpop.permute.xlu1 %1333 }
 0x66e   :  { %v2934_v53 = vpop.eup %2933 }
 0x66f   :  { %v1098_v26 = vmul.f32 %v2934_v53, %v3583_v28  ;;  %v1106_v2 = vpack.c.bf16 %v1100_v34, %v1099_v38 }
 0x671   :  { %v1105_v52 = vpack.c.bf16 %v1098_v26, %v1097_v62 }
 0x673   :  { %2611 = vmatprep.mubr.msk.bf16.mxu0 %vm330_vm0, %v1105_v52 }
 0x674   :  { %2612 = vmatmul.mubr.msk.bf16.vlgmr.msra.gmra.mrb[16].mxu0 %vm330_vm0, %v1106_v2 }
 0x675   :  { %2624 = vmatpush3.bf16.xpose.msra.mxu0 %v1275_v31  ;;  %2627 = vmatprep.mubr.msk.bf16.mxu0 %vm519_vm1, %v1254_v54 }
 0x676   :  { %2696 = vmatprep.subr.msk.bf16.mxu0 %vm519_vm1, %v1267_v58 }
 0x67d   :  { %2626 = vmatpush3.bf16.xpose.msra.mxu0 %v1278_v50 }
 0x690   :  { %v1085_v41 = vpop.xlane.xlu1 %1084 }
 0x694   :  { %v1079_v28 = vpop.xlane.xlu1 %1078 }
 0x698   :  { %v1088_v16 = vpop.xlane.xlu0 %1087  ;;  %v1256_v8 = vpop.permute.xlu1 %1255 }
 0x699   :  { %v3643_v21 = vpop.f32.mrb[36].mxu1  ;;  %2628 = vmatmul.mubr.msk.bf16.vlgmr.msra.gmra.mrb[20].mxu0 %vm519_vm1, %v1256_v8  ;;  %2935 = vrcp.f32 %v1088_v16  ;;  %v2449_v16 = vld [vmem:[%s4056_s5 + $0x50] sm:$0xff] }
 0x69a   :  { %v3646_v35 = vpop.f32.mrb[37].mxu1  ;;  %2937 = vrcp.f32 %v1079_v28 }
 0x69b   :  { %v3648_v46 = vpop.f32.mrb[38].mxu1  ;;  %2939 = vrcp.f32 %v1085_v41 }
 0x69c   :  { %v3650_v39 = vpop.f32.mrb[39].mxu1  ;;  %v1082_v42 = vpop.xlane.xlu0 %1081 }
 0x69d   :  { %2941 = vrcp.f32 %v1082_v42  ;;  %v1340_v43 = vpop.permute.xlu1 %1339  ;;  %v2447_v42 = vld [vmem:[%s4056_s5 + $0x40] sm:$0xff] }
 0x6a0   :  { %v1336_v60 = vpop.permute.xlu0 %1335 }
 0x6a1   :  { %v1341_v27 = vsel %vm1265_vm3, %v1334_v9, %v1336_v60  ;;  %v1332_v32 = vpop.permute.xlu1 %1331 }
 0x6a2   :  { %2697 = vmatprep.subr.msk.bf16.mxu1 %vm519_vm1, %v1341_v27  ;;  %v1350_v2 = vsel %vm519_vm1, %v1341_v27, 0  ;;  %v2448_v27 = vld [vmem:[%s4056_s5 + $0x48] sm:$0xff] }
 0x6a3   :  { %v2936_v1 = vpop.eup %2935 }
 0x6a4   :  { %v1338_v51 = vpop.permute.xlu0 %1337  ;;  %v2938_v49 = vpop.eup %2937  ;;  %v1104_v36 = vmul.f32 %v2936_v1, %v3603_v7 }
 0x6a5   :  { %v1497_v12 = vpop.permute.xlu1 %1496  ;;  %v2940_v3 = vpop.eup %2939  ;;  %v1101_v53 = vmul.f32 %v2938_v49, %v3599_v29  ;;  %v1342_v7 = vsel %vm1265_vm3, %v1338_v51, %v1340_v43 }
 0x6a6   :  { %2639 = vmatprep.subr.bf16.mxu0 %v1497_v12  ;;  %v1103_v62 = vmul.f32 %v2940_v3, %v3595_v24  ;;  %v1353_v24 = vsel %vm519_vm1, %v1342_v7, 0 }
 0x6a7   :  { %v2942_v10 = vpop.eup %2941  ;;  %2640 = vmatpush3.bf16.msra.mxu0 %v1497_v12  ;;  %v2450_v12 = vld [vmem:[%s4056_s5 + $0x58] sm:$0xff] }
 0x6a8   :  { %v1330_v22 = vpop.permute.xlu0 %1329  ;;  %v1102_v34 = vmul.f32 %v2942_v10, %v3607_v18  ;;  %v1108_v38 = vpack.c.bf16 %v1104_v36, %v1103_v62 }
 0x6a9   :  { %v3663_v29 = vpop.permute.xlu1 %1648 }
 0x6aa   :  { %v1107_v26 = vpack.c.bf16 %v1102_v34, %v1101_v53 }
 0x6ac   :  { %v1499_v52 = vpop.permute.xlu0 %1498  ;;  %2619 = vmatprep.mubr.msk.bf16.mxu1 %vm330_vm0, %v1107_v26 }
 0x6ad   :  { %2620 = vmatmul.mubr.msk.bf16.vlgmr.msra.gmra.mrb[40].mxu1 %vm330_vm0, %v1108_v38  ;;  %2641 = vmatprep.subr.bf16.mxu0 %v1499_v52  ;;  %v1558_v18 = vpop.permute.xlu1 %1557 }
 0x6ae   :  { %2632 = vmatpush3.bf16.xpose.msra.mxu1 %v1350_v2  ;;  %2635 = vmatprep.mubr.msk.bf16.mxu1 %vm519_vm1, %v1330_v22 }
 0x6af   :  { %2698 = vmatprep.subr.msk.bf16.mxu1 %vm519_vm1, %v1342_v7  ;;  %2642 = vmatpush3.bf16.msra.mxu0 %v1499_v52 }
 0x6b0   :  { %2699 = vmatprep.subr.msk.bf16.mxu0 %vm519_vm1, %v3663_v29 }
 0x6b1   :  { %v1560_v31 = vpop.permute.xlu1 %1559 }
 0x6b6   :  { %2634 = vmatpush3.bf16.xpose.msra.mxu1 %v1353_v24 }
 0x6b7   :  { %2647 = vmatprep.subr.bf16.mxu1 %v1558_v18 }
 0x6bd   :  { %2636 = vmatmul.mubr.msk.bf16.vlgmr.msra.gmra.mrb[44].mxu1 %vm519_vm1, %v1332_v32 }
 0x6be   :  { %2648 = vmatpush3.bf16.msra.mxu1 %v1558_v18 }
 0x6bf   :  { %2649 = vmatprep.subr.bf16.mxu1 %v1560_v31 }
 0x6c2   :  { %2650 = vmatpush3.bf16.msra.mxu1 %v1560_v31 }
 0x747   :  { %v3670_v54 = vpop.f32.mrb[16].mxu0 }
 0x748   :  { %v3672_v58 = vpop.f32.mrb[17].mxu0 }
 0x749   :  { %v3674_v50 = vpop.f32.mrb[18].mxu0 }
 0x74a   :  { %v2732_v9 = vpack.i.bf16 %v3674_v50, %v3670_v54  ;;  %v3678_v41 = vpop.f32.mrb[19].mxu0 }
 0x74b   :  { %v2717_v28 = vpack.i.bf16 %v3678_v41, %v3672_v58 }
 0x76c   :  { %v2629_v8 = vpop.f32.mrb[20].mxu0 }
 0x76d   :  { %v1323_v43 = vadd.f32 %v2629_v8, %v2449_v16  ;;  %v1314_v60 = vpop.f32.mrb[21].mxu0 }
 0x76e   :  { %v2630_v32 = vpop.f32.mrb[22].mxu0  ;;  %v1315_v1 = vadd.f32 %v2447_v42, %v1314_v60 }
 0x76f   :  { %v1317_v51 = vpop.f32.mrb[23].mxu0  ;;  %v1410_v49 = vsel %vm330_vm0, %v1323_v43, -inf  ;;  %v1326_v36 = vadd.f32 %v2630_v32, %v2450_v12 }
 0x770   :  { %v1318_v3 = vadd.f32 %v2448_v27, %v1317_v51  ;;  %1411 = vmax.xlane.f32.xlu0 %v1410_v49  ;;  %v1404_v22 = vsel %vm330_vm0, %v1315_v1, -inf }
 0x771   :  { %v1413_v53 = vsel %vm330_vm0, %v1326_v36, -inf }
 0x772   :  { %v1407_v10 = vsel %vm330_vm0, %v1318_v3, -inf }
 0x773   :  { %1408 = vmax.xlane.f32.xlu1 %v1407_v10 }
 0x774   :  { %1405 = vmax.xlane.f32.xlu0 %v1404_v22 }
 0x778   :  { %1414 = vmax.xlane.f32.xlu0 %v1413_v53 }
 0x780   :  { %v3698_v34 = vpop.f32.mrb[40].mxu1 }
 0x781   :  { %v3700_v62 = vpop.f32.mrb[41].mxu1 }
 0x782   :  { %v3702_v26 = vpop.f32.mrb[42].mxu1 }
 0x783   :  { %v2762_v38 = vpack.i.bf16 %v3702_v26, %v3698_v34  ;;  %v3706_v52 = vpop.f32.mrb[43].mxu1 }
 0x784   :  { %v2747_v2 = vpack.i.bf16 %v3706_v52, %v3700_v62 }
 0x790   :  { %v2637_v7 = vpop.f32.mrb[44].mxu1 }
 0x791   :  { %v1398_v24 = vadd.f32 %v2637_v7, %v2449_v16  ;;  %v1389_v18 = vpop.f32.mrb[45].mxu1  ;;  %v3720_v16 = vpop.permute.xlu1 %1650 }
 0x792   :  { %v2638_v31 = vpop.f32.mrb[46].mxu1  ;;  %v1390_v8 = vadd.f32 %v2447_v42, %v1389_v18 }
 0x793   :  { %v1401_v60 = vadd.f32 %v2638_v31, %v2450_v12  ;;  %v1392_v32 = vpop.f32.mrb[47].mxu1  ;;  %v1422_v51 = vsel %vm330_vm0, %v1398_v24, -inf }
 0x794   :  { %1423 = vmax.xlane.f32.xlu1 %v1422_v51  ;;  %v1393_v49 = vadd.f32 %v2448_v27, %v1392_v32  ;;  %v1416_v22 = vsel %vm330_vm0, %v1390_v8, -inf }
 0x795   :  { %v1425_v10 = vsel %vm330_vm0, %v1401_v60, -inf }
 0x796   :  { %1426 = vmax.xlane.f32.xlu0 %v1425_v10  ;;  %v1419_v53 = vsel %vm330_vm0, %v1393_v49, -inf }
 0x798   :  { %1417 = vmax.xlane.f32.xlu1 %v1416_v22 }
 0x79a   :  { %1420 = vmax.xlane.f32.xlu0 %v1419_v53 }
 0x7a9   :  { %1639 = vrot.lane.b32.xlu1 %v1626_v0, %s3016_s25 }
 0x7b0   :  { %1637 = vrot.lane.b32.xlu0 %v3223_v61, %s3016_s25 }
 0x7fd   :  { %v1412_v42 = vpop.xlane.xlu0 %1411 }
 0x7fe   :  { %v1430_v27 = vsub.f32 %v1323_v43, %v1412_v42 }
 0x800   :  { %v1440_v12 = vmul.f32 1.442695, %v1430_v27  ;;  %v1409_v7 = vpop.xlane.xlu1 %1408 }
 0x801   :  { %v1406_v18 = vpop.xlane.xlu0 %1405  ;;  %v1429_v32 = vsub.f32 %v1318_v3, %v1409_v7 }
 0x802   :  { %2943 = vpow2.f32 %v1440_v12  ;;  %v1428_v31 = vsub.f32 %v1315_v1, %v1406_v18 }
 0x803   :  { %v1438_v53 = vmul.f32 1.442695, %v1429_v32 }
 0x804   :  { %v1436_v51 = vmul.f32 1.442695, %v1428_v31 }
 0x805   :  { %v1415_v10 = vpop.xlane.xlu0 %1414 }
 0x806   :  { %2945 = vpow2.f32 %v1436_v51  ;;  %v1431_v22 = vsub.f32 %v1326_v36, %v1415_v10 }
 0x808   :  { %v1442_v57 = vmul.f32 1.442695, %v1431_v22 }
 0x80a   :  { %2947 = vpow2.f32 %v1442_v57 }
 0x80b   :  { %2949 = vpow2.f32 %v1438_v53 }
 0x80c   :  { %v3722_v59 = vpop.eup %2943 }
 0x80d   :  { %v1458_v61 = vsel %vm330_vm0, %v3722_v59, 0.0 }
 0x80e   :  { %1459 = vadd.xlane.f32.xlu1 %v1458_v61 }
 0x810   :  { %v2946_v0 = vpop.eup %2945 }
 0x811   :  { %v1452_v43 = vsel %vm330_vm0, %v2946_v0, 0.0 }
 0x812   :  { %1453 = vadd.xlane.f32.xlu1 %v1452_v43 }
 0x814   :  { %v2948_v1 = vpop.eup %2947 }
 0x815   :  { %v1461_v3 = vsel %vm330_vm0, %v2948_v1, 0.0  ;;  %v2950_v42 = vpop.eup %2949 }
 0x816   :  { %1462 = vadd.xlane.f32.xlu0 %v1461_v3  ;;  %v1455_v36 = vsel %vm330_vm0, %v2950_v42, 0.0 }
 0x81a   :  { %1456 = vadd.xlane.f32.xlu0 %v1455_v36 }
 0x821   :  { %v1424_v27 = vpop.xlane.xlu1 %1423 }
 0x822   :  { %v1434_v32 = vsub.f32 %v1398_v24, %v1424_v27 }
 0x823   :  { %1643 = vrot.lane.b32.xlu1 %v1627_v20, %s3016_s25  ;;  %v1427_v31 = vpop.xlane.xlu0 %1426 }
 0x824   :  { %v1448_v51 = vmul.f32 1.442695, %v1434_v32  ;;  %v1435_v10 = vsub.f32 %v1401_v60, %v1427_v31 }
 0x825   :  { %v1418_v12 = vpop.xlane.xlu1 %1417 }
 0x826   :  { %v1432_v7 = vsub.f32 %v1390_v8, %v1418_v12  ;;  %v1450_v53 = vmul.f32 1.442695, %v1435_v10 }
 0x827   :  { %v1421_v22 = vpop.xlane.xlu0 %1420 }
 0x828   :  { %v1444_v18 = vmul.f32 1.442695, %v1432_v7  ;;  %v1433_v57 = vsub.f32 %v1393_v49, %v1421_v22 }
 0x82a   :  { %2951 = vpow2.f32 %v1444_v18  ;;  %v1446_v15 = vmul.f32 1.442695, %v1433_v57  ;;  %v1659_v18 = vsel %vm519_vm1, %v3663_v29, 0 }
 0x82b   :  { %2953 = vpow2.f32 %v1448_v51  ;;  %v1638_v3 = vpop.permute.xlu0 %1637 }
 0x82c   :  { %2955 = vpow2.f32 %v1450_v53 }
 0x82d   :  { %2957 = vpow2.f32 %v1446_v15 }
 0x830   :  { %1641 = vrot.lane.b32.xlu0 %v3260_v19, %s3016_s25 }
 0x834   :  { %v3735_v61 = vpop.eup %2951 }
 0x835   :  { %v1464_v17 = vsel %vm330_vm0, %v3735_v61, 0.0  ;;  %v3739_v19 = vpop.eup %2953 }
 0x836   :  { %v1470_v20 = vsel %vm330_vm0, %v3739_v19, 0.0  ;;  %v2956_v24 = vpop.eup %2955 }
 0x837   :  { %v1473_v8 = vsel %vm330_vm0, %v2956_v24, 0.0  ;;  %v2958_v60 = vpop.eup %2957 }
 0x838   :  { %v1467_v49 = vsel %vm330_vm0, %v2958_v60, 0.0 }
 0x847   :  { %1465 = vadd.xlane.f32.xlu1 %v1464_v17 }
 0x84f   :  { %1471 = vadd.xlane.f32.xlu0 %v1470_v20 }
 0x853   :  { %1474 = vadd.xlane.f32.xlu0 %v1473_v8 }
 0x857   :  { %1468 = vadd.xlane.f32.xlu0 %v1467_v49 }
 0x858   :  { %1727 = vrot.lane.b32.xlu1 %v3420_v25, %s3015_s0  ;;  %v1640_v25 = vpop.permute.xlu1 %1639 }
 0x859   :  { %v1646_v31 = vsel %vm1645_vm4, %v1638_v3, %v1640_v25 }
 0x85c   :  { %1717 = vrot.lane.b32.xlu1 %v1628_v55, %s3016_s25 }
 0x860   :  { %1721 = vrot.lane.b32.xlu1 %v1629_v11, %s3016_s25 }
 0x86d   :  { %1725 = vrot.lane.b32.xlu0 %v3412_v63, %s3015_s0 }
 0x871   :  { %1715 = vrot.lane.b32.xlu0 %v3290_v45, %s3016_s25 }
 0x875   :  { %1719 = vrot.lane.b32.xlu0 %v3317_v6, %s3016_s25 }
 0x89b   :  { %v1460_v43 = vpop.xlane.xlu1 %1459 }
 0x89f   :  { %v1454_v36 = vpop.xlane.xlu1 %1453 }
 0x8a3   :  { %v1463_v37 = vpop.xlane.xlu0 %1462 }
 0x8a4   :  { %2959 = vrcp.f32 %v1463_v37 }
 0x8a5   :  { %2961 = vrcp.f32 %v1454_v36 }
 0x8a6   :  { %2963 = vrcp.f32 %v1460_v43 }
 0x8a7   :  { %v1457_v47 = vpop.xlane.xlu0 %1456 }
 0x8a8   :  { %2965 = vrcp.f32 %v1457_v47 }
 0x8ae   :  { %v2960_v55 = vpop.eup %2959 }
 0x8af   :  { %v2962_v56 = vpop.eup %2961  ;;  %v1487_v63 = vmul.f32 %v2960_v55, %v2948_v1  ;;  %v1644_v1 = vpop.permute.xlu1 %1643 }
 0x8b0   :  { %v2964_v4 = vpop.eup %2963  ;;  %v1484_v27 = vmul.f32 %v2962_v56, %v2946_v0  ;;  %v1642_v0 = vpop.permute.xlu0 %1641 }
 0x8b1   :  { %v1486_v12 = vmul.f32 %v2964_v4, %v3722_v59  ;;  %v1662_v59 = vsel %vm519_vm1, %v3720_v16, 0 }
 0x8b2   :  { %v2966_v11 = vpop.eup %2965 }
 0x8b3   :  { %v1485_v45 = vmul.f32 %v2966_v11, %v2950_v42  ;;  %v1493_v7 = vpack.c.bf16 %v1487_v63, %v1486_v12  ;;  %v1647_v42 = vsel %vm1645_vm4, %v1642_v0, %v1644_v1  ;;  %v2459_v12 = vld [vmem:[%s4056_s5 + $0x60] sm:$0xff] }
 0x8b5   :  { %v1492_v6 = vpack.c.bf16 %v1485_v45, %v1484_v27 }
 0x8b7   :  { %2643 = vmatprep.mubr.msk.bf16.mxu0 %vm330_vm0, %v1492_v6 }
 0x8b8   :  { %2644 = vmatmul.mubr.msk.bf16.vlgmr.msra.gmra.mrb[24].mxu0 %vm330_vm0, %v1493_v7  ;;  %v2461_v7 = vld [vmem:[%s4056_s5 + $0x70] sm:$0xff] }
 0x8b9   :  { %2656 = vmatpush3.bf16.xpose.msra.mxu0 %v1659_v18  ;;  %2659 = vmatprep.mubr.msk.bf16.mxu0 %vm519_vm1, %v1646_v31  ;;  %v2460_v31 = vld [vmem:[%s4056_s5 + $0x68] sm:$0xff] }
 0x8ba   :  { %2700 = vmatprep.subr.msk.bf16.mxu0 %vm519_vm1, %v3720_v16 }
 0x8c1   :  { %2658 = vmatpush3.bf16.xpose.msra.mxu0 %v1662_v59 }
 0x8c8   :  { %2660 = vmatmul.mubr.msk.bf16.vlgmr.msra.gmra.mrb[28].mxu0 %vm519_vm1, %v1647_v42 }
 0x8d4   :  { %v1466_v32 = vpop.xlane.xlu1 %1465 }
 0x8d8   :  { %v1728_v15 = vpop.permute.xlu1 %1727 }
 0x8dc   :  { %v1472_v29 = vpop.xlane.xlu0 %1471  ;;  %v1718_v37 = vpop.permute.xlu1 %1717 }
 0x8e0   :  { %v1475_v51 = vpop.xlane.xlu0 %1474 }
 0x8e1   :  { %2967 = vrcp.f32 %v1475_v51  ;;  %v2462_v51 = vld [vmem:[%s4056_s5 + $0x78] sm:$0xff]  ;;  %s3017_s5 = smov 72  }
 0x8e2   :  { %2969 = vrcp.f32 %v1466_v32 }
 0x8e3   :  { %2971 = vrcp.f32 %v1472_v29 }
 0x8e4   :  { %v1469_v10 = vpop.xlane.xlu0 %1468 }
 0x8e5   :  { %2973 = vrcp.f32 %v1469_v10 }
 0x8e8   :  { %v1726_v22 = vpop.permute.xlu0 %1725 }
 0x8e9   :  { %2701 = vmatprep.subr.msk.bf16.mxu1 %vm519_vm1, %v1726_v22  ;;  %v1736_v47 = vsel %vm519_vm1, %v1726_v22, 0 }
 0x8eb   :  { %v2968_v53 = vpop.eup %2967 }
 0x8ec   :  { %v2970_v16 = vpop.eup %2969  ;;  %v1491_v20 = vmul.f32 %v2968_v53, %v2956_v24  ;;  %v1716_v43 = vpop.permute.xlu0 %1715 }
 0x8ed   :  { %v2972_v57 = vpop.eup %2971  ;;  %v1488_v8 = vmul.f32 %v2970_v16, %v3735_v61  ;;  %v1723_v55 = vsel %vm1645_vm4, %v1716_v43, %v1718_v37  ;;  %v1739_v61 = vsel %vm519_vm1, %v1728_v15, 0  ;;  %v1722_v24 = vpop.permute.xlu1 %1721 }
 0x8ee   :  { %v1490_v25 = vmul.f32 %v2972_v57, %v3739_v19 }
 0x8ef   :  { %v2974_v17 = vpop.eup %2973 }
 0x8f0   :  { %v1489_v49 = vmul.f32 %v2974_v17, %v2958_v60  ;;  %v1495_v36 = vpack.c.bf16 %v1491_v20, %v1490_v25  ;;  %v1720_v19 = vpop.permute.xlu0 %1719 }
 0x8f1   :  { %v1724_v60 = vsel %vm1645_vm4, %v1720_v19, %v1722_v24 }
 0x8f2   :  { %v1494_v3 = vpack.c.bf16 %v1489_v49, %v1488_v8 }
 0x8f4   :  { %2651 = vmatprep.mubr.msk.bf16.mxu1 %vm330_vm0, %v1494_v3 }
 0x8f5   :  { %2652 = vmatmul.mubr.msk.bf16.vlgmr.msra.gmra.mrb[48].mxu1 %vm330_vm0, %v1495_v36 }
 0x8f6   :  { %2664 = vmatpush3.bf16.xpose.msra.mxu1 %v1736_v47  ;;  %2667 = vmatprep.mubr.msk.bf16.mxu1 %vm519_vm1, %v1723_v55 }
 0x8f7   :  { %2702 = vmatprep.subr.msk.bf16.mxu1 %vm519_vm1, %v1728_v15 }
 0x8fe   :  { %2666 = vmatpush3.bf16.xpose.msra.mxu1 %v1739_v61 }
 0x905   :  { %2668 = vmatmul.mubr.msk.bf16.vlgmr.msra.gmra.mrb[52].mxu1 %vm519_vm1, %v1724_v60 }
 0x98b   :  { %v3786_v56 = vpop.f32.mrb[24].mxu0 }
 0x98c   :  { %v3788_v4 = vpop.f32.mrb[25].mxu0 }
 0x98d   :  { %v3790_v11 = vpop.f32.mrb[26].mxu0 }
 0x98e   :  { %v2737_v63 = vpack.i.bf16 %v3790_v11, %v3786_v56  ;;  %v3794_v27 = vpop.f32.mrb[27].mxu0 }
 0x98f   :  { %v2722_v45 = vpack.i.bf16 %v3794_v27, %v3788_v4 }
 0x99b   :  { %v2661_v6 = vpop.f32.mrb[28].mxu0 }
 0x99c   :  { %v1698_v18 = vpop.f32.mrb[29].mxu0  ;;  %v1707_v42 = vadd.f32 %v2661_v6, %v2461_v7 }
 0x99d   :  { %v1699_v59 = vadd.f32 %v2459_v12, %v1698_v18  ;;  %v2662_v0 = vpop.f32.mrb[30].mxu0 }
 0x99e   :  { %v1701_v1 = vpop.f32.mrb[31].mxu0  ;;  %v1710_v22 = vadd.f32 %v2662_v0, %v2462_v51  ;;  %v1796_v53 = vsel %vm330_vm0, %v1707_v42, -inf }
 0x99f   :  { %v1702_v29 = vadd.f32 %v2460_v31, %v1701_v1  ;;  %v1790_v32 = vsel %vm330_vm0, %v1699_v59, -inf }
 0x9a0   :  { %1791 = vmax.xlane.f32.xlu0 %v1790_v32  ;;  %v1799_v16 = vsel %vm330_vm0, %v1710_v22, -inf }
 0x9a1   :  { %v1793_v10 = vsel %vm330_vm0, %v1702_v29, -inf }
 0x9a2   :  { %1794 = vmax.xlane.f32.xlu1 %v1793_v10 }
 0x9a4   :  { %1797 = vmax.xlane.f32.xlu0 %v1796_v53 }
 0x9a8   :  { %1800 = vmax.xlane.f32.xlu0 %v1799_v16 }
 0x9c8   :  { %v3814_v57 = vpop.f32.mrb[48].mxu1 }
 0x9c9   :  { %v3816_v15 = vpop.f32.mrb[49].mxu1 }
 0x9ca   :  { %v3818_v17 = vpop.f32.mrb[50].mxu1 }
 0x9cb   :  { %v2767_v20 = vpack.i.bf16 %v3818_v17, %v3814_v57  ;;  %v3822_v8 = vpop.f32.mrb[51].mxu1 }
 0x9cc   :  { %v2752_v49 = vpack.i.bf16 %v3822_v8, %v3816_v15 }
 0x9d8   :  { %v2669_v25 = vpop.f32.mrb[52].mxu1 }
 0x9d9   :  { %v1775_v43 = vpop.f32.mrb[53].mxu1  ;;  %v1784_v47 = vadd.f32 %v2669_v25, %v2461_v7 }
 0x9da   :  { %v1776_v3 = vadd.f32 %v2459_v12, %v1775_v43  ;;  %v2670_v36 = vpop.f32.mrb[54].mxu1 }
 0x9db   :  { %v1778_v37 = vpop.f32.mrb[55].mxu1  ;;  %v1787_v19 = vadd.f32 %v2670_v36, %v2462_v51  ;;  %v1808_v60 = vsel %vm330_vm0, %v1784_v47, -inf }
 0x9dc   :  { %v1779_v55 = vadd.f32 %v2460_v31, %v1778_v37  ;;  %v1802_v61 = vsel %vm330_vm0, %v1776_v3, -inf }
 0x9dd   :  { %1803 = vmax.xlane.f32.xlu1 %v1802_v61  ;;  %v1811_v6 = vsel %vm330_vm0, %v1787_v19, -inf }
 0x9de   :  { %v1805_v24 = vsel %vm330_vm0, %v1779_v55, -inf }
 0x9df   :  { %1806 = vmax.xlane.f32.xlu0 %v1805_v24 }
 0x9e1   :  { %1809 = vmax.xlane.f32.xlu1 %v1808_v60 }
 0x9e3   :  { %1812 = vmax.xlane.f32.xlu0 %v1811_v6 }
 0x9f2   :  { %1882 = vrot.lane.b32.xlu1 %v3327_v13, %s3017_s5 }
 0xa2d   :  { %v1792_v12 = vpop.xlane.xlu0 %1791 }
 0xa2e   :  { %v1814_v7 = vsub.f32 %v1699_v59, %v1792_v12 }
 0xa2f   :  { %v1795_v18 = vpop.xlane.xlu1 %1794 }
 0xa30   :  { %v1822_v1 = vmul.f32 1.442695, %v1814_v7  ;;  %v1815_v32 = vsub.f32 %v1702_v29, %v1795_v18 }
 0xa31   :  { %v1798_v31 = vpop.xlane.xlu0 %1797 }
 0xa32   :  { %v1816_v0 = vsub.f32 %v1707_v42, %v1798_v31  ;;  %v1824_v16 = vmul.f32 1.442695, %v1815_v32 }
 0xa34   :  { %v1826_v51 = vmul.f32 1.442695, %v1816_v0 }
 0xa35   :  { %v1801_v10 = vpop.xlane.xlu0 %1800 }
 0xa36   :  { %2975 = vpow2.f32 %v1826_v51  ;;  %v1817_v53 = vsub.f32 %v1710_v22, %v1801_v10 }
 0xa37   :  { %2977 = vpow2.f32 %v1822_v1 }
 0xa38   :  { %v1828_v25 = vmul.f32 1.442695, %v1817_v53 }
 0xa3a   :  { %2979 = vpow2.f32 %v1828_v25 }
 0xa3b   :  { %2981 = vpow2.f32 %v1824_v16 }
 0xa40   :  { %v3832_v43 = vpop.eup %2975 }
 0xa41   :  { %v1844_v13 = vsel %vm330_vm0, %v3832_v43, 0.0  ;;  %v2978_v59 = vpop.eup %2977 }
 0xa42   :  { %1845 = vadd.xlane.f32.xlu1 %v1844_v13  ;;  %v1838_v29 = vsel %vm330_vm0, %v2978_v59, 0.0 }
 0xa44   :  { %v3836_v36 = vpop.eup %2979 }
 0xa45   :  { %v1847_v42 = vsel %vm330_vm0, %v3836_v36, 0.0  ;;  %v2982_v22 = vpop.eup %2981 }
 0xa46   :  { %1848 = vadd.xlane.f32.xlu0 %v1847_v42  ;;  %1839 = vadd.xlane.f32.xlu1 %v1838_v29  ;;  %v1841_v37 = vsel %vm330_vm0, %v2982_v22, 0.0 }
 0xa4a   :  { %1842 = vadd.xlane.f32.xlu0 %v1841_v37 }
 0xa6a   :  { %v1804_v61 = vpop.xlane.xlu1 %1803 }
 0xa6b   :  { %v1818_v24 = vsub.f32 %v1776_v3, %v1804_v61 }
 0xa6c   :  { %v1807_v60 = vpop.xlane.xlu0 %1806 }
 0xa6d   :  { %v1819_v12 = vsub.f32 %v1779_v55, %v1807_v60  ;;  %v1830_v18 = vmul.f32 1.442695, %v1818_v24 }
 0xa6e   :  { %v1810_v6 = vpop.xlane.xlu1 %1809 }
 0xa6f   :  { %v1820_v7 = vsub.f32 %v1784_v47, %v1810_v6  ;;  %v1832_v51 = vmul.f32 1.442695, %v1819_v12 }
 0xa70   :  { %v1813_v31 = vpop.xlane.xlu0 %1812 }
 0xa71   :  { %v1834_v0 = vmul.f32 1.442695, %v1820_v7  ;;  %v1821_v1 = vsub.f32 %v1787_v19, %v1813_v31 }
 0xa72   :  { %v1883_v32 = vpop.permute.xlu1 %1882 }
 0xa73   :  { %2983 = vpow2.f32 %v1834_v0  ;;  %v1836_v10 = vmul.f32 1.442695, %v1821_v1  ;;  %2671 = vmatprep.subr.bf16.mxu0 %v1883_v32 }
 0xa74   :  { %2985 = vpow2.f32 %v1830_v18  ;;  %2672 = vmatpush3.bf16.msra.mxu0 %v1883_v32 }
 0xa75   :  { %2987 = vpow2.f32 %v1836_v10 }
 0xa76   :  { %2989 = vpow2.f32 %v1832_v51 }
 0xa7d   :  { %v3842_v53 = vpop.eup %2983 }
 0xa7e   :  { %v2986_v3 = vpop.eup %2985  ;;  %v1856_v55 = vsel %vm330_vm0, %v3842_v53, 0.0 }
 0xa7f   :  { %v2988_v47 = vpop.eup %2987  ;;  %1857 = vadd.xlane.f32.xlu1 %v1856_v55  ;;  %v1850_v25 = vsel %vm330_vm0, %v2986_v3, 0.0  ;;  %v2851_v55 = vld [vmem:[%s4057_s3 + $0x4] ss:$8 sps:$4 sm:$0xff]  }
 0xa80   :  { %v1859_v16 = vsel %vm330_vm0, %v2988_v47, 0.0  ;;  %v2990_v19 = vpop.eup %2989 }
 0xa81   :  { %1860 = vadd.xlane.f32.xlu0 %v1859_v16  ;;  %v1853_v13 = vsel %vm330_vm0, %v2990_v19, 0.0  ;;  %v2855_v16 = vld [vmem:[%s4057_s3 + $0x20] ss:$8 sps:$4 sm:$0xff]  }
 0xa83   :  { %1851 = vadd.xlane.f32.xlu1 %v1850_v25  ;;  %v2858_v25 = vld [vmem:[%s4057_s3 + $0x30] ss:$8 sps:$4 sm:$0xff]  }
 0xa85   :  { %1854 = vadd.xlane.f32.xlu0 %v1853_v13  ;;  %v2863_v13 = vld [vmem:[%s4057_s3 + $0x44] ss:$8 sps:$4 sm:$0xff]  }
 0xa94   :  { %1943 = vrot.lane.b32.xlu1 %v3415_v5, %s3017_s5 }
 0xa98   :  { %1945 = vrot.lane.b32.xlu1 %v3422_v23, %s3017_s5 }
 0xa9b   :  { %1884 = vrot.lane.b32.xlu0 %v3406_v44, %s3017_s5 }
 0xa9c   :  { %2723 = vrot.lane.b32.xlu1 %v2722_v45, %s3018_s10 }
 0xa9f   :  { %2718 = vrot.lane.b32.xlu0 %v2717_v28, %s3019_s11 }
 0xaa0   :  { %2733 = vrot.lane.b32.xlu1 %v2732_v9, %s3019_s11 }
 0xacf   :  { %v1846_v5 = vpop.xlane.xlu1 %1845 }
 0xad3   :  { %v1849_v23 = vpop.xlane.xlu0 %1848  ;;  %v1840_v44 = vpop.xlane.xlu1 %1839 }
 0xad4   :  { %2991 = vrcp.f32 %v1840_v44  ;;  %v2864_v44 = vld [vmem:[%s4057_s3 + $0x50] ss:$8 sps:$4 sm:$0xff]  }
 0xad7   :  { %v1843_v42 = vpop.xlane.xlu0 %1842 }
 0xad8   :  { %2993 = vrcp.f32 %v1843_v42  ;;  %v2869_v42 = vld [vmem:[%s4057_s3 + $0x64] ss:$8 sps:$4 sm:$0xff]  }
 0xad9   :  { %2995 = vrcp.f32 %v1849_v23  ;;  %v2866_v23 = vld [vmem:[%s4057_s3 + $0x54] ss:$8 sps:$4 sm:$0xff]  }
 0xada   :  { %2997 = vrcp.f32 %v1846_v5  ;;  %v2861_v5 = vld [vmem:[%s4057_s3 + $0x40] ss:$8 sps:$4 sm:$0xff]  }
 0xade   :  { %v2992_v29 = vpop.eup %2991 }
 0xadf   :  { %v1870_v27 = vmul.f32 %v2992_v29, %v2978_v59  ;;  %v2867_v29 = vld [vmem:[%s4057_s3 + $0x60] ss:$8 sps:$4 sm:$0xff]  }
 0xae2   :  { %v2994_v4 = vpop.eup %2993 }
 0xae3   :  { %v1871_v45 = vmul.f32 %v2994_v4, %v2982_v22  ;;  %v2996_v50 = vpop.eup %2995  ;;  %v2872_v4 = vld [vmem:[%s4057_s3 + $0x74] ss:$8 sps:$4 sm:$0xff]  }
 0xae4   :  { %v2998_v28 = vpop.eup %2997  ;;  %v1873_v24 = vmul.f32 %v2996_v50, %v3836_v36 }
 0xae5   :  { %v1878_v37 = vpack.c.bf16 %v1871_v45, %v1870_v27  ;;  %v1872_v22 = vmul.f32 %v2998_v28, %v3832_v43  ;;  %v2849_v43 = vld [vmem:[%s4057_s3] ss:$8 sps:$4 sm:$0xff]   ;;  %v2870_v27 = vld [vmem:[%s4057_s3 + $0x70] ss:$8 sps:$4 sm:$0xff]   ;;  %v2875_v45 = vld [vmem:[%s4057_s3 + $0x84] ss:$8 sps:$4 sm:$0xff]  }
 0xae7   :  { %2675 = vmatprep.mubr.msk.bf16.mxu0 %vm330_vm0, %v1878_v37  ;;  %v1879_v6 = vpack.c.bf16 %v1873_v24, %v1872_v22  ;;  %v2873_v37 = vld [vmem:[%s4057_s3 + $0x80] ss:$8 sps:$4 sm:$0xff]  }
 0xb0c   :  { %v1858_v58 = vpop.xlane.xlu1 %1857 }
 0xb0e   :  { %v1861_v41 = vpop.xlane.xlu0 %1860 }
 0xb0f   :  { %2999 = vrcp.f32 %v1861_v41  ;;  %v2876_v41 = vld [vmem:[%s4057_s3 + $0x90] ss:$8 sps:$4 sm:$0xff]  }
 0xb10   :  { %v1852_v54 = vpop.xlane.xlu1 %1851 }
 0xb11   :  { %3001 = vrcp.f32 %v1852_v54 }
 0xb12   :  { %3003 = vrcp.f32 %v1858_v58  ;;  %v1855_v9 = vpop.xlane.xlu0 %1854  ;;  %v2878_v58 = vld [vmem:[%s4057_s3 + $0x94] ss:$8 sps:$4 sm:$0xff]  }
 0xb13   :  { %3005 = vrcp.f32 %v1855_v9 }
 0xb14   :  { %v1944_v61 = vpop.permute.xlu1 %1943 }
 0xb15   :  { %2679 = vmatprep.subr.bf16.mxu1 %v1944_v61 }
 0xb16   :  { %v1885_v59 = vpop.permute.xlu0 %1884  ;;  %2680 = vmatpush3.bf16.msra.mxu1 %v1944_v61 }
 0xb17   :  { %2673 = vmatprep.subr.bf16.mxu0 %v1885_v59 }
 0xb18   :  { %2674 = vmatpush3.bf16.msra.mxu0 %v1885_v59  ;;  %v1946_v60 = vpop.permute.xlu1 %1945 }
 0xb19   :  { %2681 = vmatprep.subr.bf16.mxu1 %v1946_v60  ;;  %v3000_v12 = vpop.eup %2999  ;;  %2278 = vmatprep.subr.bf16.mxu0 %v2851_v55 }
 0xb1a   :  { %2682 = vmatpush3.bf16.msra.mxu1 %v1946_v60  ;;  %v1877_v0 = vmul.f32 %v3000_v12, %v2988_v47  ;;  %v2857_v47 = vld [vmem:[%s4057_s3 + $0x24] ss:$8 sps:$4 sm:$0xff]   ;;  %v2719_v11 = vpop.permute.xlu0 %2718 }
 0xb1b   :  { %v3002_v7 = vpop.eup %3001  ;;  %2676 = vmatmul.mubr.msk.bf16.vlgmr.msra.gmra.mrb[32].mxu0 %vm330_vm0, %v1879_v6  ;;  %v2720_v15 = vunpack.i.l.bf16 %v2719_v11 }
 0xb1c   :  { %v3004_v18 = vpop.eup %3003  ;;  %v1874_v1 = vmul.f32 %v3002_v7, %v2986_v3  ;;  %v2854_v3 = vld [vmem:[%s4057_s3 + $0x14] ss:$8 sps:$4 sm:$0xff]   ;;  %2279 = vmatpush1.bf16.msra.mxu0 %v2849_v43  ;;  %v2724_v56 = vpop.permute.xlu1 %2723 }
 0xb1d   :  { %v3006_v31 = vpop.eup %3005  ;;  %v1876_v32 = vmul.f32 %v3004_v18, %v3842_v53  ;;  %v2852_v53 = vld [vmem:[%s4057_s3 + $0x10] ss:$8 sps:$4 sm:$0xff]   ;;  %2280 = vmatprep.subr.bf16.mxu0 %v2854_v3  ;;  %v2725_v34 = vunpack.i.l.bf16 %v2724_v56  ;;  %v2100_v62 = vsel %vm519_vm1, %v3446_v30, %v2720_v15 }
 0xb1e   :  { %v1875_v36 = vmul.f32 %v3006_v31, %v2990_v19  ;;  %v2860_v19 = vld [vmem:[%s4057_s3 + $0x34] ss:$8 sps:$4 sm:$0xff]  }
 0xb1f   :  { %v1881_v10 = vpack.c.bf16 %v1877_v0, %v1876_v32  ;;  %v2109_v31 = vsel %vm2108_vm5, %v2100_v62, %v2725_v34  ;;  %v4063_v62 = vsub.s32 1, %v3166_v33 }
 0xb20   :  { %v1880_v51 = vpack.c.bf16 %v1875_v36, %v1874_v1  ;;  %2281 = vmatpush1.bf16.msra.mxu0 %v2852_v53  ;;  %v2734_v8 = vpop.permute.xlu1 %2733 }
 0xb21   :  { %2282 = vmatprep.subr.bf16.mxu0 %v2857_v47  ;;  %v2736_v0 = vunpack.i.h.bf16 %v2734_v8  ;;  %v2735_v1 = vunpack.i.l.bf16 %v2734_v8 }
 0xb22   :  { %2683 = vmatprep.mubr.msk.bf16.mxu1 %vm330_vm0, %v1880_v51 }
 0xb23   :  { %2684 = vmatmul.mubr.msk.bf16.vlgmr.msra.gmra.mrb[56].mxu1 %vm330_vm0, %v1881_v10  ;;  %v2103_v53 = vsel %vm519_vm1, %v3449_v40, %v2736_v0  ;;  %v2102_v47 = vsel %vm519_vm1, %v3444_v14, %v2735_v1 }
 0xb24   :  { %2283 = vmatpush1.bf16.msra.mxu0 %v2855_v16 }
 0xb25   :  { %2284 = vmatprep.subr.bf16.mxu0 %v2860_v19 }
 0xb28   :  { %2285 = vmatpush1.bf16.msra.mxu0 %v2858_v25 }
 0xb29   :  { %2286 = vmatprep.subr.bf16.mxu0 %v2863_v13 }
 0xb2c   :  { %2287 = vmatpush1.bf16.msra.mxu0 %v2861_v5 }
 0xb2d   :  { %2288 = vmatprep.subr.bf16.mxu0 %v2866_v23 }
 0xb30   :  { %2289 = vmatpush1.bf16.msra.mxu0 %v2864_v44 }
 0xb31   :  { %2290 = vmatprep.subr.bf16.mxu0 %v2869_v42 }
 0xb34   :  { %2291 = vmatpush1.bf16.msra.mxu0 %v2867_v29 }
 0xb35   :  { %2292 = vmatprep.subr.bf16.mxu0 %v2872_v4 }
 0xb38   :  { %2293 = vmatpush1.bf16.msra.mxu0 %v2870_v27 }
 0xb39   :  { %2294 = vmatprep.subr.bf16.mxu0 %v2875_v45 }
 0xb3c   :  { %2295 = vmatpush1.bf16.msra.mxu0 %v2873_v37 }
 0xb3d   :  { %2296 = vmatprep.subr.bf16.mxu0 %v2878_v58 }
 0xb40   :  { %2297 = vmatpush1.bf16.msra.mxu0 %v2876_v41 }
 0xbee   :  { %v2677_v54 = vpop.f32.mrb[32].mxu0 }
 0xbef   :  { %v1928_v50 = vpop.f32.mrb[33].mxu0 }
 0xbf0   :  { %v2678_v9 = vpop.f32.mrb[34].mxu0 }
 0xbf1   :  { %v2742_v28 = vpack.i.bf16 %v2678_v9, %v2677_v54  ;;  %v1931_v61 = vpop.f32.mrb[35].mxu0 }
 0xbf2   :  { %v2727_v24 = vpack.i.bf16 %v1931_v61, %v1928_v50 }
 0xbf3   :  { %2743 = vrot.lane.b32.xlu1 %v2742_v28, %s3020_s23 }
 0xbf4   :  { %2728 = vrot.lane.b32.xlu0 %v2727_v24, %s3020_s23 }
 0xbf6   :  { %v2685_v59 = vpop.f32.mrb[56].mxu1 }
 0xbf7   :  { %2753 = vrot.lane.b32.xlu1 %v2752_v49, %s3018_s10  ;;  %v1989_v22 = vpop.f32.mrb[57].mxu1  ;;  %v2726_v49 = vunpack.i.h.bf16 %v2724_v56 }
 0xbf8   :  { %2738 = vrot.lane.b32.xlu0 %v2737_v63, %s3018_s10  ;;  %v2686_v60 = vpop.f32.mrb[58].mxu1  ;;  %v2721_v63 = vunpack.i.h.bf16 %v2719_v11 }
 0xbf9   :  { %v2772_v6 = vpack.i.bf16 %v2686_v60, %v2685_v59  ;;  %v1992_v12 = vpop.f32.mrb[59].mxu1 }
 0xbfa   :  { %v2757_v7 = vpack.i.bf16 %v1992_v12, %v1989_v22  ;;  %v2101_v26 = vsel %vm519_vm1, %v3451_v48, %v2721_v63 }
 0xbfb   :  { %2763 = vrot.lane.b32.xlu1 %v2762_v38, %s3019_s11  ;;  %v2110_v18 = vsel %vm2108_vm5, %v2101_v26, %v2726_v49 }
 0xbfc   :  { %2748 = vrot.lane.b32.xlu0 %v2747_v2, %s3019_s11 }
 0xbff   :  { %2773 = vrot.lane.b32.xlu1 %v2772_v6, %s3020_s23 }
 0xc00   :  { %2758 = vrot.lane.b32.xlu0 %v2757_v7, %s3020_s23 }
 0xc04   :  { %2768 = vrot.lane.b32.xlu0 %v2767_v20, %s3018_s10 }
 0xc65   :  { %v2744_v38 = vpop.permute.xlu1 %2743 }
 0xc66   :  { %v2729_v52 = vpop.permute.xlu0 %2728  ;;  %v2746_v2 = vunpack.i.h.bf16 %v2744_v38  ;;  %v2745_v57 = vunpack.i.l.bf16 %v2744_v38 }
 0xc67   :  { %v2731_v17 = vunpack.i.h.bf16 %v2729_v52  ;;  %v2730_v20 = vunpack.i.l.bf16 %v2729_v52 }
 0xc68   :  { %v2129_v43 = vpack.c.bf16 %v2746_v2, %v2745_v57 }
 0xc69   :  { %v2118_v36 = vsel %vm2117_vm6, %v2109_v31, %v2730_v20  ;;  %v2119_v48 = vsel %vm2117_vm6, %v2110_v18, %v2731_v17  ;;  %v2127_v32 = vpack.c.bf16 %v2731_v17, %v2730_v20  ;;  %v2754_v30 = vpop.permute.xlu1 %2753 }
 0xc6a   :  { %v2126_v51 = vpack.c.bf16 %v2119_v48, %v2118_v36  ;;  %v2739_v10 = vpop.permute.xlu0 %2738  ;;  %v2756_v4 = vunpack.i.h.bf16 %v2754_v30  ;;  %v2755_v27 = vunpack.i.l.bf16 %v2754_v30 }
 0xc6b   :  { %v2741_v55 = vunpack.i.h.bf16 %v2739_v10  ;;  %v2740_v3 = vunpack.i.l.bf16 %v2739_v10  ;;  %2491 = vmatprep.mubr.msk.bf16.mxu0 %vm330_vm0, %v2127_v32 }
 0xc6c   :  { %2311 = vmatmul.mubr.bf16.vlgmr.msra.gmra.mrb[36].mxu0 %v2126_v51 }
 0xc6d   :  { %v2111_v16 = vsel %vm2108_vm5, %v2102_v47, %v2740_v3  ;;  %v2112_v19 = vsel %vm2108_vm5, %v2103_v53, %v2741_v55  ;;  %2492 = vmatprep.mubr.msk.bf16.mxu0 %vm330_vm0, %v2129_v43  ;;  %v2764_v25 = vpop.permute.xlu1 %2763 }
 0xc6e   :  { %v2749_v13 = vpop.permute.xlu0 %2748  ;;  %v2120_v5 = vsel %vm2117_vm6, %v2111_v16, %v2745_v57  ;;  %v2121_v23 = vsel %vm2117_vm6, %v2112_v19, %v2746_v2  ;;  %v2766_v41 = vunpack.i.h.bf16 %v2764_v25  ;;  %v2765_v54 = vunpack.i.l.bf16 %v2764_v25 }
 0xc6f   :  { %v2751_v44 = vunpack.i.h.bf16 %v2749_v13  ;;  %v2750_v42 = vunpack.i.l.bf16 %v2749_v13  ;;  %v2128_v29 = vpack.c.bf16 %v2121_v23, %v2120_v5 }
 0xc70   :  { %v2107_v7 = vsel %vm519_vm1, %v3648_v46, %v2766_v41  ;;  %v2106_v56 = vsel %vm519_vm1, %v3643_v21, %v2765_v54  ;;  %v2154_v46 = vld [vmem:[%s4058_s4] sm:$0x3]  ;;  %v4062_v21 = vsub.s32 0, %v3166_v33 }
 0xc71   :  { %v2105_v40 = vsel %vm519_vm1, %v3650_v39, %v2751_v44  ;;  %v2104_v14 = vsel %vm519_vm1, %v3646_v35, %v2750_v42  ;;  %v2774_v50 = vpop.permute.xlu1 %2773  ;;  %v2163_v38 = vrot.slane %v2154_v46, %v4063_v62 }
 0xc72   :  { %v2759_v45 = vpop.permute.xlu0 %2758  ;;  %v2113_v9 = vsel %vm2108_vm5, %v2104_v14, %v2755_v27  ;;  %v2114_v28 = vsel %vm2108_vm5, %v2105_v40, %v2756_v4  ;;  %v2776_v22 = vunpack.i.h.bf16 %v2774_v50  ;;  %v2775_v60 = vunpack.i.l.bf16 %v2774_v50 }
 0xc73   :  { %v2761_v37 = vunpack.i.h.bf16 %v2759_v45  ;;  %v2760_v58 = vunpack.i.l.bf16 %v2759_v45  ;;  %v2159_v26 = vrot.slane %v2154_v46, %v4062_v21 }
 0xc74   :  { %2321 = vmatmul.mubr.bf16.gmra.mrb[40].mxu0 %v2128_v29  ;;  %v2133_v49 = vpack.c.bf16 %v2776_v22, %v2775_v60 }
 0xc75   :  { %v2131_v61 = vpack.c.bf16 %v2761_v37, %v2760_v58  ;;  %v2122_v24 = vsel %vm2117_vm6, %v2113_v9, %v2760_v58  ;;  %v2123_v39 = vsel %vm2117_vm6, %v2114_v28, %v2761_v37 }
 0xc76   :  { %v2769_v59 = vpop.permute.xlu0 %2768  ;;  %v2130_v35 = vpack.c.bf16 %v2123_v39, %v2122_v24 }
 0xc77   :  { %v2771_v6 = vunpack.i.h.bf16 %v2769_v59  ;;  %v2770_v12 = vunpack.i.l.bf16 %v2769_v59  ;;  %2493 = vmatprep.mubr.msk.bf16.mxu0 %vm330_vm0, %v2131_v61 }
 0xc79   :  { %v2115_v11 = vsel %vm2108_vm5, %v2106_v56, %v2770_v12  ;;  %v2116_v63 = vsel %vm2108_vm5, %v2107_v7, %v2771_v6 }
 0xc7a   :  { %v2124_v15 = vsel %vm2117_vm6, %v2115_v11, %v2775_v60  ;;  %v2125_v8 = vsel %vm2117_vm6, %v2116_v63, %v2776_v22 }
 0xc7b   :  { %v2132_v34 = vpack.c.bf16 %v2125_v8, %v2124_v15 }
 0xc7c   :  { %2331 = vmatmul.mubr.bf16.gmra.mrb[44].mxu0 %v2130_v35 }
 0xc7d   :  { %2494 = vmatprep.mubr.msk.bf16.mxu0 %vm330_vm0, %v2133_v49 }
 0xc84   :  { %2341 = vmatmul.mubr.bf16.gmra.mrb[48].mxu0 %v2132_v34 }
 0xd3f   :  { %v2312_v52 = vpop.f32.mrb[36].mxu0 }
 0xd40   :  { %v2313_v2 = vadd.f32 %v2312_v52, %v2159_v26  ;;  %v2314_v57 = vpop.f32.mrb[37].mxu0 }
 0xd41   :  { %v2315_v17 = vadd.f32 %v2314_v57, %v2163_v38  ;;  %v2316_v20 = vpop.f32.mrb[38].mxu0 }
 0xd42   :  { %2351 = vst [vmem:[%s4059_s6] sm:$0xff] %v2313_v2  ;;  %v2317_v18 = vadd.f32 %v2316_v20, %v2159_v26  ;;  %v2318_v31 = vpop.f32.mrb[39].mxu0 }
 0xd43   :  { %2352 = vst.msk [vmem:[%s4059_s6 + $0x8] sm:$0xff] %vm330_vm0, %v2315_v17  ;;  %v2319_v0 = vadd.f32 %v2318_v31, %v2163_v38 }
 0xd44   :  { %2353 = vst [vmem:[%s4059_s6 + $0x10] sm:$0xff] %v2317_v18 }
 0xd45   :  { %2354 = vst.msk [vmem:[%s4059_s6 + $0x18] sm:$0xff] %vm330_vm0, %v2319_v0 }
 0xd47   :  { %v2322_v33 = vpop.f32.mrb[40].mxu0 }
 0xd48   :  { %v2323_v1 = vadd.f32 %v2322_v33, %v2159_v26  ;;  %v2324_v36 = vpop.f32.mrb[41].mxu0 }
 0xd49   :  { %v2325_v48 = vadd.f32 %v2324_v36, %v2163_v38  ;;  %v2326_v32 = vpop.f32.mrb[42].mxu0 }
 0xd4a   :  { %2355 = vst [vmem:[%s4059_s6 + $0x20] sm:$0xff] %v2323_v1  ;;  %v2327_v30 = vadd.f32 %v2326_v32, %v2159_v26  ;;  %v2328_v51 = vpop.f32.mrb[43].mxu0 }
 0xd4b   :  { %2356 = vst.msk [vmem:[%s4059_s6 + $0x28] sm:$0xff] %vm330_vm0, %v2325_v48  ;;  %v2329_v10 = vadd.f32 %v2328_v51, %v2163_v38 }
 0xd4c   :  { %2357 = vst [vmem:[%s4059_s6 + $0x30] sm:$0xff] %v2327_v30 }
 0xd4d   :  { %2358 = vst.msk [vmem:[%s4059_s6 + $0x38] sm:$0xff] %vm330_vm0, %v2329_v10 }
 0xd4f   :  { %v2332_v43 = vpop.f32.mrb[44].mxu0 }
 0xd50   :  { %v2333_v55 = vadd.f32 %v2332_v43, %v2159_v26  ;;  %v2334_v3 = vpop.f32.mrb[45].mxu0 }
 0xd51   :  { %v2335_v53 = vadd.f32 %v2334_v3, %v2163_v38  ;;  %v2336_v47 = vpop.f32.mrb[46].mxu0 }
 0xd52   :  { %2359 = vst [vmem:[%s4059_s6 + $0x40] sm:$0xff] %v2333_v55  ;;  %v2337_v16 = vadd.f32 %v2336_v47, %v2159_v26  ;;  %v2338_v19 = vpop.f32.mrb[47].mxu0 }
 0xd53   :  { %2360 = vst.msk [vmem:[%s4059_s6 + $0x48] sm:$0xff] %vm330_vm0, %v2335_v53  ;;  %v2339_v25 = vadd.f32 %v2338_v19, %v2163_v38 }
 0xd54   :  { %2361 = vst [vmem:[%s4059_s6 + $0x50] sm:$0xff] %v2337_v16 }
 0xd55   :  { %2362 = vst.msk [vmem:[%s4059_s6 + $0x58] sm:$0xff] %vm330_vm0, %v2339_v25 }
 0xd57   :  { %v2342_v13 = vpop.f32.mrb[48].mxu0 }
 0xd58   :  { %v2343_v5 = vadd.f32 %v2342_v13, %v2159_v26  ;;  %v2344_v23 = vpop.f32.mrb[49].mxu0 }
 0xd59   :  { %v2345_v44 = vadd.f32 %v2344_v23, %v2163_v38  ;;  %v2346_v42 = vpop.f32.mrb[50].mxu0 }
 0xd5a   :  { %2363 = vst [vmem:[%s4059_s6 + $0x60] sm:$0xff] %v2343_v5  ;;  %v2347_v29 = vadd.f32 %v2346_v42, %v2159_v26  ;;  %v2348_v40 = vpop.f32.mrb[51].mxu0 }
 0xd5b   :  { %2364 = vst.msk [vmem:[%s4059_s6 + $0x68] sm:$0xff] %vm330_vm0, %v2345_v44  ;;  %v2349_v14 = vadd.f32 %v2348_v40, %v2163_v38 }
 0xd5c   :  { %2365 = vst [vmem:[%s4059_s6 + $0x70] sm:$0xff] %v2347_v29 }
 0xd5d   :  { %2366 = vst.msk [vmem:[%s4059_s6 + $0x78] sm:$0xff] %vm330_vm0, %v2349_v14 }

// kernel: transformer_forward.28
= control target key start
LH: loop header
LB: loop body
LE: loop exit
PB: predicated region body
PF: predicated region fallthrough
CT: control target
= control target key end

     0   :  { %s2109_s12 = smov 0   ;;  %s2111_s13 = smov 0   ;;  %s2796_s0 = inlined_call_operand.vmem [shape: bf16[2,4,6,6,512], index: 0, kind: input, shape index: {}]   ;;  %s2797_s1 = inlined_call_operand.vmem [shape: f32[27,512], index: 1, kind: input, shape index: {}]   ;;  %s2798_s2 = inlined_call_operand.vmem [shape: f32[1,512], index: 2, kind: input, shape index: {}]   ;;  %s2799_s3 = inlined_call_operand.vmem [shape: bf16[2,2,4,4,512], index: 3, kind: output, shape index: {}]  }
   0x1   :  { %s2113_s14 = smov 0   ;;  %s2115_s15 = smov 0  }
   0x2   :  { %s2117_s16 = smov 0   ;;  %s2119_s17 = smov 0  }
   0x3   :  { %s2121_s18 = smov 0   ;;  %s2123_s19 = smov 0  }
   0x4   :  { %s2125_s20 = smov 0  }
   0x5 LB: > { %s1867_s21 = sadd.s32 4294967295, %s2087_s20   ;;  %s22_s22 = sadd.s32 1, %s2079_s18  ;;  %s2087_s20 = sphi %s2125_s20, %s13_s20   ;;  %s2083_s19 = sphi %s2123_s19, %s2810_s19   ;;  %s2079_s18 = sphi %s2121_s18, %s2809_s18   ;;  %s2075_s17 = sphi %s2119_s17, %s2808_s17   ;;  %s2071_s16 = sphi %s2117_s16, %s2807_s16   ;;  %s2067_s15 = sphi %s2115_s15, %s2806_s15   ;;  %s2063_s14 = sphi %s2113_s14, %s2805_s14   ;;  %s2059_s13 = sphi %s2111_s13, %s2804_s13   ;;  %s2055_s12 = sphi %s2109_s12, %s2803_s12  }
   0x6   : > { %p23_p0 = scmp.ge.s32.totalorder %s22_s22, 4  ;;  %s25_s23 = sadd.s32 1, %s2083_s19 }
   0x7   : > { %s34_s24 = sadd.s32 1, %s2067_s15  ;;  %p41_p1 = scmp.ne.s32.totalorder %s2067_s15, %s2063_s14 }
   0x8   : > { %s2812_s22 = smov (%p23_p0, %s22_s22), 0  ;;  %s2814_s23 = smov (!%p23_p0, %s25_s23), %s2083_s19 }
   0x9   : > { %s30_s25 = ssub.s32 %s2079_s18, %s2812_s22  ;;  %p42_p2 = scmp.eq.s32.totalorder %s2087_s20, 0 }
   0xa   : > { %p27_p3 = scmp.ge.s32.totalorder %s2814_s23, 2  ;;  %p58_p4 = scmp.eq.s32.totalorder %s30_s25, 0 }
   0xb   : > { %p2169_p5 = por %p42_p2, %p41_p1  ;;  %s60_s27 = sadd.s32 1, %s2059_s13 }
   0xc   : > { %s2816_s23 = smov (%p27_p3, %s2814_s23), 0  ;;  %p67_p6 = scmp.ne.s32.totalorder %s2059_s13, %s2055_s12 }
   0xd   : > { %s2177_s28 = scalar_select %p58_p4, %s2059_s13, %s60_s27  }
   0xe   : > { %s29_s29 = ssub.s32 %s2083_s19, %s2816_s23  ;;  %p125_p7 = scmp.eq.s32.totalorder %s1867_s21, 7 }
   0xf   : > { %s31_s30 = sor.u32 %s30_s25, %s29_s29  ;;  %p2183_p9 = por %p67_p6, %p42_p2 }
  0x10   : > { %p32_p8 = scmp.eq.s32.totalorder %s31_s30, 0  ;;  %p2190_p10 = por %p125_p7, %p41_p1 }
  0x11   : > { %p1870_p11 = scmp.ge.s32.totalorder %s2087_s20, 8 }
  0x12   : > { %s2195_s6 = scalar_select %p32_p8, %s2067_s15, %s34_s24  }
  0x13   : > { %147 = sbr.rel (%p1870_p11) target bundleno = 57 (0x39), region = 16 }
  0x1a   : > { %150 = sbr.rel (!%p2169_p5) target bundleno = 49 (0x31), region = 20  ;;  %s152_s7 = sand.u32 (%p2169_p5), 1, %s2067_s15  }
  0x1b   : > { %s1911_s8 = smul.u32 (%p2169_p5), 96, %s2083_s19 }
  0x1c   : > { %s1910_s9 = smul.u32 (%p2169_p5), 96, %s152_s7 }
  0x1d   : > { %s156_s10 = sadd.s32 (%p2169_p5), %s2079_s18, %s1911_s8 }
  0x1e   : > { %s1871_s11 = sshll.u32 (%p2169_p5), %s156_s10, 2  ;;  %s2211_s24 = scalar_lea.vmem (%p2169_p5), [#allocation2], %s1910_s9 }
  0x1f   : > { %s2206_s27 = scalar_lea.vmem (%p2169_p5), %s2796_s0, %s1871_s11 }
  0x20   : > { %v174_v0 = vld [vmem:[%s2206_s27] sm:$0xf] (%p2169_p5)  ;;  %v176_v1 = vld [vmem:[%s2206_s27 + $0x10] sm:$0xf] (%p2169_p5) }
  0x21   : > { %v178_v2 = vld [vmem:[%s2206_s27 + $0x20] sm:$0xf]  ;;  %175 = vst [vmem:[%s2211_s24] sm:$0xf] %v174_v0  ;;  %177 = vst [vmem:[%s2211_s24 + $0x4] sm:$0xf] %v176_v1 }
  0x22   : > { %179 = vst [vmem:[%s2211_s24 + $0x8] sm:$0xf] %v178_v2  ;;  %v180_v3 = vld [vmem:[%s2206_s27 + $0x30] sm:$0xf]  ;;  %v182_v4 = vld [vmem:[%s2206_s27 + $0x40] sm:$0xf] }
  0x23   : > { %v184_v5 = vld [vmem:[%s2206_s27 + $0x50] sm:$0xf]  ;;  %181 = vst [vmem:[%s2211_s24 + $0xc] sm:$0xf] %v180_v3  ;;  %183 = vst [vmem:[%s2211_s24 + $0x10] sm:$0xf] %v182_v4 }
  0x24   : > { %185 = vst [vmem:[%s2211_s24 + $0x14] sm:$0xf] %v184_v5  ;;  %v186_v6 = vld [vmem:[%s2206_s27 + $0x60] sm:$0xf]  ;;  %v188_v7 = vld [vmem:[%s2206_s27 + $0x70] sm:$0xf] }
  0x25   : > { %v190_v8 = vld [vmem:[%s2206_s27 + $0x80] sm:$0xf]  ;;  %187 = vst [vmem:[%s2211_s24 + $0x18] sm:$0xf] %v186_v6  ;;  %189 = vst [vmem:[%s2211_s24 + $0x1c] sm:$0xf] %v188_v7 }
  0x26   : > { %191 = vst [vmem:[%s2211_s24 + $0x20] sm:$0xf] %v190_v8  ;;  %v192_v9 = vld [vmem:[%s2206_s27 + $0x90] sm:$0xf]  ;;  %v194_v10 = vld [vmem:[%s2206_s27 + $0xa0] sm:$0xf] }
  0x27   : > { %v196_v11 = vld [vmem:[%s2206_s27 + $0xb0] sm:$0xf]  ;;  %193 = vst [vmem:[%s2211_s24 + $0x24] sm:$0xf] %v192_v9  ;;  %195 = vst [vmem:[%s2211_s24 + $0x28] sm:$0xf] %v194_v10 }
  0x28   : > { %197 = vst [vmem:[%s2211_s24 + $0x2c] sm:$0xf] %v196_v11  ;;  %v198_v12 = vld [vmem:[%s2206_s27 + $0xc0] sm:$0xf]  ;;  %v200_v13 = vld [vmem:[%s2206_s27 + $0xd0] sm:$0xf] }
  0x29   : > { %v202_v14 = vld [vmem:[%s2206_s27 + $0xe0] sm:$0xf]  ;;  %199 = vst [vmem:[%s2211_s24 + $0x30] sm:$0xf] %v198_v12  ;;  %201 = vst [vmem:[%s2211_s24 + $0x34] sm:$0xf] %v200_v13 }
  0x2a   : > { %203 = vst [vmem:[%s2211_s24 + $0x38] sm:$0xf] %v202_v14  ;;  %v204_v15 = vld [vmem:[%s2206_s27 + $0xf0] sm:$0xf]  ;;  %v206_v16 = vld [vmem:[%s2206_s27 + $0x100] sm:$0xf] }
  0x2b   : > { %v208_v17 = vld [vmem:[%s2206_s27 + $0x110] sm:$0xf]  ;;  %205 = vst [vmem:[%s2211_s24 + $0x3c] sm:$0xf] %v204_v15  ;;  %207 = vst [vmem:[%s2211_s24 + $0x40] sm:$0xf] %v206_v16 }
  0x2c   : > { %209 = vst [vmem:[%s2211_s24 + $0x44] sm:$0xf] %v208_v17  ;;  %v210_v18 = vld [vmem:[%s2206_s27 + $0x120] sm:$0xf]  ;;  %v212_v19 = vld [vmem:[%s2206_s27 + $0x130] sm:$0xf] }
  0x2d   : > { %v214_v20 = vld [vmem:[%s2206_s27 + $0x140] sm:$0xf]  ;;  %211 = vst [vmem:[%s2211_s24 + $0x48] sm:$0xf] %v210_v18  ;;  %213 = vst [vmem:[%s2211_s24 + $0x4c] sm:$0xf] %v212_v19 }
  0x2e   : > { %215 = vst [vmem:[%s2211_s24 + $0x50] sm:$0xf] %v214_v20  ;;  %v216_v21 = vld [vmem:[%s2206_s27 + $0x150] sm:$0xf]  ;;  %v218_v22 = vld [vmem:[%s2206_s27 + $0x160] sm:$0xf] }
  0x2f   : > { %v220_v23 = vld [vmem:[%s2206_s27 + $0x170] sm:$0xf]  ;;  %217 = vst [vmem:[%s2211_s24 + $0x54] sm:$0xf] %v216_v21  ;;  %219 = vst [vmem:[%s2211_s24 + $0x58] sm:$0xf] %v218_v22 }
  0x30   : > { %221 = vst [vmem:[%s2211_s24 + $0x5c] sm:$0xf] %v220_v23 }
  0x31 PF: > { %292 = sbr.rel (!%p2183_p9) target bundleno = 57 (0x39), region = 61  ;;  %s294_s26 = sand.u32 (%p2183_p9), 1, %s2059_s13  }
  0x32   : > { %s1873_s29 = sshll.u32 (%p2183_p9), %s2079_s18, 3  ;;  %s1872_s30 = sshll.u32 (%p2183_p9), %s294_s26, 5 }
  0x33   : > { %s298_s9 = scalar_lea.vmem (%p2183_p9), %s2797_s1, %s1873_s29  ;;  %s296_s10 = scalar_lea.vmem (%p2183_p9), [#allocation3], %s1872_s30 }
  0x34   : > { %v332_v24 = vld [vmem:[%s298_s9] sm:$0xff] (%p2183_p9) }
  0x35   : > { %v334_v25 = vld [vmem:[%s298_s9 + $0x20] sm:$0xff] (%p2183_p9)  ;;  %333 = vst [vmem:[%s296_s10] sm:$0xff] (%p2183_p9), %v332_v24 }
  0x36   : > { %v336_v26 = vld [vmem:[%s298_s9 + $0x40] sm:$0xff] (%p2183_p9)  ;;  %335 = vst [vmem:[%s296_s10 + $0x8] sm:$0xff] (%p2183_p9), %v334_v25 }
  0x37   : > { %337 = vst [vmem:[%s296_s10 + $0x10] sm:$0xff] (%p2183_p9), %v336_v26  ;;  %v338_v27 = vld [vmem:[%s298_s9 + $0x60] sm:$0xff] (%p2183_p9) }
  0x38   : > { %339 = vst [vmem:[%s296_s10 + $0x18] sm:$0xff] %v338_v27 }
  0x39 PF: > { %p1874_p12 = scmp.ge.s32.totalorder %s2087_s20, 1  ;;  %p350_p13 = scmp.lt.s32.totalorder %s2087_s20, 9 }
  0x3b   : > { %p351_p0 = pnand %p1874_p12, %p350_p13 }
  0x3c   : > { %s357_s4 = sand.u32 (!%p351_p0), 1, %s2063_s14   ;;  %s364_s11 = sand.u32 (!%p351_p0), 1, %s2055_s12  }
  0x3d   : > { %354 = sbr.rel (%p351_p0) target bundleno = 285 (0x11d), region = 103  ;;  %s1875_s25 = sshll.u32 (!%p351_p0), %s364_s11, 5 }
  0x3e   : > { %s1912_s21 = smul.u32 (!%p351_p0), 96, %s357_s4  ;;  %s2275_s24 = scalar_lea.vmem (!%p351_p0), [#allocation3], %s1875_s25 }
  0x3f   : > { %v1877_v30 = vld [vmem:[%s2275_s24] ss:$0 sm:$0xff] (!%p351_p0)  ;;  %v1878_v55 = vld [vmem:[%s2275_s24 + $0x1] ss:$0 sm:$0xff] (!%p351_p0)  ;;  %p393_p1 = scmp.lt.s32.totalorder (!%p351_p0), %s2071_s16, 3  ;;  %s1876_s7 = sshll.u32 (!%p351_p0), %s357_s4, 4 }
  0x40   : > { %s2271_s27 = scalar_lea.vmem (!%p351_p0), [#allocation2], %s1912_s21  ;;  %s392_s14 = scalar_lea.vmem (!%p351_p0), [#allocation4], %s1876_s7 }
  0x41   : > { %v396_v28 = vld [vmem:[%s2271_s27] sm:$0x7] (!%p351_p0)  ;;  %v397_v29 = vld [vmem:[%s2271_s27 + $0x4] sm:$0x7] (!%p351_p0)  ;;  %v398_v31 = vld [vmem:[%s2271_s27 + $0x8] sm:$0x7] (!%p351_p0) }
  0x42   : > { %v399_v32 = vld [vmem:[%s2271_s27 + $0xc] sm:$0x7] (!%p351_p0)  ;;  %v400_v33 = vld [vmem:[%s2271_s27 + $0x10] sm:$0x7] (!%p351_p0)  ;;  %v2281_v34 = vunpack.c.l.bf16 (!%p351_p0), %v396_v28  ;;  %v2283_v35 = vunpack.c.l.bf16 (!%p351_p0), %v397_v29  ;;  %v401_v36 = vld [vmem:[%s2271_s27 + $0x14] sm:$0x7] (!%p351_p0)  ;;  %v2287_v38 = vunpack.c.l.bf16 (!%p351_p0), %v398_v31 }
  0x43   : > { %v402_v37 = vld [vmem:[%s2271_s27 + $0x18] sm:$0x7] (!%p351_p0)  ;;  %v2289_v39 = vunpack.c.l.bf16 (!%p351_p0), %v399_v32  ;;  %v2291_v40 = vunpack.c.l.bf16 (!%p351_p0), %v400_v33  ;;  %v403_v41 = vld [vmem:[%s2271_s27 + $0x1c] sm:$0x7] (!%p351_p0)  ;;  %v404_v42 = vld [vmem:[%s2271_s27 + $0x20] sm:$0x7] (!%p351_p0)  ;;  %v2296_v44 = vunpack.c.l.bf16 (!%p351_p0), %v401_v36 }
  0x44   : > { %v405_v43 = vld [vmem:[%s2271_s27 + $0x24] sm:$0x7]  ;;  %v2298_v45 = vunpack.c.l.bf16 %v402_v37  ;;  %v449_v46 = vmul.f32 %v1877_v30, %v2281_v34  ;;  %v450_v47 = vmul.f32 %v1877_v30, %v2283_v35  ;;  %v406_v48 = vld [vmem:[%s2271_s27 + $0x28] sm:$0x7]  ;;  %v407_v49 = vld [vmem:[%s2271_s27 + $0x2c] sm:$0x7]  ;;  %v2305_v51 = vunpack.c.l.bf16 %v403_v41 }
  0x45   : > { %v408_v50 = vld [vmem:[%s2271_s27 + $0x30] sm:$0x7]  ;;  %v2307_v52 = vunpack.c.l.bf16 %v404_v42  ;;  %v2309_v53 = vunpack.c.l.bf16 %v405_v43  ;;  %v451_v54 = vmul.f32 %v1877_v30, %v2287_v38  ;;  %v409_v56 = vld [vmem:[%s2271_s27 + $0x34] sm:$0x7]  ;;  %v410_v57 = vld [vmem:[%s2271_s27 + $0x38] sm:$0x7]  ;;  %v2316_v59 = vunpack.c.l.bf16 %v406_v48 }
  0x46   : > { %v411_v58 = vld [vmem:[%s2271_s27 + $0x3c] sm:$0x7]  ;;  %v2318_v60 = vunpack.c.l.bf16 %v407_v49  ;;  %v2320_v61 = vunpack.c.l.bf16 %v408_v50  ;;  %v452_v62 = vmul.f32 %v1877_v30, %v2289_v39  ;;  %v412_v63 = vld [vmem:[%s2271_s27 + $0x40] sm:$0x7]  ;;  %v413_v0 = vld [vmem:[%s2271_s27 + $0x44] sm:$0x7]  ;;  %v2326_v2 = vunpack.c.l.bf16 %v409_v56 }
  0x47   : > { %v414_v1 = vld [vmem:[%s2271_s27 + $0x48] sm:$0x7]  ;;  %v2328_v3 = vunpack.c.l.bf16 %v410_v57  ;;  %v2330_v4 = vunpack.c.l.bf16 %v411_v58  ;;  %v453_v5 = vmul.f32 %v1877_v30, %v2298_v45  ;;  %v415_v6 = vld [vmem:[%s2271_s27 + $0x4c] sm:$0x7]  ;;  %v416_v7 = vld [vmem:[%s2271_s27 + $0x50] sm:$0x7]  ;;  %v2336_v9 = vunpack.c.l.bf16 %v412_v63 }
  0x48   : > { %v417_v8 = vld [vmem:[%s2271_s27 + $0x54] sm:$0x7]  ;;  %v2338_v10 = vunpack.c.l.bf16 %v413_v0  ;;  %v2340_v11 = vunpack.c.l.bf16 %v414_v1  ;;  %v454_v12 = vmul.f32 %v1877_v30, %v2305_v51  ;;  %v418_v13 = vld [vmem:[%s2271_s27 + $0x58] sm:$0x7]  ;;  %v419_v14 = vld [vmem:[%s2271_s27 + $0x5c] sm:$0x7]  ;;  %v2345_v15 = vunpack.c.l.bf16 %v415_v6 }
  0x49   : > { %v2347_v16 = vunpack.c.l.bf16 %v416_v7  ;;  %v2349_v17 = vunpack.c.l.bf16 %v417_v8  ;;  %v455_v18 = vmul.f32 %v1877_v30, %v2307_v52  ;;  %v2352_v19 = vunpack.c.l.bf16 %v418_v13  ;;  %v1879_v37 = vld [vmem:[%s2275_s24 + $0x2] ss:$0 sm:$0xff]  ;;  %s2582_s12 = scalar_select %p393_p1, %s2071_s16, 3 }
  0x4a   : > { %v2354_v20 = vunpack.c.l.bf16 %v419_v14  ;;  %v456_v21 = vmul.f32 %v1877_v30, %v2309_v53  ;;  %v470_v22 = vmul.f32 %v1878_v55, %v2281_v34  ;;  %v471_v23 = vmul.f32 %v1878_v55, %v2283_v35  ;;  %s1906_s8 = sshll.u32 (%p2190_p10), %s2075_s17, 5 }
  0x4b   : > { %v472_v24 = vmul.f32 %v1878_v55, %v2287_v38  ;;  %v473_v25 = vmul.f32 %v1878_v55, %v2289_v39  ;;  %v474_v26 = vmul.f32 %v1878_v55, %v2298_v45  ;;  %v475_v27 = vmul.f32 %v1878_v55, %v2305_v51  ;;  %s395_s30 = scalar_lea.vmem %s2798_s2, %s2582_s12  ;;  %s1698_s9 = sadd.s32 (%p2190_p10), %s2071_s16, %s1906_s8 }
  0x4c   : > { %v476_v28 = vmul.f32 %v1878_v55, %v2307_v52  ;;  %v477_v29 = vmul.f32 %v1878_v55, %v2309_v53  ;;  %v486_v31 = vrot.slane %v470_v22, 1  ;;  %v487_v32 = vrot.slane %v471_v23, 1  ;;  %s1907_s10 = sshll.u32 (%p2190_p10), %s1698_s9, 1 }
  0x4d   : > { %v488_v33 = vrot.slane %v472_v24, 1  ;;  %v489_v30 = vrot.slane %v473_v25, 1  ;;  %v490_v36 = vrot.slane %v474_v26, 1  ;;  %v491_v41 = vrot.slane %v475_v27, 1  ;;  %s1700_s21 = scalar_lea.vmem (%p2190_p10), %s2799_s3, %s1907_s10 }
  0x4e   : > { %v492_v42 = vrot.slane %v476_v28, 1  ;;  %v493_v43 = vrot.slane %v477_v29, 1  ;;  %v502_v48 = vadd.f32 %v486_v31, %v449_v46  ;;  %v503_v49 = vadd.f32 %v487_v32, %v450_v47 }
  0x4f   : > { %v504_v50 = vadd.f32 %v488_v33, %v451_v54  ;;  %v505_v56 = vadd.f32 %v489_v30, %v452_v62  ;;  %v506_v57 = vadd.f32 %v490_v36, %v453_v5  ;;  %v507_v58 = vadd.f32 %v491_v41, %v454_v12  ;;  %v1881_v41 = vld [vmem:[%s2275_s24 + $0x4] ss:$0 sm:$0xff] }
  0x50   : > { %v508_v63 = vadd.f32 %v492_v42, %v455_v18  ;;  %v509_v0 = vadd.f32 %v493_v43, %v456_v21  ;;  %v515_v55 = vmul.f32 %v1879_v37, %v2281_v34  ;;  %v516_v1 = vmul.f32 %v1879_v37, %v2283_v35  ;;  %v1880_v34 = vld [vmem:[%s2275_s24 + $0x3] ss:$0 sm:$0xff] }
  0x51   : > { %v517_v6 = vmul.f32 %v1879_v37, %v2287_v38  ;;  %v518_v7 = vmul.f32 %v1879_v37, %v2289_v39  ;;  %v519_v8 = vmul.f32 %v1879_v37, %v2298_v45  ;;  %v520_v46 = vmul.f32 %v1879_v37, %v2305_v51 }
  0x52   : > { %v521_v47 = vmul.f32 %v1879_v37, %v2307_v52  ;;  %v522_v54 = vmul.f32 %v1879_v37, %v2309_v53  ;;  %v531_v62 = vrot.slane %v515_v55, 2  ;;  %v532_v5 = vrot.slane %v516_v1, 2 }
  0x53   : > { %v533_v12 = vrot.slane %v517_v6, 2  ;;  %v534_v13 = vrot.slane %v518_v7, 2  ;;  %v535_v14 = vrot.slane %v519_v8, 2  ;;  %v536_v18 = vrot.slane %v520_v46, 2 }
  0x54   : > { %v537_v21 = vrot.slane %v521_v47, 2  ;;  %v538_v22 = vrot.slane %v522_v54, 2  ;;  %v547_v23 = vadd.f32 %v531_v62, %v502_v48  ;;  %v548_v24 = vadd.f32 %v532_v5, %v503_v49 }
  0x55   : > { %v549_v25 = vadd.f32 %v533_v12, %v504_v50  ;;  %v550_v26 = vadd.f32 %v534_v13, %v505_v56  ;;  %v551_v27 = vadd.f32 %v535_v14, %v506_v57  ;;  %v552_v28 = vadd.f32 %v536_v18, %v507_v58  ;;  %v1882_v18 = vld [vmem:[%s2275_s24 + $0x5] ss:$0 sm:$0xff] }
  0x56   : > { %v553_v29 = vadd.f32 %v537_v21, %v508_v63  ;;  %v554_v31 = vadd.f32 %v538_v22, %v509_v0  ;;  %v560_v32 = vmul.f32 %v1880_v34, %v2283_v35  ;;  %v561_v33 = vmul.f32 %v1880_v34, %v2287_v38 }
  0x57   : > { %v562_v30 = vmul.f32 %v1880_v34, %v2289_v39  ;;  %v563_v36 = vmul.f32 %v1880_v34, %v2291_v40  ;;  %v564_v37 = vmul.f32 %v1880_v34, %v2305_v51  ;;  %v565_v42 = vmul.f32 %v1880_v34, %v2307_v52 }
  0x58   : > { %v566_v43 = vmul.f32 %v1880_v34, %v2309_v53  ;;  %v567_v48 = vmul.f32 %v1880_v34, %v2316_v59  ;;  %v568_v49 = vadd.f32 %v560_v32, %v547_v23  ;;  %v569_v50 = vadd.f32 %v561_v33, %v548_v24 }
  0x59   : > { %v570_v56 = vadd.f32 %v562_v30, %v549_v25  ;;  %v571_v57 = vadd.f32 %v563_v36, %v550_v26  ;;  %v572_v58 = vadd.f32 %v564_v37, %v551_v27  ;;  %v573_v63 = vadd.f32 %v565_v42, %v552_v28 }
  0x5a   : > { %v574_v0 = vadd.f32 %v566_v43, %v553_v29  ;;  %v575_v55 = vadd.f32 %v567_v48, %v554_v31  ;;  %v581_v1 = vmul.f32 %v1881_v41, %v2283_v35  ;;  %v582_v6 = vmul.f32 %v1881_v41, %v2287_v38 }
  0x5b   : > { %v583_v7 = vmul.f32 %v1881_v41, %v2289_v39  ;;  %v584_v8 = vmul.f32 %v1881_v41, %v2291_v40  ;;  %v585_v46 = vmul.f32 %v1881_v41, %v2305_v51  ;;  %v586_v47 = vmul.f32 %v1881_v41, %v2307_v52 }
  0x5c   : > { %v587_v54 = vmul.f32 %v1881_v41, %v2309_v53  ;;  %v588_v62 = vmul.f32 %v1881_v41, %v2316_v59  ;;  %v597_v5 = vrot.slane %v581_v1, 1  ;;  %v598_v12 = vrot.slane %v582_v6, 1 }
  0x5d   : > { %v599_v13 = vrot.slane %v583_v7, 1  ;;  %v600_v14 = vrot.slane %v584_v8, 1  ;;  %v601_v34 = vrot.slane %v585_v46, 1  ;;  %v602_v21 = vrot.slane %v586_v47, 1 }
  0x5e   : > { %v603_v22 = vrot.slane %v587_v54, 1  ;;  %v604_v23 = vrot.slane %v588_v62, 1  ;;  %v613_v24 = vadd.f32 %v597_v5, %v568_v49  ;;  %v614_v25 = vadd.f32 %v598_v12, %v569_v50 }
  0x5f   : > { %v615_v26 = vadd.f32 %v599_v13, %v570_v56  ;;  %v616_v27 = vadd.f32 %v600_v14, %v571_v57  ;;  %v617_v28 = vadd.f32 %v601_v34, %v572_v58  ;;  %v618_v29 = vadd.f32 %v602_v21, %v573_v63 }
  0x60   : > { %v619_v31 = vadd.f32 %v603_v22, %v574_v0  ;;  %v620_v32 = vadd.f32 %v604_v23, %v575_v55  ;;  %v626_v33 = vmul.f32 %v1882_v18, %v2283_v35  ;;  %v627_v30 = vmul.f32 %v1882_v18, %v2287_v38  ;;  %v1883_v35 = vld [vmem:[%s2275_s24 + $0x6] ss:$0 sm:$0xff] }
  0x61   : > { %v628_v36 = vmul.f32 %v1882_v18, %v2289_v39  ;;  %v629_v37 = vmul.f32 %v1882_v18, %v2291_v40  ;;  %v630_v41 = vmul.f32 %v1882_v18, %v2305_v51  ;;  %v631_v42 = vmul.f32 %v1882_v18, %v2307_v52 }
  0x62   : > { %v632_v43 = vmul.f32 %v1882_v18, %v2309_v53  ;;  %v633_v48 = vmul.f32 %v1882_v18, %v2316_v59  ;;  %v642_v49 = vrot.slane %v626_v33, 2  ;;  %v643_v50 = vrot.slane %v627_v30, 2  ;;  %v1884_v18 = vld [vmem:[%s2275_s24 + $0x7] ss:$0 sm:$0xff] }
  0x63   : > { %v644_v56 = vrot.slane %v628_v36, 2  ;;  %v645_v57 = vrot.slane %v629_v37, 2  ;;  %v646_v58 = vrot.slane %v630_v41, 2  ;;  %v647_v63 = vrot.slane %v631_v42, 2 }
  0x64   : > { %v648_v0 = vrot.slane %v632_v43, 2  ;;  %v649_v55 = vrot.slane %v633_v48, 2  ;;  %v658_v1 = vadd.f32 %v642_v49, %v613_v24  ;;  %v659_v6 = vadd.f32 %v643_v50, %v614_v25 }
  0x65   : > { %v660_v7 = vadd.f32 %v644_v56, %v615_v26  ;;  %v661_v8 = vadd.f32 %v645_v57, %v616_v27  ;;  %v662_v46 = vadd.f32 %v646_v58, %v617_v28  ;;  %v663_v47 = vadd.f32 %v647_v63, %v618_v29 }
  0x66   : > { %v664_v54 = vadd.f32 %v648_v0, %v619_v31  ;;  %v665_v62 = vadd.f32 %v649_v55, %v620_v32  ;;  %v671_v5 = vmul.f32 %v1883_v35, %v2287_v38  ;;  %v672_v12 = vmul.f32 %v1883_v35, %v2289_v39 }
  0x67   : > { %v673_v13 = vmul.f32 %v1883_v35, %v2291_v40  ;;  %v674_v14 = vmul.f32 %v1883_v35, %v2296_v44  ;;  %v675_v34 = vmul.f32 %v1883_v35, %v2307_v52  ;;  %v676_v21 = vmul.f32 %v1883_v35, %v2309_v53 }
  0x68   : > { %v677_v22 = vmul.f32 %v1883_v35, %v2316_v59  ;;  %v678_v23 = vmul.f32 %v1883_v35, %v2318_v60  ;;  %v679_v24 = vadd.f32 %v671_v5, %v658_v1  ;;  %v680_v25 = vadd.f32 %v672_v12, %v659_v6  ;;  %v1885_v35 = vld [vmem:[%s2275_s24 + $0x8] ss:$0 sm:$0xff] }
  0x69   : > { %v681_v26 = vadd.f32 %v673_v13, %v660_v7  ;;  %v682_v27 = vadd.f32 %v674_v14, %v661_v8  ;;  %v683_v28 = vadd.f32 %v675_v34, %v662_v46  ;;  %v684_v29 = vadd.f32 %v676_v21, %v663_v47 }
  0x6a   : > { %v685_v31 = vadd.f32 %v677_v22, %v664_v54  ;;  %v686_v32 = vadd.f32 %v678_v23, %v665_v62  ;;  %v692_v33 = vmul.f32 %v1884_v18, %v2287_v38  ;;  %v693_v30 = vmul.f32 %v1884_v18, %v2289_v39 }
  0x6b   : > { %v694_v36 = vmul.f32 %v1884_v18, %v2291_v40  ;;  %v695_v37 = vmul.f32 %v1884_v18, %v2296_v44  ;;  %v696_v41 = vmul.f32 %v1884_v18, %v2307_v52  ;;  %v697_v42 = vmul.f32 %v1884_v18, %v2309_v53 }
  0x6c   : > { %v698_v43 = vmul.f32 %v1884_v18, %v2316_v59  ;;  %v699_v48 = vmul.f32 %v1884_v18, %v2318_v60  ;;  %v708_v49 = vrot.slane %v692_v33, 1  ;;  %v709_v50 = vrot.slane %v693_v30, 1 }
  0x6d   : > { %v710_v56 = vrot.slane %v694_v36, 1  ;;  %v711_v57 = vrot.slane %v695_v37, 1  ;;  %v712_v58 = vrot.slane %v696_v41, 1  ;;  %v713_v63 = vrot.slane %v697_v42, 1 }
  0x6e   : > { %v714_v0 = vrot.slane %v698_v43, 1  ;;  %v715_v55 = vrot.slane %v699_v48, 1  ;;  %v724_v1 = vadd.f32 %v708_v49, %v679_v24  ;;  %v725_v6 = vadd.f32 %v709_v50, %v680_v25  ;;  %v1887_v50 = vld [vmem:[%s2275_s24 + $0xa] ss:$0 sm:$0xff] }
  0x6f   : > { %v726_v7 = vadd.f32 %v710_v56, %v681_v26  ;;  %v727_v8 = vadd.f32 %v711_v57, %v682_v27  ;;  %v728_v46 = vadd.f32 %v712_v58, %v683_v28  ;;  %v729_v47 = vadd.f32 %v713_v63, %v684_v29 }
  0x70   : > { %v730_v54 = vadd.f32 %v714_v0, %v685_v31  ;;  %v731_v62 = vadd.f32 %v715_v55, %v686_v32  ;;  %v737_v5 = vmul.f32 %v1885_v35, %v2287_v38  ;;  %v738_v12 = vmul.f32 %v1885_v35, %v2289_v39  ;;  %v1886_v38 = vld [vmem:[%s2275_s24 + $0x9] ss:$0 sm:$0xff] }
  0x71   : > { %v739_v13 = vmul.f32 %v1885_v35, %v2291_v40  ;;  %v740_v14 = vmul.f32 %v1885_v35, %v2296_v44  ;;  %v741_v34 = vmul.f32 %v1885_v35, %v2307_v52  ;;  %v742_v18 = vmul.f32 %v1885_v35, %v2309_v53 }
  0x72   : > { %v743_v21 = vmul.f32 %v1885_v35, %v2316_v59  ;;  %v744_v22 = vmul.f32 %v1885_v35, %v2318_v60  ;;  %v753_v23 = vrot.slane %v737_v5, 2  ;;  %v754_v24 = vrot.slane %v738_v12, 2 }
  0x73   : > { %v755_v25 = vrot.slane %v739_v13, 2  ;;  %v756_v26 = vrot.slane %v740_v14, 2  ;;  %v757_v27 = vrot.slane %v741_v34, 2  ;;  %v758_v28 = vrot.slane %v742_v18, 2 }
  0x74   : > { %v759_v39 = vrot.slane %v743_v21, 2  ;;  %v760_v40 = vrot.slane %v744_v22, 2  ;;  %v769_v29 = vadd.f32 %v753_v23, %v724_v1  ;;  %v770_v44 = vadd.f32 %v754_v24, %v725_v6  ;;  %v1888_v24 = vld [vmem:[%s2275_s24 + $0xb] ss:$0 sm:$0xff] }
  0x75   : > { %v771_v31 = vadd.f32 %v755_v25, %v726_v7  ;;  %v772_v32 = vadd.f32 %v756_v26, %v727_v8  ;;  %v773_v33 = vadd.f32 %v757_v27, %v728_v46  ;;  %v774_v30 = vadd.f32 %v758_v28, %v729_v47 }
  0x76   : > { %v775_v36 = vadd.f32 %v759_v39, %v730_v54  ;;  %v776_v37 = vadd.f32 %v760_v40, %v731_v62  ;;  %v782_v41 = vmul.f32 %v1886_v38, %v2298_v45  ;;  %v783_v42 = vmul.f32 %v1886_v38, %v2305_v51 }
  0x77   : > { %v784_v43 = vmul.f32 %v1886_v38, %v2307_v52  ;;  %v785_v48 = vmul.f32 %v1886_v38, %v2309_v53  ;;  %v786_v49 = vmul.f32 %v1886_v38, %v2320_v61  ;;  %v787_v56 = vmul.f32 %v1886_v38, %v2326_v2 }
  0x78   : > { %v788_v57 = vmul.f32 %v1886_v38, %v2328_v3  ;;  %v789_v58 = vmul.f32 %v1886_v38, %v2330_v4  ;;  %v790_v35 = vadd.f32 %v782_v41, %v769_v29  ;;  %v791_v63 = vadd.f32 %v783_v42, %v770_v44 }
  0x79   : > { %v792_v0 = vadd.f32 %v784_v43, %v771_v31  ;;  %v793_v55 = vadd.f32 %v785_v48, %v772_v32  ;;  %v794_v1 = vadd.f32 %v786_v49, %v773_v33  ;;  %v795_v6 = vadd.f32 %v787_v56, %v774_v30 }
  0x7a   : > { %v796_v7 = vadd.f32 %v788_v57, %v775_v36  ;;  %v797_v8 = vadd.f32 %v789_v58, %v776_v37  ;;  %v803_v46 = vmul.f32 %v1887_v50, %v2298_v45  ;;  %v804_v47 = vmul.f32 %v1887_v50, %v2305_v51 }
  0x7b   : > { %v805_v54 = vmul.f32 %v1887_v50, %v2307_v52  ;;  %v806_v62 = vmul.f32 %v1887_v50, %v2309_v53  ;;  %v807_v5 = vmul.f32 %v1887_v50, %v2320_v61  ;;  %v808_v12 = vmul.f32 %v1887_v50, %v2326_v2 }
  0x7c   : > { %v809_v13 = vmul.f32 %v1887_v50, %v2328_v3  ;;  %v810_v14 = vmul.f32 %v1887_v50, %v2330_v4  ;;  %v819_v34 = vrot.slane %v803_v46, 1  ;;  %v820_v18 = vrot.slane %v804_v47, 1 }
  0x7d   : > { %v821_v21 = vrot.slane %v805_v54, 1  ;;  %v822_v22 = vrot.slane %v806_v62, 1  ;;  %v823_v23 = vrot.slane %v807_v5, 1  ;;  %v824_v25 = vrot.slane %v808_v12, 1 }
  0x7e   : > { %v825_v26 = vrot.slane %v809_v13, 1  ;;  %v826_v27 = vrot.slane %v810_v14, 1  ;;  %v835_v38 = vadd.f32 %v819_v34, %v790_v35  ;;  %v836_v28 = vadd.f32 %v820_v18, %v791_v63  ;;  %v1890_v34 = vld [vmem:[%s2275_s24 + $0xd] ss:$0 sm:$0xff] }
  0x7f   : > { %v837_v39 = vadd.f32 %v821_v21, %v792_v0  ;;  %v838_v40 = vadd.f32 %v822_v22, %v793_v55  ;;  %v839_v29 = vadd.f32 %v823_v23, %v794_v1  ;;  %v840_v44 = vadd.f32 %v824_v25, %v795_v6 }
  0x80   : > { %v841_v31 = vadd.f32 %v825_v26, %v796_v7  ;;  %v842_v32 = vadd.f32 %v826_v27, %v797_v8  ;;  %v848_v33 = vmul.f32 %v1888_v24, %v2298_v45  ;;  %v849_v30 = vmul.f32 %v1888_v24, %v2305_v51  ;;  %v1889_v45 = vld [vmem:[%s2275_s24 + $0xc] ss:$0 sm:$0xff] }
  0x81   : > { %v850_v36 = vmul.f32 %v1888_v24, %v2307_v52  ;;  %v851_v37 = vmul.f32 %v1888_v24, %v2309_v53  ;;  %v852_v41 = vmul.f32 %v1888_v24, %v2320_v61  ;;  %v853_v42 = vmul.f32 %v1888_v24, %v2326_v2 }
  0x82   : > { %v854_v43 = vmul.f32 %v1888_v24, %v2328_v3  ;;  %v855_v48 = vmul.f32 %v1888_v24, %v2330_v4  ;;  %v864_v49 = vrot.slane %v848_v33, 2  ;;  %v865_v50 = vrot.slane %v849_v30, 2 }
  0x83   : > { %v866_v56 = vrot.slane %v850_v36, 2  ;;  %v867_v57 = vrot.slane %v851_v37, 2  ;;  %v868_v58 = vrot.slane %v852_v41, 2  ;;  %v869_v35 = vrot.slane %v853_v42, 2 }
  0x84   : > { %v870_v63 = vrot.slane %v854_v43, 2  ;;  %v871_v0 = vrot.slane %v855_v48, 2  ;;  %v880_v55 = vadd.f32 %v864_v49, %v835_v38  ;;  %v881_v1 = vadd.f32 %v865_v50, %v836_v28  ;;  %v1891_v49 = vld [vmem:[%s2275_s24 + $0xe] ss:$0 sm:$0xff] }
  0x85   : > { %v882_v6 = vadd.f32 %v866_v56, %v837_v39  ;;  %v883_v7 = vadd.f32 %v867_v57, %v838_v40  ;;  %v884_v8 = vadd.f32 %v868_v58, %v839_v29  ;;  %v885_v46 = vadd.f32 %v869_v35, %v840_v44 }
  0x86   : > { %v886_v47 = vadd.f32 %v870_v63, %v841_v31  ;;  %v887_v54 = vadd.f32 %v871_v0, %v842_v32  ;;  %v893_v62 = vmul.f32 %v1889_v45, %v2305_v51  ;;  %v894_v5 = vmul.f32 %v1889_v45, %v2307_v52 }
  0x87   : > { %v895_v12 = vmul.f32 %v1889_v45, %v2309_v53  ;;  %v896_v13 = vmul.f32 %v1889_v45, %v2316_v59  ;;  %v897_v14 = vmul.f32 %v1889_v45, %v2326_v2  ;;  %v898_v18 = vmul.f32 %v1889_v45, %v2328_v3 }
  0x88   : > { %v899_v21 = vmul.f32 %v1889_v45, %v2330_v4  ;;  %v900_v22 = vmul.f32 %v1889_v45, %v2336_v9  ;;  %v901_v23 = vadd.f32 %v893_v62, %v880_v55  ;;  %v902_v24 = vadd.f32 %v894_v5, %v881_v1 }
  0x89   : > { %v903_v25 = vadd.f32 %v895_v12, %v882_v6  ;;  %v904_v26 = vadd.f32 %v896_v13, %v883_v7  ;;  %v905_v27 = vadd.f32 %v897_v14, %v884_v8  ;;  %v906_v38 = vadd.f32 %v898_v18, %v885_v46 }
  0x8a   : > { %v907_v28 = vadd.f32 %v899_v21, %v886_v47  ;;  %v908_v39 = vadd.f32 %v900_v22, %v887_v54  ;;  %v914_v40 = vmul.f32 %v1890_v34, %v2305_v51  ;;  %v915_v29 = vmul.f32 %v1890_v34, %v2307_v52 }
  0x8b   : > { %v916_v44 = vmul.f32 %v1890_v34, %v2309_v53  ;;  %v917_v31 = vmul.f32 %v1890_v34, %v2316_v59  ;;  %v918_v32 = vmul.f32 %v1890_v34, %v2326_v2  ;;  %v919_v33 = vmul.f32 %v1890_v34, %v2328_v3 }
  0x8c   : > { %v920_v30 = vmul.f32 %v1890_v34, %v2330_v4  ;;  %v921_v36 = vmul.f32 %v1890_v34, %v2336_v9  ;;  %v930_v37 = vrot.slane %v914_v40, 1  ;;  %v931_v41 = vrot.slane %v915_v29, 1 }
  0x8d   : > { %v932_v42 = vrot.slane %v916_v44, 1  ;;  %v933_v43 = vrot.slane %v917_v31, 1  ;;  %v934_v48 = vrot.slane %v918_v32, 1  ;;  %v935_v50 = vrot.slane %v919_v33, 1 }
  0x8e   : > { %v936_v56 = vrot.slane %v920_v30, 1  ;;  %v937_v57 = vrot.slane %v921_v36, 1  ;;  %v946_v58 = vadd.f32 %v930_v37, %v901_v23  ;;  %v947_v45 = vadd.f32 %v931_v41, %v902_v24  ;;  %v1893_v36 = vld [vmem:[%s2275_s24 + $0x10] ss:$0 sm:$0xff] }
  0x8f   : > { %v948_v35 = vadd.f32 %v932_v42, %v903_v25  ;;  %v949_v63 = vadd.f32 %v933_v43, %v904_v26  ;;  %v950_v0 = vadd.f32 %v934_v48, %v905_v27  ;;  %v951_v55 = vadd.f32 %v935_v50, %v906_v38 }
  0x90   : > { %v952_v1 = vadd.f32 %v936_v56, %v907_v28  ;;  %v953_v6 = vadd.f32 %v937_v57, %v908_v39  ;;  %v959_v7 = vmul.f32 %v1891_v49, %v2305_v51  ;;  %v960_v8 = vmul.f32 %v1891_v49, %v2307_v52  ;;  %v1892_v51 = vld [vmem:[%s2275_s24 + $0xf] ss:$0 sm:$0xff] }
  0x91   : > { %v961_v46 = vmul.f32 %v1891_v49, %v2309_v53  ;;  %v962_v47 = vmul.f32 %v1891_v49, %v2316_v59  ;;  %v963_v54 = vmul.f32 %v1891_v49, %v2326_v2  ;;  %v964_v62 = vmul.f32 %v1891_v49, %v2328_v3 }
  0x92   : > { %v965_v5 = vmul.f32 %v1891_v49, %v2330_v4  ;;  %v966_v12 = vmul.f32 %v1891_v49, %v2336_v9  ;;  %v975_v13 = vrot.slane %v959_v7, 2  ;;  %v976_v14 = vrot.slane %v960_v8, 2 }
  0x93   : > { %v977_v34 = vrot.slane %v961_v46, 2  ;;  %v978_v18 = vrot.slane %v962_v47, 2  ;;  %v979_v21 = vrot.slane %v963_v54, 2  ;;  %v980_v22 = vrot.slane %v964_v62, 2 }
  0x94   : > { %v981_v23 = vrot.slane %v965_v5, 2  ;;  %v982_v24 = vrot.slane %v966_v12, 2  ;;  %v991_v25 = vadd.f32 %v975_v13, %v946_v58  ;;  %v992_v26 = vadd.f32 %v976_v14, %v947_v45  ;;  %v1894_v12 = vld [vmem:[%s2275_s24 + $0x11] ss:$0 sm:$0xff] }
  0x95   : > { %v993_v27 = vadd.f32 %v977_v34, %v948_v35  ;;  %v994_v38 = vadd.f32 %v978_v18, %v949_v63  ;;  %v995_v28 = vadd.f32 %v979_v21, %v950_v0  ;;  %v996_v39 = vadd.f32 %v980_v22, %v951_v55 }
  0x96   : > { %v997_v40 = vadd.f32 %v981_v23, %v952_v1  ;;  %v998_v29 = vadd.f32 %v982_v24, %v953_v6  ;;  %v1004_v44 = vmul.f32 %v1892_v51, %v2307_v52  ;;  %v1005_v31 = vmul.f32 %v1892_v51, %v2309_v53 }
  0x97   : > { %v1006_v32 = vmul.f32 %v1892_v51, %v2316_v59  ;;  %v1007_v33 = vmul.f32 %v1892_v51, %v2318_v60  ;;  %v1008_v30 = vmul.f32 %v1892_v51, %v2328_v3  ;;  %v1009_v37 = vmul.f32 %v1892_v51, %v2330_v4 }
  0x98   : > { %v1010_v41 = vmul.f32 %v1892_v51, %v2336_v9  ;;  %v1011_v42 = vmul.f32 %v1892_v51, %v2338_v10  ;;  %v1012_v43 = vadd.f32 %v1004_v44, %v991_v25  ;;  %v1013_v48 = vadd.f32 %v1005_v31, %v992_v26 }
  0x99   : > { %v1014_v49 = vadd.f32 %v1006_v32, %v993_v27  ;;  %v1015_v50 = vadd.f32 %v1007_v33, %v994_v38  ;;  %v1016_v56 = vadd.f32 %v1008_v30, %v995_v28  ;;  %v1017_v57 = vadd.f32 %v1009_v37, %v996_v39 }
  0x9a   : > { %v1018_v58 = vadd.f32 %v1010_v41, %v997_v40  ;;  %v1019_v45 = vadd.f32 %v1011_v42, %v998_v29  ;;  %v1025_v35 = vmul.f32 %v1893_v36, %v2307_v52  ;;  %v1026_v63 = vmul.f32 %v1893_v36, %v2309_v53 }
  0x9b   : > { %v1027_v0 = vmul.f32 %v1893_v36, %v2316_v59  ;;  %v1028_v55 = vmul.f32 %v1893_v36, %v2318_v60  ;;  %v1029_v1 = vmul.f32 %v1893_v36, %v2328_v3  ;;  %v1030_v6 = vmul.f32 %v1893_v36, %v2330_v4 }
  0x9c   : > { %v1031_v7 = vmul.f32 %v1893_v36, %v2336_v9  ;;  %v1032_v8 = vmul.f32 %v1893_v36, %v2338_v10  ;;  %v1041_v46 = vrot.slane %v1025_v35, 1  ;;  %v1042_v47 = vrot.slane %v1026_v63, 1 }
  0x9d   : > { %v1043_v54 = vrot.slane %v1027_v0, 1  ;;  %v1044_v62 = vrot.slane %v1028_v55, 1  ;;  %v1045_v5 = vrot.slane %v1029_v1, 1  ;;  %v1046_v13 = vrot.slane %v1030_v6, 1  ;;  %v1896_v55 = vld [vmem:[%s2275_s24 + $0x13] ss:$0 sm:$0xff] }
  0x9e   : > { %v1047_v14 = vrot.slane %v1031_v7, 1  ;;  %v1048_v34 = vrot.slane %v1032_v8, 1  ;;  %v1057_v18 = vadd.f32 %v1041_v46, %v1012_v43  ;;  %v1058_v21 = vadd.f32 %v1042_v47, %v1013_v48 }
  0x9f   : > { %v1059_v51 = vadd.f32 %v1043_v54, %v1014_v49  ;;  %v1060_v22 = vadd.f32 %v1044_v62, %v1015_v50  ;;  %v1061_v23 = vadd.f32 %v1045_v5, %v1016_v56  ;;  %v1062_v24 = vadd.f32 %v1046_v13, %v1017_v57 }
  0xa0   : > { %v1063_v25 = vadd.f32 %v1047_v14, %v1018_v58  ;;  %v1064_v26 = vadd.f32 %v1048_v34, %v1019_v45  ;;  %v1070_v27 = vmul.f32 %v1894_v12, %v2307_v52  ;;  %v1071_v38 = vmul.f32 %v1894_v12, %v2309_v53  ;;  %v1895_v52 = vld [vmem:[%s2275_s24 + $0x12] ss:$0 sm:$0xff] }
  0xa1   : > { %v1072_v28 = vmul.f32 %v1894_v12, %v2316_v59  ;;  %v1073_v39 = vmul.f32 %v1894_v12, %v2318_v60  ;;  %v1074_v40 = vmul.f32 %v1894_v12, %v2328_v3  ;;  %v1075_v29 = vmul.f32 %v1894_v12, %v2330_v4 }
  0xa2   : > { %v1076_v44 = vmul.f32 %v1894_v12, %v2336_v9  ;;  %v1077_v31 = vmul.f32 %v1894_v12, %v2338_v10  ;;  %v1086_v32 = vrot.slane %v1070_v27, 2  ;;  %v1087_v33 = vrot.slane %v1071_v38, 2 }
  0xa3   : > { %v1088_v30 = vrot.slane %v1072_v28, 2  ;;  %v1089_v36 = vrot.slane %v1073_v39, 2  ;;  %v1090_v37 = vrot.slane %v1074_v40, 2  ;;  %v1091_v41 = vrot.slane %v1075_v29, 2  ;;  %v1897_v39 = vld [vmem:[%s2275_s24 + $0x14] ss:$0 sm:$0xff] }
  0xa4   : > { %v1092_v53 = vrot.slane %v1076_v44, 2  ;;  %v1093_v59 = vrot.slane %v1077_v31, 2  ;;  %v1102_v42 = vadd.f32 %v1086_v32, %v1057_v18  ;;  %v1103_v60 = vadd.f32 %v1087_v33, %v1058_v21 }
  0xa5   : > { %v1104_v43 = vadd.f32 %v1088_v30, %v1059_v51  ;;  %v1105_v48 = vadd.f32 %v1089_v36, %v1060_v22  ;;  %v1106_v49 = vadd.f32 %v1090_v37, %v1061_v23  ;;  %v1107_v50 = vadd.f32 %v1091_v41, %v1062_v24 }
  0xa6   : > { %v1108_v56 = vadd.f32 %v1092_v53, %v1063_v25  ;;  %v1109_v57 = vadd.f32 %v1093_v59, %v1064_v26  ;;  %v1115_v58 = vmul.f32 %v1895_v52, %v2320_v61  ;;  %v1116_v45 = vmul.f32 %v1895_v52, %v2326_v2 }
  0xa7   : > { %v1117_v35 = vmul.f32 %v1895_v52, %v2328_v3  ;;  %v1118_v63 = vmul.f32 %v1895_v52, %v2330_v4  ;;  %v1119_v0 = vmul.f32 %v1895_v52, %v2340_v11  ;;  %v1120_v1 = vmul.f32 %v1895_v52, %v2345_v15 }
  0xa8   : > { %v1121_v6 = vmul.f32 %v1895_v52, %v2347_v16  ;;  %v1122_v7 = vmul.f32 %v1895_v52, %v2349_v17  ;;  %v1123_v8 = vadd.f32 %v1115_v58, %v1102_v42  ;;  %v1124_v46 = vadd.f32 %v1116_v45, %v1103_v60 }
  0xa9   : > { %v1125_v47 = vadd.f32 %v1117_v35, %v1104_v43  ;;  %v1126_v54 = vadd.f32 %v1118_v63, %v1105_v48  ;;  %v1127_v62 = vadd.f32 %v1119_v0, %v1106_v49  ;;  %v1128_v5 = vadd.f32 %v1120_v1, %v1107_v50 }
  0xaa   : > { %v1129_v12 = vadd.f32 %v1121_v6, %v1108_v56  ;;  %v1130_v13 = vadd.f32 %v1122_v7, %v1109_v57  ;;  %v1136_v14 = vmul.f32 %v1896_v55, %v2320_v61  ;;  %v1137_v34 = vmul.f32 %v1896_v55, %v2326_v2 }
  0xab   : > { %v1138_v18 = vmul.f32 %v1896_v55, %v2328_v3  ;;  %v1139_v21 = vmul.f32 %v1896_v55, %v2330_v4  ;;  %v1140_v51 = vmul.f32 %v1896_v55, %v2340_v11  ;;  %v1141_v22 = vmul.f32 %v1896_v55, %v2345_v15 }
  0xac   : > { %v1142_v23 = vmul.f32 %v1896_v55, %v2347_v16  ;;  %v1143_v24 = vmul.f32 %v1896_v55, %v2349_v17  ;;  %v1152_v25 = vrot.slane %v1136_v14, 1  ;;  %v1153_v26 = vrot.slane %v1137_v34, 1  ;;  %v1899_v34 = vld [vmem:[%s2275_s24 + $0x16] ss:$0 sm:$0xff] }
  0xad   : > { %v1154_v27 = vrot.slane %v1138_v18, 1  ;;  %v1155_v38 = vrot.slane %v1139_v21, 1  ;;  %v1156_v28 = vrot.slane %v1140_v51, 1  ;;  %v1157_v40 = vrot.slane %v1141_v22, 1 }
  0xae   : > { %v1158_v29 = vrot.slane %v1142_v23, 1  ;;  %v1159_v44 = vrot.slane %v1143_v24, 1  ;;  %v1168_v31 = vadd.f32 %v1152_v25, %v1123_v8  ;;  %v1169_v32 = vadd.f32 %v1153_v26, %v1124_v46 }
  0xaf   : > { %v1170_v33 = vadd.f32 %v1154_v27, %v1125_v47  ;;  %v1171_v30 = vadd.f32 %v1155_v38, %v1126_v54  ;;  %v1172_v36 = vadd.f32 %v1156_v28, %v1127_v62  ;;  %v1173_v37 = vadd.f32 %v1157_v40, %v1128_v5 }
  0xb0   : > { %v1174_v52 = vadd.f32 %v1158_v29, %v1129_v12  ;;  %v1175_v41 = vadd.f32 %v1159_v44, %v1130_v13  ;;  %v1181_v53 = vmul.f32 %v1897_v39, %v2320_v61  ;;  %v1182_v59 = vmul.f32 %v1897_v39, %v2326_v2  ;;  %v1898_v61 = vld [vmem:[%s2275_s24 + $0x15] ss:$0 sm:$0xff] }
  0xb1   : > { %v1183_v42 = vmul.f32 %v1897_v39, %v2328_v3  ;;  %v1184_v60 = vmul.f32 %v1897_v39, %v2330_v4  ;;  %v1185_v43 = vmul.f32 %v1897_v39, %v2340_v11  ;;  %v1186_v48 = vmul.f32 %v1897_v39, %v2345_v15 }
  0xb2   : > { %v1187_v49 = vmul.f32 %v1897_v39, %v2347_v16  ;;  %v1188_v50 = vmul.f32 %v1897_v39, %v2349_v17  ;;  %v1197_v56 = vrot.slane %v1181_v53, 2  ;;  %v1198_v57 = vrot.slane %v1182_v59, 2  ;;  %v1900_v59 = vld [vmem:[%s2275_s24 + $0x17] ss:$0 sm:$0xff] }
  0xb3   : > { %v1199_v58 = vrot.slane %v1183_v42, 2  ;;  %v1200_v45 = vrot.slane %v1184_v60, 2  ;;  %v1201_v35 = vrot.slane %v1185_v43, 2  ;;  %v1202_v63 = vrot.slane %v1186_v48, 2 }
  0xb4   : > { %v1203_v0 = vrot.slane %v1187_v49, 2  ;;  %v1204_v55 = vrot.slane %v1188_v50, 2  ;;  %v1213_v1 = vadd.f32 %v1197_v56, %v1168_v31  ;;  %v1214_v6 = vadd.f32 %v1198_v57, %v1169_v32 }
  0xb5   : > { %v1215_v7 = vadd.f32 %v1199_v58, %v1170_v33  ;;  %v1216_v11 = vadd.f32 %v1200_v45, %v1171_v30  ;;  %v1217_v8 = vadd.f32 %v1201_v35, %v1172_v36  ;;  %v1218_v46 = vadd.f32 %v1202_v63, %v1173_v37 }
  0xb6   : > { %v1219_v47 = vadd.f32 %v1203_v0, %v1174_v52  ;;  %v1220_v54 = vadd.f32 %v1204_v55, %v1175_v41  ;;  %v1226_v62 = vmul.f32 %v1898_v61, %v2326_v2  ;;  %v1227_v5 = vmul.f32 %v1898_v61, %v2328_v3 }
  0xb7   : > { %v1228_v12 = vmul.f32 %v1898_v61, %v2330_v4  ;;  %v1229_v13 = vmul.f32 %v1898_v61, %v2336_v9  ;;  %v1230_v14 = vmul.f32 %v1898_v61, %v2345_v15  ;;  %v1231_v18 = vmul.f32 %v1898_v61, %v2347_v16 }
  0xb8   : > { %v1232_v21 = vmul.f32 %v1898_v61, %v2349_v17  ;;  %v1233_v51 = vmul.f32 %v1898_v61, %v2352_v19  ;;  %v1234_v22 = vadd.f32 %v1226_v62, %v1213_v1  ;;  %v1235_v23 = vadd.f32 %v1227_v5, %v1214_v6 }
  0xb9   : > { %v1236_v24 = vadd.f32 %v1228_v12, %v1215_v7  ;;  %v1237_v25 = vadd.f32 %v1229_v13, %v1216_v11  ;;  %v1238_v26 = vadd.f32 %v1230_v14, %v1217_v8  ;;  %v1239_v27 = vadd.f32 %v1231_v18, %v1218_v46 }
  0xba   : > { %v1240_v38 = vadd.f32 %v1232_v21, %v1219_v47  ;;  %v1241_v28 = vadd.f32 %v1233_v51, %v1220_v54  ;;  %v1247_v39 = vmul.f32 %v1899_v34, %v2326_v2  ;;  %v1248_v40 = vmul.f32 %v1899_v34, %v2328_v3 }
  0xbb   : > { %v1249_v29 = vmul.f32 %v1899_v34, %v2330_v4  ;;  %v1250_v44 = vmul.f32 %v1899_v34, %v2336_v9  ;;  %v1251_v31 = vmul.f32 %v1899_v34, %v2345_v15  ;;  %v1252_v32 = vmul.f32 %v1899_v34, %v2347_v16 }
  0xbc   : > { %v1253_v33 = vmul.f32 %v1899_v34, %v2349_v17  ;;  %v1254_v30 = vmul.f32 %v1899_v34, %v2352_v19  ;;  %v1263_v36 = vrot.slane %v1247_v39, 1  ;;  %v1264_v37 = vrot.slane %v1248_v40, 1 }
  0xbd   : > { %v1265_v52 = vrot.slane %v1249_v29, 1  ;;  %v1266_v41 = vrot.slane %v1250_v44, 1  ;;  %v1267_v53 = vrot.slane %v1251_v31, 1  ;;  %v1268_v42 = vrot.slane %v1252_v32, 1 }
  0xbe   : > { %v1269_v60 = vrot.slane %v1253_v33, 1  ;;  %v1270_v43 = vrot.slane %v1254_v30, 1  ;;  %v1279_v48 = vadd.f32 %v1263_v36, %v1234_v22  ;;  %v1280_v49 = vadd.f32 %v1264_v37, %v1235_v23 }
  0xbf   : > { %v1281_v50 = vadd.f32 %v1265_v52, %v1236_v24  ;;  %v1282_v56 = vadd.f32 %v1266_v41, %v1237_v25  ;;  %v1283_v57 = vadd.f32 %v1267_v53, %v1238_v26  ;;  %v1284_v58 = vadd.f32 %v1268_v42, %v1239_v27 }
  0xc0   : > { %v1285_v45 = vadd.f32 %v1269_v60, %v1240_v38  ;;  %v1286_v35 = vadd.f32 %v1270_v43, %v1241_v28  ;;  %v1292_v61 = vmul.f32 %v1900_v59, %v2326_v2  ;;  %v1293_v63 = vmul.f32 %v1900_v59, %v2328_v3  ;;  %v1901_v2 = vld [vmem:[%s2275_s24 + $0x18] ss:$0 sm:$0xff]  ;;  %v1902_v28 = vld [vmem:[%s2275_s24 + $0x19] ss:$0 sm:$0xff] }
  0xc1   : > { %v1294_v0 = vmul.f32 %v1900_v59, %v2330_v4  ;;  %v1295_v55 = vmul.f32 %v1900_v59, %v2336_v9  ;;  %v1296_v1 = vmul.f32 %v1900_v59, %v2345_v15  ;;  %v1297_v6 = vmul.f32 %v1900_v59, %v2347_v16 }
  0xc2   : > { %v1298_v7 = vmul.f32 %v1900_v59, %v2349_v17  ;;  %v1299_v11 = vmul.f32 %v1900_v59, %v2352_v19  ;;  %v1308_v8 = vrot.slane %v1292_v61, 2  ;;  %v1309_v46 = vrot.slane %v1293_v63, 2 }
  0xc3   : > { %v1310_v47 = vrot.slane %v1294_v0, 2  ;;  %v1311_v54 = vrot.slane %v1295_v55, 2  ;;  %v1312_v62 = vrot.slane %v1296_v1, 2  ;;  %v1313_v5 = vrot.slane %v1297_v6, 2 }
  0xc4   : > { %v1314_v12 = vrot.slane %v1298_v7, 2  ;;  %v1315_v13 = vrot.slane %v1299_v11, 2  ;;  %v1324_v14 = vadd.f32 %v1308_v8, %v1279_v48  ;;  %v1325_v34 = vadd.f32 %v1309_v46, %v1280_v49 }
  0xc5   : > { %v1326_v15 = vadd.f32 %v1310_v47, %v1281_v50  ;;  %v1327_v18 = vadd.f32 %v1311_v54, %v1282_v56  ;;  %v1328_v21 = vadd.f32 %v1312_v62, %v1283_v57  ;;  %v1329_v51 = vadd.f32 %v1313_v5, %v1284_v58 }
  0xc6   : > { %v1330_v22 = vadd.f32 %v1314_v12, %v1285_v45  ;;  %v1331_v23 = vadd.f32 %v1315_v13, %v1286_v35  ;;  %v1337_v24 = vmul.f32 %v1901_v2, %v2328_v3  ;;  %v1338_v25 = vmul.f32 %v1901_v2, %v2330_v4  ;;  %v1903_v35 = vld [vmem:[%s2275_s24 + $0x1a] ss:$0 sm:$0xff] }
  0xc7   : > { %v1339_v26 = vmul.f32 %v1901_v2, %v2336_v9  ;;  %v1340_v27 = vmul.f32 %v1901_v2, %v2338_v10  ;;  %v1341_v38 = vmul.f32 %v1901_v2, %v2347_v16  ;;  %v1342_v39 = vmul.f32 %v1901_v2, %v2349_v17 }
  0xc8   : > { %v1343_v40 = vmul.f32 %v1901_v2, %v2352_v19  ;;  %v1344_v29 = vmul.f32 %v1901_v2, %v2354_v20  ;;  %v1345_v44 = vadd.f32 %v1337_v24, %v1324_v14  ;;  %v1346_v31 = vadd.f32 %v1338_v25, %v1325_v34 }
  0xc9   : > { %v1347_v32 = vadd.f32 %v1339_v26, %v1326_v15  ;;  %v1348_v33 = vadd.f32 %v1340_v27, %v1327_v18  ;;  %v1349_v30 = vadd.f32 %v1341_v38, %v1328_v21  ;;  %v1350_v36 = vadd.f32 %v1342_v39, %v1329_v51 }
  0xca   : > { %v1351_v37 = vadd.f32 %v1343_v40, %v1330_v22  ;;  %v1352_v52 = vadd.f32 %v1344_v29, %v1331_v23  ;;  %v1358_v41 = vmul.f32 %v1902_v28, %v2328_v3  ;;  %v1359_v53 = vmul.f32 %v1902_v28, %v2330_v4 }
  0xcb   : > { %v1360_v59 = vmul.f32 %v1902_v28, %v2336_v9  ;;  %v1361_v42 = vmul.f32 %v1902_v28, %v2338_v10  ;;  %v1362_v60 = vmul.f32 %v1902_v28, %v2347_v16  ;;  %v1363_v43 = vmul.f32 %v1902_v28, %v2349_v17 }
  0xcc   : > { %v1364_v48 = vmul.f32 %v1902_v28, %v2352_v19  ;;  %v1365_v49 = vmul.f32 %v1902_v28, %v2354_v20  ;;  %v1374_v50 = vrot.slane %v1358_v41, 1  ;;  %v1375_v56 = vrot.slane %v1359_v53, 1 }
  0xcd   : > { %v1376_v57 = vrot.slane %v1360_v59, 1  ;;  %v1377_v58 = vrot.slane %v1361_v42, 1  ;;  %v1378_v45 = vrot.slane %v1362_v60, 1  ;;  %v1379_v61 = vrot.slane %v1363_v43, 1 }
  0xce   : > { %v1380_v63 = vrot.slane %v1364_v48, 1  ;;  %v1381_v0 = vrot.slane %v1365_v49, 1  ;;  %v1390_v55 = vadd.f32 %v1374_v50, %v1345_v44  ;;  %v1391_v1 = vadd.f32 %v1375_v56, %v1346_v31 }
  0xcf   : > { %v1392_v6 = vadd.f32 %v1376_v57, %v1347_v32  ;;  %v1393_v7 = vadd.f32 %v1377_v58, %v1348_v33  ;;  %v1394_v11 = vadd.f32 %v1378_v45, %v1349_v30  ;;  %v1395_v8 = vadd.f32 %v1379_v61, %v1350_v36 }
  0xd0   : > { %v1396_v46 = vadd.f32 %v1380_v63, %v1351_v37  ;;  %v1397_v47 = vadd.f32 %v1381_v0, %v1352_v52  ;;  %v1403_v54 = vmul.f32 %v1903_v35, %v2328_v3  ;;  %v1404_v62 = vmul.f32 %v1903_v35, %v2330_v4  ;;  %v1904_v3 = vld [vmem:[%s395_s30] ss:$0 sm:$0xff] }
  0xd1   : > { %v1405_v2 = vmul.f32 %v1903_v35, %v2336_v9  ;;  %v1406_v5 = vmul.f32 %v1903_v35, %v2338_v10  ;;  %v1407_v12 = vmul.f32 %v1903_v35, %v2347_v16  ;;  %v1408_v13 = vmul.f32 %v1903_v35, %v2349_v17 }
  0xd2   : > { %v1409_v14 = vmul.f32 %v1903_v35, %v2352_v19  ;;  %v1410_v34 = vmul.f32 %v1903_v35, %v2354_v20  ;;  %v1419_v15 = vrot.slane %v1403_v54, 2  ;;  %v1420_v18 = vrot.slane %v1404_v62, 2 }
  0xd3   : > { %v1421_v21 = vrot.slane %v1405_v2, 2  ;;  %v1422_v51 = vrot.slane %v1406_v5, 2  ;;  %v1423_v22 = vrot.slane %v1407_v12, 2  ;;  %v1424_v23 = vrot.slane %v1408_v13, 2 }
  0xd4   : > { %v1425_v4 = vrot.slane %v1409_v14, 2  ;;  %v1426_v24 = vrot.slane %v1410_v34, 2  ;;  %v1435_v9 = vadd.f32 %v1419_v15, %v1390_v55  ;;  %v1436_v25 = vadd.f32 %v1420_v18, %v1391_v1 }
  0xd5   : > { %v1437_v10 = vadd.f32 %v1421_v21, %v1392_v6  ;;  %v1438_v26 = vadd.f32 %v1422_v51, %v1393_v7  ;;  %v1439_v16 = vadd.f32 %v1423_v22, %v1394_v11  ;;  %v1440_v27 = vadd.f32 %v1424_v23, %v1395_v8 }
  0xd6   : > { %v1441_v17 = vadd.f32 %v1425_v4, %v1396_v46  ;;  %v1442_v38 = vadd.f32 %v1426_v24, %v1397_v47  ;;  %v2600_v19 = vadd.f32 %v1904_v3, %v1435_v9  ;;  %v2602_v20 = vadd.f32 %v1904_v3, %v1436_v25 }
  0xd7   : > { %v2604_v28 = vadd.f32 %v1904_v3, %v1437_v10  ;;  %v2606_v39 = vadd.f32 %v1904_v3, %v1438_v26  ;;  %v2608_v40 = vadd.f32 %v1904_v3, %v1439_v16  ;;  %v2610_v29 = vadd.f32 %v1904_v3, %v1440_v27 }
  0xd8   : > { %v2612_v44 = vadd.f32 %v1904_v3, %v1441_v17  ;;  %v2614_v31 = vadd.f32 %v1904_v3, %v1442_v38  ;;  %v2617_v32 = vmul.f32 0.70710677, %v2600_v19  ;;  %v2620_v33 = vmul.f32 0.70710677, %v2602_v20 }
  0xd9   : > { %v2623_v30 = vmul.f32 0.70710677, %v2604_v28  ;;  %v2626_v36 = vmul.f32 0.70710677, %v2606_v39  ;;  %v2629_v37 = vmul.f32 0.70710677, %v2608_v40 }
  0xda   : > { %v2632_v52 = vmul.f32 0.70710677, %v2610_v29  ;;  %v2635_v41 = vmul.f32 0.70710677, %v2612_v44  ;;  %v2638_v53 = vmul.f32 0.70710677, %v2614_v31 }
  0xdb   : > { %v1474_v59 = vand.u32 2147483647, %v2617_v32  ;;  %v1475_v42 = vand.u32 2147483647, %v2620_v33  ;;  %v1476_v60 = vand.u32 2147483647, %v2623_v30 }
  0xdc   : > { %v1477_v43 = vand.u32 2147483647, %v2626_v36  ;;  %v1478_v48 = vand.u32 2147483647, %v2629_v37  ;;  %v1479_v49 = vand.u32 2147483647, %v2632_v52 }
  0xdd   : > { %v1480_v50 = vand.u32 2147483647, %v2635_v41  ;;  %v1481_v56 = vand.u32 2147483647, %v2638_v53  ;;  %v1482_v57 = vmul.f32 0.3275911, %v1474_v59 }
  0xde   : > { %v1483_v58 = vmul.f32 0.3275911, %v1475_v42  ;;  %v1484_v45 = vmul.f32 0.3275911, %v1476_v60  ;;  %v1485_v35 = vmul.f32 0.3275911, %v1477_v43 }
  0xdf   : > { %v1486_v61 = vmul.f32 0.3275911, %v1478_v48  ;;  %v1487_v63 = vmul.f32 0.3275911, %v1479_v49  ;;  %v1488_v0 = vmul.f32 0.3275911, %v1480_v50 }
  0xe0   : > { %v1489_v55 = vmul.f32 0.3275911, %v1481_v56  ;;  %v1490_v1 = vadd.f32 1.0, %v1482_v57  ;;  %v1491_v6 = vadd.f32 1.0, %v1483_v58  ;;  %v1492_v7 = vadd.f32 1.0, %v1484_v45 }
  0xe1   : > { %v1493_v11 = vadd.f32 1.0, %v1485_v35  ;;  %v1494_v8 = vadd.f32 1.0, %v1486_v61  ;;  %v1495_v46 = vadd.f32 1.0, %v1487_v63  ;;  %v1496_v47 = vadd.f32 1.0, %v1488_v0 }
  0xe2   : > { %1985 = vrcp.f32 %v1490_v1  ;;  %v1586_v54 = vsub.f32 0.0, %v1474_v59  ;;  %v1587_v62 = vsub.f32 0.0, %v1475_v42  ;;  %v1588_v2 = vsub.f32 0.0, %v1476_v60 }
  0xe3   : > { %1987 = vrcp.f32 %v1491_v6  ;;  %v1589_v5 = vsub.f32 0.0, %v1477_v43  ;;  %v1497_v12 = vadd.f32 1.0, %v1489_v55  ;;  %v1590_v13 = vsub.f32 0.0, %v1478_v48 }
  0xe4   : > { %1989 = vrcp.f32 %v1492_v7  ;;  %v1591_v14 = vsub.f32 0.0, %v1479_v49  ;;  %v1592_v34 = vsub.f32 0.0, %v1480_v50  ;;  %v1594_v15 = vmul.f32 %v1586_v54, %v1474_v59 }
  0xe5   : > { %1991 = vrcp.f32 %v1493_v11  ;;  %v1595_v18 = vmul.f32 %v1587_v62, %v1475_v42  ;;  %v1593_v21 = vsub.f32 0.0, %v1481_v56  ;;  %v1596_v51 = vmul.f32 %v1588_v2, %v1476_v60 }
  0xe6   : > { %1993 = vrcp.f32 %v1494_v8  ;;  %v1597_v22 = vmul.f32 %v1589_v5, %v1477_v43  ;;  %v1598_v3 = vmul.f32 %v1590_v13, %v1478_v48  ;;  %v1599_v23 = vmul.f32 %v1591_v14, %v1479_v49 }
  0xe7   : > { %1995 = vrcp.f32 %v1495_v46  ;;  %v1602_v4 = vmul.f32 1.442695, %v1594_v15  ;;  %v1604_v24 = vmul.f32 1.442695, %v1595_v18  ;;  %v1600_v9 = vmul.f32 %v1592_v34, %v1480_v50 }
  0xe8   : > { %1997 = vrcp.f32 %v1496_v47  ;;  %v1606_v25 = vmul.f32 1.442695, %v1596_v51  ;;  %v1601_v10 = vmul.f32 %v1593_v21, %v1481_v56  ;;  %v1608_v26 = vmul.f32 1.442695, %v1597_v22 }
  0xe9   : > { %1999 = vrcp.f32 %v1497_v12  ;;  %v2649_v16 = vmul.f32 0.5, %v2600_v19  ;;  %v2652_v27 = vmul.f32 0.5, %v2602_v20  ;;  %v1610_v17 = vmul.f32 1.442695, %v1598_v3 }
  0xea   : > { %2001 = vpow2.f32 %v1602_v4  ;;  %v2657_v59 = vmul.f32 0.5, %v2604_v28  ;;  %v2660_v42 = vmul.f32 0.5, %v2606_v39  ;;  %v1612_v60 = vmul.f32 1.442695, %v1599_v23 }
  0xeb   : > { %2003 = vpow2.f32 %v1604_v24  ;;  %v2665_v19 = vmul.f32 0.5, %v2608_v40  ;;  %v1614_v48 = vmul.f32 1.442695, %v1600_v9  ;;  %v2671_v50 = vmul.f32 0.5, %v2610_v29 }
  0xec   : > { %v2654_v38 = vpop.eup %1985  ;;  %2005 = vpow2.f32 %v1606_v25  ;;  %v1616_v39 = vmul.f32 1.442695, %v1601_v10  ;;  %v2677_v57 = vmul.f32 0.5, %v2612_v44  ;;  %v2683_v35 = vmul.f32 0.5, %v2614_v31 }
  0xed   : > { %v2662_v43 = vpop.eup %1987  ;;  %v1514_v20 = vmul.f32 1.0614054, %v2654_v38  ;;  %2007 = vpow2.f32 %v1608_v26  ;;  %vm1634_vm0 = vcmp.ge.f32.partialorder %v2617_v32, 0.0  ;;  %vm1635_vm1 = vcmp.ge.f32.partialorder %v2620_v33, 0.0 }
  0xee   : > { %v2668_v49 = vpop.eup %1989  ;;  %v1515_v28 = vmul.f32 1.0614054, %v2662_v43  ;;  %2009 = vpow2.f32 %v1610_v17  ;;  %vm1636_vm2 = vcmp.ge.f32.partialorder %v2623_v30, 0.0  ;;  %vm1637_vm3 = vcmp.ge.f32.partialorder %v2626_v36, 0.0 }
  0xef   : > { %v2674_v56 = vpop.eup %1991  ;;  %v1516_v40 = vmul.f32 1.0614054, %v2668_v49  ;;  %v1522_v58 = vadd.f32 -1.4531521, %v1514_v20  ;;  %2011 = vpow2.f32 %v1612_v60  ;;  %vm1638_vm4 = vcmp.ge.f32.partialorder %v2629_v37, 0.0 }
  0xf0   : > { %v2680_v45 = vpop.eup %1993  ;;  %v1517_v29 = vmul.f32 1.0614054, %v2674_v56  ;;  %v1523_v61 = vadd.f32 -1.4531521, %v1515_v28  ;;  %2013 = vpow2.f32 %v1614_v48  ;;  %vm1639_vm5 = vcmp.ge.f32.partialorder %v2632_v52, 0.0 }
  0xf1   : > { %v2686_v63 = vpop.eup %1995  ;;  %v1518_v0 = vmul.f32 1.0614054, %v2680_v45  ;;  %v1524_v55 = vadd.f32 -1.4531521, %v1516_v40  ;;  %v1530_v44 = vmul.f32 %v2654_v38, %v1522_v58  ;;  %2015 = vpow2.f32 %v1616_v39 }
  0xf2   : > { %v2690_v1 = vpop.eup %1997  ;;  %v1519_v6 = vmul.f32 1.0614054, %v2686_v63  ;;  %v1525_v7 = vadd.f32 -1.4531521, %v1517_v29  ;;  %v1531_v31 = vmul.f32 %v2662_v43, %v1523_v61  ;;  %vm1640_vm6 = vcmp.ge.f32.partialorder %v2635_v41, 0.0 }
  0xf3   : > { %v2694_v11 = vpop.eup %1999  ;;  %v1520_v8 = vmul.f32 1.0614054, %v2690_v1  ;;  %v1526_v46 = vadd.f32 -1.4531521, %v1518_v0  ;;  %v1532_v47 = vmul.f32 %v2668_v49, %v1524_v55  ;;  %v1538_v54 = vadd.f32 1.4214138, %v1530_v44 }
  0xf4   : > { %v1521_v62 = vmul.f32 1.0614054, %v2694_v11  ;;  %v1527_v2 = vadd.f32 -1.4531521, %v1519_v6  ;;  %v1533_v5 = vmul.f32 %v2674_v56, %v1525_v7  ;;  %v1539_v12 = vadd.f32 1.4214138, %v1531_v31  ;;  %v2002_v13 = vpop.eup %2001 }
  0xf5   : > { %v1528_v14 = vadd.f32 -1.4531521, %v1520_v8  ;;  %v1534_v34 = vmul.f32 %v2680_v45, %v1526_v46  ;;  %v1540_v15 = vadd.f32 1.4214138, %v1532_v47  ;;  %v1546_v18 = vmul.f32 %v2654_v38, %v1538_v54  ;;  %v2004_v21 = vpop.eup %2003 }
  0xf6   : > { %v1529_v51 = vadd.f32 -1.4531521, %v1521_v62  ;;  %v1535_v22 = vmul.f32 %v2686_v63, %v1527_v2  ;;  %v1541_v3 = vadd.f32 1.4214138, %v1533_v5  ;;  %v1547_v23 = vmul.f32 %v2662_v43, %v1539_v12  ;;  %v2006_v4 = vpop.eup %2005 }
  0xf7   : > { %v1536_v24 = vmul.f32 %v2690_v1, %v1528_v14  ;;  %v1542_v9 = vadd.f32 1.4214138, %v1534_v34  ;;  %v1548_v25 = vmul.f32 %v2668_v49, %v1540_v15  ;;  %v1554_v10 = vadd.f32 -0.28449672, %v1546_v18  ;;  %v2008_v26 = vpop.eup %2007 }
  0xf8   : > { %v1537_v17 = vmul.f32 %v2694_v11, %v1529_v51  ;;  %v1543_v60 = vadd.f32 1.4214138, %v1535_v22  ;;  %v1549_v20 = vmul.f32 %v2674_v56, %v1541_v3  ;;  %v1555_v48 = vadd.f32 -0.28449672, %v1547_v23  ;;  %v2010_v28 = vpop.eup %2009 }
  0xf9   : > { %v1544_v39 = vadd.f32 1.4214138, %v1536_v24  ;;  %v1550_v40 = vmul.f32 %v2680_v45, %v1542_v9  ;;  %v1556_v58 = vadd.f32 -0.28449672, %v1548_v25  ;;  %v1562_v29 = vmul.f32 %v2654_v38, %v1554_v10  ;;  %v2012_v61 = vpop.eup %2011 }
  0xfa   : > { %v1545_v0 = vadd.f32 1.4214138, %v1537_v17  ;;  %v1551_v55 = vmul.f32 %v2686_v63, %v1543_v60  ;;  %v1557_v44 = vadd.f32 -0.28449672, %v1549_v20  ;;  %v1563_v6 = vmul.f32 %v2662_v43, %v1555_v48  ;;  %v2014_v7 = vpop.eup %2013 }
  0xfb   : > { %v1552_v31 = vmul.f32 %v2690_v1, %v1544_v39  ;;  %v1558_v8 = vadd.f32 -0.28449672, %v1550_v40  ;;  %v1564_v46 = vmul.f32 %v2668_v49, %v1556_v58  ;;  %v1570_v47 = vadd.f32 0.2548296, %v1562_v29  ;;  %v2016_v54 = vpop.eup %2015 }
  0xfc   : > { %v1553_v62 = vmul.f32 %v2694_v11, %v1545_v0  ;;  %v1559_v2 = vadd.f32 -0.28449672, %v1551_v55  ;;  %v1565_v5 = vmul.f32 %v2674_v56, %v1557_v44  ;;  %v1571_v12 = vadd.f32 0.2548296, %v1563_v6 }
  0xfd   : > { %v1560_v14 = vadd.f32 -0.28449672, %v1552_v31  ;;  %v1566_v34 = vmul.f32 %v2680_v45, %v1558_v8  ;;  %v1572_v15 = vadd.f32 0.2548296, %v1564_v46  ;;  %v1578_v18 = vmul.f32 %v2654_v38, %v1570_v47 }
  0xfe   : > { %v1561_v51 = vadd.f32 -0.28449672, %v1553_v62  ;;  %v1567_v22 = vmul.f32 %v2686_v63, %v1559_v2  ;;  %v1573_v3 = vadd.f32 0.2548296, %v1565_v5  ;;  %v1579_v23 = vmul.f32 %v2662_v43, %v1571_v12 }
  0xff   : > { %v1568_v24 = vmul.f32 %v2690_v1, %v1560_v14  ;;  %v1574_v9 = vadd.f32 0.2548296, %v1566_v34  ;;  %v1580_v25 = vmul.f32 %v2668_v49, %v1572_v15  ;;  %v1618_v10 = vmul.f32 %v2002_v13, %v1578_v18 }
 0x100   : > { %v1569_v38 = vmul.f32 %v2694_v11, %v1561_v51  ;;  %v1575_v17 = vadd.f32 0.2548296, %v1567_v22  ;;  %v1581_v60 = vmul.f32 %v2674_v56, %v1573_v3  ;;  %v1619_v20 = vmul.f32 %v2004_v21, %v1579_v23 }
 0x101   : > { %v1576_v48 = vadd.f32 0.2548296, %v1568_v24  ;;  %v1582_v43 = vmul.f32 %v2680_v45, %v1574_v9  ;;  %v1620_v39 = vmul.f32 %v2006_v4, %v1580_v25  ;;  %v1626_v40 = vsub.f32 1.0, %v1618_v10 }
 0x102   : > { %vm1641_vm7 = vcmp.ge.f32.partialorder %v2638_v53, 0.0  ;;  %v1577_v58 = vadd.f32 0.2548296, %v1569_v38  ;;  %v1583_v49 = vmul.f32 %v2686_v63, %v1575_v17  ;;  %v1621_v13 = vmul.f32 %v2008_v26, %v1581_v60 }
 0x103   : > { %v1627_v29 = vsub.f32 1.0, %v1619_v20  ;;  %v1584_v0 = vmul.f32 %v2690_v1, %v1576_v48  ;;  %v1622_v55 = vmul.f32 %v2010_v28, %v1582_v43  ;;  %v1628_v44 = vsub.f32 1.0, %v1620_v39 }
 0x104   : > { %v1642_v56 = vsub.f32 0.0, %v1626_v40  ;;  %v1585_v21 = vmul.f32 %v2694_v11, %v1577_v58  ;;  %v1623_v6 = vmul.f32 %v2012_v61, %v1583_v49  ;;  %v1629_v31 = vsub.f32 1.0, %v1621_v13 }
 0x105   : > { %v1643_v8 = vsub.f32 0.0, %v1627_v29  ;;  %v1624_v45 = vmul.f32 %v2014_v7, %v1584_v0  ;;  %v1630_v4 = vsub.f32 1.0, %v1622_v55  ;;  %v1644_v46 = vsub.f32 0.0, %v1628_v44 }
 0x106   : > { %v1650_v47 = vsel %vm1634_vm0, %v1626_v40, %v1642_v56  ;;  %v1625_v63 = vmul.f32 %v2016_v54, %v1585_v21  ;;  %v1631_v26 = vsub.f32 1.0, %v1623_v6  ;;  %v1645_v62 = vsub.f32 0.0, %v1629_v31 }
 0x107   : > { %v1651_v1 = vsel %vm1635_vm1, %v1627_v29, %v1643_v8  ;;  %v1632_v28 = vsub.f32 1.0, %v1624_v45  ;;  %v1646_v2 = vsub.f32 0.0, %v1630_v4  ;;  %v1652_v11 = vsel %vm1636_vm2, %v1628_v44, %v1644_v46 }
 0x108   : > { %v1658_v61 = vadd.f32 1.0, %v1650_v47  ;;  %v1633_v5 = vsub.f32 1.0, %v1625_v63  ;;  %v1647_v7 = vsub.f32 0.0, %v1631_v26  ;;  %v1653_v12 = vsel %vm1637_vm3, %v1629_v31, %v1645_v62 }
 0x109   : > { %v1659_v14 = vadd.f32 1.0, %v1651_v1  ;;  %v1648_v32 = vsub.f32 0.0, %v1632_v28  ;;  %v1654_v54 = vsel %vm1638_vm4, %v1630_v4, %v1646_v2  ;;  %v1660_v33 = vadd.f32 1.0, %v1652_v11 }
 0x10a   : > { %v1661_v34 = vadd.f32 1.0, %v1653_v12  ;;  %v1649_v15 = vsub.f32 0.0, %v1633_v5  ;;  %v1655_v30 = vsel %vm1639_vm5, %v1631_v26, %v1647_v7  ;;  %v1662_v18 = vadd.f32 1.0, %v1654_v54 }
 0x10b   : > { %v1666_v51 = vmul.f32 %v1658_v61, %v2649_v16  ;;  %v1656_v36 = vsel %vm1640_vm6, %v1632_v28, %v1648_v32  ;;  %v1663_v22 = vadd.f32 1.0, %v1655_v30  ;;  %v1667_v3 = vmul.f32 %v1659_v14, %v2652_v27 }
 0x10c   : > { %v1668_v23 = vmul.f32 %v1660_v33, %v2657_v59  ;;  %v1657_v37 = vsel %vm1641_vm7, %v1633_v5, %v1649_v15  ;;  %v1664_v24 = vadd.f32 1.0, %v1656_v36  ;;  %v1669_v9 = vmul.f32 %v1661_v34, %v2660_v42 }
 0x10d   : > { %v1670_v52 = vmul.f32 %v1662_v18, %v2665_v19  ;;  %v1665_v25 = vadd.f32 1.0, %v1657_v37  ;;  %v1671_v10 = vmul.f32 %v1663_v22, %v2671_v50  ;;  %v1674_v16 = vpack.c.bf16 %v1666_v51, %v1666_v51  ;;  %1696 = sbr.rel (!%p2190_p10) target bundleno = 285 (0x11d), region = 115 }
 0x10e   : > { %v1675_v38 = vpack.c.bf16 %v1667_v3, %v1667_v3  ;;  %v1672_v41 = vmul.f32 %v1664_v24, %v2677_v57  ;;  %v1676_v17 = vpack.c.bf16 %v1668_v23, %v1668_v23  ;;  %v1677_v60 = vpack.c.bf16 %v1669_v9, %v1669_v9 }
 0x10f   : > { %v1678_v27 = vpack.c.bf16 %v1670_v52, %v1670_v52  ;;  %v1673_v59 = vmul.f32 %v1665_v25, %v2683_v35  ;;  %v1679_v20 = vpack.c.bf16 %v1671_v10, %v1671_v10  ;;  %1682 = vst [vmem:[%s392_s14] sm:$0x3] %v1674_v16 }
 0x110   : > { %1683 = vst [vmem:[%s392_s14 + $0x2] sm:$0x3] %v1675_v38  ;;  %v1680_v53 = vpack.c.bf16 %v1672_v41, %v1672_v41  ;;  %1684 = vst [vmem:[%s392_s14 + $0x4] sm:$0x3] %v1676_v17 }
 0x111   : > { %1685 = vst [vmem:[%s392_s14 + $0x6] sm:$0x3] %v1677_v60  ;;  %1686 = vst [vmem:[%s392_s14 + $0x8] sm:$0x3] %v1678_v27  ;;  %v1681_v42 = vpack.c.bf16 %v1673_v59, %v1673_v59 }
 0x112   : > { %1687 = vst [vmem:[%s392_s14 + $0xa] sm:$0x3] %v1679_v20  ;;  %1688 = vst [vmem:[%s392_s14 + $0xc] sm:$0x3] %v1680_v53 }
 0x113   : > { %1689 = vst [vmem:[%s392_s14 + $0xe] sm:$0x3] %v1681_v42 }
 0x116   : > { %v1716_v19 = vld [vmem:[%s392_s14] sm:$0x3] }
 0x117   : > { %v1718_v50 = vld [vmem:[%s392_s14 + $0x2] sm:$0x3]  ;;  %v1720_v57 = vld [vmem:[%s392_s14 + $0x4] sm:$0x3]  ;;  %1717 = vst [vmem:[%s1700_s21] sm:$0x3] %v1716_v19 }
 0x118   : > { %v1722_v35 = vld [vmem:[%s392_s14 + $0x6] sm:$0x3]  ;;  %v1724_v48 = vld [vmem:[%s392_s14 + $0x8] sm:$0x3]  ;;  %1719 = vst [vmem:[%s1700_s21 + $0x8] sm:$0x3] %v1718_v50 }
 0x119   : > { %v1726_v43 = vld [vmem:[%s392_s14 + $0xa] sm:$0x3]  ;;  %v1728_v39 = vld [vmem:[%s392_s14 + $0xc] sm:$0x3]  ;;  %1721 = vst [vmem:[%s1700_s21 + $0x10] sm:$0x3] %v1720_v57 }
 0x11a   : > { %v1730_v40 = vld [vmem:[%s392_s14 + $0xe] sm:$0x3]  ;;  %1723 = vst [vmem:[%s1700_s21 + $0x18] sm:$0x3] %v1722_v35  ;;  %1725 = vst [vmem:[%s1700_s21 + $0x20] sm:$0x3] %v1724_v48 }
 0x11b   : > { %1727 = vst [vmem:[%s1700_s21 + $0x28] sm:$0x3] %v1726_v43  ;;  %1729 = vst [vmem:[%s1700_s21 + $0x30] sm:$0x3] %v1728_v39 }
 0x11c   : > { %1731 = vst [vmem:[%s1700_s21 + $0x38] sm:$0x3] %v1730_v40 }
 0x11d PF: > { %s13_s20 = sadd.s32 1, %s2087_s20   ;;  %s2803_s12 = smov %s2059_s13 }
 0x11e   : > { %p10_p2 = scmp.ge.s32.totalorder %s13_s20, 10   ;;  %s2804_s13 = smov %s2177_s28 }
 0x11f   : > { %s2805_s14 = smov %s2067_s15  ;;  %s2806_s15 = smov %s2195_s6 }
 0x120   : > { %s2807_s16 = smov %s2079_s18  ;;  %s2808_s17 = smov %s2083_s19 }
 0x121   : > { %s2809_s18 = smov %s2812_s22  ;;  %s2810_s19 = smov %s2816_s23 }
 0x122   :  { %12 = sbr.rel (!%p10_p2) target bundleno = 5 (0x5), region = 198 }

// kernel: transformer_forward.30
= control target key start
LH: loop header
LB: loop body
LE: loop exit
PB: predicated region body
PF: predicated region fallthrough
CT: control target
= control target key end

     0   :  { %vm29_vm0 = vcmask 1041408   ;;  %v94_v0 = vmov 0.0   ;;  %vm95_vm1 = vmmov 0   ;;  %vm25_vm2 = vcmask 31744   ;;  %s128_s1 = inlined_call_operand.vmem [shape: bf16[4,80], index: 1, kind: input, shape index: {}]   ;;  %s129_s0 = inlined_call_operand.vmem [shape: f32[8,4], index: 0, kind: input, shape index: {}]   ;;  %s130_s2 = inlined_call_operand.vmem [shape: f32[1,80], index: 2, kind: input, shape index: {}]   ;;  %s131_s3 = inlined_call_operand.vmem [shape: f32[8,80], index: 3, kind: output, shape index: {}]  }
   0x1   :  { %84 = vmatprep.subr.bf16.mxu0 %v94_v0  ;;  %v17_v1 = vld [vmem:[%s128_s1] sm:$0x3]  ;;  %86 = vmatprep.mubr.msk.bf16.mxu0 %vm95_vm1, %v94_v0  ;;  %vm74_vm3 = vcmask 654336  }
   0x2   :  { %v15_v2 = vld [vmem:[%s129_s0] sm:$0xff]  ;;  %v31_v3 = vsel %vm29_vm0, %v17_v1, 0 }
   0x3   :  { %v16_v4 = vpack.c.bf16 %v15_v2, %v15_v2  ;;  %85 = vmatpush3.bf16.msra.mxu0 %v31_v3  ;;  %v80_v5 = vld [vmem:[%s130_s2] ss:$0 sm:$0xff] }
   0x6   :  { %87 = vmatmul.mubr.msk.bf16.vlgmr.msra.gmra.mrb[0].mxu0 %vm25_vm2, %v16_v4 }
  0xd9   :  { %v67_v6 = vpop.f32.mrb[0].mxu0 }
  0xda   :  { %v68_v7 = vadd.f32 %v80_v5, %v67_v6  ;;  %v88_v8 = vpop.f32.mrb[1].mxu0 }
  0xdb   :  { %v70_v9 = vpop.f32.mrb[2].mxu0 }
  0xdc   :  { %92 = vtanh.f32 %v68_v7  ;;  %v89_v10 = vpop.f32.mrb[3].mxu0 }
  0xe6   :  { %v93_v11 = vpop.eup %92 }
  0xe7   :  { %75 = vst.msk [vmem:[%s131_s3] sm:$0xff] %vm74_vm3, %v93_v11 }

// kernel: transformer_forward.29
= control target key start
LH: loop header
LB: loop body
LE: loop exit
PB: predicated region body
PF: predicated region fallthrough
CT: control target
= control target key end

     0   :  { %vm688_vm0 = vcmask 261120   ;;  %s1332_s1 = inlined_call_operand.vmem [shape: bf16[512,160], index: 1, kind: input, shape index: {}]   ;;  %s1333_s0 = inlined_call_operand.vmem [shape: bf16[64,512], index: 0, kind: input, shape index: {}]   ;;  %s1334_s2 = inlined_call_operand.vmem [shape: f32[1,160], index: 2, kind: input, shape index: {}]   ;;  %s1335_s3 = inlined_call_operand.vmem [shape: f32[64,160], index: 3, kind: input, shape index: {}]   ;;  %s1336_s4 = inlined_call_operand.vmem [shape: f32[64,160], index: 4, kind: output, shape index: {}]  }
   0x1   :  { %v820_v0 = vld [vmem:[%s1332_s1 + $0x4] ss:$8 sps:$4 sm:$0xff]   ;;  %v824_v2 = vld [vmem:[%s1332_s1] ss:$8 sps:$4 sm:$0xff]   ;;  %v826_v4 = vld [vmem:[%s1332_s1 + $0x14] ss:$8 sps:$4 sm:$0xff]  }
   0x2   :  { %v822_v1 = vld [vmem:[%s1332_s1 + $0x104] ss:$8 sps:$4 sm:$0xff]   ;;  %509 = vmatprep.subr.bf16.mxu1 %v820_v0  ;;  %v825_v3 = vld [vmem:[%s1332_s1 + $0x100] ss:$8 sps:$4 sm:$0xff]   ;;  %v828_v5 = vld [vmem:[%s1332_s1 + $0x114] ss:$8 sps:$4 sm:$0xff]  }
   0x3   :  { %582 = vmatprep.subr.bf16.mxu0 %v822_v1  ;;  %510 = vmatpush1.bf16.msra.mxu1 %v824_v2  ;;  %v830_v6 = vld [vmem:[%s1332_s1 + $0x10] ss:$8 sps:$4 sm:$0xff]   ;;  %v832_v8 = vld [vmem:[%s1332_s1 + $0x24] ss:$8 sps:$4 sm:$0xff]   ;;  %v836_v10 = vld [vmem:[%s1332_s1 + $0x20] ss:$8 sps:$4 sm:$0xff]  }
   0x4   :  { %583 = vmatpush1.bf16.msra.mxu0 %v825_v3  ;;  %511 = vmatprep.subr.bf16.mxu1 %v826_v4  ;;  %v831_v7 = vld [vmem:[%s1332_s1 + $0x110] ss:$8 sps:$4 sm:$0xff]   ;;  %v834_v9 = vld [vmem:[%s1332_s1 + $0x124] ss:$8 sps:$4 sm:$0xff]   ;;  %v837_v11 = vld [vmem:[%s1332_s1 + $0x120] ss:$8 sps:$4 sm:$0xff]  }
   0x5   :  { %584 = vmatprep.subr.bf16.mxu0 %v828_v5  ;;  %v838_v12 = vld [vmem:[%s1332_s1 + $0x34] ss:$8 sps:$4 sm:$0xff]   ;;  %v842_v14 = vld [vmem:[%s1332_s1 + $0x30] ss:$8 sps:$4 sm:$0xff]   ;;  %v844_v16 = vld [vmem:[%s1332_s1 + $0x44] ss:$8 sps:$4 sm:$0xff]  }
   0x6   :  { %v840_v13 = vld [vmem:[%s1332_s1 + $0x134] ss:$8 sps:$4 sm:$0xff]   ;;  %v843_v15 = vld [vmem:[%s1332_s1 + $0x130] ss:$8 sps:$4 sm:$0xff]   ;;  %v846_v17 = vld [vmem:[%s1332_s1 + $0x144] ss:$8 sps:$4 sm:$0xff]  }
   0x7   :  { %512 = vmatpush1.bf16.msra.mxu1 %v830_v6  ;;  %v848_v18 = vld [vmem:[%s1332_s1 + $0x40] ss:$8 sps:$4 sm:$0xff]   ;;  %v850_v20 = vld [vmem:[%s1332_s1 + $0x54] ss:$8 sps:$4 sm:$0xff]   ;;  %v854_v22 = vld [vmem:[%s1332_s1 + $0x50] ss:$8 sps:$4 sm:$0xff]  }
   0x8   :  { %585 = vmatpush1.bf16.msra.mxu0 %v831_v7  ;;  %513 = vmatprep.subr.bf16.mxu1 %v832_v8  ;;  %v849_v19 = vld [vmem:[%s1332_s1 + $0x140] ss:$8 sps:$4 sm:$0xff]   ;;  %v852_v21 = vld [vmem:[%s1332_s1 + $0x154] ss:$8 sps:$4 sm:$0xff]   ;;  %v855_v23 = vld [vmem:[%s1332_s1 + $0x150] ss:$8 sps:$4 sm:$0xff]  }
   0x9   :  { %586 = vmatprep.subr.bf16.mxu0 %v834_v9  ;;  %v856_v24 = vld [vmem:[%s1332_s1 + $0x64] ss:$8 sps:$4 sm:$0xff]   ;;  %v860_v26 = vld [vmem:[%s1332_s1 + $0x60] ss:$8 sps:$4 sm:$0xff]   ;;  %v862_v28 = vld [vmem:[%s1332_s1 + $0x74] ss:$8 sps:$4 sm:$0xff]  }
   0xa   :  { %v858_v25 = vld [vmem:[%s1332_s1 + $0x164] ss:$8 sps:$4 sm:$0xff]   ;;  %v861_v27 = vld [vmem:[%s1332_s1 + $0x160] ss:$8 sps:$4 sm:$0xff]   ;;  %v864_v29 = vld [vmem:[%s1332_s1 + $0x174] ss:$8 sps:$4 sm:$0xff]  }
   0xb   :  { %514 = vmatpush1.bf16.msra.mxu1 %v836_v10  ;;  %v866_v30 = vld [vmem:[%s1332_s1 + $0x70] ss:$8 sps:$4 sm:$0xff]   ;;  %v868_v32 = vld [vmem:[%s1332_s1 + $0x84] ss:$8 sps:$4 sm:$0xff]   ;;  %v872_v34 = vld [vmem:[%s1332_s1 + $0x80] ss:$8 sps:$4 sm:$0xff]  }
   0xc   :  { %587 = vmatpush1.bf16.msra.mxu0 %v837_v11  ;;  %515 = vmatprep.subr.bf16.mxu1 %v838_v12  ;;  %v867_v31 = vld [vmem:[%s1332_s1 + $0x170] ss:$8 sps:$4 sm:$0xff]   ;;  %v870_v33 = vld [vmem:[%s1332_s1 + $0x184] ss:$8 sps:$4 sm:$0xff]   ;;  %v873_v35 = vld [vmem:[%s1332_s1 + $0x180] ss:$8 sps:$4 sm:$0xff]  }
   0xd   :  { %588 = vmatprep.subr.bf16.mxu0 %v840_v13  ;;  %v874_v36 = vld [vmem:[%s1332_s1 + $0x94] ss:$8 sps:$4 sm:$0xff]   ;;  %v878_v38 = vld [vmem:[%s1332_s1 + $0x90] ss:$8 sps:$4 sm:$0xff]   ;;  %v880_v40 = vld [vmem:[%s1332_s1 + $0xa4] ss:$8 sps:$4 sm:$0xff]  }
   0xe   :  { %v876_v37 = vld [vmem:[%s1332_s1 + $0x194] ss:$8 sps:$4 sm:$0xff]   ;;  %v879_v39 = vld [vmem:[%s1332_s1 + $0x190] ss:$8 sps:$4 sm:$0xff]   ;;  %v882_v41 = vld [vmem:[%s1332_s1 + $0x1a4] ss:$8 sps:$4 sm:$0xff]  }
   0xf   :  { %516 = vmatpush1.bf16.msra.mxu1 %v842_v14  ;;  %v884_v42 = vld [vmem:[%s1332_s1 + $0xa0] ss:$8 sps:$4 sm:$0xff]   ;;  %v886_v44 = vld [vmem:[%s1332_s1 + $0xb4] ss:$8 sps:$4 sm:$0xff]   ;;  %v890_v46 = vld [vmem:[%s1332_s1 + $0xb0] ss:$8 sps:$4 sm:$0xff]  }
  0x10   :  { %589 = vmatpush1.bf16.msra.mxu0 %v843_v15  ;;  %517 = vmatprep.subr.bf16.mxu1 %v844_v16  ;;  %v885_v43 = vld [vmem:[%s1332_s1 + $0x1a0] ss:$8 sps:$4 sm:$0xff]   ;;  %v888_v45 = vld [vmem:[%s1332_s1 + $0x1b4] ss:$8 sps:$4 sm:$0xff]   ;;  %v891_v47 = vld [vmem:[%s1332_s1 + $0x1b0] ss:$8 sps:$4 sm:$0xff]   ;;  %v99_v16 = vlaneseq }
  0x11   :  { %590 = vmatprep.subr.bf16.mxu0 %v846_v17  ;;  %v892_v48 = vld [vmem:[%s1332_s1 + $0xc4] ss:$8 sps:$4 sm:$0xff]   ;;  %v896_v52 = vld [vmem:[%s1332_s1 + $0xc0] ss:$8 sps:$4 sm:$0xff]   ;;  %v898_v54 = vld [vmem:[%s1332_s1 + $0xd4] ss:$8 sps:$4 sm:$0xff]  }
  0x12   :  { %v918_v49 = vld [vmem:[%s1333_s0 + $0x4] ss:$16 sps:$4 sm:$0xff]   ;;  %v921_v51 = vld [vmem:[%s1333_s0 + $0xc] ss:$16 sps:$4 sm:$0xff]   ;;  %v897_v53 = vld [vmem:[%s1332_s1 + $0x1c0] ss:$8 sps:$4 sm:$0xff]  }
  0x13   :  { %518 = vmatpush1.bf16.msra.mxu1 %v848_v18  ;;  %v894_v50 = vld [vmem:[%s1332_s1 + $0x1c4] ss:$8 sps:$4 sm:$0xff]   ;;  %541 = vmatprep.mubr.bf16.mxu1 %v918_v49  ;;  %v900_v55 = vld [vmem:[%s1332_s1 + $0x1d4] ss:$8 sps:$4 sm:$0xff]   ;;  %v902_v56 = vld [vmem:[%s1332_s1 + $0xd0] ss:$8 sps:$4 sm:$0xff]  }
  0x14   :  { %591 = vmatpush1.bf16.msra.mxu0 %v849_v19  ;;  %519 = vmatprep.subr.bf16.mxu1 %v850_v20  ;;  %v903_v57 = vld [vmem:[%s1332_s1 + $0x1d0] ss:$8 sps:$4 sm:$0xff]   ;;  %v904_v58 = vld [vmem:[%s1332_s1 + $0xe4] ss:$8 sps:$4 sm:$0xff]   ;;  %v908_v60 = vld [vmem:[%s1332_s1 + $0xe0] ss:$8 sps:$4 sm:$0xff]  }
  0x15   :  { %592 = vmatprep.subr.bf16.mxu0 %v852_v21  ;;  %614 = vmatprep.mubr.bf16.mxu0 %v921_v51  ;;  %v906_v59 = vld [vmem:[%s1332_s1 + $0x1e4] ss:$8 sps:$4 sm:$0xff]   ;;  %v909_v61 = vld [vmem:[%s1332_s1 + $0x1e0] ss:$8 sps:$4 sm:$0xff]   ;;  %v910_v62 = vld [vmem:[%s1332_s1 + $0xf4] ss:$8 sps:$4 sm:$0xff]  }
  0x16   :  { %v912_v63 = vld [vmem:[%s1332_s1 + $0x1f4] ss:$8 sps:$4 sm:$0xff]   ;;  %v914_v0 = vld [vmem:[%s1332_s1 + $0xf0] ss:$8 sps:$4 sm:$0xff]   ;;  %v100_v17 = vshrl.u32 %v99_v16, 7 }
  0x17   :  { %520 = vmatpush1.bf16.msra.mxu1 %v854_v22  ;;  %v915_v1 = vld [vmem:[%s1332_s1 + $0x1f0] ss:$8 sps:$4 sm:$0xff]   ;;  %v922_v4 = vld [vmem:[%s1333_s0 + $0x24] ss:$16 sps:$4 sm:$0xff]   ;;  %v924_v5 = vld [vmem:[%s1333_s0 + $0x2c] ss:$16 sps:$4 sm:$0xff]  }
  0x18   :  { %593 = vmatpush1.bf16.msra.mxu0 %v855_v23  ;;  %521 = vmatprep.subr.bf16.mxu1 %v856_v24  ;;  %v916_v2 = vld [vmem:[%s1333_s0] ss:$16 sps:$4 sm:$0xff]   ;;  %v919_v3 = vld [vmem:[%s1333_s0 + $0x8] ss:$16 sps:$4 sm:$0xff]   ;;  %v928_v8 = vld [vmem:[%s1333_s0 + $0x44] ss:$16 sps:$4 sm:$0xff]  }
  0x19   :  { %594 = vmatprep.subr.bf16.mxu0 %v858_v25  ;;  %v926_v6 = vld [vmem:[%s1333_s0 + $0x20] ss:$16 sps:$4 sm:$0xff]   ;;  %v927_v7 = vld [vmem:[%s1333_s0 + $0x28] ss:$16 sps:$4 sm:$0xff]   ;;  %v930_v9 = vld [vmem:[%s1333_s0 + $0x4c] ss:$16 sps:$4 sm:$0xff]  }
  0x1a   :  { %v932_v10 = vld [vmem:[%s1333_s0 + $0x40] ss:$16 sps:$4 sm:$0xff]   ;;  %v933_v11 = vld [vmem:[%s1333_s0 + $0x48] ss:$16 sps:$4 sm:$0xff]   ;;  %v934_v12 = vld [vmem:[%s1333_s0 + $0x64] ss:$16 sps:$4 sm:$0xff]  }
  0x1b   :  { %522 = vmatpush1.bf16.msra.mxu1 %v860_v26  ;;  %v936_v13 = vld [vmem:[%s1333_s0 + $0x6c] ss:$16 sps:$4 sm:$0xff]   ;;  %v938_v14 = vld [vmem:[%s1333_s0 + $0x60] ss:$16 sps:$4 sm:$0xff]   ;;  %v939_v15 = vld [vmem:[%s1333_s0 + $0x68] ss:$16 sps:$4 sm:$0xff]  }
  0x1c   :  { %595 = vmatpush1.bf16.msra.mxu0 %v861_v27  ;;  %523 = vmatprep.subr.bf16.mxu1 %v862_v28  ;;  %v101_v18 = vsub.s32 0, %v100_v17  ;;  %v97_v19 = vld [vmem:[%s1334_s2] sm:$0x3]  ;;  %v105_v20 = vsub.s32 1, %v100_v17  ;;  %v664_v17 = vld [vmem:[%s1335_s3 + $0x48] sm:$0xff] }
  0x1d   :  { %596 = vmatprep.subr.bf16.mxu0 %v864_v29  ;;  %v655_v28 = vld [vmem:[%s1335_s3] sm:$0xff] }
  0x1e   :  { %v1208_v21 = vrot.slane %v97_v19, %v101_v18  ;;  %v1210_v22 = vrot.slane %v97_v19, %v105_v20 }
  0x1f   :  { %524 = vmatpush1.bf16.msra.mxu1 %v866_v30 }
  0x20   :  { %597 = vmatpush1.bf16.msra.mxu0 %v867_v31  ;;  %525 = vmatprep.subr.bf16.mxu1 %v868_v32 }
  0x21   :  { %598 = vmatprep.subr.bf16.mxu0 %v870_v33  ;;  %v656_v33 = vld [vmem:[%s1335_s3 + $0x8] sm:$0xff] }
  0x23   :  { %526 = vmatpush1.bf16.msra.mxu1 %v872_v34 }
  0x24   :  { %599 = vmatpush1.bf16.msra.mxu0 %v873_v35  ;;  %527 = vmatprep.subr.bf16.mxu1 %v874_v36 }
  0x25   :  { %600 = vmatprep.subr.bf16.mxu0 %v876_v37 }
  0x27   :  { %528 = vmatpush1.bf16.msra.mxu1 %v878_v38  ;;  %v657_v38 = vld [vmem:[%s1335_s3 + $0x10] sm:$0xff] }
  0x28   :  { %601 = vmatpush1.bf16.msra.mxu0 %v879_v39  ;;  %529 = vmatprep.subr.bf16.mxu1 %v880_v40 }
  0x29   :  { %602 = vmatprep.subr.bf16.mxu0 %v882_v41 }
  0x2b   :  { %530 = vmatpush1.bf16.msra.mxu1 %v884_v42  ;;  %v658_v42 = vld [vmem:[%s1335_s3 + $0x18] sm:$0xff] }
  0x2c   :  { %603 = vmatpush1.bf16.msra.mxu0 %v885_v43  ;;  %531 = vmatprep.subr.bf16.mxu1 %v886_v44 }
  0x2d   :  { %604 = vmatprep.subr.bf16.mxu0 %v888_v45 }
  0x2f   :  { %532 = vmatpush1.bf16.msra.mxu1 %v890_v46 }
  0x30   :  { %605 = vmatpush1.bf16.msra.mxu0 %v891_v47  ;;  %533 = vmatprep.subr.bf16.mxu1 %v892_v48 }
  0x31   :  { %606 = vmatprep.subr.bf16.mxu0 %v894_v50 }
  0x33   :  { %534 = vmatpush1.bf16.msra.mxu1 %v896_v52  ;;  %v659_v52 = vld [vmem:[%s1335_s3 + $0x20] sm:$0xff] }
  0x34   :  { %607 = vmatpush1.bf16.msra.mxu0 %v897_v53  ;;  %535 = vmatprep.subr.bf16.mxu1 %v898_v54 }
  0x35   :  { %608 = vmatprep.subr.bf16.mxu0 %v900_v55 }
  0x37   :  { %536 = vmatpush1.bf16.msra.mxu1 %v902_v56 }
  0x38   :  { %609 = vmatpush1.bf16.msra.mxu0 %v903_v57  ;;  %537 = vmatprep.subr.bf16.mxu1 %v904_v58  ;;  %v660_v57 = vld [vmem:[%s1335_s3 + $0x28] sm:$0xff] }
  0x39   :  { %610 = vmatprep.subr.bf16.mxu0 %v906_v59 }
  0x3b   :  { %538 = vmatpush1.bf16.msra.mxu1 %v908_v60 }
  0x3c   :  { %611 = vmatpush1.bf16.msra.mxu0 %v909_v61  ;;  %539 = vmatprep.subr.bf16.mxu1 %v910_v62  ;;  %v661_v62 = vld [vmem:[%s1335_s3 + $0x30] sm:$0xff] }
  0x3d   :  { %612 = vmatprep.subr.bf16.mxu0 %v912_v63 }
  0x3f   :  { %540 = vmatpush1.bf16.msra.mxu1 %v914_v0 }
  0x40   :  { %613 = vmatpush1.bf16.msra.mxu0 %v915_v1 }
  0x42   :  { %542 = vmatmul.mubr.bf16.vlgmr.msra.gmra.mrb[0].mxu1 %v916_v2  ;;  %v662_v2 = vld [vmem:[%s1335_s3 + $0x38] sm:$0xff] }
  0x43   :  { %615 = vmatmul.mubr.bf16.vlgmr.msra.gmra.mrb[0].mxu0 %v919_v3  ;;  %551 = vmatprep.mubr.bf16.mxu1 %v922_v4 }
  0x44   :  { %624 = vmatprep.mubr.bf16.mxu0 %v924_v5 }
  0x4a   :  { %552 = vmatmul.mubr.bf16.gmra.mrb[4].mxu1 %v926_v6 }
  0x4b   :  { %625 = vmatmul.mubr.bf16.gmra.mrb[4].mxu0 %v927_v7  ;;  %561 = vmatprep.mubr.bf16.mxu1 %v928_v8 }
  0x4c   :  { %634 = vmatprep.mubr.bf16.mxu0 %v930_v9 }
  0x52   :  { %562 = vmatmul.mubr.bf16.gmra.mrb[8].mxu1 %v932_v10 }
  0x53   :  { %635 = vmatmul.mubr.bf16.gmra.mrb[8].mxu0 %v933_v11  ;;  %571 = vmatprep.mubr.bf16.mxu1 %v934_v12  ;;  %v663_v12 = vld [vmem:[%s1335_s3 + $0x40] sm:$0xff] }
  0x54   :  { %644 = vmatprep.mubr.bf16.mxu0 %v936_v13 }
  0x5a   :  { %572 = vmatmul.mubr.bf16.gmra.mrb[12].mxu1 %v938_v14 }
  0x5b   :  { %645 = vmatmul.mubr.bf16.gmra.mrb[12].mxu0 %v939_v15 }
 0x115   :  { %v543_v23 = vpop.f32.mrb[0].mxu1 }
 0x116   :  { %v616_v24 = vpop.f32.mrb[0].mxu0  ;;  %v544_v25 = vadd.f32 %v543_v23, %v1208_v21  ;;  %v545_v26 = vpop.f32.mrb[1].mxu1 }
 0x117   :  { %v618_v27 = vpop.f32.mrb[1].mxu0  ;;  %v546_v29 = vadd.f32 %v545_v26, %v1210_v22  ;;  %v547_v30 = vpop.f32.mrb[2].mxu1 }
 0x118   :  { %v620_v31 = vpop.f32.mrb[2].mxu0  ;;  %v617_v32 = vadd.f32 %v616_v24, %v544_v25  ;;  %v548_v34 = vadd.f32 %v547_v30, %v1208_v21  ;;  %v549_v35 = vpop.f32.mrb[3].mxu1  ;;  %v665_v24 = vld [vmem:[%s1335_s3 + $0x50] sm:$0xff] }
 0x119   :  { %v622_v36 = vpop.f32.mrb[3].mxu0  ;;  %v619_v37 = vadd.f32 %v618_v27, %v546_v29  ;;  %v550_v39 = vadd.f32 %v549_v35, %v1210_v22 }
 0x11a   :  { %v671_v40 = vadd.f32 %v655_v28, %v617_v32  ;;  %v621_v41 = vadd.f32 %v620_v31, %v548_v34  ;;  %v666_v28 = vld [vmem:[%s1335_s3 + $0x58] sm:$0xff] }
 0x11b   :  { %v672_v43 = vadd.f32 %v656_v33, %v619_v37  ;;  %v623_v44 = vadd.f32 %v622_v36, %v550_v39 }
 0x11c   :  { %687 = vst [vmem:[%s1336_s4] sm:$0xff] %v671_v40  ;;  %v673_v45 = vadd.f32 %v657_v38, %v621_v41  ;;  %v667_v38 = vld [vmem:[%s1335_s3 + $0x60] sm:$0xff] }
 0x11d   :  { %689 = vst.msk [vmem:[%s1336_s4 + $0x8] sm:$0xff] %vm688_vm0, %v672_v43  ;;  %v674_v46 = vadd.f32 %v658_v42, %v623_v44  ;;  %v553_v47 = vpop.f32.mrb[4].mxu1  ;;  %v668_v43 = vld [vmem:[%s1335_s3 + $0x68] sm:$0xff] }
 0x11e   :  { %v626_v48 = vpop.f32.mrb[4].mxu0  ;;  %690 = vst [vmem:[%s1336_s4 + $0x10] sm:$0xff] %v673_v45  ;;  %v554_v49 = vadd.f32 %v553_v47, %v1208_v21  ;;  %v555_v50 = vpop.f32.mrb[5].mxu1 }
 0x11f   :  { %v628_v51 = vpop.f32.mrb[5].mxu0  ;;  %691 = vst.msk [vmem:[%s1336_s4 + $0x18] sm:$0xff] %vm688_vm0, %v674_v46  ;;  %v556_v53 = vadd.f32 %v555_v50, %v1210_v22  ;;  %v557_v54 = vpop.f32.mrb[6].mxu1 }
 0x120   :  { %v630_v55 = vpop.f32.mrb[6].mxu0  ;;  %v627_v56 = vadd.f32 %v626_v48, %v554_v49  ;;  %v558_v58 = vadd.f32 %v557_v54, %v1208_v21  ;;  %v559_v59 = vpop.f32.mrb[7].mxu1  ;;  %v669_v48 = vld [vmem:[%s1335_s3 + $0x70] sm:$0xff] }
 0x121   :  { %v632_v60 = vpop.f32.mrb[7].mxu0  ;;  %v629_v61 = vadd.f32 %v628_v51, %v556_v53  ;;  %v560_v63 = vadd.f32 %v559_v59, %v1210_v22 }
 0x122   :  { %v675_v0 = vadd.f32 %v659_v52, %v627_v56  ;;  %v631_v1 = vadd.f32 %v630_v55, %v558_v58  ;;  %v670_v52 = vld [vmem:[%s1335_s3 + $0x78] sm:$0xff] }
 0x123   :  { %v676_v3 = vadd.f32 %v660_v57, %v629_v61  ;;  %v633_v4 = vadd.f32 %v632_v60, %v560_v63 }
 0x124   :  { %692 = vst [vmem:[%s1336_s4 + $0x20] sm:$0xff] %v675_v0  ;;  %v677_v5 = vadd.f32 %v661_v62, %v631_v1 }
 0x125   :  { %693 = vst.msk [vmem:[%s1336_s4 + $0x28] sm:$0xff] %vm688_vm0, %v676_v3  ;;  %v678_v6 = vadd.f32 %v662_v2, %v633_v4  ;;  %v563_v7 = vpop.f32.mrb[8].mxu1 }
 0x126   :  { %v636_v8 = vpop.f32.mrb[8].mxu0  ;;  %694 = vst [vmem:[%s1336_s4 + $0x30] sm:$0xff] %v677_v5  ;;  %v564_v9 = vadd.f32 %v563_v7, %v1208_v21  ;;  %v565_v10 = vpop.f32.mrb[9].mxu1 }
 0x127   :  { %v638_v11 = vpop.f32.mrb[9].mxu0  ;;  %695 = vst.msk [vmem:[%s1336_s4 + $0x38] sm:$0xff] %vm688_vm0, %v678_v6  ;;  %v566_v13 = vadd.f32 %v565_v10, %v1210_v22  ;;  %v567_v14 = vpop.f32.mrb[10].mxu1 }
 0x128   :  { %v640_v15 = vpop.f32.mrb[10].mxu0  ;;  %v637_v16 = vadd.f32 %v636_v8, %v564_v9  ;;  %v568_v18 = vadd.f32 %v567_v14, %v1208_v21  ;;  %v569_v19 = vpop.f32.mrb[11].mxu1 }
 0x129   :  { %v642_v20 = vpop.f32.mrb[11].mxu0  ;;  %v639_v23 = vadd.f32 %v638_v11, %v566_v13  ;;  %v570_v25 = vadd.f32 %v569_v19, %v1210_v22 }
 0x12a   :  { %v679_v26 = vadd.f32 %v663_v12, %v637_v16  ;;  %v641_v27 = vadd.f32 %v640_v15, %v568_v18 }
 0x12b   :  { %v680_v29 = vadd.f32 %v664_v17, %v639_v23  ;;  %v643_v30 = vadd.f32 %v642_v20, %v570_v25 }
 0x12c   :  { %696 = vst [vmem:[%s1336_s4 + $0x40] sm:$0xff] %v679_v26  ;;  %v681_v31 = vadd.f32 %v665_v24, %v641_v27 }
 0x12d   :  { %697 = vst.msk [vmem:[%s1336_s4 + $0x48] sm:$0xff] %vm688_vm0, %v680_v29  ;;  %v682_v32 = vadd.f32 %v666_v28, %v643_v30  ;;  %v573_v33 = vpop.f32.mrb[12].mxu1 }
 0x12e   :  { %v646_v34 = vpop.f32.mrb[12].mxu0  ;;  %698 = vst [vmem:[%s1336_s4 + $0x50] sm:$0xff] %v681_v31  ;;  %v574_v35 = vadd.f32 %v573_v33, %v1208_v21  ;;  %v575_v36 = vpop.f32.mrb[13].mxu1 }
 0x12f   :  { %v648_v37 = vpop.f32.mrb[13].mxu0  ;;  %699 = vst.msk [vmem:[%s1336_s4 + $0x58] sm:$0xff] %vm688_vm0, %v682_v32  ;;  %v576_v39 = vadd.f32 %v575_v36, %v1210_v22  ;;  %v577_v40 = vpop.f32.mrb[14].mxu1 }
 0x130   :  { %v650_v41 = vpop.f32.mrb[14].mxu0  ;;  %v647_v42 = vadd.f32 %v646_v34, %v574_v35  ;;  %v578_v44 = vadd.f32 %v577_v40, %v1208_v21  ;;  %v579_v45 = vpop.f32.mrb[15].mxu1 }
 0x131   :  { %v652_v46 = vpop.f32.mrb[15].mxu0  ;;  %v649_v47 = vadd.f32 %v648_v37, %v576_v39  ;;  %v580_v49 = vadd.f32 %v579_v45, %v1210_v22 }
 0x132   :  { %v683_v50 = vadd.f32 %v667_v38, %v647_v42  ;;  %v651_v51 = vadd.f32 %v650_v41, %v578_v44 }
 0x133   :  { %v684_v53 = vadd.f32 %v668_v43, %v649_v47  ;;  %v653_v54 = vadd.f32 %v652_v46, %v580_v49 }
 0x134   :  { %700 = vst [vmem:[%s1336_s4 + $0x60] sm:$0xff] %v683_v50  ;;  %v685_v21 = vadd.f32 %v669_v48, %v651_v51 }
 0x135   :  { %701 = vst.msk [vmem:[%s1336_s4 + $0x68] sm:$0xff] %vm688_vm0, %v684_v53  ;;  %v686_v55 = vadd.f32 %v670_v52, %v653_v54 }
 0x136   :  { %702 = vst [vmem:[%s1336_s4 + $0x70] sm:$0xff] %v685_v21 }
 0x137   :  { %703 = vst.msk [vmem:[%s1336_s4 + $0x78] sm:$0xff] %vm688_vm0, %v686_v55 }

// kernel: transformer_forward.31
= control target key start
LH: loop header
LB: loop body
LE: loop exit
PB: predicated region body
PF: predicated region fallthrough
CT: control target
= control target key end

     0   :  { %v150_v0 = vmov 0.0   ;;  %vm151_vm0 = vmmov 0   ;;  %vm64_vm1 = vcmask 654336   ;;  %s196_s1 = inlined_call_operand.vmem [shape: bf16[80,80], index: 1, kind: input, shape index: {}]   ;;  %s197_s0 = inlined_call_operand.vmem [shape: f32[8,80], index: 0, kind: input, shape index: {}]   ;;  %s198_s2 = inlined_call_operand.vmem [shape: f32[1,80], index: 2, kind: input, shape index: {}]   ;;  %s199_s3 = inlined_call_operand.vmem [shape: f32[8,80], index: 3, kind: output, shape index: {}]  }
   0x1   :  { %127 = vmatprep.subr.bf16.mxu0 %v150_v0  ;;  %v143_v1 = vld [vmem:[%s196_s1] sm:$0xff]   ;;  %137 = vmatprep.mubr.msk.bf16.mxu0 %vm151_vm0, %v150_v0  ;;  %v144_v2 = vld [vmem:[%s196_s1 + $0x8] sm:$0xff]   ;;  %v145_v3 = vld [vmem:[%s196_s1 + $0x10] sm:$0xff]  }
   0x2   :  { %128 = vmatpush3.bf16.msra.mxu0 %v143_v1  ;;  %v146_v4 = vld [vmem:[%s196_s1 + $0x18] sm:$0xff]   ;;  %v147_v5 = vld [vmem:[%s196_s1 + $0x20] sm:$0xff]  }
   0x3   :  { %129 = vmatprep.subr.bf16.mxu0 %v150_v0  ;;  %v15_v6 = vld [vmem:[%s197_s0] sm:$0xff] }
   0x4   :  { %v16_v7 = vpack.c.bf16 %v15_v6, %v15_v6  ;;  %v114_v8 = vld [vmem:[%s198_s2] ss:$0 sm:$0xff] }
   0x6   :  { %130 = vmatpush3.bf16.msra.mxu0 %v144_v2 }
   0x7   :  { %131 = vmatprep.subr.bf16.mxu0 %v150_v0 }
   0xa   :  { %132 = vmatpush3.bf16.msra.mxu0 %v145_v3 }
   0xb   :  { %133 = vmatprep.subr.bf16.mxu0 %v150_v0 }
   0xe   :  { %134 = vmatpush3.bf16.msra.mxu0 %v146_v4 }
   0xf   :  { %135 = vmatprep.subr.bf16.mxu0 %v150_v0 }
  0x12   :  { %136 = vmatpush3.bf16.msra.mxu0 %v147_v5 }
  0x15   :  { %138 = vmatmul.mubr.msk.bf16.vlgmr.msra.gmra.mrb[0].mxu0 %vm64_vm1, %v16_v7 }
  0xe8   :  { %v102_v9 = vpop.f32.mrb[0].mxu0 }
  0xe9   :  { %v103_v10 = vadd.f32 %v114_v8, %v102_v9  ;;  %v139_v11 = vpop.f32.mrb[1].mxu0 }
  0xea   :  { %v105_v12 = vpop.f32.mrb[2].mxu0 }
  0xeb   :  { %148 = vtanh.f32 %v103_v10  ;;  %v140_v13 = vpop.f32.mrb[3].mxu0 }
  0xf5   :  { %v149_v14 = vpop.eup %148 }
  0xf6   :  { %109 = vst.msk [vmem:[%s199_s3] sm:$0xff] %vm64_vm1, %v149_v14 }

</bundles_post_ra>
